<compile_context>
chip_gen: v7x
topology: tpu7x:2x2x1
jax: 0.10.0
libtpu: 0.0.40
codegen_flags: <defaults>
</compile_context>

<pallas_src>
from functools import partial

import numpy as np

import jax
import jax.numpy as jnp
from jax.experimental import pallas as pl
from jax.experimental.pallas import tpu as pltpu


# ----------------------------------------------------------------------------
# Kernel 1: fused conv stack over a block of B_blk images.
# Activation layout: one tall 2D array (B_blk*28, W*C) in bf16; image b lives
# at rows [b*28, b*28+...).  conv(3x3, valid) == sum_{dy} A[dy:dy+M, :] @ M_dy
# with banded weight matrices M_dy.  Rows that straddle two images are finite
# garbage and are never read downstream.
# ----------------------------------------------------------------------------
def _conv_stack_kernel(x_ref, m1_ref, b1_ref, m2_ref, b2_ref, m3_ref, b3_ref,
                       o_ref):
    rows = x_ref.shape[0]                 # B_blk * 28

    def layer(a, m_ref, b_ref, mo):
        acc = jnp.dot(a[0:mo, :], m_ref[0], preferred_element_type=jnp.float32)
        acc = acc + jnp.dot(a[1:mo + 1, :], m_ref[1],
                            preferred_element_type=jnp.float32)
        acc = acc + jnp.dot(a[2:mo + 2, :], m_ref[2],
                            preferred_element_type=jnp.float32)
        return jnp.maximum(acc + b_ref[...], 0.0).astype(jnp.bfloat16)

    a = x_ref[...]                        # (rows, 28)        Cin = 1
    a = layer(a, m1_ref, b1_ref, rows - 2)  # (rows-2, 26*8  = 208)
    a = layer(a, m2_ref, b2_ref, rows - 4)  # (rows-4, 24*16 = 384)
    a = layer(a, m3_ref, b3_ref, rows - 6)  # (rows-6, 22*8  = 176)
    o_ref[0:rows - 6, :] = a
    o_ref[rows - 6:rows, :] = jnp.zeros((6, o_ref.shape[1]), o_ref.dtype)


def conv_stack(x_tall, m1, b1r, m2, b2r, m3, b3r, *, b_blk):
    rows = x_tall.shape[0]
    r_blk = b_blk * 28
    n_blocks = rows // r_blk
    return pl.pallas_call(
        _conv_stack_kernel,
        out_shape=jax.ShapeDtypeStruct((rows, 22 * 8), jnp.bfloat16),
        grid_spec=pltpu.PrefetchScalarGridSpec(
            num_scalar_prefetch=0,
            grid=(n_blocks,),
            in_specs=[
                pl.BlockSpec((r_blk, 28), lambda i: (i, 0)),
                pl.BlockSpec(m1.shape, lambda i: (0, 0, 0)),
                pl.BlockSpec(b1r.shape, lambda i: (0, 0)),
                pl.BlockSpec(m2.shape, lambda i: (0, 0, 0)),
                pl.BlockSpec(b2r.shape, lambda i: (0, 0)),
                pl.BlockSpec(m3.shape, lambda i: (0, 0, 0)),
                pl.BlockSpec(b3r.shape, lambda i: (0, 0)),
            ],
            out_specs=pl.BlockSpec((r_blk, 22 * 8), lambda i: (i, 0)),
        ),
        compiler_params=pltpu.CompilerParams(
            dimension_semantics=("parallel",),   # batch blocks -> 2 TCs on v7x
        ),
    )(x_tall, m1, b1r, m2, b2r, m3, b3r)


# ----------------------------------------------------------------------------
# Kernel 2: fused fc1 (3872 -> 1000, ReLU) + fc2 (1000 -> 10).
# x is the conv activation in (22, N, 176) bf16 layout (r leading), so fc1 is
# 22 leading-indexed matmuls against fc1_w reshaped to (22, 176, 1024) -- no
# flat-3872 relayout anywhere.  fc1_w is streamed as int8 N-tiles (tile_n=512)
# and dequantized in-kernel with per-column scales; fc2 is accumulated in a
# VMEM scratch with pl.when init/finalize.  The tile axis is optionally split
# in "halves" marked "parallel" (2 on v7x only).
# ----------------------------------------------------------------------------
def _fc_fused_kernel(x_ref, w1_ref, s_ref, b1_ref, w2_ref, o_ref, acc_ref):
    j = pl.program_id(1)

    @pl.when(j == 0)
    def _init():
        acc_ref[...] = jnp.zeros_like(acc_ref)

    m = x_ref.shape[1]
    tile_n = w1_ref.shape[2]
    h = jnp.zeros((m, tile_n), jnp.float32)
    for r in range(x_ref.shape[0]):                       # 22, unrolled
        h = h + jnp.dot(x_ref[r], w1_ref[r].astype(jnp.bfloat16),
                        preferred_element_type=jnp.float32)
    h = jnp.maximum(h * s_ref[...] + b1_ref[...], 0.0)    # dequant + bias + ReLU
    acc_ref[...] += jnp.dot(h.astype(jnp.bfloat16), w2_ref[...],
                            preferred_element_type=jnp.float32)

    @pl.when(j == pl.num_programs(1) - 1)
    def _finalize():
        o_ref[...] = acc_ref[...]


def fc_fused(x_t, w1q, w1s, b1p, w2p, *, tile_n=512, halves=1):
    r22, m, kk = x_t.shape                # (22, N_pad, 176)
    n_out_pad = w1q.shape[2]              # 1024
    co = w2p.shape[1]                     # 128
    n_tiles = n_out_pad // tile_n
    assert n_tiles * tile_n == n_out_pad and n_tiles % halves == 0
    inner = n_tiles // halves

    return pl.pallas_call(
        _fc_fused_kernel,
        out_shape=jax.ShapeDtypeStruct((halves, m, co), jnp.float32),
        grid_spec=pltpu.PrefetchScalarGridSpec(
            num_scalar_prefetch=0,
            grid=(halves, inner),
            in_specs=[
                pl.BlockSpec((r22, m, kk), lambda h, j: (0, 0, 0)),
                pl.BlockSpec((r22, kk, tile_n), lambda h, j: (0, 0, h * inner + j)),
                pl.BlockSpec((1, tile_n), lambda h, j: (0, h * inner + j)),
                pl.BlockSpec((1, tile_n), lambda h, j: (0, h * inner + j)),
                pl.BlockSpec((tile_n, co), lambda h, j: (h * inner + j, 0)),
            ],
            out_specs=pl.BlockSpec((None, m, co), lambda h, j: (h, 0, 0)),
            scratch_shapes=[pltpu.VMEM((m, co), jnp.float32)],
        ),
        compiler_params=pltpu.CompilerParams(
            dimension_semantics=("parallel", "arbitrary"),
        ),
    )(x_t, w1q, w1s, b1p, w2p)


# ----------------------------------------------------------------------------
# One-time parameter preparation (outside the jitted forward pass).
# ----------------------------------------------------------------------------
def prepare_params(params):
    def banded(w_hwio, win):
        # w_hwio: (3, 3, Cin, Cout).  NOTE: real PyTorch checkpoints are OIHW
        # and would need a transpose to HWIO first; synthetic init is HWIO.
        w = np.asarray(w_hwio, np.float32)
        kh, kw, cin, cout = w.shape
        wo = win - kw + 1
        mat = np.zeros((kh, win * cin, wo * cout), np.float32)
        for dy in range(kh):
            for xo in range(wo):
                for dx in range(kw):
                    wc = xo + dx
                    mat[dy, wc * cin:(wc + 1) * cin,
                        xo * cout:(xo + 1) * cout] = w[dy, dx]
        return jnp.asarray(mat, jnp.bfloat16)

    def bias_row(b, wo):
        return jnp.asarray(np.tile(np.asarray(b, np.float32), wo)[None, :])

    # Conv weights as banded matrices (bf16, <1 MB total, resident in VMEM).
    m1, b1r = banded(params["w1"], 28), bias_row(params["b1"], 26)
    m2, b2r = banded(params["w2"], 26), bias_row(params["b2"], 24)
    m3, b3r = banded(params["w3"], 24), bias_row(params["b3"], 22)

    # fc1: fold PyTorch's NCHW flatten (C,H,W) into a one-time row permutation
    # (rows reordered to H,W,C), pad 1000 -> 1024 output columns, then quantize
    # to int8 with per-output-column scales (scale applied after the f32 dot).
    w1 = np.asarray(params["fc1_w"], np.float32)            # rows in CHW order
    w1 = w1.reshape(8, 22, 22, 1000).transpose(1, 2, 0, 3).reshape(3872, 1000)
    w1p = np.zeros((3872, 1024), np.float32)
    w1p[:, :1000] = w1
    scale = np.maximum(np.abs(w1p).max(axis=0), 1e-8) / 127.0          # (1024,)
    w1q = np.clip(np.rint(w1p / scale[None, :]), -127, 127).astype(np.int8)
    w1q = w1q.reshape(22, 176, 1024)     # per conv-output-row weight slabs
    b1p = np.zeros((1, 1024), np.float32)
    b1p[0, :1000] = np.asarray(params["fc1_b"], np.float32)

    # fc2: pad 1000 -> 1024 rows and 10 -> 128 cols (lane-dense output), bf16.
    w2p = np.zeros((1024, 128), np.float32)
    w2p[:1000, :10] = np.asarray(params["fc2_w"], np.float32)

    return {
        "m1": m1, "b1r": b1r, "m2": m2, "b2r": b2r, "m3": m3, "b3r": b3r,
        "fc1_wq": jnp.asarray(w1q),                         # int8 (22,176,1024)
        "fc1_s": jnp.asarray(scale[None, :], jnp.float32),  # (1, 1024)
        "fc1_b": jnp.asarray(b1p, jnp.float32),
        "fc2_w": jnp.asarray(w2p, jnp.bfloat16),
        "fc2_b": jnp.asarray(params["fc2_b"], jnp.float32),
    }


def _pick_halves():
    # The 2-way fc "halves" split only pays off on v7x (2 TensorCores/chip).
    try:
        kind = jax.devices()[0].device_kind.lower()
    except Exception:
        return 1
    return 2 if "7" in kind else 1


# ----------------------------------------------------------------------------
# Forward pass (mirrors the PyTorch module).
# ----------------------------------------------------------------------------
@partial(jax.jit, static_argnames=("b_blk", "halves"))
def forward(x_nchw, prep, *, b_blk=8, halves=1):
    n = x_nchw.shape[0]
    n_blocks = -(-n // b_blk)
    n_pad = n_blocks * b_blk

    x = x_nchw.reshape(n, 28, 28).astype(jnp.bfloat16)      # Cin = 1
    if n_pad != n:
        x = jnp.pad(x, ((0, n_pad - n), (0, 0), (0, 0)))
    x_tall = x.reshape(n_pad * 28, 28)                      # tall 2D layout

    a_tall = conv_stack(x_tall, prep["m1"], prep["b1r"], prep["m2"],
                        prep["b2r"], prep["m3"], prep["b3r"],
                        b_blk=b_blk)                        # (n_pad*28, 176) bf16

    # Tiny bf16 rearrangement (~62 KB): drop the cross-image garbage rows and
    # put the conv-row axis leading so fc1 can contract with leading indexing.
    a_t = jnp.transpose(a_tall.reshape(n_pad, 28, 176)[:, :22, :], (1, 0, 2))

    parts = fc_fused(a_t, prep["fc1_wq"], prep["fc1_s"], prep["fc1_b"],
                     prep["fc2_w"], tile_n=512, halves=halves)  # (halves, n_pad, 128)
    return parts.sum(axis=0)[:n, :10] + prep["fc2_b"]       # (n, 10)


def init_params(key):
    ks = jax.random.split(key, 10)
    s = 0.05  # deterministic synthetic init (not a checkpoint load)
    return {
        "w1": s * jax.random.normal(ks[0], (3, 3, 1, 8), jnp.float32),
        "b1": s * jax.random.normal(ks[1], (8,), jnp.float32),
        "w2": s * jax.random.normal(ks[2], (3, 3, 8, 16), jnp.float32),
        "b2": s * jax.random.normal(ks[3], (16,), jnp.float32),
        "w3": s * jax.random.normal(ks[4], (3, 3, 16, 8), jnp.float32),
        "b3": s * jax.random.normal(ks[5], (8,), jnp.float32),
        "fc1_w": s * jax.random.normal(ks[6], (8 * 22 * 22, 1000), jnp.float32),
        "fc1_b": s * jax.random.normal(ks[7], (1000,), jnp.float32),
        "fc2_w": s * jax.random.normal(ks[8], (1000, 10), jnp.float32),
        "fc2_b": s * jax.random.normal(ks[9], (10,), jnp.float32),
    }


if __name__ == "__main__":
    key = jax.random.PRNGKey(0)
    pkey, xkey = jax.random.split(key)
    params = init_params(pkey)
    prep = prepare_params(params)

    # Input implied by the module: 1-channel 28x28 images (28 -> 26 -> 24 -> 22).
    x = jax.random.normal(xkey, (2, 1, 28, 28), jnp.float32)

    out = forward(x, prep, b_blk=8, halves=_pick_halves())
    out = jax.block_until_ready(out)

    assert out.shape == (2, 10), out.shape
    assert out.dtype == jnp.float32
    assert bool(jnp.all(jnp.isfinite(out)))
    print("KERNEL_OK")
</pallas_src>

<mosaic_0001>
module attributes {stable_mosaic.version = 11 : i64} {
  func.func @_conv_stack_kernel(%arg0: i32, %arg1: memref<224x28xbf16, #tpu.memory_space<vmem>>, %arg2: memref<3x28x208xbf16, #tpu.memory_space<vmem>>, %arg3: memref<1x208xf32, #tpu.memory_space<vmem>>, %arg4: memref<3x208x384xbf16, #tpu.memory_space<vmem>>, %arg5: memref<1x384xf32, #tpu.memory_space<vmem>>, %arg6: memref<3x384x176xbf16, #tpu.memory_space<vmem>>, %arg7: memref<1x176xf32, #tpu.memory_space<vmem>>, %arg8: memref<224x176xbf16, #tpu.memory_space<vmem>>) attributes {dimension_semantics = [#tpu.dimension_semantics<parallel>], iteration_bounds = array<i64: 1>, scalar_prefetch = 0 : i64, scratch_operands = 0 : i64, tpu.core_type = #tpu.core_type<tc>, window_params = [{transform_indices = @transform_0, window_bounds = array<i64: 224, 28>}, {pipeline_mode = #tpu.pipeline_mode<synchronous>, transform_indices = @transform_1, window_bounds = array<i64: 3, 28, 208>}, {pipeline_mode = #tpu.pipeline_mode<synchronous>, transform_indices = @transform_2, window_bounds = array<i64: 1, 208>}, {pipeline_mode = #tpu.pipeline_mode<synchronous>, transform_indices = @transform_3, window_bounds = array<i64: 3, 208, 384>}, {pipeline_mode = #tpu.pipeline_mode<synchronous>, transform_indices = @transform_4, window_bounds = array<i64: 1, 384>}, {pipeline_mode = #tpu.pipeline_mode<synchronous>, transform_indices = @transform_5, window_bounds = array<i64: 3, 384, 176>}, {pipeline_mode = #tpu.pipeline_mode<synchronous>, transform_indices = @transform_6, window_bounds = array<i64: 1, 176>}, {transform_indices = @transform_7, window_bounds = array<i64: 224, 176>}]} {
    %c0 = arith.constant 0 : index
    %c0_0 = arith.constant 0 : index
    %0 = vector.load %arg1[%c0, %c0_0] : memref<224x28xbf16, #tpu.memory_space<vmem>>, vector<224x28xbf16>
    %1 = vector.extract_strided_slice %0 {offsets = [0, 0], sizes = [222, 28], strides = [1, 1]} : vector<224x28xbf16> to vector<222x28xbf16>
    %c0_1 = arith.constant 0 : index
    %c0_2 = arith.constant 0 : index
    %c0_3 = arith.constant 0 : index
    %2 = vector.load %arg2[%c0_1, %c0_2, %c0_3] : memref<3x28x208xbf16, #tpu.memory_space<vmem>>, vector<1x28x208xbf16>
    %3 = vector.shape_cast %2 : vector<1x28x208xbf16> to vector<28x208xbf16>
    %cst = arith.constant dense<0.000000e+00> : vector<222x208xf32>
    %4 = tpu.matmul %1, %3, %cst {dimension_numbers = #tpu.dot_dimension_numbers<[1], [0], [0], [1], [0, 0, 1, 1], [], []>} : vector<222x28xbf16>, vector<28x208xbf16>, vector<222x208xf32> -> vector<222x208xf32>
    %5 = vector.extract_strided_slice %0 {offsets = [1, 0], sizes = [222, 28], strides = [1, 1]} : vector<224x28xbf16> to vector<222x28xbf16>
    %c1 = arith.constant 1 : index
    %c0_4 = arith.constant 0 : index
    %c0_5 = arith.constant 0 : index
    %6 = vector.load %arg2[%c1, %c0_4, %c0_5] : memref<3x28x208xbf16, #tpu.memory_space<vmem>>, vector<1x28x208xbf16>
    %7 = vector.shape_cast %6 : vector<1x28x208xbf16> to vector<28x208xbf16>
    %cst_6 = arith.constant dense<0.000000e+00> : vector<222x208xf32>
    %8 = tpu.matmul %5, %7, %cst_6 {dimension_numbers = #tpu.dot_dimension_numbers<[1], [0], [0], [1], [0, 0, 1, 1], [], []>} : vector<222x28xbf16>, vector<28x208xbf16>, vector<222x208xf32> -> vector<222x208xf32>
    %9 = arith.addf %4, %8 : vector<222x208xf32>
    %10 = vector.extract_strided_slice %0 {offsets = [2, 0], sizes = [222, 28], strides = [1, 1]} : vector<224x28xbf16> to vector<222x28xbf16>
    %c2 = arith.constant 2 : index
    %c0_7 = arith.constant 0 : index
    %c0_8 = arith.constant 0 : index
    %11 = vector.load %arg2[%c2, %c0_7, %c0_8] : memref<3x28x208xbf16, #tpu.memory_space<vmem>>, vector<1x28x208xbf16>
    %12 = vector.shape_cast %11 : vector<1x28x208xbf16> to vector<28x208xbf16>
    %cst_9 = arith.constant dense<0.000000e+00> : vector<222x208xf32>
    %13 = tpu.matmul %10, %12, %cst_9 {dimension_numbers = #tpu.dot_dimension_numbers<[1], [0], [0], [1], [0, 0, 1, 1], [], []>} : vector<222x28xbf16>, vector<28x208xbf16>, vector<222x208xf32> -> vector<222x208xf32>
    %14 = arith.addf %9, %13 : vector<222x208xf32>
    %c0_10 = arith.constant 0 : index
    %c0_11 = arith.constant 0 : index
    %15 = vector.load %arg3[%c0_10, %c0_11] : memref<1x208xf32, #tpu.memory_space<vmem>>, vector<1x208xf32>
    %16 = vector.broadcast %15 : vector<1x208xf32> to vector<222x208xf32>
    %17 = arith.addf %14, %16 : vector<222x208xf32>
    %cst_12 = arith.constant 0.000000e+00 : f32
    %18 = vector.broadcast %cst_12 : f32 to vector<222x208xf32>
    %19 = arith.maximumf %17, %18 : vector<222x208xf32>
    %20 = arith.truncf %19 : vector<222x208xf32> to vector<222x208xbf16>
    %21 = vector.extract_strided_slice %20 {offsets = [0, 0], sizes = [220, 208], strides = [1, 1]} : vector<222x208xbf16> to vector<220x208xbf16>
    %c0_13 = arith.constant 0 : index
    %c0_14 = arith.constant 0 : index
    %c0_15 = arith.constant 0 : index
    %22 = vector.load %arg4[%c0_13, %c0_14, %c0_15] : memref<3x208x384xbf16, #tpu.memory_space<vmem>>, vector<1x208x384xbf16>
    %23 = vector.shape_cast %22 : vector<1x208x384xbf16> to vector<208x384xbf16>
    %cst_16 = arith.constant dense<0.000000e+00> : vector<220x384xf32>
    %24 = tpu.matmul %21, %23, %cst_16 {dimension_numbers = #tpu.dot_dimension_numbers<[1], [0], [0], [1], [0, 0, 1, 1], [], []>} : vector<220x208xbf16>, vector<208x384xbf16>, vector<220x384xf32> -> vector<220x384xf32>
    %25 = vector.extract_strided_slice %20 {offsets = [1, 0], sizes = [220, 208], strides = [1, 1]} : vector<222x208xbf16> to vector<220x208xbf16>
    %c1_17 = arith.constant 1 : index
    %c0_18 = arith.constant 0 : index
    %c0_19 = arith.constant 0 : index
    %26 = vector.load %arg4[%c1_17, %c0_18, %c0_19] : memref<3x208x384xbf16, #tpu.memory_space<vmem>>, vector<1x208x384xbf16>
    %27 = vector.shape_cast %26 : vector<1x208x384xbf16> to vector<208x384xbf16>
    %cst_20 = arith.constant dense<0.000000e+00> : vector<220x384xf32>
    %28 = tpu.matmul %25, %27, %cst_20 {dimension_numbers = #tpu.dot_dimension_numbers<[1], [0], [0], [1], [0, 0, 1, 1], [], []>} : vector<220x208xbf16>, vector<208x384xbf16>, vector<220x384xf32> -> vector<220x384xf32>
    %29 = arith.addf %24, %28 : vector<220x384xf32>
    %30 = vector.extract_strided_slice %20 {offsets = [2, 0], sizes = [220, 208], strides = [1, 1]} : vector<222x208xbf16> to vector<220x208xbf16>
    %c2_21 = arith.constant 2 : index
    %c0_22 = arith.constant 0 : index
    %c0_23 = arith.constant 0 : index
    %31 = vector.load %arg4[%c2_21, %c0_22, %c0_23] : memref<3x208x384xbf16, #tpu.memory_space<vmem>>, vector<1x208x384xbf16>
    %32 = vector.shape_cast %31 : vector<1x208x384xbf16> to vector<208x384xbf16>
    %cst_24 = arith.constant dense<0.000000e+00> : vector<220x384xf32>
    %33 = tpu.matmul %30, %32, %cst_24 {dimension_numbers = #tpu.dot_dimension_numbers<[1], [0], [0], [1], [0, 0, 1, 1], [], []>} : vector<220x208xbf16>, vector<208x384xbf16>, vector<220x384xf32> -> vector<220x384xf32>
    %34 = arith.addf %29, %33 : vector<220x384xf32>
    %c0_25 = arith.constant 0 : index
    %c0_26 = arith.constant 0 : index
    %35 = vector.load %arg5[%c0_25, %c0_26] : memref<1x384xf32, #tpu.memory_space<vmem>>, vector<1x384xf32>
    %36 = vector.broadcast %35 : vector<1x384xf32> to vector<220x384xf32>
    %37 = arith.addf %34, %36 : vector<220x384xf32>
    %cst_27 = arith.constant 0.000000e+00 : f32
    %38 = vector.broadcast %cst_27 : f32 to vector<220x384xf32>
    %39 = arith.maximumf %37, %38 : vector<220x384xf32>
    %40 = arith.truncf %39 : vector<220x384xf32> to vector<220x384xbf16>
    %41 = vector.extract_strided_slice %40 {offsets = [0, 0], sizes = [218, 384], strides = [1, 1]} : vector<220x384xbf16> to vector<218x384xbf16>
    %c0_28 = arith.constant 0 : index
    %c0_29 = arith.constant 0 : index
    %c0_30 = arith.constant 0 : index
    %42 = vector.load %arg6[%c0_28, %c0_29, %c0_30] : memref<3x384x176xbf16, #tpu.memory_space<vmem>>, vector<1x384x176xbf16>
    %43 = vector.shape_cast %42 : vector<1x384x176xbf16> to vector<384x176xbf16>
    %cst_31 = arith.constant dense<0.000000e+00> : vector<218x176xf32>
    %44 = tpu.matmul %41, %43, %cst_31 {dimension_numbers = #tpu.dot_dimension_numbers<[1], [0], [0], [1], [0, 0, 1, 1], [], []>} : vector<218x384xbf16>, vector<384x176xbf16>, vector<218x176xf32> -> vector<218x176xf32>
    %45 = vector.extract_strided_slice %40 {offsets = [1, 0], sizes = [218, 384], strides = [1, 1]} : vector<220x384xbf16> to vector<218x384xbf16>
    %c1_32 = arith.constant 1 : index
    %c0_33 = arith.constant 0 : index
    %c0_34 = arith.constant 0 : index
    %46 = vector.load %arg6[%c1_32, %c0_33, %c0_34] : memref<3x384x176xbf16, #tpu.memory_space<vmem>>, vector<1x384x176xbf16>
    %47 = vector.shape_cast %46 : vector<1x384x176xbf16> to vector<384x176xbf16>
    %cst_35 = arith.constant dense<0.000000e+00> : vector<218x176xf32>
    %48 = tpu.matmul %45, %47, %cst_35 {dimension_numbers = #tpu.dot_dimension_numbers<[1], [0], [0], [1], [0, 0, 1, 1], [], []>} : vector<218x384xbf16>, vector<384x176xbf16>, vector<218x176xf32> -> vector<218x176xf32>
    %49 = arith.addf %44, %48 : vector<218x176xf32>
    %50 = vector.extract_strided_slice %40 {offsets = [2, 0], sizes = [218, 384], strides = [1, 1]} : vector<220x384xbf16> to vector<218x384xbf16>
    %c2_36 = arith.constant 2 : index
    %c0_37 = arith.constant 0 : index
    %c0_38 = arith.constant 0 : index
    %51 = vector.load %arg6[%c2_36, %c0_37, %c0_38] : memref<3x384x176xbf16, #tpu.memory_space<vmem>>, vector<1x384x176xbf16>
    %52 = vector.shape_cast %51 : vector<1x384x176xbf16> to vector<384x176xbf16>
    %cst_39 = arith.constant dense<0.000000e+00> : vector<218x176xf32>
    %53 = tpu.matmul %50, %52, %cst_39 {dimension_numbers = #tpu.dot_dimension_numbers<[1], [0], [0], [1], [0, 0, 1, 1], [], []>} : vector<218x384xbf16>, vector<384x176xbf16>, vector<218x176xf32> -> vector<218x176xf32>
    %54 = arith.addf %49, %53 : vector<218x176xf32>
    %c0_40 = arith.constant 0 : index
    %c0_41 = arith.constant 0 : index
    %55 = vector.load %arg7[%c0_40, %c0_41] : memref<1x176xf32, #tpu.memory_space<vmem>>, vector<1x176xf32>
    %56 = vector.broadcast %55 : vector<1x176xf32> to vector<218x176xf32>
    %57 = arith.addf %54, %56 : vector<218x176xf32>
    %cst_42 = arith.constant 0.000000e+00 : f32
    %58 = vector.broadcast %cst_42 : f32 to vector<218x176xf32>
    %59 = arith.maximumf %57, %58 : vector<218x176xf32>
    %60 = arith.truncf %59 : vector<218x176xf32> to vector<218x176xbf16>
    %c0_43 = arith.constant 0 : index
    %c0_44 = arith.constant 0 : index
    %61 = vector.load %arg8[%c0_43, %c0_44] : memref<224x176xbf16, #tpu.memory_space<vmem>>, vector<218x176xbf16>
    tpu.vector_store %arg8[%c0_43, %c0_44], %60 {strides = array<i32>} : memref<224x176xbf16, #tpu.memory_space<vmem>>, vector<218x176xbf16>,
    %cst_45 = arith.constant 0.000000e+00 : bf16
    %62 = vector.broadcast %cst_45 : bf16 to vector<6x176xbf16>
    %c218 = arith.constant 218 : index
    %c0_46 = arith.constant 0 : index
    %63 = vector.load %arg8[%c218, %c0_46] : memref<224x176xbf16, #tpu.memory_space<vmem>>, vector<6x176xbf16>
    tpu.vector_store %arg8[%c218, %c0_46], %62 {strides = array<i32>} : memref<224x176xbf16, #tpu.memory_space<vmem>>, vector<6x176xbf16>,
    return
  }
  func.func @transform_0(%arg0: i32) -> (i32, i32) {
    %c0_i32 = arith.constant 0 : i32
    %c0_i32_0 = arith.constant 0 : i32
    return %arg0, %c0_i32 : i32, i32
  }
  func.func @transform_1(%arg0: i32) -> (i32, i32, i32) {
    %c0_i32 = arith.constant 0 : i32
    %c0_i32_0 = arith.constant 0 : i32
    %c0_i32_1 = arith.constant 0 : i32
    %c0_i32_2 = arith.constant 0 : i32
    return %c0_i32, %c0_i32_0, %c0_i32_1 : i32, i32, i32
  }
  func.func @transform_2(%arg0: i32) -> (i32, i32) {
    %c0_i32 = arith.constant 0 : i32
    %c0_i32_0 = arith.constant 0 : i32
    %c0_i32_1 = arith.constant 0 : i32
    return %c0_i32, %c0_i32_0 : i32, i32
  }
  func.func @transform_3(%arg0: i32) -> (i32, i32, i32) {
    %c0_i32 = arith.constant 0 : i32
    %c0_i32_0 = arith.constant 0 : i32
    %c0_i32_1 = arith.constant 0 : i32
    %c0_i32_2 = arith.constant 0 : i32
    return %c0_i32, %c0_i32_0, %c0_i32_1 : i32, i32, i32
  }
  func.func @transform_4(%arg0: i32) -> (i32, i32) {
    %c0_i32 = arith.constant 0 : i32
    %c0_i32_0 = arith.constant 0 : i32
    %c0_i32_1 = arith.constant 0 : i32
    return %c0_i32, %c0_i32_0 : i32, i32
  }
  func.func @transform_5(%arg0: i32) -> (i32, i32, i32) {
    %c0_i32 = arith.constant 0 : i32
    %c0_i32_0 = arith.constant 0 : i32
    %c0_i32_1 = arith.constant 0 : i32
    %c0_i32_2 = arith.constant 0 : i32
    return %c0_i32, %c0_i32_0, %c0_i32_1 : i32, i32, i32
  }
  func.func @transform_6(%arg0: i32) -> (i32, i32) {
    %c0_i32 = arith.constant 0 : i32
    %c0_i32_0 = arith.constant 0 : i32
    %c0_i32_1 = arith.constant 0 : i32
    return %c0_i32, %c0_i32_0 : i32, i32
  }
  func.func @transform_7(%arg0: i32) -> (i32, i32) {
    %c0_i32 = arith.constant 0 : i32
    %c0_i32_0 = arith.constant 0 : i32
    return %arg0, %c0_i32 : i32, i32
  }
}

module attributes {stable_mosaic.version = 11 : i64} {
  func.func @_fc_fused_kernel(%arg0: i32, %arg1: i32, %arg2: memref<22x8x176xbf16, #tpu.memory_space<vmem>>, %arg3: memref<22x176x512xi8, #tpu.memory_space<vmem>>, %arg4: memref<1x512xf32, #tpu.memory_space<vmem>>, %arg5: memref<1x512xf32, #tpu.memory_space<vmem>>, %arg6: memref<512x128xbf16, #tpu.memory_space<vmem>>, %arg7: memref<1x8x128xf32, #tpu.memory_space<vmem>>, %arg8: memref<8x128xf32, #tpu.memory_space<vmem>>) attributes {dimension_semantics = [#tpu.dimension_semantics<parallel>, #tpu.dimension_semantics<arbitrary>], iteration_bounds = array<i64: 1, 2>, scalar_prefetch = 0 : i64, scratch_operands = 1 : i64, tpu.core_type = #tpu.core_type<tc>, window_params = [{pipeline_mode = #tpu.pipeline_mode<synchronous>, transform_indices = @transform_0, window_bounds = array<i64: 22, 8, 176>}, {transform_indices = @transform_1, window_bounds = array<i64: 22, 176, 512>}, {transform_indices = @transform_2, window_bounds = array<i64: 1, 512>}, {transform_indices = @transform_3, window_bounds = array<i64: 1, 512>}, {transform_indices = @transform_4, window_bounds = array<i64: 512, 128>}, {transform_indices = @transform_5, window_bounds = array<i64: 1, 8, 128>}]} {
    %c0_i32 = arith.constant 0 : i32
    %0 = arith.cmpi eq, %arg1, %c0_i32 : i32
    %1 = arith.extui %0 : i1 to i32
    %c0_i32_0 = arith.constant 0 : i32
    %2 = arith.cmpi ne, %1, %c0_i32_0 : i32
    scf.if %2 {
      %cst_146 = arith.constant 0.000000e+00 : f32
      %175 = vector.broadcast %cst_146 : f32 to vector<8x128xf32>
      %c0_147 = arith.constant 0 : index
      %c0_148 = arith.constant 0 : index
      %176 = vector.load %arg8[%c0_147, %c0_148] : memref<8x128xf32, #tpu.memory_space<vmem>>, vector<8x128xf32>
      tpu.vector_store %arg8[%c0_147, %c0_148], %175 {strides = array<i32>} : memref<8x128xf32, #tpu.memory_space<vmem>>, vector<8x128xf32>,
    } else {
    }
    %cst = arith.constant 0.000000e+00 : f32
    %3 = vector.broadcast %cst : f32 to vector<8x512xf32>
    %c0 = arith.constant 0 : index
    %c0_1 = arith.constant 0 : index
    %c0_2 = arith.constant 0 : index
    %4 = vector.load %arg2[%c0, %c0_1, %c0_2] : memref<22x8x176xbf16, #tpu.memory_space<vmem>>, vector<1x8x176xbf16>
    %5 = vector.shape_cast %4 : vector<1x8x176xbf16> to vector<8x176xbf16>
    %c0_3 = arith.constant 0 : index
    %c0_4 = arith.constant 0 : index
    %c0_5 = arith.constant 0 : index
    %6 = vector.load %arg3[%c0_3, %c0_4, %c0_5] : memref<22x176x512xi8, #tpu.memory_space<vmem>>, vector<1x176x512xi8>
    %7 = vector.shape_cast %6 : vector<1x176x512xi8> to vector<176x512xi8>
    %8 = arith.sitofp %7 : vector<176x512xi8> to vector<176x512xbf16>
    %cst_6 = arith.constant dense<0.000000e+00> : vector<8x512xf32>
    %9 = tpu.matmul %5, %8, %cst_6 {dimension_numbers = #tpu.dot_dimension_numbers<[1], [0], [0], [1], [0, 0, 1, 1], [], []>} : vector<8x176xbf16>, vector<176x512xbf16>, vector<8x512xf32> -> vector<8x512xf32>
    %10 = arith.addf %3, %9 : vector<8x512xf32>
    %c1 = arith.constant 1 : index
    %c0_7 = arith.constant 0 : index
    %c0_8 = arith.constant 0 : index
    %11 = vector.load %arg2[%c1, %c0_7, %c0_8] : memref<22x8x176xbf16, #tpu.memory_space<vmem>>, vector<1x8x176xbf16>
    %12 = vector.shape_cast %11 : vector<1x8x176xbf16> to vector<8x176xbf16>
    %c1_9 = arith.constant 1 : index
    %c0_10 = arith.constant 0 : index
    %c0_11 = arith.constant 0 : index
    %13 = vector.load %arg3[%c1_9, %c0_10, %c0_11] : memref<22x176x512xi8, #tpu.memory_space<vmem>>, vector<1x176x512xi8>
    %14 = vector.shape_cast %13 : vector<1x176x512xi8> to vector<176x512xi8>
    %15 = arith.sitofp %14 : vector<176x512xi8> to vector<176x512xbf16>
    %cst_12 = arith.constant dense<0.000000e+00> : vector<8x512xf32>
    %16 = tpu.matmul %12, %15, %cst_12 {dimension_numbers = #tpu.dot_dimension_numbers<[1], [0], [0], [1], [0, 0, 1, 1], [], []>} : vector<8x176xbf16>, vector<176x512xbf16>, vector<8x512xf32> -> vector<8x512xf32>
    %17 = arith.addf %10, %16 : vector<8x512xf32>
    %c2 = arith.constant 2 : index
    %c0_13 = arith.constant 0 : index
    %c0_14 = arith.constant 0 : index
    %18 = vector.load %arg2[%c2, %c0_13, %c0_14] : memref<22x8x176xbf16, #tpu.memory_space<vmem>>, vector<1x8x176xbf16>
    %19 = vector.shape_cast %18 : vector<1x8x176xbf16> to vector<8x176xbf16>
    %c2_15 = arith.constant 2 : index
    %c0_16 = arith.constant 0 : index
    %c0_17 = arith.constant 0 : index
    %20 = vector.load %arg3[%c2_15, %c0_16, %c0_17] : memref<22x176x512xi8, #tpu.memory_space<vmem>>, vector<1x176x512xi8>
    %21 = vector.shape_cast %20 : vector<1x176x512xi8> to vector<176x512xi8>
    %22 = arith.sitofp %21 : vector<176x512xi8> to vector<176x512xbf16>
    %cst_18 = arith.constant dense<0.000000e+00> : vector<8x512xf32>
    %23 = tpu.matmul %19, %22, %cst_18 {dimension_numbers = #tpu.dot_dimension_numbers<[1], [0], [0], [1], [0, 0, 1, 1], [], []>} : vector<8x176xbf16>, vector<176x512xbf16>, vector<8x512xf32> -> vector<8x512xf32>
    %24 = arith.addf %17, %23 : vector<8x512xf32>
    %c3 = arith.constant 3 : index
    %c0_19 = arith.constant 0 : index
    %c0_20 = arith.constant 0 : index
    %25 = vector.load %arg2[%c3, %c0_19, %c0_20] : memref<22x8x176xbf16, #tpu.memory_space<vmem>>, vector<1x8x176xbf16>
    %26 = vector.shape_cast %25 : vector<1x8x176xbf16> to vector<8x176xbf16>
    %c3_21 = arith.constant 3 : index
    %c0_22 = arith.constant 0 : index
    %c0_23 = arith.constant 0 : index
    %27 = vector.load %arg3[%c3_21, %c0_22, %c0_23] : memref<22x176x512xi8, #tpu.memory_space<vmem>>, vector<1x176x512xi8>
    %28 = vector.shape_cast %27 : vector<1x176x512xi8> to vector<176x512xi8>
    %29 = arith.sitofp %28 : vector<176x512xi8> to vector<176x512xbf16>
    %cst_24 = arith.constant dense<0.000000e+00> : vector<8x512xf32>
    %30 = tpu.matmul %26, %29, %cst_24 {dimension_numbers = #tpu.dot_dimension_numbers<[1], [0], [0], [1], [0, 0, 1, 1], [], []>} : vector<8x176xbf16>, vector<176x512xbf16>, vector<8x512xf32> -> vector<8x512xf32>
    %31 = arith.addf %24, %30 : vector<8x512xf32>
    %c4 = arith.constant 4 : index
    %c0_25 = arith.constant 0 : index
    %c0_26 = arith.constant 0 : index
    %32 = vector.load %arg2[%c4, %c0_25, %c0_26] : memref<22x8x176xbf16, #tpu.memory_space<vmem>>, vector<1x8x176xbf16>
    %33 = vector.shape_cast %32 : vector<1x8x176xbf16> to vector<8x176xbf16>
    %c4_27 = arith.constant 4 : index
    %c0_28 = arith.constant 0 : index
    %c0_29 = arith.constant 0 : index
    %34 = vector.load %arg3[%c4_27, %c0_28, %c0_29] : memref<22x176x512xi8, #tpu.memory_space<vmem>>, vector<1x176x512xi8>
    %35 = vector.shape_cast %34 : vector<1x176x512xi8> to vector<176x512xi8>
    %36 = arith.sitofp %35 : vector<176x512xi8> to vector<176x512xbf16>
    %cst_30 = arith.constant dense<0.000000e+00> : vector<8x512xf32>
    %37 = tpu.matmul %33, %36, %cst_30 {dimension_numbers = #tpu.dot_dimension_numbers<[1], [0], [0], [1], [0, 0, 1, 1], [], []>} : vector<8x176xbf16>, vector<176x512xbf16>, vector<8x512xf32> -> vector<8x512xf32>
    %38 = arith.addf %31, %37 : vector<8x512xf32>
    %c5 = arith.constant 5 : index
    %c0_31 = arith.constant 0 : index
    %c0_32 = arith.constant 0 : index
    %39 = vector.load %arg2[%c5, %c0_31, %c0_32] : memref<22x8x176xbf16, #tpu.memory_space<vmem>>, vector<1x8x176xbf16>
    %40 = vector.shape_cast %39 : vector<1x8x176xbf16> to vector<8x176xbf16>
    %c5_33 = arith.constant 5 : index
    %c0_34 = arith.constant 0 : index
    %c0_35 = arith.constant 0 : index
    %41 = vector.load %arg3[%c5_33, %c0_34, %c0_35] : memref<22x176x512xi8, #tpu.memory_space<vmem>>, vector<1x176x512xi8>
    %42 = vector.shape_cast %41 : vector<1x176x512xi8> to vector<176x512xi8>
    %43 = arith.sitofp %42 : vector<176x512xi8> to vector<176x512xbf16>
    %cst_36 = arith.constant dense<0.000000e+00> : vector<8x512xf32>
    %44 = tpu.matmul %40, %43, %cst_36 {dimension_numbers = #tpu.dot_dimension_numbers<[1], [0], [0], [1], [0, 0, 1, 1], [], []>} : vector<8x176xbf16>, vector<176x512xbf16>, vector<8x512xf32> -> vector<8x512xf32>
    %45 = arith.addf %38, %44 : vector<8x512xf32>
    %c6 = arith.constant 6 : index
    %c0_37 = arith.constant 0 : index
    %c0_38 = arith.constant 0 : index
    %46 = vector.load %arg2[%c6, %c0_37, %c0_38] : memref<22x8x176xbf16, #tpu.memory_space<vmem>>, vector<1x8x176xbf16>
    %47 = vector.shape_cast %46 : vector<1x8x176xbf16> to vector<8x176xbf16>
    %c6_39 = arith.constant 6 : index
    %c0_40 = arith.constant 0 : index
    %c0_41 = arith.constant 0 : index
    %48 = vector.load %arg3[%c6_39, %c0_40, %c0_41] : memref<22x176x512xi8, #tpu.memory_space<vmem>>, vector<1x176x512xi8>
    %49 = vector.shape_cast %48 : vector<1x176x512xi8> to vector<176x512xi8>
    %50 = arith.sitofp %49 : vector<176x512xi8> to vector<176x512xbf16>
    %cst_42 = arith.constant dense<0.000000e+00> : vector<8x512xf32>
    %51 = tpu.matmul %47, %50, %cst_42 {dimension_numbers = #tpu.dot_dimension_numbers<[1], [0], [0], [1], [0, 0, 1, 1], [], []>} : vector<8x176xbf16>, vector<176x512xbf16>, vector<8x512xf32> -> vector<8x512xf32>
    %52 = arith.addf %45, %51 : vector<8x512xf32>
    %c7 = arith.constant 7 : index
    %c0_43 = arith.constant 0 : index
    %c0_44 = arith.constant 0 : index
    %53 = vector.load %arg2[%c7, %c0_43, %c0_44] : memref<22x8x176xbf16, #tpu.memory_space<vmem>>, vector<1x8x176xbf16>
    %54 = vector.shape_cast %53 : vector<1x8x176xbf16> to vector<8x176xbf16>
    %c7_45 = arith.constant 7 : index
    %c0_46 = arith.constant 0 : index
    %c0_47 = arith.constant 0 : index
    %55 = vector.load %arg3[%c7_45, %c0_46, %c0_47] : memref<22x176x512xi8, #tpu.memory_space<vmem>>, vector<1x176x512xi8>
    %56 = vector.shape_cast %55 : vector<1x176x512xi8> to vector<176x512xi8>
    %57 = arith.sitofp %56 : vector<176x512xi8> to vector<176x512xbf16>
    %cst_48 = arith.constant dense<0.000000e+00> : vector<8x512xf32>
    %58 = tpu.matmul %54, %57, %cst_48 {dimension_numbers = #tpu.dot_dimension_numbers<[1], [0], [0], [1], [0, 0, 1, 1], [], []>} : vector<8x176xbf16>, vector<176x512xbf16>, vector<8x512xf32> -> vector<8x512xf32>
    %59 = arith.addf %52, %58 : vector<8x512xf32>
    %c8 = arith.constant 8 : index
    %c0_49 = arith.constant 0 : index
    %c0_50 = arith.constant 0 : index
    %60 = vector.load %arg2[%c8, %c0_49, %c0_50] : memref<22x8x176xbf16, #tpu.memory_space<vmem>>, vector<1x8x176xbf16>
    %61 = vector.shape_cast %60 : vector<1x8x176xbf16> to vector<8x176xbf16>
    %c8_51 = arith.constant 8 : index
    %c0_52 = arith.constant 0 : index
    %c0_53 = arith.constant 0 : index
    %62 = vector.load %arg3[%c8_51, %c0_52, %c0_53] : memref<22x176x512xi8, #tpu.memory_space<vmem>>, vector<1x176x512xi8>
    %63 = vector.shape_cast %62 : vector<1x176x512xi8> to vector<176x512xi8>
    %64 = arith.sitofp %63 : vector<176x512xi8> to vector<176x512xbf16>
    %cst_54 = arith.constant dense<0.000000e+00> : vector<8x512xf32>
    %65 = tpu.matmul %61, %64, %cst_54 {dimension_numbers = #tpu.dot_dimension_numbers<[1], [0], [0], [1], [0, 0, 1, 1], [], []>} : vector<8x176xbf16>, vector<176x512xbf16>, vector<8x512xf32> -> vector<8x512xf32>
    %66 = arith.addf %59, %65 : vector<8x512xf32>
    %c9 = arith.constant 9 : index
    %c0_55 = arith.constant 0 : index
    %c0_56 = arith.constant 0 : index
    %67 = vector.load %arg2[%c9, %c0_55, %c0_56] : memref<22x8x176xbf16, #tpu.memory_space<vmem>>, vector<1x8x176xbf16>
    %68 = vector.shape_cast %67 : vector<1x8x176xbf16> to vector<8x176xbf16>
    %c9_57 = arith.constant 9 : index
    %c0_58 = arith.constant 0 : index
    %c0_59 = arith.constant 0 : index
    %69 = vector.load %arg3[%c9_57, %c0_58, %c0_59] : memref<22x176x512xi8, #tpu.memory_space<vmem>>, vector<1x176x512xi8>
    %70 = vector.shape_cast %69 : vector<1x176x512xi8> to vector<176x512xi8>
    %71 = arith.sitofp %70 : vector<176x512xi8> to vector<176x512xbf16>
    %cst_60 = arith.constant dense<0.000000e+00> : vector<8x512xf32>
    %72 = tpu.matmul %68, %71, %cst_60 {dimension_numbers = #tpu.dot_dimension_numbers<[1], [0], [0], [1], [0, 0, 1, 1], [], []>} : vector<8x176xbf16>, vector<176x512xbf16>, vector<8x512xf32> -> vector<8x512xf32>
    %73 = arith.addf %66, %72 : vector<8x512xf32>
    %c10 = arith.constant 10 : index
    %c0_61 = arith.constant 0 : index
    %c0_62 = arith.constant 0 : index
    %74 = vector.load %arg2[%c10, %c0_61, %c0_62] : memref<22x8x176xbf16, #tpu.memory_space<vmem>>, vector<1x8x176xbf16>
    %75 = vector.shape_cast %74 : vector<1x8x176xbf16> to vector<8x176xbf16>
    %c10_63 = arith.constant 10 : index
    %c0_64 = arith.constant 0 : index
    %c0_65 = arith.constant 0 : index
    %76 = vector.load %arg3[%c10_63, %c0_64, %c0_65] : memref<22x176x512xi8, #tpu.memory_space<vmem>>, vector<1x176x512xi8>
    %77 = vector.shape_cast %76 : vector<1x176x512xi8> to vector<176x512xi8>
    %78 = arith.sitofp %77 : vector<176x512xi8> to vector<176x512xbf16>
    %cst_66 = arith.constant dense<0.000000e+00> : vector<8x512xf32>
    %79 = tpu.matmul %75, %78, %cst_66 {dimension_numbers = #tpu.dot_dimension_numbers<[1], [0], [0], [1], [0, 0, 1, 1], [], []>} : vector<8x176xbf16>, vector<176x512xbf16>, vector<8x512xf32> -> vector<8x512xf32>
    %80 = arith.addf %73, %79 : vector<8x512xf32>
    %c11 = arith.constant 11 : index
    %c0_67 = arith.constant 0 : index
    %c0_68 = arith.constant 0 : index
    %81 = vector.load %arg2[%c11, %c0_67, %c0_68] : memref<22x8x176xbf16, #tpu.memory_space<vmem>>, vector<1x8x176xbf16>
    %82 = vector.shape_cast %81 : vector<1x8x176xbf16> to vector<8x176xbf16>
    %c11_69 = arith.constant 11 : index
    %c0_70 = arith.constant 0 : index
    %c0_71 = arith.constant 0 : index
    %83 = vector.load %arg3[%c11_69, %c0_70, %c0_71] : memref<22x176x512xi8, #tpu.memory_space<vmem>>, vector<1x176x512xi8>
    %84 = vector.shape_cast %83 : vector<1x176x512xi8> to vector<176x512xi8>
    %85 = arith.sitofp %84 : vector<176x512xi8> to vector<176x512xbf16>
    %cst_72 = arith.constant dense<0.000000e+00> : vector<8x512xf32>
    %86 = tpu.matmul %82, %85, %cst_72 {dimension_numbers = #tpu.dot_dimension_numbers<[1], [0], [0], [1], [0, 0, 1, 1], [], []>} : vector<8x176xbf16>, vector<176x512xbf16>, vector<8x512xf32> -> vector<8x512xf32>
    %87 = arith.addf %80, %86 : vector<8x512xf32>
    %c12 = arith.constant 12 : index
    %c0_73 = arith.constant 0 : index
    %c0_74 = arith.constant 0 : index
    %88 = vector.load %arg2[%c12, %c0_73, %c0_74] : memref<22x8x176xbf16, #tpu.memory_space<vmem>>, vector<1x8x176xbf16>
    %89 = vector.shape_cast %88 : vector<1x8x176xbf16> to vector<8x176xbf16>
    %c12_75 = arith.constant 12 : index
    %c0_76 = arith.constant 0 : index
    %c0_77 = arith.constant 0 : index
    %90 = vector.load %arg3[%c12_75, %c0_76, %c0_77] : memref<22x176x512xi8, #tpu.memory_space<vmem>>, vector<1x176x512xi8>
    %91 = vector.shape_cast %90 : vector<1x176x512xi8> to vector<176x512xi8>
    %92 = arith.sitofp %91 : vector<176x512xi8> to vector<176x512xbf16>
    %cst_78 = arith.constant dense<0.000000e+00> : vector<8x512xf32>
    %93 = tpu.matmul %89, %92, %cst_78 {dimension_numbers = #tpu.dot_dimension_numbers<[1], [0], [0], [1], [0, 0, 1, 1], [], []>} : vector<8x176xbf16>, vector<176x512xbf16>, vector<8x512xf32> -> vector<8x512xf32>
    %94 = arith.addf %87, %93 : vector<8x512xf32>
    %c13 = arith.constant 13 : index
    %c0_79 = arith.constant 0 : index
    %c0_80 = arith.constant 0 : index
    %95 = vector.load %arg2[%c13, %c0_79, %c0_80] : memref<22x8x176xbf16, #tpu.memory_space<vmem>>, vector<1x8x176xbf16>
    %96 = vector.shape_cast %95 : vector<1x8x176xbf16> to vector<8x176xbf16>
    %c13_81 = arith.constant 13 : index
    %c0_82 = arith.constant 0 : index
    %c0_83 = arith.constant 0 : index
    %97 = vector.load %arg3[%c13_81, %c0_82, %c0_83] : memref<22x176x512xi8, #tpu.memory_space<vmem>>, vector<1x176x512xi8>
    %98 = vector.shape_cast %97 : vector<1x176x512xi8> to vector<176x512xi8>
    %99 = arith.sitofp %98 : vector<176x512xi8> to vector<176x512xbf16>
    %cst_84 = arith.constant dense<0.000000e+00> : vector<8x512xf32>
    %100 = tpu.matmul %96, %99, %cst_84 {dimension_numbers = #tpu.dot_dimension_numbers<[1], [0], [0], [1], [0, 0, 1, 1], [], []>} : vector<8x176xbf16>, vector<176x512xbf16>, vector<8x512xf32> -> vector<8x512xf32>
    %101 = arith.addf %94, %100 : vector<8x512xf32>
    %c14 = arith.constant 14 : index
    %c0_85 = arith.constant 0 : index
    %c0_86 = arith.constant 0 : index
    %102 = vector.load %arg2[%c14, %c0_85, %c0_86] : memref<22x8x176xbf16, #tpu.memory_space<vmem>>, vector<1x8x176xbf16>
    %103 = vector.shape_cast %102 : vector<1x8x176xbf16> to vector<8x176xbf16>
    %c14_87 = arith.constant 14 : index
    %c0_88 = arith.constant 0 : index
    %c0_89 = arith.constant 0 : index
    %104 = vector.load %arg3[%c14_87, %c0_88, %c0_89] : memref<22x176x512xi8, #tpu.memory_space<vmem>>, vector<1x176x512xi8>
    %105 = vector.shape_cast %104 : vector<1x176x512xi8> to vector<176x512xi8>
    %106 = arith.sitofp %105 : vector<176x512xi8> to vector<176x512xbf16>
    %cst_90 = arith.constant dense<0.000000e+00> : vector<8x512xf32>
    %107 = tpu.matmul %103, %106, %cst_90 {dimension_numbers = #tpu.dot_dimension_numbers<[1], [0], [0], [1], [0, 0, 1, 1], [], []>} : vector<8x176xbf16>, vector<176x512xbf16>, vector<8x512xf32> -> vector<8x512xf32>
    %108 = arith.addf %101, %107 : vector<8x512xf32>
    %c15 = arith.constant 15 : index
    %c0_91 = arith.constant 0 : index
    %c0_92 = arith.constant 0 : index
    %109 = vector.load %arg2[%c15, %c0_91, %c0_92] : memref<22x8x176xbf16, #tpu.memory_space<vmem>>, vector<1x8x176xbf16>
    %110 = vector.shape_cast %109 : vector<1x8x176xbf16> to vector<8x176xbf16>
    %c15_93 = arith.constant 15 : index
    %c0_94 = arith.constant 0 : index
    %c0_95 = arith.constant 0 : index
    %111 = vector.load %arg3[%c15_93, %c0_94, %c0_95] : memref<22x176x512xi8, #tpu.memory_space<vmem>>, vector<1x176x512xi8>
    %112 = vector.shape_cast %111 : vector<1x176x512xi8> to vector<176x512xi8>
    %113 = arith.sitofp %112 : vector<176x512xi8> to vector<176x512xbf16>
    %cst_96 = arith.constant dense<0.000000e+00> : vector<8x512xf32>
    %114 = tpu.matmul %110, %113, %cst_96 {dimension_numbers = #tpu.dot_dimension_numbers<[1], [0], [0], [1], [0, 0, 1, 1], [], []>} : vector<8x176xbf16>, vector<176x512xbf16>, vector<8x512xf32> -> vector<8x512xf32>
    %115 = arith.addf %108, %114 : vector<8x512xf32>
    %c16 = arith.constant 16 : index
    %c0_97 = arith.constant 0 : index
    %c0_98 = arith.constant 0 : index
    %116 = vector.load %arg2[%c16, %c0_97, %c0_98] : memref<22x8x176xbf16, #tpu.memory_space<vmem>>, vector<1x8x176xbf16>
    %117 = vector.shape_cast %116 : vector<1x8x176xbf16> to vector<8x176xbf16>
    %c16_99 = arith.constant 16 : index
    %c0_100 = arith.constant 0 : index
    %c0_101 = arith.constant 0 : index
    %118 = vector.load %arg3[%c16_99, %c0_100, %c0_101] : memref<22x176x512xi8, #tpu.memory_space<vmem>>, vector<1x176x512xi8>
    %119 = vector.shape_cast %118 : vector<1x176x512xi8> to vector<176x512xi8>
    %120 = arith.sitofp %119 : vector<176x512xi8> to vector<176x512xbf16>
    %cst_102 = arith.constant dense<0.000000e+00> : vector<8x512xf32>
    %121 = tpu.matmul %117, %120, %cst_102 {dimension_numbers = #tpu.dot_dimension_numbers<[1], [0], [0], [1], [0, 0, 1, 1], [], []>} : vector<8x176xbf16>, vector<176x512xbf16>, vector<8x512xf32> -> vector<8x512xf32>
    %122 = arith.addf %115, %121 : vector<8x512xf32>
    %c17 = arith.constant 17 : index
    %c0_103 = arith.constant 0 : index
    %c0_104 = arith.constant 0 : index
    %123 = vector.load %arg2[%c17, %c0_103, %c0_104] : memref<22x8x176xbf16, #tpu.memory_space<vmem>>, vector<1x8x176xbf16>
    %124 = vector.shape_cast %123 : vector<1x8x176xbf16> to vector<8x176xbf16>
    %c17_105 = arith.constant 17 : index
    %c0_106 = arith.constant 0 : index
    %c0_107 = arith.constant 0 : index
    %125 = vector.load %arg3[%c17_105, %c0_106, %c0_107] : memref<22x176x512xi8, #tpu.memory_space<vmem>>, vector<1x176x512xi8>
    %126 = vector.shape_cast %125 : vector<1x176x512xi8> to vector<176x512xi8>
    %127 = arith.sitofp %126 : vector<176x512xi8> to vector<176x512xbf16>
    %cst_108 = arith.constant dense<0.000000e+00> : vector<8x512xf32>
    %128 = tpu.matmul %124, %127, %cst_108 {dimension_numbers = #tpu.dot_dimension_numbers<[1], [0], [0], [1], [0, 0, 1, 1], [], []>} : vector<8x176xbf16>, vector<176x512xbf16>, vector<8x512xf32> -> vector<8x512xf32>
    %129 = arith.addf %122, %128 : vector<8x512xf32>
    %c18 = arith.constant 18 : index
    %c0_109 = arith.constant 0 : index
    %c0_110 = arith.constant 0 : index
    %130 = vector.load %arg2[%c18, %c0_109, %c0_110] : memref<22x8x176xbf16, #tpu.memory_space<vmem>>, vector<1x8x176xbf16>
    %131 = vector.shape_cast %130 : vector<1x8x176xbf16> to vector<8x176xbf16>
    %c18_111 = arith.constant 18 : index
    %c0_112 = arith.constant 0 : index
    %c0_113 = arith.constant 0 : index
    %132 = vector.load %arg3[%c18_111, %c0_112, %c0_113] : memref<22x176x512xi8, #tpu.memory_space<vmem>>, vector<1x176x512xi8>
    %133 = vector.shape_cast %132 : vector<1x176x512xi8> to vector<176x512xi8>
    %134 = arith.sitofp %133 : vector<176x512xi8> to vector<176x512xbf16>
    %cst_114 = arith.constant dense<0.000000e+00> : vector<8x512xf32>
    %135 = tpu.matmul %131, %134, %cst_114 {dimension_numbers = #tpu.dot_dimension_numbers<[1], [0], [0], [1], [0, 0, 1, 1], [], []>} : vector<8x176xbf16>, vector<176x512xbf16>, vector<8x512xf32> -> vector<8x512xf32>
    %136 = arith.addf %129, %135 : vector<8x512xf32>
    %c19 = arith.constant 19 : index
    %c0_115 = arith.constant 0 : index
    %c0_116 = arith.constant 0 : index
    %137 = vector.load %arg2[%c19, %c0_115, %c0_116] : memref<22x8x176xbf16, #tpu.memory_space<vmem>>, vector<1x8x176xbf16>
    %138 = vector.shape_cast %137 : vector<1x8x176xbf16> to vector<8x176xbf16>
    %c19_117 = arith.constant 19 : index
    %c0_118 = arith.constant 0 : index
    %c0_119 = arith.constant 0 : index
    %139 = vector.load %arg3[%c19_117, %c0_118, %c0_119] : memref<22x176x512xi8, #tpu.memory_space<vmem>>, vector<1x176x512xi8>
    %140 = vector.shape_cast %139 : vector<1x176x512xi8> to vector<176x512xi8>
    %141 = arith.sitofp %140 : vector<176x512xi8> to vector<176x512xbf16>
    %cst_120 = arith.constant dense<0.000000e+00> : vector<8x512xf32>
    %142 = tpu.matmul %138, %141, %cst_120 {dimension_numbers = #tpu.dot_dimension_numbers<[1], [0], [0], [1], [0, 0, 1, 1], [], []>} : vector<8x176xbf16>, vector<176x512xbf16>, vector<8x512xf32> -> vector<8x512xf32>
    %143 = arith.addf %136, %142 : vector<8x512xf32>
    %c20 = arith.constant 20 : index
    %c0_121 = arith.constant 0 : index
    %c0_122 = arith.constant 0 : index
    %144 = vector.load %arg2[%c20, %c0_121, %c0_122] : memref<22x8x176xbf16, #tpu.memory_space<vmem>>, vector<1x8x176xbf16>
    %145 = vector.shape_cast %144 : vector<1x8x176xbf16> to vector<8x176xbf16>
    %c20_123 = arith.constant 20 : index
    %c0_124 = arith.constant 0 : index
    %c0_125 = arith.constant 0 : index
    %146 = vector.load %arg3[%c20_123, %c0_124, %c0_125] : memref<22x176x512xi8, #tpu.memory_space<vmem>>, vector<1x176x512xi8>
    %147 = vector.shape_cast %146 : vector<1x176x512xi8> to vector<176x512xi8>
    %148 = arith.sitofp %147 : vector<176x512xi8> to vector<176x512xbf16>
    %cst_126 = arith.constant dense<0.000000e+00> : vector<8x512xf32>
    %149 = tpu.matmul %145, %148, %cst_126 {dimension_numbers = #tpu.dot_dimension_numbers<[1], [0], [0], [1], [0, 0, 1, 1], [], []>} : vector<8x176xbf16>, vector<176x512xbf16>, vector<8x512xf32> -> vector<8x512xf32>
    %150 = arith.addf %143, %149 : vector<8x512xf32>
    %c21 = arith.constant 21 : index
    %c0_127 = arith.constant 0 : index
    %c0_128 = arith.constant 0 : index
    %151 = vector.load %arg2[%c21, %c0_127, %c0_128] : memref<22x8x176xbf16, #tpu.memory_space<vmem>>, vector<1x8x176xbf16>
    %152 = vector.shape_cast %151 : vector<1x8x176xbf16> to vector<8x176xbf16>
    %c21_129 = arith.constant 21 : index
    %c0_130 = arith.constant 0 : index
    %c0_131 = arith.constant 0 : index
    %153 = vector.load %arg3[%c21_129, %c0_130, %c0_131] : memref<22x176x512xi8, #tpu.memory_space<vmem>>, vector<1x176x512xi8>
    %154 = vector.shape_cast %153 : vector<1x176x512xi8> to vector<176x512xi8>
    %155 = arith.sitofp %154 : vector<176x512xi8> to vector<176x512xbf16>
    %cst_132 = arith.constant dense<0.000000e+00> : vector<8x512xf32>
    %156 = tpu.matmul %152, %155, %cst_132 {dimension_numbers = #tpu.dot_dimension_numbers<[1], [0], [0], [1], [0, 0, 1, 1], [], []>} : vector<8x176xbf16>, vector<176x512xbf16>, vector<8x512xf32> -> vector<8x512xf32>
    %157 = arith.addf %150, %156 : vector<8x512xf32>
    %c0_133 = arith.constant 0 : index
    %c0_134 = arith.constant 0 : index
    %158 = vector.load %arg4[%c0_133, %c0_134] : memref<1x512xf32, #tpu.memory_space<vmem>>, vector<1x512xf32>
    %159 = vector.broadcast %158 : vector<1x512xf32> to vector<8x512xf32>
    %160 = arith.mulf %157, %159 : vector<8x512xf32>
    %c0_135 = arith.constant 0 : index
    %c0_136 = arith.constant 0 : index
    %161 = vector.load %arg5[%c0_135, %c0_136] : memref<1x512xf32, #tpu.memory_space<vmem>>, vector<1x512xf32>
    %162 = vector.broadcast %161 : vector<1x512xf32> to vector<8x512xf32>
    %163 = arith.addf %160, %162 : vector<8x512xf32>
    %cst_137 = arith.constant 0.000000e+00 : f32
    %164 = vector.broadcast %cst_137 : f32 to vector<8x512xf32>
    %165 = arith.maximumf %163, %164 : vector<8x512xf32>
    %c0_138 = arith.constant 0 : index
    %c0_139 = arith.constant 0 : index
    %166 = vector.load %arg8[%c0_138, %c0_139] : memref<8x128xf32, #tpu.memory_space<vmem>>, vector<8x128xf32>
    %167 = arith.truncf %165 : vector<8x512xf32> to vector<8x512xbf16>
    %c0_140 = arith.constant 0 : index
    %c0_141 = arith.constant 0 : index
    %168 = vector.load %arg6[%c0_140, %c0_141] : memref<512x128xbf16, #tpu.memory_space<vmem>>, vector<512x128xbf16>
    %cst_142 = arith.constant dense<0.000000e+00> : vector<8x128xf32>
    %169 = tpu.matmul %167, %168, %cst_142 {dimension_numbers = #tpu.dot_dimension_numbers<[1], [0], [0], [1], [0, 0, 1, 1], [], []>} : vector<8x512xbf16>, vector<512x128xbf16>, vector<8x128xf32> -> vector<8x128xf32>
    %170 = arith.addf %166, %169 : vector<8x128xf32>
    %c0_143 = arith.constant 0 : index
    %c0_144 = arith.constant 0 : index
    %171 = vector.load %arg8[%c0_143, %c0_144] : memref<8x128xf32, #tpu.memory_space<vmem>>, vector<8x128xf32>
    tpu.vector_store %arg8[%c0_143, %c0_144], %170 {strides = array<i32>} : memref<8x128xf32, #tpu.memory_space<vmem>>, vector<8x128xf32>,
    %c1_i32 = arith.constant 1 : i32
    %172 = arith.cmpi eq, %arg1, %c1_i32 : i32
    %173 = arith.extui %172 : i1 to i32
    %c0_i32_145 = arith.constant 0 : i32
    %174 = arith.cmpi ne, %173, %c0_i32_145 : i32
    scf.if %174 {
      %c0_146 = arith.constant 0 : index
      %c0_147 = arith.constant 0 : index
      %175 = vector.load %arg8[%c0_146, %c0_147] : memref<8x128xf32, #tpu.memory_space<vmem>>, vector<8x128xf32>
      %c0_148 = arith.constant 0 : index
      %c0_149 = arith.constant 0 : index
      %c0_150 = arith.constant 0 : index
      %176 = vector.load %arg7[%c0_148, %c0_149, %c0_150] : memref<1x8x128xf32, #tpu.memory_space<vmem>>, vector<1x8x128xf32>
      %177 = vector.shape_cast %176 : vector<1x8x128xf32> to vector<8x128xf32>
      %178 = vector.shape_cast %175 : vector<8x128xf32> to vector<1x8x128xf32>
      tpu.vector_store %arg7[%c0_148, %c0_149, %c0_150], %178 {strides = array<i32>} : memref<1x8x128xf32, #tpu.memory_space<vmem>>, vector<1x8x128xf32>,
    } else {
    }
    return
  }
  func.func @transform_0(%arg0: i32, %arg1: i32) -> (i32, i32, i32) {
    %c0_i32 = arith.constant 0 : i32
    %c0_i32_0 = arith.constant 0 : i32
    %c0_i32_1 = arith.constant 0 : i32
    %c0_i32_2 = arith.constant 0 : i32
    return %c0_i32, %c0_i32_0, %c0_i32_1 : i32, i32, i32
  }
  func.func @transform_1(%arg0: i32, %arg1: i32) -> (i32, i32, i32) {
    %c2_i32 = arith.constant 2 : i32
    %0 = arith.muli %arg0, %c2_i32 : i32
    %1 = arith.addi %0, %arg1 : i32
    %c0_i32 = arith.constant 0 : i32
    %c0_i32_0 = arith.constant 0 : i32
    %c0_i32_1 = arith.constant 0 : i32
    return %c0_i32, %c0_i32_0, %1 : i32, i32, i32
  }
  func.func @transform_2(%arg0: i32, %arg1: i32) -> (i32, i32) {
    %c2_i32 = arith.constant 2 : i32
    %0 = arith.muli %arg0, %c2_i32 : i32
    %1 = arith.addi %0, %arg1 : i32
    %c0_i32 = arith.constant 0 : i32
    %c0_i32_0 = arith.constant 0 : i32
    return %c0_i32, %1 : i32, i32
  }
  func.func @transform_3(%arg0: i32, %arg1: i32) -> (i32, i32) {
    %c2_i32 = arith.constant 2 : i32
    %0 = arith.muli %arg0, %c2_i32 : i32
    %1 = arith.addi %0, %arg1 : i32
    %c0_i32 = arith.constant 0 : i32
    %c0_i32_0 = arith.constant 0 : i32
    return %c0_i32, %1 : i32, i32
  }
  func.func @transform_4(%arg0: i32, %arg1: i32) -> (i32, i32) {
    %c2_i32 = arith.constant 2 : i32
    %0 = arith.muli %arg0, %c2_i32 : i32
    %1 = arith.addi %0, %arg1 : i32
    %c0_i32 = arith.constant 0 : i32
    %c0_i32_0 = arith.constant 0 : i32
    return %1, %c0_i32 : i32, i32
  }
  func.func @transform_5(%arg0: i32, %arg1: i32) -> (i32, i32, i32) {
    %c0_i32 = arith.constant 0 : i32
    %c0_i32_0 = arith.constant 0 : i32
    %c0_i32_1 = arith.constant 0 : i32
    return %arg0, %c0_i32, %c0_i32_0 : i32, i32, i32
  }
}

</mosaic_0001>

<bundles_post_ra>
// kernel: forward.2
= control target key start
LH: loop header
LB: loop body
LE: loop exit
PB: predicated region body
PF: predicated region fallthrough
CT: control target
= control target key end

     0   :  { %12 = vsyncpa [#allocation3], 0  ;;  %s10937_s0 = inlined_call_operand.vmem [shape: bf16[224,28], index: 0, kind: input, shape index: {}]   ;;  %s10938_s1 = inlined_call_operand.hbm [shape: bf16[3,28,208], index: 1, kind: input, shape index: {}]   ;;  %s10939_s2 = inlined_call_operand.hbm [shape: f32[1,208], index: 2, kind: input, shape index: {}]   ;;  %s10940_s3 = inlined_call_operand.hbm [shape: bf16[3,208,384], index: 3, kind: input, shape index: {}]   ;;  %s10941_s4 = inlined_call_operand.hbm [shape: f32[1,384], index: 4, kind: input, shape index: {}]   ;;  %s10942_s5 = inlined_call_operand.vmem [shape: bf16[3,384,176], index: 5, kind: input, shape index: {}]   ;;  %s10943_s6 = inlined_call_operand.hbm [shape: f32[1,176], index: 6, kind: input, shape index: {}]   ;;  %s10944_s7 = inlined_call_operand.vmem [shape: bf16[224,176], index: 7, kind: output, shape index: {}]  }
   0x1   :  { %13 = vsyncpa [#allocation5], 0 }
   0x2   :  { %14 = vsyncpa [#allocation8], 0  ;;  %s8219_s24 = smov [#allocation4]   ;;  %s8220_s26 = smov [#allocation7]  }
   0x3   :  { %s35_s25 = sshll.u32 %s8219_s24, 4  ;;  %s57_s27 = sshll.u32 %s8220_s26, 4  ;;  %s36_s25 = int_to_ptr.vmem [resolvable:$true] %s35_s25  ;;  %s58_s27 = int_to_ptr.vmem [resolvable:$true] %s57_s27 }
   0x4   :  { %s8103_s30 = scalar_lea.hbm %s10939_s2, 32 }
   0x5   :  { %p8104_p0 = scmp.ne.s32.totalorder %s10939_s2, %s8103_s30  ;;  %p8107_p1 = scmp.lt.u32.totalorder %s8103_s30, %s10939_s2 }
   0x7   :  { %p8109_p2 = pnand %p8107_p1, %p8104_p0 }
   0x9   :  { %8112 = shalt.err (!%p8109_p2)
}
   0xa   :  { %s8113_s12 = scalar_lea.vmem %s36_s25, 32  ;;  %p8118_p4 = scmp.lt.s32.totalorder %s36_s25, %s36_s25 }
   0xb   :  { %p8114_p3 = scmp.ne.s32.totalorder %s36_s25, %s8113_s12  ;;  %p8119_p5 = scmp.lt.s32.totalorder %s8113_s12, %s8113_s12 }
   0xd   :  { %p8120_p6 = por %p8119_p5, %p8118_p4 }
   0xf   :  { %p8121_p7 = pnand %p8120_p6, %p8114_p3 }
  0x11   :  { %8124 = shalt.err (!%p8121_p7)
}
  0x12   :  { %38 = dma.hbm_to_vmem [thread:$0]  %s10939_s2, 32, %s36_s25, [#allocation5]  }
  0x13   :  { %s8125_s17 = scalar_lea.hbm %s10941_s4, 48 }
  0x14   :  { %p8126_p8 = scmp.ne.s32.totalorder %s10941_s4, %s8125_s17  ;;  %p8129_p9 = scmp.lt.u32.totalorder %s8125_s17, %s10941_s4 }
  0x16   :  { %p8131_p10 = pnand %p8129_p9, %p8126_p8 }
  0x18   :  { %8134 = shalt.err (!%p8131_p10)
}
  0x19   :  { %s8135_s22 = scalar_lea.vmem %s58_s27, 48  ;;  %s8139_s23 = scalar_lea.vmem %s58_s27, 64 }
  0x1a   :  { %p8136_p11 = scmp.ne.s32.totalorder %s58_s27, %s8135_s22  ;;  %p8140_p12 = scmp.lt.s32.totalorder %s58_s27, %s58_s27 }
  0x1b   :  { %p8141_p13 = scmp.lt.s32.totalorder %s8139_s23, %s8135_s22 }
  0x1d   :  { %p8142_p0 = por %p8141_p13, %p8140_p12 }
  0x1f   :  { %p8143_p1 = pnand %p8142_p0, %p8136_p11 }
  0x21   :  { %8146 = shalt.err (!%p8143_p1)
}
  0x22   :  { %60 = dma.hbm_to_vmem [thread:$0]  %s10941_s4, 48, %s58_s27, [#allocation8]  }
  0x23   :  { %s8221_s25 = smov [#allocation2]   ;;  %s8147_s30 = scalar_lea.hbm %s10938_s1, 1536 }
  0x24   :  { %s22_s26 = sshll.u32 %s8221_s25, 4  ;;  %p8148_p2 = scmp.ne.s32.totalorder %s10938_s1, %s8147_s30  ;;  %s23_s26 = int_to_ptr.vmem [resolvable:$true] %s22_s26 }
  0x25   :  { %p8151_p3 = scmp.lt.u32.totalorder %s8147_s30, %s10938_s1 }
  0x27   :  { %p8153_p4 = pnand %p8151_p3, %p8148_p2 }
  0x29   :  { %8156 = shalt.err (!%p8153_p4)
}
  0x2a   :  { %s8157_s12 = scalar_lea.vmem %s23_s26, 1536  ;;  %p8162_p6 = scmp.lt.s32.totalorder %s23_s26, %s23_s26 }
  0x2b   :  { %p8158_p5 = scmp.ne.s32.totalorder %s23_s26, %s8157_s12  ;;  %p8163_p7 = scmp.lt.s32.totalorder %s8157_s12, %s8157_s12 }
  0x2d   :  { %p8164_p8 = por %p8163_p7, %p8162_p6 }
  0x2f   :  { %p8165_p9 = pnand %p8164_p8, %p8158_p5 }
  0x31   :  { %8168 = shalt.err (!%p8165_p9)
}
  0x32   :  { %s8222_s4 = smov 128   ;;  %s8223_s27 = smov 8  }
  0x33   :  { %28 = dma.hbm_to_vmem [thread:$0]  %s10938_s1, 1536, %s23_s26, [#allocation3], %s8222_s4, %s8222_s4, %s8223_s27  }
  0x34   :  { %s8224_s15 = smov [#allocation6]   ;;  %s8169_s19 = scalar_lea.hbm %s10940_s3, 14976 }
  0x35   :  { %s44_s16 = sshll.u32 %s8224_s15, 4  ;;  %p8170_p10 = scmp.ne.s32.totalorder %s10940_s3, %s8169_s19  ;;  %s45_s16 = int_to_ptr.vmem [resolvable:$true] %s44_s16 }
  0x36   :  { %p8173_p11 = scmp.lt.u32.totalorder %s8169_s19, %s10940_s3 }
  0x38   :  { %p8175_p12 = pnand %p8173_p11, %p8170_p10 }
  0x3a   :  { %8178 = shalt.err (!%p8175_p12)
}
  0x3b   :  { %s8179_s2 = scalar_lea.vmem %s45_s16, 14976  ;;  %p8184_p0 = scmp.lt.s32.totalorder %s45_s16, %s45_s16 }
  0x3c   :  { %p8180_p13 = scmp.ne.s32.totalorder %s45_s16, %s8179_s2  ;;  %p8185_p1 = scmp.lt.s32.totalorder %s8179_s2, %s8179_s2 }
  0x3e   :  { %p8186_p2 = por %p8185_p1, %p8184_p0 }
  0x40   :  { %p8187_p3 = pnand %p8186_p2, %p8180_p13 }
  0x42   :  { %8190 = shalt.err (!%p8187_p3)
}
  0x43   :  { %s8225_s1 = smov 192   ;;  %s8226_s24 = smov 12  }
  0x44   :  { %50 = dma.hbm_to_vmem [thread:$0]  %s10940_s3, 14976, %s45_s16, [#allocation5], %s8225_s1, %s8225_s1, %s8226_s24  }
  0x45   :  { %s8227_s28 = smov [#allocation9]   ;;  %s8191_s9 = scalar_lea.hbm %s10943_s6, 32 }
  0x46   :  { %s69_s29 = sshll.u32 %s8227_s28, 4  ;;  %p8192_p4 = scmp.ne.s32.totalorder %s10943_s6, %s8191_s9  ;;  %s70_s29 = int_to_ptr.vmem [resolvable:$true] %s69_s29 }
  0x47   :  { %p8195_p5 = scmp.lt.u32.totalorder %s8191_s9, %s10943_s6 }
  0x49   :  { %p8197_p6 = pnand %p8195_p5, %p8192_p4 }
  0x4b   :  { %8200 = shalt.err (!%p8197_p6)
}
  0x4c   :  { %s8201_s27 = scalar_lea.vmem %s70_s29, 32  ;;  %p8206_p8 = scmp.lt.s32.totalorder %s70_s29, %s70_s29 }
  0x4d   :  { %p8202_p7 = scmp.ne.s32.totalorder %s70_s29, %s8201_s27  ;;  %p8207_p9 = scmp.lt.s32.totalorder %s8201_s27, %s8201_s27 }
  0x4f   :  { %p8208_p10 = por %p8207_p9, %p8206_p8 }
  0x51   :  { %p8209_p11 = pnand %p8208_p10, %p8202_p7 }
  0x53   :  { %8212 = shalt.err (!%p8209_p11)
}
  0x54   :  { %72 = dma.hbm_to_vmem [thread:$0]  %s10943_s6, 32, %s70_s29, [#allocation8]  }
  0x55   :  { %8213 = dma.done.wait [#allocation3], 1536  }
  0x56   :  { %8214 = vsyncadd [#allocation3], 4294965760 }
  0x57   :  { %8215 = dma.done.wait [#allocation5], 15008  }
  0x58   :  { %8216 = vsyncadd [#allocation5], 4294952288 }
  0x59   :  { %8217 = dma.done.wait [#allocation8], 80  }
  0x5a   :  { %8218 = vsyncadd [#allocation8], 4294967216  ;;  %vm6572_vm0 = vcmask 1043457   ;;  %vm6573_vm1 = vcmask 392197   ;;  %v10945_v0 = vmov 0   ;;  %vm369_vm3 = vcmask 1045504  }
  0x5b   :  { %vm6574_vm2 = vmor %vm6573_vm1, %vm6572_vm0  ;;  %408 = vmatprep.mubr.bf16.mxu0 %v10945_v0  ;;  %v7697_v1 = vld [vmem:[#allocation2 + $0x24] ss:$8 sps:$4 sm:$0xff]   ;;  %v7699_v2 = vld [vmem:[#allocation2 + $0x20] ss:$8 sps:$4 sm:$0xff]   ;;  %vm196_vm4 = vsmask.f32 7424 }
  0x5c   :  { %6575 = vst.msk [vmem:[%s10944_s7 + $0xd8] sm:$0xee] %vm6574_vm2, %v10945_v0  ;;  %376 = vmatprep.subr.bf16.mxu0 %v7697_v1  ;;  %v7700_v3 = vld [vmem:[#allocation2 + $0x34] ss:$8 sps:$4 sm:$0x3f]   ;;  %v8339_v6 = vld [vmem:[%s10937_s0] sm:$0xff]  }
  0x5d   :  { %v7702_v4 = vld [vmem:[#allocation2 + $0x30] ss:$8 sps:$4 sm:$0x3f]   ;;  %377 = vmatpush1.bf16.msra.mxu0 %v7699_v2  ;;  %v8344_v7 = vld [vmem:[%s10937_s0 + $0x8] sm:$0xff]   ;;  %v198_v8 = vshrl.u32 %v8339_v6, 16  ;;  %v200_v9 = vshll.u32 %v8339_v6, 16 }
  0x5e   :  { %6601 = vmatprep.subr.msk.bf16.mxu0 %vm369_vm3, %v7700_v3  ;;  %v371_v5 = vsel %vm369_vm3, %v7702_v4, 0  ;;  %v205_v10 = vshll.u32 %v8344_v7, 16  ;;  %v7707_v11 = vld [vmem:[#allocation2 + $0x4] ss:$8 sps:$4 sm:$0xff]   ;;  %v8352_v12 = vld [vmem:[%s10937_s0 + $0x10] sm:$0xff]   ;;  %vm326_vm5 = vcmask 228352  }
  0x5f   :  { %v202_v13 = vrot.slane %v200_v9, 1  ;;  %v7705_v15 = vld [vmem:[#allocation2] ss:$8 sps:$4 sm:$0xff]   ;;  %v209_v17 = vshrl.u32 %v8344_v7, 16  ;;  %v213_v18 = vshll.u32 %v8352_v12, 16  ;;  %v8362_v22 = vld [vmem:[%s10937_s0 + $0x18] sm:$0xff]  }
  0x60   :  { %v207_v14 = vrot.slane %v205_v10, 1  ;;  %v217_v23 = vshrl.u32 %v8352_v12, 16  ;;  %v7715_v24 = vld [vmem:[#allocation2 + $0x14] ss:$8 sps:$4 sm:$0x3f]   ;;  %v221_v26 = vshll.u32 %v8362_v22, 16 }
  0x61   :  { %379 = vmatpush1.bf16.msra.mxu0 %v371_v5  ;;  %v203_v16 = vor.u32 %v202_v13, %v198_v8  ;;  %v215_v21 = vrot.slane %v213_v18, 1  ;;  %v7717_v27 = vld [vmem:[#allocation2 + $0x10] ss:$8 sps:$4 sm:$0x3f]   ;;  %v8374_v31 = vld [vmem:[%s10937_s0 + $0x20] sm:$0xff]   ;;  %v225_v32 = vshrl.u32 %v8362_v22, 16 }
  0x62   :  { %601 = vmatprep.subr.bf16.mxu0 %v7707_v11  ;;  %v211_v20 = vor.u32 %v209_v17, %v207_v14  ;;  %v596_v28 = vsel %vm369_vm3, %v7717_v27, 0  ;;  %v223_v30 = vrot.slane %v221_v26, 1  ;;  %v229_v34 = vshll.u32 %v8374_v31, 16  ;;  %v7725_v35 = vld [vmem:[#allocation2 + $0x44] ss:$8 sps:$4 sm:$0xff]   ;;  %v8389_v39 = vld [vmem:[%s10937_s0 + $0x30] sm:$0xff]  }
  0x63   :  { %v208_v19 = vsel %vm196_vm4, %v203_v16, %v207_v14  ;;  %v219_v29 = vor.u32 %v217_v23, %v215_v21  ;;  %v8382_v36 = vld [vmem:[%s10937_s0 + $0x28] sm:$0xff]   ;;  %v233_v41 = vshrl.u32 %v8374_v31, 16  ;;  %v245_v45 = vshll.u32 %v8389_v39, 16  ;;  %v8402_v49 = vld [vmem:[%s10937_s0 + $0x38] sm:$0xff]   ;;  %v8409_v51 = vld [vmem:[%s10937_s0 + $0x40] sm:$0xff]  }
  0x64   :  { %6602 = vmatmul.mubr.msk.bf16.vlgmr.msra.gmra.mrb[0].mxu0 %vm326_vm5, %v208_v19  ;;  %v216_v25 = vsel %vm196_vm4, %v211_v20, %v215_v21  ;;  %v227_v37 = vor.u32 %v225_v32, %v223_v30  ;;  %v231_v38 = vrot.slane %v229_v34, 1  ;;  %v237_v42 = vshll.u32 %v8382_v36, 16  ;;  %v8414_v52 = vld [vmem:[%s10937_s0 + $0x48] sm:$0xff]   ;;  %v8422_v56 = vld [vmem:[%s10937_s0 + $0x50] sm:$0xff]   ;;  %v8442_v13 = vld [vmem:[%s10937_s0 + $0x58] sm:$0xff]  }
  0x65   :  { %602 = vmatpush1.bf16.msra.mxu0 %v7705_v15  ;;  %418 = vmatprep.mubr.bf16.mxu0 %v10945_v0  ;;  %v224_v33 = vsel %vm196_vm4, %v219_v29, %v223_v30  ;;  %v241_v47 = vshrl.u32 %v8382_v36, 16  ;;  %v247_v48 = vrot.slane %v245_v45, 1  ;;  %v249_v54 = vshrl.u32 %v8389_v39, 16  ;;  %v8452_v18 = vld [vmem:[%s10937_s0 + $0x60] sm:$0xff]  }
  0x66   :  { %6620 = vmatprep.subr.msk.bf16.mxu0 %vm369_vm3, %v7715_v24  ;;  %v232_v40 = vsel %vm196_vm4, %v227_v37, %v231_v38  ;;  %v235_v43 = vor.u32 %v233_v41, %v231_v38  ;;  %v239_v44 = vrot.slane %v237_v42, 1  ;;  %v253_v55 = vshll.u32 %v8402_v49, 16  ;;  %v7723_v38 = vld [vmem:[#allocation2 + $0x40] ss:$8 sps:$4 sm:$0xff]  }
  0x67   :  { %v251_v57 = vor.u32 %v249_v54, %v247_v48  ;;  %v261_v59 = vshll.u32 %v8409_v51, 16  ;;  %v269_v60 = vshll.u32 %v8414_v52, 16  ;;  %v277_v61 = vshll.u32 %v8422_v56, 16  ;;  %v7728_v41 = vld [vmem:[#allocation2 + $0x50] ss:$8 sps:$4 sm:$0x3f]  }
  0x68   :  { %v240_v46 = vsel %vm196_vm4, %v235_v43, %v239_v44  ;;  %v243_v50 = vor.u32 %v241_v47, %v239_v44  ;;  %v255_v58 = vrot.slane %v253_v55, 1  ;;  %v257_v63 = vshrl.u32 %v8402_v49, 16  ;;  %v7747_v43 = vld [vmem:[#allocation6 + $0x4] ss:$12 sps:$4 sm:$0xff]   ;;  %v7749_v44 = vld [vmem:[#allocation6] ss:$12 sps:$4 sm:$0xff]  }
  0x69   :  { %604 = vmatpush1.bf16.msra.mxu0 %v596_v28  ;;  %v265_v1 = vshrl.u32 %v8409_v51, 16  ;;  %v263_v2 = vrot.slane %v261_v59, 1  ;;  %v273_v3 = vshrl.u32 %v8414_v52, 16  ;;  %v271_v4 = vrot.slane %v269_v60, 1  ;;  %v7750_v45 = vld [vmem:[#allocation6 + $0x1c] ss:$12 sps:$4 sm:$0xff]   ;;  %2400 = vmatprep.subr.bf16.mxu1 %v7747_v43 }
  0x6a   :  { %873 = vmatprep.subr.bf16.mxu0 %v7725_v35  ;;  %v248_v53 = vsel %vm196_vm4, %v243_v50, %v247_v48  ;;  %v256_v62 = vsel %vm196_vm4, %v251_v57, %v255_v58  ;;  %v279_v5 = vrot.slane %v277_v61, 1  ;;  %v259_v8 = vor.u32 %v257_v63, %v255_v58  ;;  %2401 = vmatpush1.bf16.msra.mxu1 %v7749_v44  ;;  %v7756_v47 = vld [vmem:[#allocation6 + $0x34] ss:$12 sps:$4 sm:$0xff]   ;;  %v7758_v48 = vld [vmem:[#allocation6 + $0x30] ss:$12 sps:$4 sm:$0xff]  }
  0x6b   :  { %v267_v10 = vor.u32 %v265_v1, %v263_v2  ;;  %v275_v14 = vor.u32 %v273_v3, %v271_v4  ;;  %v281_v16 = vshrl.u32 %v8422_v56, 16  ;;  %v285_v17 = vshll.u32 %v8442_v13, 16  ;;  %2402 = vmatprep.subr.bf16.mxu1 %v7750_v45  ;;  %v7759_v50 = vld [vmem:[#allocation6 + $0x4c] ss:$12 sps:$4 sm:$0xff]   ;;  %v7765_v54 = vld [vmem:[#allocation6 + $0x64] ss:$12 sps:$4 sm:$0xff]  }
  0x6c   :  { %6603 = vmatmul.mubr.msk.bf16.gmra.mrb[4].mxu0 %vm326_vm5, %v216_v25  ;;  %v264_v9 = vsel %vm196_vm4, %v259_v8, %v263_v2  ;;  %v289_v23 = vshrl.u32 %v8442_v13, 16  ;;  %v293_v24 = vshll.u32 %v8452_v18, 16  ;;  %v8462_v25 = vld [vmem:[%s10937_s0 + $0x68] sm:$0xff]   ;;  %v297_v29 = vshrl.u32 %v8452_v18, 16  ;;  %v7774_v1 = vld [vmem:[#allocation6 + $0x94] ss:$12 sps:$4 sm:$0xff]  }
  0x6d   :  { %428 = vmatprep.mubr.bf16.mxu0 %v10945_v0  ;;  %v272_v11 = vsel %vm196_vm4, %v267_v10, %v271_v4  ;;  %v280_v15 = vsel %vm196_vm4, %v275_v14, %v279_v5  ;;  %v283_v19 = vor.u32 %v281_v16, %v279_v5  ;;  %v287_v20 = vrot.slane %v285_v17, 1  ;;  %v7767_v58 = vld [vmem:[#allocation6 + $0x60] ss:$12 sps:$4 sm:$0xff]   ;;  %v7768_v59 = vld [vmem:[#allocation6 + $0x7c] ss:$12 sps:$4 sm:$0xff]  }
  0x6e   :  { %v295_v27 = vrot.slane %v293_v24, 1  ;;  %v301_v30 = vshll.u32 %v8462_v25, 16  ;;  %v305_v35 = vshrl.u32 %v8462_v25, 16  ;;  %v868_v42 = vsel %vm369_vm3, %v7728_v41, 0  ;;  %v7729_v61 = vld [vmem:[#allocation6 + $0x138] ss:$12 sps:$4 sm:$0xff]  }
  0x6f   :  { %v288_v21 = vsel %vm196_vm4, %v283_v19, %v287_v20  ;;  %v291_v26 = vor.u32 %v289_v23, %v287_v20  ;;  %v780_v55 = vrot.slane %v8339_v6, 1  ;;  %v781_v57 = vrot.slane %v8344_v7, 1  ;;  %v7770_v63 = vld [vmem:[#allocation6 + $0x78] ss:$12 sps:$4 sm:$0xff]   ;;  %v7732_v2 = vld [vmem:[#allocation6 + $0x150] ss:$12 sps:$4 sm:$0xff]  }
  0x70   :  { %v299_v32 = vor.u32 %v297_v29, %v295_v27  ;;  %vm779_vm6 = vcmask 1046528   ;;  %v7737_v3 = vld [vmem:[#allocation6 + $0x16c] ss:$12 sps:$4 sm:$0xff]   ;;  %v7776_v4 = vld [vmem:[#allocation6 + $0x90] ss:$12 sps:$4 sm:$0xff]   ;;  %v791_v41 = vrot.slane %v8389_v39, 1 }
  0x71   :  { %v296_v28 = vsel %vm196_vm4, %v291_v26, %v295_v27  ;;  %v782_v60 = vsel %vm779_vm6, %v780_v55, %v781_v57  ;;  %v7777_v5 = vld [vmem:[#allocation6 + $0xac] ss:$12 sps:$4 sm:$0xff]   ;;  %v7740_v10 = vld [vmem:[#allocation6 + $0x184] ss:$12 sps:$4 sm:$0xff]   ;;  %v7743_v17 = vld [vmem:[#allocation6 + $0x19c] ss:$12 sps:$4 sm:$0xff]  }
  0x72   :  { %v7783_v14 = vld [vmem:[#allocation6 + $0xc4] ss:$12 sps:$4 sm:$0xff]   ;;  %v7738_v16 = vld [vmem:[#allocation6 + $0x180] ss:$12 sps:$4 sm:$0xff]   ;;  %v7786_v20 = vld [vmem:[#allocation6 + $0xdc] ss:$12 sps:$4 sm:$0xff]  }
  0x73   :  { %v7785_v19 = vld [vmem:[#allocation6 + $0xc0] ss:$12 sps:$4 sm:$0xff]   ;;  %v7741_v23 = vld [vmem:[#allocation6 + $0x198] ss:$12 sps:$4 sm:$0xff]   ;;  %v787_v27 = vrot.slane %v8374_v31, 1  ;;  %v793_v44 = vrot.slane %v8402_v49, 1 }
  0x74   :  { %6604 = vmatmul.mubr.msk.bf16.gmra.mrb[8].mxu0 %vm326_vm5, %v224_v33  ;;  %v303_v33 = vrot.slane %v301_v30, 1  ;;  %v7746_v24 = vld [vmem:[#allocation6 + $0x1b4] ss:$12 sps:$4 sm:$0xff]   ;;  %v7788_v26 = vld [vmem:[#allocation6 + $0xd8] ss:$12 sps:$4 sm:$0xff]   ;;  %vm1803_vm7 = vcmask 654336  }
  0x75   :  { %438 = vmatprep.mubr.bf16.mxu0 %v10945_v0  ;;  %v7754_v29 = vld [vmem:[#allocation6 + $0x1cc] ss:$12 sps:$4 sm:$0xff]   ;;  %v7789_v43 = vld [vmem:[#allocation6 + $0x228] ss:$12 sps:$4 sm:$0xff]   ;;  %v794_v45 = vsel %vm779_vm6, %v791_v41, %v793_v44  ;;  %vm6538_vm8 = vcmask 1043456   ;;  %vm6539_vm9 = vcmask 392196  }
  0x76   :  { %v304_v34 = vsel %vm196_vm4, %v299_v32, %v303_v33  ;;  %v307_v37 = vor.u32 %v305_v35, %v303_v33  ;;  %v7752_v32 = vld [vmem:[#allocation6 + $0x1c8] ss:$12 sps:$4 sm:$0xff]   ;;  %v7764_v33 = vld [vmem:[#allocation6 + $0x1e4] ss:$12 sps:$4 sm:$0xff]   ;;  %v7795_v55 = vld [vmem:[#allocation6 + $0x10c] ss:$12 sps:$4 sm:$0xff]  }
  0x77   :  { %v7773_v35 = vld [vmem:[#allocation6 + $0x1fc] ss:$12 sps:$4 sm:$0xff]   ;;  %vm10707_vm10 = vmor %vm6539_vm9, %vm6538_vm8  ;;  %vm6568_vm11 = vcmask 1040384   ;;  %vm6569_vm12 = vcmask 389124  }
  0x78   :  { %vm6570_vm13 = vmor %vm6569_vm12, %vm6568_vm11 }
  0x7c   :  { %6605 = vmatmul.mubr.msk.bf16.gmra.mrb[12].mxu0 %vm326_vm5, %v232_v40  ;;  %v7726_v40 = vld [vmem:[#allocation2 + $0x54] ss:$8 sps:$4 sm:$0x3f]  }
  0x7d   :  { %448 = vmatprep.mubr.bf16.mxu0 %v10945_v0 }
  0x84   :  { %6606 = vmatmul.mubr.msk.bf16.gmra.mrb[16].mxu0 %vm326_vm5, %v240_v46  ;;  %v7755_v46 = vld [vmem:[#allocation6 + $0x18] ss:$12 sps:$4 sm:$0xff]  }
  0x85   :  { %458 = vmatprep.mubr.bf16.mxu0 %v10945_v0  ;;  %2403 = vmatpush1.bf16.msra.mxu1 %v7755_v46 }
  0x86   :  { %2404 = vmatprep.subr.bf16.mxu1 %v7756_v47  ;;  %v797_v47 = vrot.slane %v8414_v52, 1 }
  0x89   :  { %2405 = vmatpush1.bf16.msra.mxu1 %v7758_v48 }
  0x8a   :  { %2406 = vmatprep.subr.bf16.mxu1 %v7759_v50 }
  0x8c   :  { %6607 = vmatmul.mubr.msk.bf16.gmra.mrb[20].mxu0 %vm326_vm5, %v248_v53  ;;  %v7761_v53 = vld [vmem:[#allocation6 + $0x48] ss:$12 sps:$4 sm:$0xff]  }
  0x8d   :  { %468 = vmatprep.mubr.bf16.mxu0 %v10945_v0  ;;  %2407 = vmatpush1.bf16.msra.mxu1 %v7761_v53 }
  0x8e   :  { %2408 = vmatprep.subr.bf16.mxu1 %v7765_v54  ;;  %v7794_v54 = vld [vmem:[#allocation6 + $0xf0] ss:$12 sps:$4 sm:$0xff]  }
  0x91   :  { %2409 = vmatpush1.bf16.msra.mxu1 %v7767_v58  ;;  %v7801_v58 = vld [vmem:[#allocation6 + $0x124] ss:$12 sps:$4 sm:$0xff]  }
  0x92   :  { %2410 = vmatprep.subr.bf16.mxu1 %v7768_v59  ;;  %v7803_v59 = vld [vmem:[#allocation6 + $0x120] ss:$12 sps:$4 sm:$0xff]  }
  0x94   :  { %6608 = vmatmul.mubr.msk.bf16.gmra.mrb[24].mxu0 %vm326_vm5, %v256_v62  ;;  %v7734_v62 = vld [vmem:[#allocation6 + $0x154] ss:$12 sps:$4 sm:$0xff]  }
  0x95   :  { %478 = vmatprep.mubr.bf16.mxu0 %v10945_v0  ;;  %2411 = vmatpush1.bf16.msra.mxu1 %v7770_v63  ;;  %v7804_v63 = vld [vmem:[#allocation6 + $0x258] ss:$12 sps:$4 sm:$0xff]  }
  0x96   :  { %2412 = vmatprep.subr.bf16.mxu1 %v7774_v1  ;;  %v1104_v1 = vlaneseq }
  0x99   :  { %2413 = vmatpush1.bf16.msra.mxu1 %v7776_v4 }
  0x9a   :  { %2414 = vmatprep.subr.bf16.mxu1 %v7777_v5 }
  0x9c   :  { %6609 = vmatmul.mubr.msk.bf16.gmra.mrb[28].mxu0 %vm326_vm5, %v264_v9  ;;  %v7735_v9 = vld [vmem:[#allocation6 + $0x168] ss:$12 sps:$4 sm:$0xff]  }
  0x9d   :  { %488 = vmatprep.mubr.bf16.mxu0 %v10945_v0 }
  0xa4   :  { %6610 = vmatmul.mubr.msk.bf16.gmra.mrb[32].mxu0 %vm326_vm5, %v272_v11  ;;  %v7779_v11 = vld [vmem:[#allocation6 + $0xa8] ss:$12 sps:$4 sm:$0xff]  }
  0xa5   :  { %498 = vmatprep.mubr.bf16.mxu0 %v10945_v0  ;;  %2415 = vmatpush1.bf16.msra.mxu1 %v7779_v11 }
  0xa6   :  { %2416 = vmatprep.subr.bf16.mxu1 %v7783_v14 }
  0xa9   :  { %2417 = vmatpush1.bf16.msra.mxu1 %v7785_v19 }
  0xaa   :  { %2418 = vmatprep.subr.bf16.mxu1 %v7786_v20 }
  0xac   :  { %6611 = vmatmul.mubr.msk.bf16.gmra.mrb[36].mxu0 %vm326_vm5, %v280_v15  ;;  %v785_v15 = vrot.slane %v8362_v22, 1 }
  0xad   :  { %508 = vmatprep.mubr.bf16.mxu0 %v10945_v0  ;;  %2419 = vmatpush1.bf16.msra.mxu1 %v7788_v26 }
  0xae   :  { %v788_v30 = vsel %vm779_vm6, %v785_v15, %v787_v27 }
  0xb4   :  { %6612 = vmatmul.mubr.msk.bf16.gmra.mrb[40].mxu0 %vm326_vm5, %v288_v21 }
  0xb5   :  { %518 = vmatprep.mubr.bf16.mxu0 %v10945_v0 }
  0xbc   :  { %6613 = vmatmul.mubr.msk.bf16.gmra.mrb[44].mxu0 %vm326_vm5, %v296_v28  ;;  %v7744_v28 = vld [vmem:[#allocation6 + $0x1b0] ss:$12 sps:$4 sm:$0xff]  }
  0xbd   :  { %528 = vmatprep.mubr.bf16.mxu0 %v10945_v0 }
  0xc4   :  { %6614 = vmatmul.mubr.msk.bf16.gmra.mrb[48].mxu0 %vm326_vm5, %v304_v34  ;;  %v789_v34 = vrot.slane %v8382_v36, 1 }
  0xc5   :  { %538 = vmatprep.mubr.bf16.mxu0 %v10945_v0 }
  0xcc   :  { %6615 = vmatmul.mubr.msk.bf16.gmra.mrb[52].mxu0 %vm326_vm5, %v307_v37  ;;  %v790_v37 = vsel %vm779_vm6, %v787_v27, %v789_v34  ;;  %v7813_v27 = vld [vmem:[#allocation6 + $0x270] ss:$12 sps:$4 sm:$0xff]  }
  0xcd   :  { %633 = vmatprep.mubr.bf16.mxu0 %v10945_v0 }
  0xd4   :  { %6621 = vmatmul.mubr.msk.bf16.vlgmr.msra.gmra.mrb[0].mxu0 %vm326_vm5, %v8339_v6  ;;  %v8101_v6 = vld [vmem:[%s10937_s0 + $0x10] sm:$0xff]  }
  0xd5   :  { %874 = vmatpush1.bf16.msra.mxu0 %v7723_v38  ;;  %643 = vmatprep.mubr.bf16.mxu0 %v10945_v0  ;;  %v7771_v38 = vld [vmem:[#allocation6 + $0x1f8] ss:$12 sps:$4 sm:$0xff]  }
  0xd6   :  { %6639 = vmatprep.subr.msk.bf16.mxu0 %vm369_vm3, %v7726_v40  ;;  %v7782_v40 = vld [vmem:[#allocation6 + $0x214] ss:$12 sps:$4 sm:$0xff]  }
  0xd9   :  { %876 = vmatpush1.bf16.msra.mxu0 %v868_v42  ;;  %v7780_v42 = vld [vmem:[#allocation6 + $0x210] ss:$12 sps:$4 sm:$0xff]  }
  0xdc   :  { %6622 = vmatmul.mubr.msk.bf16.gmra.mrb[4].mxu0 %vm326_vm5, %v8344_v7  ;;  %v783_v7 = vrot.slane %v8101_v6, 1  ;;  %v8578_v6 = vshrl.u32 %v1104_v1, 7 }
  0xdd   :  { %653 = vmatprep.mubr.bf16.mxu0 %v10945_v0 }
  0xde   :  { %v784_v8 = vsel %vm779_vm6, %v781_v57, %v783_v7  ;;  %v786_v21 = vsel %vm779_vm6, %v783_v7, %v785_v15  ;;  %v7797_v57 = vld [vmem:[#allocation6 + $0x108] ss:$12 sps:$4 sm:$0xff]   ;;  %11028 = vst [vmem:[#allocation13_spill] sm:$0xff] %v8578_v6  ;;  %v8581_v7 = vsub.s32 0, %v8578_v6 }
  0xe0   :  { %11029 = vst [vmem:[#allocation14_spill] sm:$0xff] %v8581_v7 }
  0xe4   :  { %6623 = vmatmul.mubr.msk.bf16.gmra.mrb[8].mxu0 %vm326_vm5, %v8352_v12  ;;  %v7731_v12 = vld [vmem:[#allocation6 + $0x13c] ss:$12 sps:$4 sm:$0xff]  }
  0xe5   :  { %663 = vmatprep.mubr.bf16.mxu0 %v10945_v0  ;;  %1846 = vmatprep.subr.bf16.mxu0 %v7731_v12  ;;  %v792_v12 = vsel %vm779_vm6, %v789_v34, %v791_v41 }
  0xec   :  { %6624 = vmatmul.mubr.msk.bf16.gmra.mrb[12].mxu0 %vm326_vm5, %v8362_v22  ;;  %v7792_v22 = vld [vmem:[#allocation6 + $0xf4] ss:$12 sps:$4 sm:$0xff]  }
  0xed   :  { %673 = vmatprep.mubr.bf16.mxu0 %v10945_v0  ;;  %2420 = vmatprep.subr.bf16.mxu1 %v7792_v22 }
  0xee   :  { %2421 = vmatpush1.bf16.msra.mxu1 %v7794_v54 }
  0xef   :  { %2422 = vmatprep.subr.bf16.mxu1 %v7795_v55 }
  0xf2   :  { %2423 = vmatpush1.bf16.msra.mxu1 %v7797_v57 }
  0xf3   :  { %2424 = vmatprep.subr.bf16.mxu1 %v7801_v58 }
  0xf4   :  { %6625 = vmatmul.mubr.msk.bf16.gmra.mrb[16].mxu0 %vm326_vm5, %v8374_v31  ;;  %v7762_v31 = vld [vmem:[#allocation6 + $0x1e0] ss:$12 sps:$4 sm:$0xff]  }
  0xf5   :  { %683 = vmatprep.mubr.bf16.mxu0 %v10945_v0 }
  0xf6   :  { %2425 = vmatpush1.bf16.msra.mxu1 %v7803_v59 }
  0xfc   :  { %6626 = vmatmul.mubr.msk.bf16.gmra.mrb[20].mxu0 %vm326_vm5, %v8382_v36  ;;  %v7791_v36 = vld [vmem:[#allocation6 + $0x22c] ss:$12 sps:$4 sm:$0xff]  }
  0xfd   :  { %693 = vmatprep.mubr.bf16.mxu0 %v10945_v0 }
 0x104   :  { %6627 = vmatmul.mubr.msk.bf16.gmra.mrb[24].mxu0 %vm326_vm5, %v8389_v39  ;;  %v795_v39 = vrot.slane %v8409_v51, 1 }
 0x105   :  { %703 = vmatprep.mubr.bf16.mxu0 %v10945_v0 }
 0x106   :  { %v796_v46 = vsel %vm779_vm6, %v793_v44, %v795_v39  ;;  %v798_v48 = vsel %vm779_vm6, %v795_v39, %v797_v47 }
 0x10c   :  { %6628 = vmatmul.mubr.msk.bf16.gmra.mrb[28].mxu0 %vm326_vm5, %v8402_v49  ;;  %v799_v49 = vrot.slane %v8422_v56, 1 }
 0x10d   :  { %713 = vmatprep.mubr.bf16.mxu0 %v10945_v0 }
 0x10e   :  { %v800_v50 = vsel %vm779_vm6, %v797_v47, %v799_v49  ;;  %v7820_v47 = vld [vmem:[#allocation6 + $0x2a0] ss:$12 sps:$4 sm:$0xff]  }
 0x114   :  { %6629 = vmatmul.mubr.msk.bf16.gmra.mrb[32].mxu0 %vm326_vm5, %v8409_v51  ;;  %v801_v51 = vrot.slane %v8442_v13, 1 }
 0x115   :  { %723 = vmatprep.mubr.bf16.mxu0 %v10945_v0 }
 0x116   :  { %v802_v53 = vsel %vm779_vm6, %v799_v49, %v801_v51 }
 0x11c   :  { %6630 = vmatmul.mubr.msk.bf16.gmra.mrb[36].mxu0 %vm326_vm5, %v8414_v52  ;;  %v803_v52 = vrot.slane %v8452_v18, 1 }
 0x11d   :  { %733 = vmatprep.mubr.bf16.mxu0 %v10945_v0 }
 0x124   :  { %6631 = vmatmul.mubr.msk.bf16.gmra.mrb[40].mxu0 %vm326_vm5, %v8422_v56  ;;  %v804_v56 = vsel %vm779_vm6, %v801_v51, %v803_v52 }
 0x125   :  { %743 = vmatprep.mubr.bf16.mxu0 %v10945_v0 }
 0x12c   :  { %6632 = vmatmul.mubr.msk.bf16.gmra.mrb[44].mxu0 %vm326_vm5, %v8442_v13  ;;  %v805_v13 = vrot.slane %v8462_v25, 1 }
 0x12d   :  { %753 = vmatprep.mubr.bf16.mxu0 %v10945_v0 }
 0x134   :  { %6633 = vmatmul.mubr.msk.bf16.gmra.mrb[48].mxu0 %vm326_vm5, %v8452_v18  ;;  %v806_v18 = vsel %vm779_vm6, %v803_v52, %v805_v13 }
 0x135   :  { %763 = vmatprep.mubr.bf16.mxu0 %v10945_v0 }
 0x13c   :  { %6634 = vmatmul.mubr.msk.bf16.gmra.mrb[52].mxu0 %vm326_vm5, %v8462_v25  ;;  %v7815_v25 = vld [vmem:[#allocation6 + $0x274] ss:$12 sps:$4 sm:$0xff]  }
 0x13d   :  { %905 = vmatprep.mubr.bf16.mxu0 %v10945_v0  ;;  %3117 = vmatprep.subr.bf16.mxu1 %v7815_v25 }
 0x144   :  { %6640 = vmatmul.mubr.msk.bf16.vlgmr.msra.gmra.mrb[0].mxu0 %vm326_vm5, %v782_v60  ;;  %v7798_v60 = vld [vmem:[#allocation6 + $0x240] ss:$12 sps:$4 sm:$0xff]  }
 0x145   :  { %915 = vmatprep.mubr.bf16.mxu0 %v10945_v0  ;;  %1847 = vmatpush1.bf16.msra.mxu0 %v7729_v61  ;;  %v7800_v61 = vld [vmem:[#allocation6 + $0x244] ss:$12 sps:$4 sm:$0xff]  }
 0x146   :  { %1848 = vmatprep.subr.bf16.mxu0 %v7734_v62  ;;  %v7806_v62 = vld [vmem:[#allocation6 + $0x25c] ss:$12 sps:$4 sm:$0xff]  }
 0x149   :  { %1849 = vmatpush1.bf16.msra.mxu0 %v7732_v2  ;;  %v1102_v2 = vld [vmem:[#allocation4] sm:$0x3] }
 0x14a   :  { %1850 = vmatprep.subr.bf16.mxu0 %v7737_v3  ;;  %v8584_v3 = vsub.s32 1, %v8578_v6  ;;  %v8587_v4 = vrot.slane %v1102_v2, %v8581_v7 }
 0x14c   :  { %6641 = vmatmul.mubr.msk.bf16.gmra.mrb[4].mxu0 %vm326_vm5, %v784_v8  ;;  %11030 = vst [vmem:[#allocation15_spill] sm:$0xff] %v8584_v3  ;;  %v8590_v5 = vrot.slane %v1102_v2, %v8584_v3  ;;  %v7807_v2 = vld [vmem:[#allocation6 + $0x140] ss:$12 sps:$4 sm:$0xff]  }
 0x14d   :  { %925 = vmatprep.mubr.bf16.mxu0 %v10945_v0  ;;  %1851 = vmatpush1.bf16.msra.mxu0 %v7735_v9 }
 0x14e   :  { %1852 = vmatprep.subr.bf16.mxu0 %v7740_v10 }
 0x151   :  { %1853 = vmatpush1.bf16.msra.mxu0 %v7738_v16 }
 0x152   :  { %1854 = vmatprep.subr.bf16.mxu0 %v7743_v17 }
 0x154   :  { %6642 = vmatmul.mubr.msk.bf16.gmra.mrb[8].mxu0 %vm326_vm5, %v786_v21 }
 0x155   :  { %935 = vmatprep.mubr.bf16.mxu0 %v10945_v0  ;;  %1855 = vmatpush1.bf16.msra.mxu0 %v7741_v23 }
 0x156   :  { %1856 = vmatprep.subr.bf16.mxu0 %v7746_v24 }
 0x159   :  { %1857 = vmatpush1.bf16.msra.mxu0 %v7744_v28 }
 0x15a   :  { %1858 = vmatprep.subr.bf16.mxu0 %v7754_v29 }
 0x15c   :  { %6643 = vmatmul.mubr.msk.bf16.gmra.mrb[12].mxu0 %vm326_vm5, %v788_v30  ;;  %v7818_v30 = vld [vmem:[#allocation6 + $0x28c] ss:$12 sps:$4 sm:$0xff]  }
 0x15d   :  { %945 = vmatprep.mubr.bf16.mxu0 %v10945_v0  ;;  %1859 = vmatpush1.bf16.msra.mxu0 %v7752_v32 }
 0x15e   :  { %1860 = vmatprep.subr.bf16.mxu0 %v7764_v33 }
 0x161   :  { %1861 = vmatpush1.bf16.msra.mxu0 %v7762_v31 }
 0x162   :  { %1862 = vmatprep.subr.bf16.mxu0 %v7773_v35 }
 0x164   :  { %6644 = vmatmul.mubr.msk.bf16.gmra.mrb[16].mxu0 %vm326_vm5, %v790_v37 }
 0x165   :  { %955 = vmatprep.mubr.bf16.mxu0 %v10945_v0  ;;  %1863 = vmatpush1.bf16.msra.mxu0 %v7771_v38  ;;  %v7816_v38 = vld [vmem:[#allocation6 + $0x288] ss:$12 sps:$4 sm:$0xff]  }
 0x166   :  { %1864 = vmatprep.subr.bf16.mxu0 %v7782_v40 }
 0x169   :  { %1865 = vmatpush1.bf16.msra.mxu0 %v7780_v42 }
 0x16a   :  { %1866 = vmatprep.subr.bf16.mxu0 %v7791_v36  ;;  %v7822_v36 = vld [vmem:[#allocation6 + $0x2a4] ss:$12 sps:$4 sm:$0xff]  }
 0x16c   :  { %6645 = vmatmul.mubr.msk.bf16.gmra.mrb[20].mxu0 %vm326_vm5, %v792_v12 }
 0x16d   :  { %965 = vmatprep.mubr.bf16.mxu0 %v10945_v0  ;;  %1867 = vmatpush1.bf16.msra.mxu0 %v7789_v43 }
 0x16e   :  { %1868 = vmatprep.subr.bf16.mxu0 %v7800_v61 }
 0x171   :  { %1869 = vmatpush1.bf16.msra.mxu0 %v7798_v60 }
 0x172   :  { %1870 = vmatprep.subr.bf16.mxu0 %v7806_v62  ;;  %v7823_v62 = vld [vmem:[#allocation6 + $0x2b8] ss:$12 sps:$4 sm:$0xff]  }
 0x174   :  { %6646 = vmatmul.mubr.msk.bf16.gmra.mrb[24].mxu0 %vm326_vm5, %v794_v45 }
 0x175   :  { %975 = vmatprep.mubr.bf16.mxu0 %v10945_v0  ;;  %1871 = vmatpush1.bf16.msra.mxu0 %v7804_v63 }
 0x176   :  { %2019 = vmatprep.subr.bf16.mxu0 %v10945_v0 }
 0x17c   :  { %6647 = vmatmul.mubr.msk.bf16.gmra.mrb[28].mxu0 %vm326_vm5, %v796_v46 }
 0x17d   :  { %985 = vmatprep.mubr.bf16.mxu0 %v10945_v0 }
 0x184   :  { %6648 = vmatmul.mubr.msk.bf16.gmra.mrb[32].mxu0 %vm326_vm5, %v798_v48 }
 0x185   :  { %995 = vmatprep.mubr.bf16.mxu0 %v10945_v0 }
 0x18c   :  { %6649 = vmatmul.mubr.msk.bf16.gmra.mrb[36].mxu0 %vm326_vm5, %v800_v50 }
 0x18d   :  { %1005 = vmatprep.mubr.bf16.mxu0 %v10945_v0 }
 0x194   :  { %6650 = vmatmul.mubr.msk.bf16.gmra.mrb[40].mxu0 %vm326_vm5, %v802_v53  ;;  %v7825_v53 = vld [vmem:[#allocation6 + $0x2bc] ss:$12 sps:$4 sm:$0xff]  }
 0x195   :  { %1015 = vmatprep.mubr.bf16.mxu0 %v10945_v0 }
 0x19c   :  { %6651 = vmatmul.mubr.msk.bf16.gmra.mrb[44].mxu0 %vm326_vm5, %v804_v56 }
 0x19d   :  { %1025 = vmatprep.mubr.bf16.mxu0 %v10945_v0 }
 0x1a4   :  { %6652 = vmatmul.mubr.msk.bf16.gmra.mrb[48].mxu0 %vm326_vm5, %v806_v18 }
 0x1a5   :  { %1035 = vmatprep.mubr.bf16.mxu0 %v10945_v0 }
 0x1ac   :  { %6653 = vmatmul.mubr.msk.bf16.gmra.mrb[52].mxu0 %vm326_vm5, %v805_v13 }
 0x217   :  { %v907_v8 = vpop.f32.mrb[0].mxu0 }
 0x218   :  { %v1114_v9 = vadd.f32 %v8587_v4, %v907_v8  ;;  %v909_v10 = vpop.f32.mrb[1].mxu0  ;;  %v7829_v8 = vld [vmem:[#allocation6 + $0x2d4] ss:$12 sps:$4 sm:$0xff]  }
 0x219   :  { %v1115_v11 = vadd.f32 %v8590_v5, %v909_v10  ;;  %v911_v14 = vpop.f32.mrb[2].mxu0 }
 0x21a   :  { %v1116_v15 = vadd.f32 %v8587_v4, %v911_v14  ;;  %v913_v16 = vpop.f32.mrb[3].mxu0  ;;  %v1170_v19 = vmax.f32 %v1114_v9, 0.0 }
 0x21b   :  { %v1117_v17 = vadd.f32 %v8590_v5, %v913_v16  ;;  %v1171_v21 = vmax.f32 %v1115_v11, 0.0 }
 0x21c   :  { %v1172_v20 = vmax.f32 %v1116_v15, 0.0 }
 0x21d   :  { %v1173_v23 = vmax.f32 %v1117_v17, 0.0 }
 0x21e   :  { %v8596_v24 = vpack.c.bf16 %v1172_v20, %v1170_v19  ;;  %v7827_v19 = vld [vmem:[#allocation6 + $0x2d0] ss:$12 sps:$4 sm:$0xff]  }
 0x21f   :  { %v8598_v26 = vpack.c.bf16 %v1173_v23, %v1171_v21  ;;  %v917_v22 = vpop.f32.mrb[4].mxu0 }
 0x220   :  { %v1118_v28 = vadd.f32 %v8587_v4, %v917_v22  ;;  %v919_v29 = vpop.f32.mrb[5].mxu0  ;;  %v1362_v42 = vshll.u32 %v8596_v24, 16  ;;  %v1360_v13 = vshrl.u32 %v8596_v24, 16  ;;  %v7808_v22 = vld [vmem:[#allocation6 + $0x158] ss:$12 sps:$4 sm:$0xff]  }
 0x221   :  { %v1119_v32 = vadd.f32 %v8590_v5, %v919_v29  ;;  %v921_v33 = vpop.f32.mrb[6].mxu0  ;;  %6760 = vmatprep.mubr.msk.bf16.mxu1 %vm1803_vm7, %v8598_v26  ;;  %v1374_v37 = vshll.u32 %v8598_v26, 16  ;;  %v1372_v55 = vshrl.u32 %v8598_v26, 16 }
 0x222   :  { %v1120_v34 = vadd.f32 %v8587_v4, %v921_v33  ;;  %v923_v31 = vpop.f32.mrb[7].mxu0  ;;  %2433 = vmatmul.mubr.bf16.vlgmr.msra.gmra.mrb[0].mxu1 %v8596_v24  ;;  %v1174_v40 = vmax.f32 %v1118_v28, 0.0  ;;  %v1364_v50 = vrot.slane %v1362_v42, 1 }
 0x223   :  { %v1121_v35 = vadd.f32 %v8590_v5, %v923_v31  ;;  %3118 = vmatpush1.bf16.msra.mxu1 %v7813_v27  ;;  %v1175_v12 = vmax.f32 %v1119_v32, 0.0  ;;  %v1376_v46 = vrot.slane %v1374_v37, 1  ;;  %v7832_v27 = vld [vmem:[#allocation6 + $0x2ec] ss:$12 sps:$4 sm:$0xff]  }
 0x224   :  { %v1176_v41 = vmax.f32 %v1120_v34, 0.0  ;;  %3119 = vmatprep.subr.bf16.mxu1 %v7818_v30  ;;  %v1365_v1 = vor.u32 %v1364_v50, %v1360_v13 }
 0x225   :  { %v1177_v43 = vmax.f32 %v1121_v35, 0.0  ;;  %v1377_v61 = vor.u32 %v1376_v46, %v1372_v55 }
 0x226   :  { %v8609_v44 = vpack.c.bf16 %v1176_v41, %v1174_v40  ;;  %v7830_v41 = vld [vmem:[#allocation6 + $0x2e8] ss:$12 sps:$4 sm:$0xff]  }
 0x227   :  { %v8611_v45 = vpack.c.bf16 %v1177_v43, %v1175_v12  ;;  %v927_v39 = vpop.f32.mrb[8].mxu0  ;;  %3120 = vmatpush1.bf16.msra.mxu1 %v7816_v38  ;;  %v7809_v43 = vld [vmem:[#allocation6 + $0x170] ss:$12 sps:$4 sm:$0xff]  }
 0x228   :  { %v1122_v48 = vadd.f32 %v8587_v4, %v927_v39  ;;  %v929_v49 = vpop.f32.mrb[9].mxu0  ;;  %v1367_v51 = vshll.u32 %v8609_v44, 16  ;;  %3121 = vmatprep.subr.bf16.mxu1 %v7822_v36  ;;  %v1383_v31 = vshrl.u32 %v8609_v44, 16  ;;  %v7836_v39 = vld [vmem:[#allocation6 + $0x304] ss:$12 sps:$4 sm:$0xff]  }
 0x229   :  { %v1123_v52 = vadd.f32 %v8590_v5, %v929_v49  ;;  %v931_v54 = vpop.f32.mrb[10].mxu0  ;;  %6761 = vmatprep.mubr.msk.bf16.mxu1 %vm1803_vm7, %v8611_v45  ;;  %v1379_v56 = vshll.u32 %v8611_v45, 16  ;;  %v1391_v30 = vshrl.u32 %v8611_v45, 16 }
 0x22a   :  { %v1124_v57 = vadd.f32 %v8587_v4, %v931_v54  ;;  %v933_v58 = vpop.f32.mrb[11].mxu0  ;;  %2443 = vmatmul.mubr.bf16.gmra.mrb[4].mxu1 %v8609_v44  ;;  %v1369_v59 = vrot.slane %v1367_v51, 1  ;;  %v1178_v63 = vmax.f32 %v1122_v48, 0.0 }
 0x22b   :  { %v1125_v60 = vadd.f32 %v8590_v5, %v933_v58  ;;  %v1381_v18 = vrot.slane %v1379_v56, 1  ;;  %3122 = vmatpush1.bf16.msra.mxu1 %v7820_v47  ;;  %v1179_v9 = vmax.f32 %v1123_v52, 0.0  ;;  %v7834_v52 = vld [vmem:[#allocation6 + $0x300] ss:$12 sps:$4 sm:$0xff]   ;;  %v7839_v58 = vld [vmem:[#allocation6 + $0x31c] ss:$12 sps:$4 sm:$0xff]  }
 0x22c   :  { %v1180_v25 = vmax.f32 %v1124_v57, 0.0  ;;  %3123 = vmatprep.subr.bf16.mxu1 %v7825_v53  ;;  %v8632_v15 = vsel %vm196_vm4, %v1365_v1, %v1369_v59  ;;  %v1385_v12 = vor.u32 %v1383_v31, %v1369_v59  ;;  %v7810_v57 = vld [vmem:[#allocation6 + $0x188] ss:$12 sps:$4 sm:$0xff]  }
 0x22d   :  { %v1181_v10 = vmax.f32 %v1125_v60, 0.0  ;;  %v8625_v11 = vsel %vm196_vm4, %v1377_v61, %v1381_v18  ;;  %v1393_v38 = vor.u32 %v1391_v30, %v1381_v18 }
 0x22e   :  { %v8627_v14 = vpack.c.bf16 %v1180_v25, %v1178_v63  ;;  %6693 = vmatprep.mubr.msk.bf16.mxu0 %vm1803_vm7, %v8625_v11 }
 0x22f   :  { %v8634_v16 = vpack.c.bf16 %v1181_v10, %v1179_v9  ;;  %v937_v17 = vpop.f32.mrb[12].mxu0  ;;  %1879 = vmatmul.mubr.bf16.vlgmr.msra.gmra.mrb[56].mxu0 %v8632_v15  ;;  %3124 = vmatpush1.bf16.msra.mxu1 %v7823_v62  ;;  %v7837_v9 = vld [vmem:[#allocation6 + $0x318] ss:$12 sps:$4 sm:$0xff]  }
 0x230   :  { %v1126_v20 = vadd.f32 %v8587_v4, %v937_v17  ;;  %v939_v21 = vpop.f32.mrb[13].mxu0  ;;  %2020 = vmatpush1.bf16.msra.mxu0 %v7807_v2  ;;  %v1387_v23 = vshll.u32 %v8627_v14, 16  ;;  %3125 = vmatprep.subr.bf16.mxu1 %v7829_v8  ;;  %v1399_v63 = vshrl.u32 %v8627_v14, 16 }
 0x231   :  { %v1127_v28 = vadd.f32 %v8590_v5, %v939_v21  ;;  %v941_v29 = vpop.f32.mrb[14].mxu0  ;;  %6762 = vmatprep.mubr.msk.bf16.mxu1 %vm1803_vm7, %v8634_v16  ;;  %v1395_v32 = vshll.u32 %v8634_v16, 16  ;;  %2021 = vmatprep.subr.bf16.mxu0 %v10945_v0  ;;  %v1407_v60 = vshrl.u32 %v8634_v16, 16  ;;  %v7843_v21 = vld [vmem:[#allocation6 + $0x334] ss:$12 sps:$4 sm:$0xff]  }
 0x232   :  { %v1128_v33 = vadd.f32 %v8587_v4, %v941_v29  ;;  %v943_v34 = vpop.f32.mrb[15].mxu0  ;;  %2453 = vmatmul.mubr.bf16.gmra.mrb[8].mxu1 %v8627_v14  ;;  %v1389_v35 = vrot.slane %v1387_v23, 1  ;;  %v1182_v42 = vmax.f32 %v1126_v20, 0.0  ;;  %v7811_v20 = vld [vmem:[#allocation6 + $0x1a0] ss:$12 sps:$4 sm:$0xff]  }
 0x233   :  { %v1129_v37 = vadd.f32 %v8590_v5, %v943_v34  ;;  %v1397_v40 = vrot.slane %v1395_v32, 1  ;;  %3126 = vmatpush1.bf16.msra.mxu1 %v7827_v19  ;;  %v1183_v46 = vmax.f32 %v1127_v28, 0.0 }
 0x234   :  { %v1184_v36 = vmax.f32 %v1128_v33, 0.0  ;;  %2022 = vmatpush1.bf16.msra.mxu0 %v7808_v22  ;;  %3127 = vmatprep.subr.bf16.mxu1 %v7832_v27  ;;  %v8658_v50 = vsel %vm196_vm4, %v1385_v12, %v1389_v35  ;;  %v1401_v19 = vor.u32 %v1399_v63, %v1389_v35  ;;  %v7841_v33 = vld [vmem:[#allocation6 + $0x330] ss:$12 sps:$4 sm:$0xff]  }
 0x235   :  { %v1185_v47 = vmax.f32 %v1129_v37, 0.0  ;;  %v8650_v48 = vsel %vm196_vm4, %v1393_v38, %v1397_v40  ;;  %2023 = vmatprep.subr.bf16.mxu0 %v10945_v0  ;;  %v1409_v2 = vor.u32 %v1407_v60, %v1397_v40  ;;  %v7812_v37 = vld [vmem:[#allocation6 + $0x1b8] ss:$12 sps:$4 sm:$0xff]  }
 0x236   :  { %v8653_v49 = vpack.c.bf16 %v1184_v36, %v1182_v42  ;;  %6694 = vmatprep.mubr.msk.bf16.mxu0 %vm1803_vm7, %v8650_v48  ;;  %v7846_v38 = vld [vmem:[#allocation6 + $0x34c] ss:$12 sps:$4 sm:$0xff]  }
 0x237   :  { %v8660_v51 = vpack.c.bf16 %v1185_v47, %v1183_v46  ;;  %v947_v53 = vpop.f32.mrb[16].mxu0  ;;  %1889 = vmatmul.mubr.bf16.gmra.mrb[60].mxu0 %v8658_v50  ;;  %3128 = vmatpush1.bf16.msra.mxu1 %v7830_v41 }
 0x238   :  { %v1130_v54 = vadd.f32 %v8587_v4, %v947_v53  ;;  %v949_v55 = vpop.f32.mrb[17].mxu0  ;;  %v1403_v56 = vshll.u32 %v8653_v49, 16  ;;  %2024 = vmatpush1.bf16.msra.mxu0 %v7809_v43  ;;  %3129 = vmatprep.subr.bf16.mxu1 %v7836_v39  ;;  %v1415_v39 = vshrl.u32 %v8653_v49, 16 }
 0x239   :  { %v1131_v13 = vadd.f32 %v8590_v5, %v949_v55  ;;  %v951_v59 = vpop.f32.mrb[18].mxu0  ;;  %6763 = vmatprep.mubr.msk.bf16.mxu1 %vm1803_vm7, %v8660_v51  ;;  %v1411_v61 = vshll.u32 %v8660_v51, 16  ;;  %2025 = vmatprep.subr.bf16.mxu0 %v10945_v0  ;;  %v1423_v42 = vshrl.u32 %v8660_v51, 16 }
 0x23a   :  { %v1132_v18 = vadd.f32 %v8587_v4, %v951_v59  ;;  %v953_v62 = vpop.f32.mrb[19].mxu0  ;;  %2463 = vmatmul.mubr.bf16.gmra.mrb[12].mxu1 %v8653_v49  ;;  %v1405_v25 = vrot.slane %v1403_v56, 1  ;;  %v1186_v10 = vmax.f32 %v1130_v54, 0.0  ;;  %v7844_v54 = vld [vmem:[#allocation6 + $0x348] ss:$12 sps:$4 sm:$0xff]  }
 0x23b   :  { %v1133_v1 = vadd.f32 %v8590_v5, %v953_v62  ;;  %v1413_v8 = vrot.slane %v1411_v61, 1  ;;  %3130 = vmatpush1.bf16.msra.mxu1 %v7834_v52  ;;  %v1187_v23 = vmax.f32 %v1131_v13, 0.0  ;;  %v7849_v13 = vld [vmem:[#allocation6 + $0x364] ss:$12 sps:$4 sm:$0xff]  }
 0x23c   :  { %v1188_v17 = vmax.f32 %v1132_v18, 0.0  ;;  %2026 = vmatpush1.bf16.msra.mxu0 %v7810_v57  ;;  %3131 = vmatprep.subr.bf16.mxu1 %v7839_v58  ;;  %v8684_v29 = vsel %vm196_vm4, %v1401_v19, %v1405_v25  ;;  %v1417_v57 = vor.u32 %v1415_v39, %v1405_v25  ;;  %v7819_v58 = vld [vmem:[#allocation6 + $0x1d0] ss:$12 sps:$4 sm:$0xff]  }
 0x23d   :  { %v1189_v22 = vmax.f32 %v1133_v1, 0.0  ;;  %v8676_v27 = vsel %vm196_vm4, %v1409_v2, %v1413_v8  ;;  %2027 = vmatprep.subr.bf16.mxu0 %v10945_v0  ;;  %v1425_v53 = vor.u32 %v1423_v42, %v1413_v8  ;;  %v7847_v1 = vld [vmem:[#allocation6 + $0x360] ss:$12 sps:$4 sm:$0xff]  }
 0x23e   :  { %v8679_v28 = vpack.c.bf16 %v1188_v17, %v1186_v10  ;;  %6695 = vmatprep.mubr.msk.bf16.mxu0 %vm1803_vm7, %v8676_v27  ;;  %v7826_v10 = vld [vmem:[#allocation6 + $0x1e8] ss:$12 sps:$4 sm:$0xff]  }
 0x23f   :  { %v8686_v30 = vpack.c.bf16 %v1189_v22, %v1187_v23  ;;  %v957_v32 = vpop.f32.mrb[20].mxu0  ;;  %1899 = vmatmul.mubr.bf16.gmra.mrb[64].mxu0 %v8684_v29  ;;  %3132 = vmatpush1.bf16.msra.mxu1 %v7837_v9  ;;  %v7853_v17 = vld [vmem:[#allocation6 + $0x37c] ss:$12 sps:$4 sm:$0xff]  }
 0x240   :  { %v1134_v34 = vadd.f32 %v8587_v4, %v957_v32  ;;  %v959_v31 = vpop.f32.mrb[21].mxu0  ;;  %v1419_v35 = vshll.u32 %v8679_v28, 16  ;;  %2028 = vmatpush1.bf16.msra.mxu0 %v7811_v20  ;;  %3133 = vmatprep.subr.bf16.mxu1 %v7843_v21 }
 0x241   :  { %v1135_v40 = vadd.f32 %v8590_v5, %v959_v31  ;;  %v961_v41 = vpop.f32.mrb[22].mxu0  ;;  %6764 = vmatprep.mubr.msk.bf16.mxu1 %vm1803_vm7, %v8686_v30  ;;  %v1427_v36 = vshll.u32 %v8686_v30, 16  ;;  %2029 = vmatprep.subr.bf16.mxu0 %v10945_v0  ;;  %v1439_v21 = vshrl.u32 %v8686_v30, 16 }
 0x242   :  { %v1136_v12 = vadd.f32 %v8587_v4, %v961_v41  ;;  %v963_v43 = vpop.f32.mrb[23].mxu0  ;;  %2473 = vmatmul.mubr.bf16.gmra.mrb[16].mxu1 %v8679_v28  ;;  %v1421_v46 = vrot.slane %v1419_v35, 1  ;;  %v1190_v55 = vmax.f32 %v1134_v34, 0.0 }
 0x243   :  { %v1137_v47 = vadd.f32 %v8590_v5, %v963_v43  ;;  %v1429_v52 = vrot.slane %v1427_v36, 1  ;;  %3134 = vmatpush1.bf16.msra.mxu1 %v7841_v33  ;;  %v1191_v59 = vmax.f32 %v1135_v40, 0.0  ;;  %v1431_v33 = vshrl.u32 %v8679_v28, 16  ;;  %v7833_v36 = vld [vmem:[#allocation6 + $0x200] ss:$12 sps:$4 sm:$0xff]  }
 0x244   :  { %v1192_v56 = vmax.f32 %v1136_v12, 0.0  ;;  %2030 = vmatpush1.bf16.msra.mxu0 %v7812_v37  ;;  %3135 = vmatprep.subr.bf16.mxu1 %v7846_v38  ;;  %v8710_v62 = vsel %vm196_vm4, %v1417_v57, %v1421_v46  ;;  %v7851_v38 = vld [vmem:[#allocation6 + $0x378] ss:$12 sps:$4 sm:$0xff]   ;;  %v7856_v12 = vld [vmem:[#allocation6 + $0x394] ss:$12 sps:$4 sm:$0xff]  }
 0x245   :  { %v1193_v60 = vmax.f32 %v1137_v47, 0.0  ;;  %v8702_v61 = vsel %vm196_vm4, %v1425_v53, %v1429_v52  ;;  %2031 = vmatprep.subr.bf16.mxu0 %v10945_v0  ;;  %v1441_v35 = vor.u32 %v1439_v21, %v1429_v52  ;;  %v1433_v42 = vor.u32 %v1431_v33, %v1421_v46 }
 0x246   :  { %v8705_v18 = vpack.c.bf16 %v1192_v56, %v1190_v55  ;;  %6696 = vmatprep.mubr.msk.bf16.mxu0 %vm1803_vm7, %v8702_v61  ;;  %v7854_v55 = vld [vmem:[#allocation6 + $0x390] ss:$12 sps:$4 sm:$0xff]  }
 0x247   :  { %v8712_v63 = vpack.c.bf16 %v1193_v60, %v1191_v59  ;;  %v967_v25 = vpop.f32.mrb[24].mxu0  ;;  %1909 = vmatmul.mubr.bf16.gmra.mrb[68].mxu0 %v8710_v62  ;;  %3136 = vmatpush1.bf16.msra.mxu1 %v7844_v54 }
 0x248   :  { %v1138_v2 = vadd.f32 %v8587_v4, %v967_v25  ;;  %v969_v8 = vpop.f32.mrb[25].mxu0  ;;  %v1435_v9 = vshll.u32 %v8705_v18, 16  ;;  %2032 = vmatpush1.bf16.msra.mxu0 %v7819_v58  ;;  %3137 = vmatprep.subr.bf16.mxu1 %v7849_v13  ;;  %v7840_v13 = vld [vmem:[#allocation6 + $0x218] ss:$12 sps:$4 sm:$0xff]  }
 0x249   :  { %v1139_v19 = vadd.f32 %v8590_v5, %v969_v8  ;;  %v971_v20 = vpop.f32.mrb[26].mxu0  ;;  %6765 = vmatprep.mubr.msk.bf16.mxu1 %vm1803_vm7, %v8712_v63  ;;  %v1443_v23 = vshll.u32 %v8712_v63, 16  ;;  %2033 = vmatprep.subr.bf16.mxu0 %v10945_v0  ;;  %v1455_v25 = vshrl.u32 %v8712_v63, 16 }
 0x24a   :  { %v1140_v22 = vadd.f32 %v8587_v4, %v971_v20  ;;  %v973_v32 = vpop.f32.mrb[27].mxu0  ;;  %2483 = vmatmul.mubr.bf16.gmra.mrb[20].mxu1 %v8705_v18  ;;  %v1437_v34 = vrot.slane %v1435_v9, 1  ;;  %v1194_v40 = vmax.f32 %v1138_v2, 0.0  ;;  %v1447_v9 = vshrl.u32 %v8705_v18, 16 }
 0x24b   :  { %v1141_v31 = vadd.f32 %v8590_v5, %v973_v32  ;;  %v1445_v37 = vrot.slane %v1443_v23, 1  ;;  %3138 = vmatpush1.bf16.msra.mxu1 %v7847_v1  ;;  %v1195_v43 = vmax.f32 %v1139_v19, 0.0  ;;  %v7850_v32 = vld [vmem:[#allocation6 + $0x230] ss:$12 sps:$4 sm:$0xff]  }
 0x24c   :  { %v1196_v41 = vmax.f32 %v1140_v22, 0.0  ;;  %2034 = vmatpush1.bf16.msra.mxu0 %v7826_v10  ;;  %3139 = vmatprep.subr.bf16.mxu1 %v7853_v17  ;;  %v8736_v52 = vsel %vm196_vm4, %v1433_v42, %v1437_v34  ;;  %v1449_v22 = vor.u32 %v1447_v9, %v1437_v34  ;;  %v7858_v9 = vld [vmem:[#allocation6 + $0x260] ss:$12 sps:$4 sm:$0xff]  }
 0x24d   :  { %v1197_v39 = vmax.f32 %v1141_v31, 0.0  ;;  %v8728_v47 = vsel %vm196_vm4, %v1441_v35, %v1445_v37  ;;  %2035 = vmatprep.subr.bf16.mxu0 %v10945_v0  ;;  %v1457_v19 = vor.u32 %v1455_v25, %v1445_v37 }
 0x24e   :  { %v8731_v53 = vpack.c.bf16 %v1196_v41, %v1194_v40  ;;  %6697 = vmatprep.mubr.msk.bf16.mxu0 %vm1803_vm7, %v8728_v47 }
 0x24f   :  { %v8738_v46 = vpack.c.bf16 %v1197_v39, %v1195_v43  ;;  %v977_v54 = vpop.f32.mrb[28].mxu0  ;;  %1919 = vmatmul.mubr.bf16.gmra.mrb[72].mxu0 %v8736_v52  ;;  %3140 = vmatpush1.bf16.msra.mxu1 %v7851_v38 }
 0x250   :  { %v1142_v56 = vadd.f32 %v8587_v4, %v977_v54  ;;  %v979_v57 = vpop.f32.mrb[29].mxu0  ;;  %v1451_v58 = vshll.u32 %v8731_v53, 16  ;;  %2036 = vmatpush1.bf16.msra.mxu0 %v7833_v36  ;;  %3141 = vmatprep.subr.bf16.mxu1 %v7856_v12  ;;  %v7857_v12 = vld [vmem:[#allocation6 + $0x248] ss:$12 sps:$4 sm:$0xff]  }
 0x251   :  { %v1143_v59 = vadd.f32 %v8590_v5, %v979_v57  ;;  %v981_v60 = vpop.f32.mrb[30].mxu0  ;;  %6766 = vmatprep.mubr.msk.bf16.mxu1 %vm1803_vm7, %v8738_v46  ;;  %v1459_v1 = vshll.u32 %v8738_v46, 16  ;;  %2037 = vmatprep.subr.bf16.mxu0 %v10945_v0  ;;  %v1471_v54 = vshrl.u32 %v8738_v46, 16 }
 0x252   :  { %v1144_v2 = vadd.f32 %v8587_v4, %v981_v60  ;;  %v983_v8 = vpop.f32.mrb[31].mxu0  ;;  %2493 = vmatmul.mubr.bf16.gmra.mrb[24].mxu1 %v8731_v53  ;;  %v1453_v10 = vrot.slane %v1451_v58, 1  ;;  %v1198_v21 = vmax.f32 %v1142_v56, 0.0  ;;  %v1463_v58 = vshrl.u32 %v8731_v53, 16 }
 0x253   :  { %v1145_v17 = vadd.f32 %v8590_v5, %v983_v8  ;;  %v1461_v20 = vrot.slane %v1459_v1, 1  ;;  %3142 = vmatpush1.bf16.msra.mxu1 %v7854_v55  ;;  %v1199_v33 = vmax.f32 %v1143_v59, 0.0 }
 0x254   :  { %v1200_v23 = vmax.f32 %v1144_v2, 0.0  ;;  %2038 = vmatpush1.bf16.msra.mxu0 %v7840_v13  ;;  %v8762_v37 = vsel %vm196_vm4, %v1449_v22, %v1453_v10  ;;  %v1465_v8 = vor.u32 %v1463_v58, %v1453_v10 }
 0x255   :  { %v1201_v31 = vmax.f32 %v1145_v17, 0.0  ;;  %v8754_v35 = vsel %vm196_vm4, %v1457_v19, %v1461_v20  ;;  %2039 = vmatprep.subr.bf16.mxu0 %v10945_v0  ;;  %v1473_v60 = vor.u32 %v1471_v54, %v1461_v20 }
 0x256   :  { %v8757_v38 = vpack.c.bf16 %v1200_v23, %v1198_v21  ;;  %6698 = vmatprep.mubr.msk.bf16.mxu0 %vm1803_vm7, %v8754_v35 }
 0x257   :  { %v8764_v40 = vpack.c.bf16 %v1201_v31, %v1199_v33  ;;  %v987_v34 = vpop.f32.mrb[32].mxu0  ;;  %1929 = vmatmul.mubr.bf16.gmra.mrb[76].mxu0 %v8762_v37 }
 0x258   :  { %v1146_v41 = vadd.f32 %v8587_v4, %v987_v34  ;;  %v989_v42 = vpop.f32.mrb[33].mxu0  ;;  %v1467_v36 = vshll.u32 %v8757_v38, 16  ;;  %2040 = vmatpush1.bf16.msra.mxu0 %v7850_v32 }
 0x259   :  { %v1147_v43 = vadd.f32 %v8590_v5, %v989_v42  ;;  %v991_v39 = vpop.f32.mrb[34].mxu0  ;;  %6767 = vmatprep.mubr.msk.bf16.mxu1 %vm1803_vm7, %v8764_v40  ;;  %v1475_v55 = vshll.u32 %v8764_v40, 16  ;;  %2041 = vmatprep.subr.bf16.mxu0 %v10945_v0  ;;  %v1487_v42 = vshrl.u32 %v8764_v40, 16 }
 0x25a   :  { %v1148_v56 = vadd.f32 %v8587_v4, %v991_v39  ;;  %v993_v57 = vpop.f32.mrb[35].mxu0  ;;  %2503 = vmatmul.mubr.bf16.gmra.mrb[28].mxu1 %v8757_v38  ;;  %v1469_v13 = vrot.slane %v1467_v36, 1  ;;  %v1202_v1 = vmax.f32 %v1146_v41, 0.0  ;;  %v1479_v39 = vshrl.u32 %v8757_v38, 16 }
 0x25b   :  { %v1149_v59 = vadd.f32 %v8590_v5, %v993_v57  ;;  %v1477_v25 = vrot.slane %v1475_v55, 1  ;;  %v1203_v17 = vmax.f32 %v1147_v43, 0.0 }
 0x25c   :  { %v1204_v2 = vmax.f32 %v1148_v56, 0.0  ;;  %2042 = vmatpush1.bf16.msra.mxu0 %v7857_v12  ;;  %v8788_v20 = vsel %vm196_vm4, %v1465_v8, %v1469_v13 }
 0x25d   :  { %v1205_v19 = vmax.f32 %v1149_v59, 0.0  ;;  %v8780_v21 = vsel %vm196_vm4, %v1473_v60, %v1477_v25  ;;  %2043 = vmatprep.subr.bf16.mxu0 %v10945_v0  ;;  %v1489_v56 = vor.u32 %v1487_v42, %v1477_v25  ;;  %v1481_v60 = vor.u32 %v1479_v39, %v1469_v13 }
 0x25e   :  { %v8783_v23 = vpack.c.bf16 %v1204_v2, %v1202_v1  ;;  %6699 = vmatprep.mubr.msk.bf16.mxu0 %vm1803_vm7, %v8780_v21 }
 0x25f   :  { %v8790_v22 = vpack.c.bf16 %v1205_v19, %v1203_v17  ;;  %v997_v10 = vpop.f32.mrb[36].mxu0  ;;  %1939 = vmatmul.mubr.bf16.gmra.mrb[80].mxu0 %v8788_v20 }
 0x260   :  { %v1150_v32 = vadd.f32 %v8587_v4, %v997_v10  ;;  %v999_v33 = vpop.f32.mrb[37].mxu0  ;;  %v1483_v31 = vshll.u32 %v8783_v23, 16  ;;  %2044 = vmatpush1.bf16.msra.mxu0 %v7858_v9 }
 0x261   :  { %v1151_v34 = vadd.f32 %v8590_v5, %v999_v33  ;;  %v1001_v41 = vpop.f32.mrb[38].mxu0  ;;  %6768 = vmatprep.mubr.msk.bf16.mxu1 %vm1803_vm7, %v8790_v22  ;;  %v1491_v36 = vshll.u32 %v8790_v22, 16  ;;  %2573 = vmatprep.subr.bf16.mxu0 %v10945_v0 }
 0x262   :  { %v1152_v12 = vadd.f32 %v8587_v4, %v1001_v41  ;;  %v1003_v43 = vpop.f32.mrb[39].mxu0  ;;  %2513 = vmatmul.mubr.bf16.gmra.mrb[32].mxu1 %v8783_v23  ;;  %v1485_v54 = vrot.slane %v1483_v31, 1  ;;  %v1206_v58 = vmax.f32 %v1150_v32, 0.0 }
 0x263   :  { %v1153_v55 = vadd.f32 %v8590_v5, %v1003_v43  ;;  %v1493_v57 = vrot.slane %v1491_v36, 1  ;;  %v1207_v1 = vmax.f32 %v1151_v34, 0.0  ;;  %v1503_v34 = vshrl.u32 %v8790_v22, 16 }
 0x264   :  { %v1208_v59 = vmax.f32 %v1152_v12, 0.0  ;;  %v8813_v17 = vsel %vm196_vm4, %v1481_v60, %v1485_v54  ;;  %v1495_v12 = vshrl.u32 %v8783_v23, 16 }
 0x265   :  { %v1209_v2 = vmax.f32 %v1153_v55, 0.0  ;;  %v8806_v8 = vsel %vm196_vm4, %v1489_v56, %v1493_v57  ;;  %11031 = vst [vmem:[#allocation16_spill] sm:$0xff] %v8813_v17  ;;  %v1505_v55 = vor.u32 %v1503_v34, %v1493_v57 }
 0x266   :  { %v8808_v9 = vpack.c.bf16 %v1208_v59, %v1206_v58  ;;  %6700 = vmatprep.mubr.msk.bf16.mxu0 %vm1803_vm7, %v8806_v8  ;;  %v1497_v60 = vor.u32 %v1495_v12, %v1485_v54 }
 0x267   :  { %v8815_v19 = vpack.c.bf16 %v1209_v2, %v1207_v1  ;;  %v1007_v25 = vpop.f32.mrb[40].mxu0  ;;  %1949 = vmatmul.mubr.bf16.gmra.mrb[84].mxu0 %v8813_v17 }
 0x268   :  { %v1154_v13 = vadd.f32 %v8587_v4, %v1007_v25  ;;  %v1009_v10 = vpop.f32.mrb[41].mxu0  ;;  %v1499_v32 = vshll.u32 %v8808_v9, 16 }
 0x269   :  { %v1155_v33 = vadd.f32 %v8590_v5, %v1009_v10  ;;  %v1011_v31 = vpop.f32.mrb[42].mxu0  ;;  %6769 = vmatprep.mubr.msk.bf16.mxu1 %vm1803_vm7, %v8815_v19  ;;  %v1507_v41 = vshll.u32 %v8815_v19, 16 }
 0x26a   :  { %v1156_v42 = vadd.f32 %v8587_v4, %v1011_v31  ;;  %v1013_v36 = vpop.f32.mrb[43].mxu0  ;;  %2523 = vmatmul.mubr.bf16.gmra.mrb[36].mxu1 %v8808_v9  ;;  %v1501_v43 = vrot.slane %v1499_v32, 1  ;;  %v1210_v58 = vmax.f32 %v1154_v13, 0.0 }
 0x26b   :  { %v1157_v39 = vadd.f32 %v8590_v5, %v1013_v36  ;;  %v1509_v56 = vrot.slane %v1507_v41, 1  ;;  %v1211_v1 = vmax.f32 %v1155_v33, 0.0 }
 0x26c   :  { %v1212_v59 = vmax.f32 %v1156_v42, 0.0  ;;  %v8837_v31 = vsel %vm196_vm4, %v1497_v60, %v1501_v43  ;;  %v1519_v42 = vshrl.u32 %v8815_v19, 16 }
 0x26d   :  { %v1213_v2 = vmax.f32 %v1157_v39, 0.0  ;;  %v8830_v25 = vsel %vm196_vm4, %v1505_v55, %v1509_v56  ;;  %11033 = vst [vmem:[#allocation18_spill] sm:$0xff] %v8837_v31  ;;  %v1511_v55 = vshrl.u32 %v8808_v9, 16 }
 0x26e   :  { %11032 = vst [vmem:[#allocation17_spill] sm:$0xff] %v8830_v25  ;;  %v8832_v10 = vpack.c.bf16 %v1212_v59, %v1210_v58  ;;  %6701 = vmatprep.mubr.msk.bf16.mxu0 %vm1803_vm7, %v8830_v25  ;;  %v1521_v60 = vor.u32 %v1519_v42, %v1509_v56 }
 0x26f   :  { %v8839_v32 = vpack.c.bf16 %v1213_v2, %v1211_v1  ;;  %v1017_v57 = vpop.f32.mrb[44].mxu0  ;;  %1959 = vmatmul.mubr.bf16.gmra.mrb[88].mxu0 %v8837_v31 }
 0x270   :  { %v1158_v54 = vadd.f32 %v8587_v4, %v1017_v57  ;;  %v1019_v13 = vpop.f32.mrb[45].mxu0  ;;  %v1515_v33 = vshll.u32 %v8832_v10, 16 }
 0x271   :  { %v1159_v34 = vadd.f32 %v8590_v5, %v1019_v13  ;;  %v1021_v41 = vpop.f32.mrb[46].mxu0  ;;  %6770 = vmatprep.mubr.msk.bf16.mxu1 %vm1803_vm7, %v8839_v32  ;;  %v1523_v36 = vshll.u32 %v8839_v32, 16  ;;  %v1513_v13 = vor.u32 %v1511_v55, %v1501_v43  ;;  %v1527_v55 = vshrl.u32 %v8832_v10, 16 }
 0x272   :  { %v1160_v12 = vadd.f32 %v8587_v4, %v1021_v41  ;;  %v1023_v39 = vpop.f32.mrb[47].mxu0  ;;  %2533 = vmatmul.mubr.bf16.gmra.mrb[40].mxu1 %v8832_v10  ;;  %v1517_v58 = vrot.slane %v1515_v33, 1  ;;  %v1214_v2 = vmax.f32 %v1158_v54, 0.0 }
 0x273   :  { %v1161_v59 = vadd.f32 %v8590_v5, %v1023_v39  ;;  %v1525_v1 = vrot.slane %v1523_v36, 1  ;;  %v1215_v0 = vmax.f32 %v1159_v34, 0.0 }
 0x274   :  { %v1216_v57 = vmax.f32 %v1160_v12, 0.0  ;;  %v8861_v41 = vsel %vm196_vm4, %v1513_v13, %v1517_v58  ;;  %v1535_v12 = vshrl.u32 %v8839_v32, 16 }
 0x275   :  { %v1217_v6 = vmax.f32 %v1161_v59, 0.0  ;;  %v8854_v3 = vsel %vm196_vm4, %v1521_v60, %v1525_v1  ;;  %11035 = vst [vmem:[#allocation20_spill] sm:$0xff] %v8861_v41 }
 0x276   :  { %11034 = vst [vmem:[#allocation19_spill] sm:$0xff] %v8854_v3  ;;  %v8856_v7 = vpack.c.bf16 %v1216_v57, %v1214_v2  ;;  %6702 = vmatprep.mubr.msk.bf16.mxu0 %vm1803_vm7, %v8854_v3  ;;  %v1537_v2 = vor.u32 %v1535_v12, %v1525_v1 }
 0x277   :  { %v8863_v33 = vpack.c.bf16 %v1217_v6, %v1215_v0  ;;  %v1027_v56 = vpop.f32.mrb[48].mxu0  ;;  %1969 = vmatmul.mubr.bf16.gmra.mrb[92].mxu0 %v8861_v41 }
 0x278   :  { %v1162_v43 = vadd.f32 %v8587_v4, %v1027_v56  ;;  %v1029_v54 = vpop.f32.mrb[49].mxu0  ;;  %v1531_v34 = vshll.u32 %v8856_v7, 16 }
 0x279   :  { %11036 = vst [vmem:[#allocation21_spill] sm:$0xff] %v8863_v33  ;;  %v1163_v42 = vadd.f32 %v8590_v5, %v1029_v54  ;;  %v1031_v36 = vpop.f32.mrb[50].mxu0  ;;  %6771 = vmatprep.mubr.msk.bf16.mxu1 %vm1803_vm7, %v8863_v33  ;;  %v1539_v39 = vshll.u32 %v8863_v33, 16  ;;  %v1529_v54 = vor.u32 %v1527_v55, %v1517_v58  ;;  %v1543_v55 = vshrl.u32 %v8856_v7, 16 }
 0x27a   :  { %v1164_v0 = vadd.f32 %v8587_v4, %v1031_v36  ;;  %v1033_v6 = vpop.f32.mrb[51].mxu0  ;;  %2543 = vmatmul.mubr.bf16.gmra.mrb[44].mxu1 %v8856_v7  ;;  %v1533_v59 = vrot.slane %v1531_v34, 1  ;;  %v1218_v13 = vmax.f32 %v1162_v43, 0.0 }
 0x27b   :  { %v1165_v60 = vadd.f32 %v8590_v5, %v1033_v6  ;;  %v1541_v57 = vrot.slane %v1539_v39, 1  ;;  %v1219_v41 = vmax.f32 %v1163_v42, 0.0 }
 0x27c   :  { %v1220_v56 = vmax.f32 %v1164_v0, 0.0  ;;  %v8885_v36 = vsel %vm196_vm4, %v1529_v54, %v1533_v59  ;;  %v1551_v0 = vshrl.u32 %v8863_v33, 16 }
 0x27d   :  { %v1221_v3 = vmax.f32 %v1165_v60, 0.0  ;;  %v8878_v31 = vsel %vm196_vm4, %v1537_v2, %v1541_v57  ;;  %11038 = vst [vmem:[#allocation23_spill] sm:$0xff] %v8885_v36 }
 0x27e   :  { %11037 = vst [vmem:[#allocation22_spill] sm:$0xff] %v8878_v31  ;;  %v8880_v25 = vpack.c.bf16 %v1220_v56, %v1218_v13  ;;  %6703 = vmatprep.mubr.msk.bf16.mxu0 %vm1803_vm7, %v8878_v31  ;;  %v1553_v13 = vor.u32 %v1551_v0, %v1541_v57 }
 0x27f   :  { %v8887_v34 = vpack.c.bf16 %v1221_v3, %v1219_v41  ;;  %v1037_v1 = vpop.f32.mrb[52].mxu0  ;;  %1979 = vmatmul.mubr.bf16.gmra.mrb[96].mxu0 %v8885_v36 }
 0x280   :  { %v1166_v58 = vadd.f32 %v8587_v4, %v1037_v1  ;;  %v1039_v43 = vpop.f32.mrb[53].mxu0  ;;  %v1547_v42 = vshll.u32 %v8880_v25, 16 }
 0x281   :  { %v1167_v12 = vadd.f32 %v8590_v5, %v1039_v43  ;;  %v1041_v39 = vpop.f32.mrb[54].mxu0  ;;  %6772 = vmatprep.mubr.msk.bf16.mxu1 %vm1803_vm7, %v8887_v34  ;;  %v1555_v6 = vshll.u32 %v8887_v34, 16  ;;  %v1545_v43 = vor.u32 %v1543_v55, %v1533_v59  ;;  %v2802_v59 = vrot.slane %v8598_v26, 1 }
 0x282   :  { %v1168_v3 = vadd.f32 %v8587_v4, %v1041_v39  ;;  %v1043_v41 = vpop.f32.mrb[55].mxu0  ;;  %2553 = vmatmul.mubr.bf16.gmra.mrb[48].mxu1 %v8880_v25  ;;  %v1549_v60 = vrot.slane %v1547_v42, 1  ;;  %v1222_v54 = vmax.f32 %v1166_v58, 0.0  ;;  %v1567_v42 = vshrl.u32 %v8887_v34, 16 }
 0x283   :  { %v1169_v2 = vadd.f32 %v8590_v5, %v1043_v41  ;;  %v1557_v56 = vrot.slane %v1555_v6, 1  ;;  %v1223_v36 = vmax.f32 %v1167_v12, 0.0  ;;  %v2803_v5 = vrot.slane %v8611_v45, 1 }
 0x284   :  { %v1224_v1 = vmax.f32 %v1168_v3, 0.0  ;;  %v8909_v4 = vsel %vm196_vm4, %v1545_v43, %v1549_v60 }
 0x285   :  { %v1225_v31 = vmax.f32 %v1169_v2, 0.0  ;;  %v8902_v17 = vsel %vm196_vm4, %v1553_v13, %v1557_v56  ;;  %v8923_v39 = vsel %vm779_vm6, %v2802_v59, %v2803_v5  ;;  %v1569_v0 = vor.u32 %v1567_v42, %v1557_v56 }
 0x286   :  { %v8904_v33 = vpack.c.bf16 %v1224_v1, %v1222_v54  ;;  %6704 = vmatprep.mubr.msk.bf16.mxu0 %vm1803_vm7, %v8902_v17  ;;  %v2800_v13 = vrot.slane %v8609_v44, 1  ;;  %v2807_v1 = vrot.slane %v8634_v16, 1  ;;  %v2799_v56 = vrot.slane %v8596_v24, 1 }
 0x287   :  { %v8912_v57 = vpack.c.bf16 %v1225_v31, %v1223_v36  ;;  %1989 = vmatmul.mubr.bf16.gmra.mrb[100].mxu0 %v8909_v4  ;;  %v1559_v31 = vshrl.u32 %v8880_v25, 16  ;;  %v2805_v42 = vrot.slane %v8627_v14, 1 }
 0x288   :  { %v1563_v58 = vshll.u32 %v8904_v33, 16  ;;  %v8950_v43 = vsel %vm779_vm6, %v2803_v5, %v2807_v1  ;;  %v1575_v59 = vshrl.u32 %v8904_v33, 16 }
 0x289   :  { %6773 = vmatprep.mubr.msk.bf16.mxu1 %vm1803_vm7, %v8912_v57  ;;  %v1571_v12 = vshll.u32 %v8912_v57, 16  ;;  %v1578_v3 = vshrl.u32 %v8912_v57, 16  ;;  %v1561_v41 = vor.u32 %v1559_v31, %v1549_v60  ;;  %v8946_v60 = vsel %vm779_vm6, %v2799_v56, %v2800_v13  ;;  %v7862_v56 = vld [vmem:[#allocation6 + $0x50] ss:$12 sps:$4 sm:$0xff]  }
 0x28a   :  { %2563 = vmatmul.mubr.bf16.gmra.mrb[52].mxu1 %v8904_v33  ;;  %v1565_v36 = vrot.slane %v1563_v58, 1  ;;  %v8963_v31 = vsel %vm779_vm6, %v2800_v13, %v2805_v42 }
 0x28b   :  { %6827 = vmatprep.mubr.msk.bf16.mxu1 %vm1803_vm7, %v8923_v39  ;;  %v1573_v6 = vrot.slane %v1571_v12, 1  ;;  %v2811_v12 = vrot.slane %v8660_v51, 1 }
 0x28c   :  { %v8938_v54 = vsel %vm196_vm4, %v1561_v41, %v1565_v36  ;;  %v8955_v58 = vor.u32 %v1575_v59, %v1565_v36  ;;  %v7859_v36 = vld [vmem:[#allocation6 + $0x8] ss:$12 sps:$4 sm:$0xff]   ;;  %v11040_v41 = vmov 0  }
 0x28d   :  { %v8930_v55 = vsel %vm196_vm4, %v1569_v0, %v1573_v6  ;;  %v8932_v2 = vor.u32 %v1578_v3, %v1573_v6  ;;  %v8967_v5 = vsel %vm779_vm6, %v2807_v1, %v2811_v12  ;;  %v2809_v0 = vrot.slane %v8653_v49, 1 }
 0x28e   :  { %6705 = vmatprep.mubr.msk.bf16.mxu0 %vm1803_vm7, %v8930_v55  ;;  %v2815_v6 = vrot.slane %v8686_v30, 1  ;;  %v2813_v1 = vrot.slane %v8679_v28, 1 }
 0x28f   :  { %1999 = vmatmul.mubr.bf16.gmra.mrb[104].mxu0 %v8938_v54  ;;  %v8977_v3 = vsel %vm779_vm6, %v2805_v42, %v2809_v0 }
 0x290   :  { %6706 = vmatprep.mubr.msk.bf16.mxu0 %vm1803_vm7, %v8932_v2  ;;  %11039 = vst [vmem:[#allocation24_spill] sm:$0xff] %v8977_v3  ;;  %v8982_v13 = vsel %vm779_vm6, %v2811_v12, %v2815_v6  ;;  %v8993_v59 = vsel %vm779_vm6, %v2809_v0, %v2813_v1  ;;  %v2817_v12 = vrot.slane %v8705_v18, 1 }
 0x291   :  { %11041 = vst [vmem:[#allocation25_spill] sm:$0xff] %v8982_v13  ;;  %11042 = vst [vmem:[#allocation26_spill] sm:$0xff] %v8993_v59 }
 0x292   :  { %3150 = vmatmul.mubr.bf16.vlgmr.msra.gmra.mrb[0].mxu1 %v8946_v60  ;;  %v9009_v0 = vsel %vm779_vm6, %v2813_v1, %v2817_v12 }
 0x293   :  { %6828 = vmatprep.mubr.msk.bf16.mxu1 %vm1803_vm7, %v8950_v43  ;;  %11044 = vst [vmem:[#allocation28_spill] sm:$0xff] %v9009_v0 }
 0x297   :  { %2009 = vmatmul.mubr.bf16.gmra.mrb[108].mxu0 %v8955_v58 }
 0x298   :  { %6707 = vmatprep.mubr.msk.bf16.mxu0 %vm1803_vm7, %v8625_v11  ;;  %v7860_v11 = vld [vmem:[#allocation6 + $0x20] ss:$12 sps:$4 sm:$0xff]  }
 0x29a   :  { %3160 = vmatmul.mubr.bf16.gmra.mrb[4].mxu1 %v8963_v31 }
 0x29b   :  { %6829 = vmatprep.mubr.msk.bf16.mxu1 %vm1803_vm7, %v8967_v5 }
 0x29f   :  { %2052 = vmatmul.mubr.bf16.vlgmr.msra.gmra.mrb[112].mxu0 %v8632_v15  ;;  %v7861_v15 = vld [vmem:[#allocation6 + $0x38] ss:$12 sps:$4 sm:$0xff]  }
 0x2a0   :  { %6708 = vmatprep.mubr.msk.bf16.mxu0 %vm1803_vm7, %v8650_v48  ;;  %2574 = vmatpush1.bf16.msra.mxu0 %v7859_v36  ;;  %v2819_v48 = vrot.slane %v8712_v63, 1  ;;  %v7864_v36 = vld [vmem:[#allocation6 + $0x80] ss:$12 sps:$4 sm:$0xff]  }
 0x2a1   :  { %2575 = vmatprep.subr.bf16.mxu0 %v11040_v41 }
 0x2a2   :  { %3170 = vmatmul.mubr.bf16.gmra.mrb[8].mxu1 %v8977_v3  ;;  %v8998_v42 = vsel %vm779_vm6, %v2815_v6, %v2819_v48  ;;  %v9322_v3 = vld [vmem:[%s10942_s5 + $0x200] ss:$8 sps:$4 sm:$0xff]  }
 0x2a3   :  { %6830 = vmatprep.mubr.msk.bf16.mxu1 %vm1803_vm7, %v8982_v13  ;;  %11043 = vst [vmem:[#allocation27_spill] sm:$0xff] %v8998_v42  ;;  %v9317_v13 = vld [vmem:[%s10942_s5 + $0x204] ss:$8 sps:$4 sm:$0xff]   ;;  %11079 = vst [vmem:[#allocation47_spill] sm:$0xff] %v9322_v3 }
 0x2a4   :  { %2576 = vmatpush1.bf16.msra.mxu0 %v7860_v11  ;;  %v2821_v11 = vrot.slane %v8731_v53, 1  ;;  %11078 = vst [vmem:[#allocation46_spill] sm:$0xff] %v9317_v13 }
 0x2a5   :  { %2577 = vmatprep.subr.bf16.mxu0 %v11040_v41 }
 0x2a6   :  { %v9025_v1 = vsel %vm779_vm6, %v2817_v12, %v2821_v11 }
 0x2a7   :  { %2060 = vmatmul.mubr.bf16.gmra.mrb[116].mxu0 %v8658_v50  ;;  %v7863_v50 = vld [vmem:[#allocation6 + $0x68] ss:$12 sps:$4 sm:$0xff]   ;;  %11046 = vst [vmem:[#allocation30_spill] sm:$0xff] %v9025_v1 }
 0x2a8   :  { %6709 = vmatprep.mubr.msk.bf16.mxu0 %vm1803_vm7, %v8676_v27  ;;  %2578 = vmatpush1.bf16.msra.mxu0 %v7861_v15  ;;  %v2823_v27 = vrot.slane %v8738_v46, 1  ;;  %v7866_v15 = vld [vmem:[#allocation6 + $0xb0] ss:$12 sps:$4 sm:$0xff]  }
 0x2a9   :  { %2579 = vmatprep.subr.bf16.mxu0 %v11040_v41 }
 0x2aa   :  { %3180 = vmatmul.mubr.bf16.gmra.mrb[12].mxu1 %v8993_v59  ;;  %v9014_v6 = vsel %vm779_vm6, %v2819_v48, %v2823_v27  ;;  %v9280_v59 = vld [vmem:[%s10942_s5 + $0x1e4] ss:$8 sps:$4 sm:$0xff]  }
 0x2ab   :  { %6831 = vmatprep.mubr.msk.bf16.mxu1 %vm1803_vm7, %v8998_v42  ;;  %11045 = vst [vmem:[#allocation29_spill] sm:$0xff] %v9014_v6  ;;  %11074 = vst [vmem:[#allocation42_spill] sm:$0xff] %v9280_v59 }
 0x2ac   :  { %2580 = vmatpush1.bf16.msra.mxu0 %v7862_v56  ;;  %v2825_v56 = vrot.slane %v8757_v38, 1 }
 0x2ad   :  { %2581 = vmatprep.subr.bf16.mxu0 %v11040_v41 }
 0x2ae   :  { %v9041_v12 = vsel %vm779_vm6, %v2821_v11, %v2825_v56 }
 0x2af   :  { %2068 = vmatmul.mubr.bf16.gmra.mrb[120].mxu0 %v8684_v29  ;;  %v7865_v29 = vld [vmem:[#allocation6 + $0x98] ss:$12 sps:$4 sm:$0xff]   ;;  %11048 = vst [vmem:[#allocation32_spill] sm:$0xff] %v9041_v12 }
 0x2b0   :  { %6710 = vmatprep.mubr.msk.bf16.mxu0 %vm1803_vm7, %v8702_v61  ;;  %2582 = vmatpush1.bf16.msra.mxu0 %v7863_v50  ;;  %v2827_v61 = vrot.slane %v8764_v40, 1  ;;  %v7868_v50 = vld [vmem:[#allocation6 + $0xe0] ss:$12 sps:$4 sm:$0xff]  }
 0x2b1   :  { %2583 = vmatprep.subr.bf16.mxu0 %v11040_v41 }
 0x2b2   :  { %3190 = vmatmul.mubr.bf16.gmra.mrb[16].mxu1 %v9009_v0  ;;  %v9030_v48 = vsel %vm779_vm6, %v2823_v27, %v2827_v61 }
 0x2b3   :  { %6832 = vmatprep.mubr.msk.bf16.mxu1 %vm1803_vm7, %v9014_v6  ;;  %11047 = vst [vmem:[#allocation31_spill] sm:$0xff] %v9030_v48 }
 0x2b4   :  { %2584 = vmatpush1.bf16.msra.mxu0 %v7864_v36  ;;  %v2829_v36 = vrot.slane %v8783_v23, 1 }
 0x2b5   :  { %2585 = vmatprep.subr.bf16.mxu0 %v11040_v41 }
 0x2b6   :  { %v9057_v11 = vsel %vm779_vm6, %v2825_v56, %v2829_v36 }
 0x2b7   :  { %2076 = vmatmul.mubr.bf16.gmra.mrb[124].mxu0 %v8710_v62  ;;  %v7867_v62 = vld [vmem:[#allocation6 + $0xc8] ss:$12 sps:$4 sm:$0xff]   ;;  %11050 = vst [vmem:[#allocation34_spill] sm:$0xff] %v9057_v11 }
 0x2b8   :  { %6711 = vmatprep.mubr.msk.bf16.mxu0 %vm1803_vm7, %v8728_v47  ;;  %2586 = vmatpush1.bf16.msra.mxu0 %v7865_v29  ;;  %v2831_v47 = vrot.slane %v8790_v22, 1  ;;  %v7870_v29 = vld [vmem:[#allocation6 + $0x110] ss:$12 sps:$4 sm:$0xff]  }
 0x2b9   :  { %2587 = vmatprep.subr.bf16.mxu0 %v11040_v41 }
 0x2ba   :  { %3200 = vmatmul.mubr.bf16.gmra.mrb[20].mxu1 %v9025_v1  ;;  %v9046_v27 = vsel %vm779_vm6, %v2827_v61, %v2831_v47  ;;  %v9259_v1 = vld [vmem:[%s10942_s5 + $0x1d4] ss:$8 sps:$4 sm:$0xff]  }
 0x2bb   :  { %6833 = vmatprep.mubr.msk.bf16.mxu1 %vm1803_vm7, %v9030_v48  ;;  %11049 = vst [vmem:[#allocation33_spill] sm:$0xff] %v9046_v27  ;;  %v9248_v48 = vld [vmem:[%s10942_s5 + $0x1c0] ss:$8 sps:$4 sm:$0xff]   ;;  %11072 = vst [vmem:[#allocation40_spill] sm:$0xff] %v9259_v1 }
 0x2bc   :  { %2588 = vmatpush1.bf16.msra.mxu0 %v7866_v15  ;;  %v2833_v15 = vrot.slane %v8808_v9, 1  ;;  %11071 = vst [vmem:[#allocation39_spill] sm:$0xff] %v9248_v48 }
 0x2bd   :  { %2589 = vmatprep.subr.bf16.mxu0 %v11040_v41 }
 0x2bf   :  { %2084 = vmatmul.mubr.bf16.gmra.mrb[128].mxu0 %v8736_v52  ;;  %v7869_v52 = vld [vmem:[#allocation6 + $0xf8] ss:$12 sps:$4 sm:$0xff]  }
 0x2c0   :  { %6712 = vmatprep.mubr.msk.bf16.mxu0 %vm1803_vm7, %v8754_v35  ;;  %2590 = vmatpush1.bf16.msra.mxu0 %v7867_v62  ;;  %v2835_v35 = vrot.slane %v8815_v19, 1  ;;  %v9073_v62 = vsel %vm779_vm6, %v2829_v36, %v2833_v15 }
 0x2c1   :  { %2591 = vmatprep.subr.bf16.mxu0 %v11040_v41  ;;  %11052 = vst [vmem:[#allocation36_spill] sm:$0xff] %v9073_v62 }
 0x2c2   :  { %3210 = vmatmul.mubr.bf16.gmra.mrb[24].mxu1 %v9041_v12  ;;  %v9062_v61 = vsel %vm779_vm6, %v2831_v47, %v2835_v35  ;;  %v2837_v47 = vrot.slane %v8832_v10, 1  ;;  %v9243_v12 = vld [vmem:[%s10942_s5 + $0x1c4] ss:$8 sps:$4 sm:$0xff]  }
 0x2c3   :  { %6834 = vmatprep.mubr.msk.bf16.mxu1 %vm1803_vm7, %v9046_v27  ;;  %11051 = vst [vmem:[#allocation35_spill] sm:$0xff] %v9062_v61 }
 0x2c4   :  { %2592 = vmatpush1.bf16.msra.mxu0 %v7868_v50  ;;  %v9088_v36 = vsel %vm779_vm6, %v2833_v15, %v2837_v47 }
 0x2c5   :  { %2593 = vmatprep.subr.bf16.mxu0 %v11040_v41 }
 0x2c7   :  { %2092 = vmatmul.mubr.bf16.gmra.mrb[132].mxu0 %v8762_v37  ;;  %v7871_v37 = vld [vmem:[#allocation6 + $0x128] ss:$12 sps:$4 sm:$0xff]  }
 0x2c8   :  { %6713 = vmatprep.mubr.msk.bf16.mxu0 %vm1803_vm7, %v8780_v21  ;;  %2594 = vmatpush1.bf16.msra.mxu0 %v7869_v52  ;;  %v2839_v21 = vrot.slane %v8839_v32, 1  ;;  %v11055_v52 = vld [vmem:[#allocation16_spill] sm:$0xff] }
 0x2c9   :  { %2595 = vmatprep.subr.bf16.mxu0 %v11040_v41 }
 0x2ca   :  { %3220 = vmatmul.mubr.bf16.gmra.mrb[28].mxu1 %v9057_v11  ;;  %v9078_v56 = vsel %vm779_vm6, %v2835_v35, %v2839_v21 }
 0x2cb   :  { %6835 = vmatprep.mubr.msk.bf16.mxu1 %vm1803_vm7, %v9062_v61  ;;  %11053 = vst [vmem:[#allocation37_spill] sm:$0xff] %v9078_v56 }
 0x2cc   :  { %2596 = vmatpush1.bf16.msra.mxu0 %v7870_v29  ;;  %v2841_v29 = vrot.slane %v8856_v7, 1 }
 0x2cd   :  { %2597 = vmatprep.subr.bf16.mxu0 %v11040_v41 }
 0x2ce   :  { %v9102_v15 = vsel %vm779_vm6, %v2837_v47, %v2841_v29 }
 0x2cf   :  { %2100 = vmatmul.mubr.bf16.gmra.mrb[136].mxu0 %v8788_v20  ;;  %v11054_v20 = vld [vmem:[#allocation21_spill] sm:$0xff] }
 0x2d0   :  { %6714 = vmatprep.mubr.msk.bf16.mxu0 %vm1803_vm7, %v8806_v8  ;;  %2598 = vmatpush1.bf16.msra.mxu0 %v7871_v37  ;;  %v2843_v50 = vrot.slane %v11054_v20, 1  ;;  %v11056_v8 = vld [vmem:[#allocation17_spill] sm:$0xff]  ;;  %11057 = vst [vmem:[#allocation21_spill] sm:$0xff] %v9088_v36  ;;  %v2847_v37 = vrot.slane %v8887_v34, 1 }
 0x2d1   :  { %3290 = vmatprep.subr.bf16.mxu0 %v11040_v41  ;;  %11061 = vst [vmem:[#allocation17_spill] sm:$0xff] %v9102_v15 }
 0x2d2   :  { %3230 = vmatmul.mubr.bf16.gmra.mrb[32].mxu1 %v9073_v62  ;;  %v9092_v35 = vsel %vm779_vm6, %v2839_v21, %v2843_v50  ;;  %v9106_v21 = vsel %vm779_vm6, %v2843_v50, %v2847_v37  ;;  %v9222_v62 = vld [vmem:[%s10942_s5 + $0x1b4] ss:$8 sps:$4 sm:$0xff]  }
 0x2d3   :  { %6836 = vmatprep.mubr.msk.bf16.mxu1 %vm1803_vm7, %v9078_v56  ;;  %11058 = vst [vmem:[#allocation16_spill] sm:$0xff] %v9092_v35  ;;  %v11059_v56 = vld [vmem:[#allocation18_spill] sm:$0xff] }
 0x2d4   :  { %11062 = vst [vmem:[#allocation18_spill] sm:$0xff] %v9106_v21 }
 0x2d7   :  { %2108 = vmatmul.mubr.bf16.gmra.mrb[140].mxu0 %v11055_v52  ;;  %v11060_v52 = vld [vmem:[#allocation19_spill] sm:$0xff] }
 0x2d8   :  { %6715 = vmatprep.mubr.msk.bf16.mxu0 %vm1803_vm7, %v11056_v8  ;;  %v2845_v8 = vrot.slane %v8880_v25, 1 }
 0x2da   :  { %3240 = vmatmul.mubr.bf16.gmra.mrb[36].mxu1 %v9088_v36  ;;  %v11065_v36 = vld [vmem:[#allocation22_spill] sm:$0xff]  ;;  %v9118_v47 = vsel %vm779_vm6, %v2841_v29, %v2845_v8 }
 0x2db   :  { %6837 = vmatprep.mubr.msk.bf16.mxu1 %vm1803_vm7, %v9092_v35  ;;  %v9112_v35 = vrot.slane %v8912_v57, 1 }
 0x2dd   :  { %11063 = vst [vmem:[#allocation19_spill] sm:$0xff] %v9112_v35  ;;  %v9123_v50 = vsel %vm779_vm6, %v2847_v37, %v9112_v35 }
 0x2de   :  { %11067 = vst [vmem:[#allocation22_spill] sm:$0xff] %v9123_v50 }
 0x2df   :  { %2116 = vmatmul.mubr.bf16.gmra.mrb[144].mxu0 %v11059_v56  ;;  %v11064_v56 = vld [vmem:[#allocation20_spill] sm:$0xff] }
 0x2e0   :  { %6716 = vmatprep.mubr.msk.bf16.mxu0 %vm1803_vm7, %v11060_v52  ;;  %11066 = vst [vmem:[#allocation20_spill] sm:$0xff] %v9118_v47  ;;  %v9128_v52 = vrot.slane %v8904_v33, 1 }
 0x2e2   :  { %3250 = vmatmul.mubr.bf16.gmra.mrb[40].mxu1 %v9102_v15  ;;  %11068 = vst [vmem:[#allocation38_spill] sm:$0xff] %v9128_v52  ;;  %v9211_v15 = vld [vmem:[%s10942_s5 + $0x1a0] ss:$8 sps:$4 sm:$0xff]  }
 0x2e3   :  { %6838 = vmatprep.mubr.msk.bf16.mxu1 %vm1803_vm7, %v9106_v21  ;;  %v11069_v21 = vld [vmem:[#allocation23_spill] sm:$0xff] }
 0x2e7   :  { %2124 = vmatmul.mubr.bf16.gmra.mrb[148].mxu0 %v11064_v56  ;;  %v9169_v56 = vld [vmem:[%s10942_s5 + $0x184] ss:$8 sps:$4 sm:$0xff]  }
 0x2e8   :  { %6717 = vmatprep.mubr.msk.bf16.mxu0 %vm1803_vm7, %v11065_v36  ;;  %v9135_v36 = vsel %vm779_vm6, %v2845_v8, %v9128_v52  ;;  %7151 = vmatprep.subr.bf16.mxu1 %v9169_v56 }
 0x2e9   :  { %11070 = vst [vmem:[#allocation23_spill] sm:$0xff] %v9135_v36 }
 0x2ea   :  { %3260 = vmatmul.mubr.bf16.gmra.mrb[44].mxu1 %v9118_v47  ;;  %v9206_v47 = vld [vmem:[%s10942_s5 + $0x1a4] ss:$8 sps:$4 sm:$0xff]  }
 0x2eb   :  { %6839 = vmatprep.mubr.msk.bf16.mxu1 %vm1803_vm7, %v9123_v50 }
 0x2ef   :  { %2132 = vmatmul.mubr.bf16.gmra.mrb[152].mxu0 %v11069_v21 }
 0x2f0   :  { %6718 = vmatprep.mubr.msk.bf16.mxu0 %vm1803_vm7, %v8902_v17 }
 0x2f2   :  { %3270 = vmatmul.mubr.bf16.gmra.mrb[48].mxu1 %v9135_v36 }
 0x2f3   :  { %6840 = vmatprep.mubr.msk.bf16.mxu1 %vm1803_vm7, %v9112_v35 }
 0x2f7   :  { %2140 = vmatmul.mubr.bf16.gmra.mrb[156].mxu0 %v8909_v4 }
 0x2f8   :  { %6719 = vmatprep.mubr.msk.bf16.mxu0 %vm1803_vm7, %v8930_v55 }
 0x2fa   :  { %3280 = vmatmul.mubr.bf16.gmra.mrb[52].mxu1 %v9128_v52  ;;  %v9185_v52 = vld [vmem:[%s10942_s5 + $0x194] ss:$8 sps:$4 sm:$0xff]  }
 0x2ff   :  { %2148 = vmatmul.mubr.bf16.gmra.mrb[160].mxu0 %v8938_v54 }
 0x300   :  { %6720 = vmatprep.mubr.msk.bf16.mxu0 %vm1803_vm7, %v8932_v2  ;;  %v7872_v2 = vld [vmem:[#allocation6 + $0x278] ss:$12 sps:$4 sm:$0xff]  }
 0x302   :  { %v9147_v17 = vpop.f32.mrb[56].mxu0 }
 0x303   :  { %v9149_v29 = vpop.f32.mrb[57].mxu0 }
 0x304   :  { %v9151_v37 = vpop.f32.mrb[58].mxu0 }
 0x305   :  { %v9153_v21 = vpop.f32.mrb[59].mxu0 }
 0x307   :  { %2156 = vmatmul.mubr.bf16.gmra.mrb[164].mxu0 %v8955_v58  ;;  %v9174_v58 = vld [vmem:[%s10942_s5 + $0x180] ss:$8 sps:$4 sm:$0xff]  }
 0x308   :  { %6774 = vmatprep.mubr.msk.bf16.mxu0 %vm1803_vm7, %v8598_v26  ;;  %v7873_v26 = vld [vmem:[#allocation6 + $0x290] ss:$12 sps:$4 sm:$0xff]   ;;  %7167 = vmatpush1.bf16.msra.mxu1 %v9174_v58 }
 0x309   :  { %7152 = vmatprep.subr.bf16.mxu1 %v9185_v52 }
 0x30a   :  { %v9158_v4 = vpop.f32.mrb[60].mxu0 }
 0x30b   :  { %v9160_v55 = vpop.f32.mrb[61].mxu0 }
 0x30c   :  { %v9162_v54 = vpop.f32.mrb[62].mxu0 }
 0x30d   :  { %v9164_v8 = vpop.f32.mrb[63].mxu0 }
 0x30f   :  { %2606 = vmatmul.mubr.bf16.vlgmr.msra.gmra.mrb[168].mxu0 %v8596_v24  ;;  %v9192_v24 = vld [vmem:[%s10942_s5 + $0x190] ss:$8 sps:$4 sm:$0xff]  }
 0x310   :  { %6775 = vmatprep.mubr.msk.bf16.mxu0 %vm1803_vm7, %v8611_v45  ;;  %3291 = vmatpush1.bf16.msra.mxu0 %v7872_v2  ;;  %v7874_v2 = vld [vmem:[#allocation6 + $0x2a8] ss:$12 sps:$4 sm:$0xff]  }
 0x311   :  { %3292 = vmatprep.subr.bf16.mxu0 %v11040_v41  ;;  %7168 = vmatpush1.bf16.msra.mxu1 %v9192_v24 }
 0x312   :  { %v9187_v35 = vpop.f32.mrb[64].mxu0  ;;  %7153 = vmatprep.subr.bf16.mxu1 %v9206_v47 }
 0x313   :  { %v9194_v36 = vpop.f32.mrb[65].mxu0 }
 0x314   :  { %v9197_v45 = vpop.f32.mrb[66].mxu0  ;;  %3293 = vmatpush1.bf16.msra.mxu0 %v7873_v26  ;;  %v7875_v26 = vld [vmem:[#allocation6 + $0x2c0] ss:$12 sps:$4 sm:$0xff]  }
 0x315   :  { %v9199_v50 = vpop.f32.mrb[67].mxu0  ;;  %3294 = vmatprep.subr.bf16.mxu0 %v11040_v41  ;;  %7169 = vmatpush1.bf16.msra.mxu1 %v9211_v15 }
 0x316   :  { %7154 = vmatprep.subr.bf16.mxu1 %v9222_v62 }
 0x317   :  { %2614 = vmatmul.mubr.bf16.gmra.mrb[172].mxu0 %v8609_v44  ;;  %v9229_v44 = vld [vmem:[%s10942_s5 + $0x1b0] ss:$8 sps:$4 sm:$0xff]  }
 0x318   :  { %6776 = vmatprep.mubr.msk.bf16.mxu0 %vm1803_vm7, %v8634_v16  ;;  %3295 = vmatpush1.bf16.msra.mxu0 %v7874_v2  ;;  %v7876_v2 = vld [vmem:[#allocation6 + $0x2d8] ss:$12 sps:$4 sm:$0xff]  }
 0x319   :  { %3296 = vmatprep.subr.bf16.mxu0 %v11040_v41  ;;  %7170 = vmatpush1.bf16.msra.mxu1 %v9229_v44 }
 0x31a   :  { %v9224_v61 = vpop.f32.mrb[68].mxu0  ;;  %7155 = vmatprep.subr.bf16.mxu1 %v9243_v12 }
 0x31b   :  { %v9231_v11 = vpop.f32.mrb[69].mxu0 }
 0x31c   :  { %v9234_v16 = vpop.f32.mrb[70].mxu0  ;;  %3297 = vmatpush1.bf16.msra.mxu0 %v7875_v26  ;;  %v7877_v26 = vld [vmem:[#allocation6 + $0x2f0] ss:$12 sps:$4 sm:$0xff]  }
 0x31d   :  { %v9236_v27 = vpop.f32.mrb[71].mxu0  ;;  %3298 = vmatprep.subr.bf16.mxu0 %v11040_v41  ;;  %7171 = vmatpush1.bf16.msra.mxu1 %v9248_v48  ;;  %v9285_v48 = vld [vmem:[%s10942_s5 + $0x1e0] ss:$8 sps:$4 sm:$0xff]  }
 0x31e   :  { %7156 = vmatprep.subr.bf16.mxu1 %v9259_v1  ;;  %11075 = vst [vmem:[#allocation43_spill] sm:$0xff] %v9285_v48 }
 0x31f   :  { %2622 = vmatmul.mubr.bf16.gmra.mrb[176].mxu0 %v8627_v14  ;;  %v9266_v14 = vld [vmem:[%s10942_s5 + $0x1d0] ss:$8 sps:$4 sm:$0xff]  }
 0x320   :  { %6777 = vmatprep.mubr.msk.bf16.mxu0 %vm1803_vm7, %v8660_v51  ;;  %3299 = vmatpush1.bf16.msra.mxu0 %v7876_v2  ;;  %11073 = vst [vmem:[#allocation41_spill] sm:$0xff] %v9266_v14  ;;  %v7878_v2 = vld [vmem:[#allocation6 + $0x308] ss:$12 sps:$4 sm:$0xff]  }
 0x321   :  { %3300 = vmatprep.subr.bf16.mxu0 %v11040_v41  ;;  %7172 = vmatpush1.bf16.msra.mxu1 %v9266_v14  ;;  %v9296_v14 = vld [vmem:[%s10942_s5 + $0x1f4] ss:$8 sps:$4 sm:$0xff]  }
 0x322   :  { %v9261_v6 = vpop.f32.mrb[72].mxu0  ;;  %7157 = vmatprep.subr.bf16.mxu1 %v9280_v59  ;;  %11076 = vst [vmem:[#allocation44_spill] sm:$0xff] %v9296_v14 }
 0x323   :  { %v9268_v0 = vpop.f32.mrb[73].mxu0 }
 0x324   :  { %v9271_v51 = vpop.f32.mrb[74].mxu0  ;;  %3301 = vmatpush1.bf16.msra.mxu0 %v7877_v26  ;;  %v7879_v26 = vld [vmem:[#allocation6 + $0x320] ss:$12 sps:$4 sm:$0xff]  }
 0x325   :  { %v9273_v42 = vpop.f32.mrb[75].mxu0  ;;  %3302 = vmatprep.subr.bf16.mxu0 %v11040_v41  ;;  %7173 = vmatpush1.bf16.msra.mxu1 %v9285_v48 }
 0x326   :  { %7158 = vmatprep.subr.bf16.mxu1 %v9296_v14 }
 0x327   :  { %2630 = vmatmul.mubr.bf16.gmra.mrb[180].mxu0 %v8653_v49  ;;  %v9303_v49 = vld [vmem:[%s10942_s5 + $0x1f0] ss:$8 sps:$4 sm:$0xff]  }
 0x328   :  { %6778 = vmatprep.mubr.msk.bf16.mxu0 %vm1803_vm7, %v8686_v30  ;;  %3303 = vmatpush1.bf16.msra.mxu0 %v7878_v2  ;;  %11077 = vst [vmem:[#allocation45_spill] sm:$0xff] %v9303_v49  ;;  %v7880_v2 = vld [vmem:[#allocation6 + $0x338] ss:$12 sps:$4 sm:$0xff]  }
 0x329   :  { %3304 = vmatprep.subr.bf16.mxu0 %v11040_v41  ;;  %7174 = vmatpush1.bf16.msra.mxu1 %v9303_v49  ;;  %v9333_v49 = vld [vmem:[%s10942_s5 + $0x214] ss:$8 sps:$4 sm:$0xff]  }
 0x32a   :  { %v9298_v1 = vpop.f32.mrb[76].mxu0  ;;  %7159 = vmatprep.subr.bf16.mxu1 %v9317_v13  ;;  %11080 = vst [vmem:[#allocation48_spill] sm:$0xff] %v9333_v49 }
 0x32b   :  { %v9305_v59 = vpop.f32.mrb[77].mxu0 }
 0x32c   :  { %v9308_v30 = vpop.f32.mrb[78].mxu0  ;;  %3305 = vmatpush1.bf16.msra.mxu0 %v7879_v26  ;;  %v7881_v26 = vld [vmem:[#allocation6 + $0x350] ss:$12 sps:$4 sm:$0xff]  }
 0x32d   :  { %v9310_v48 = vpop.f32.mrb[79].mxu0  ;;  %3306 = vmatprep.subr.bf16.mxu0 %v11040_v41  ;;  %7175 = vmatpush1.bf16.msra.mxu1 %v9322_v3 }
 0x32e   :  { %7160 = vmatprep.subr.bf16.mxu1 %v9333_v49 }
 0x32f   :  { %2638 = vmatmul.mubr.bf16.gmra.mrb[184].mxu0 %v8679_v28  ;;  %v9340_v28 = vld [vmem:[%s10942_s5 + $0x210] ss:$8 sps:$4 sm:$0xff]  }
 0x330   :  { %6779 = vmatprep.mubr.msk.bf16.mxu0 %vm1803_vm7, %v8712_v63  ;;  %3307 = vmatpush1.bf16.msra.mxu0 %v7880_v2  ;;  %11082 = vst [vmem:[#allocation50_spill] sm:$0xff] %v9340_v28  ;;  %v7882_v2 = vld [vmem:[#allocation6 + $0x368] ss:$12 sps:$4 sm:$0xff]  }
 0x331   :  { %3308 = vmatprep.subr.bf16.mxu0 %v11040_v41  ;;  %7176 = vmatpush1.bf16.msra.mxu1 %v9340_v28  ;;  %v9370_v28 = vld [vmem:[%s10942_s5 + $0x234] ss:$8 sps:$4 sm:$0xff]  }
 0x332   :  { %v9335_v14 = vpop.f32.mrb[80].mxu0  ;;  %11086 = vst [vmem:[#allocation54_spill] sm:$0xff] %v9370_v28 }
 0x333   :  { %11081 = vst [vmem:[#allocation49_spill] sm:$0xff] %v9335_v14  ;;  %v9342_v13 = vpop.f32.mrb[81].mxu0  ;;  %v9354_v14 = vld [vmem:[%s10942_s5 + $0x224] ss:$8 sps:$4 sm:$0xff]  }
 0x334   :  { %11083 = vst [vmem:[#allocation51_spill] sm:$0xff] %v9342_v13  ;;  %v9345_v63 = vpop.f32.mrb[82].mxu0  ;;  %3309 = vmatpush1.bf16.msra.mxu0 %v7881_v26  ;;  %11084 = vst [vmem:[#allocation52_spill] sm:$0xff] %v9354_v14  ;;  %v9359_v13 = vld [vmem:[%s10942_s5 + $0x220] ss:$8 sps:$4 sm:$0xff]   ;;  %7161 = vmatprep.subr.bf16.mxu1 %v9354_v14 }
 0x335   :  { %v9347_v3 = vpop.f32.mrb[83].mxu0  ;;  %3310 = vmatprep.subr.bf16.mxu0 %v11040_v41  ;;  %11085 = vst [vmem:[#allocation53_spill] sm:$0xff] %v9359_v13  ;;  %v7883_v26 = vld [vmem:[#allocation6 + $0x380] ss:$12 sps:$4 sm:$0xff]   ;;  %7177 = vmatpush1.bf16.msra.mxu1 %v9359_v13 }
 0x336   :  { %7162 = vmatprep.subr.bf16.mxu1 %v9370_v28 }
 0x337   :  { %2646 = vmatmul.mubr.bf16.gmra.mrb[188].mxu0 %v8705_v18  ;;  %v9377_v18 = vld [vmem:[%s10942_s5 + $0x230] ss:$8 sps:$4 sm:$0xff]  }
 0x338   :  { %6780 = vmatprep.mubr.msk.bf16.mxu0 %vm1803_vm7, %v8738_v46  ;;  %3311 = vmatpush1.bf16.msra.mxu0 %v7882_v2  ;;  %11088 = vst [vmem:[#allocation56_spill] sm:$0xff] %v9377_v18  ;;  %v7884_v2 = vld [vmem:[#allocation6 + $0x398] ss:$12 sps:$4 sm:$0xff]  }
 0x339   :  { %3312 = vmatprep.subr.bf16.mxu0 %v11040_v41  ;;  %7178 = vmatpush1.bf16.msra.mxu1 %v9377_v18  ;;  %v9449_v18 = vld [vmem:[%s10942_s5 + $0x270] ss:$8 sps:$4 sm:$0xff]  }
 0x33a   :  { %v9372_v49 = vpop.f32.mrb[84].mxu0  ;;  %11098 = vst [vmem:[#allocation66_spill] sm:$0xff] %v9449_v18 }
 0x33b   :  { %11087 = vst [vmem:[#allocation55_spill] sm:$0xff] %v9372_v49  ;;  %v9379_v14 = vpop.f32.mrb[85].mxu0  ;;  %v9391_v49 = vld [vmem:[%s10942_s5 + $0x244] ss:$8 sps:$4 sm:$0xff]  }
 0x33c   :  { %11089 = vst [vmem:[#allocation57_spill] sm:$0xff] %v9379_v14  ;;  %v9382_v46 = vpop.f32.mrb[86].mxu0  ;;  %3313 = vmatpush1.bf16.msra.mxu0 %v7883_v26  ;;  %11090 = vst [vmem:[#allocation58_spill] sm:$0xff] %v9391_v49  ;;  %v9396_v14 = vld [vmem:[%s10942_s5 + $0x240] ss:$8 sps:$4 sm:$0xff]   ;;  %7163 = vmatprep.subr.bf16.mxu1 %v9391_v49 }
 0x33d   :  { %v9384_v13 = vpop.f32.mrb[87].mxu0  ;;  %3314 = vmatprep.subr.bf16.mxu0 %v11040_v41  ;;  %11091 = vst [vmem:[#allocation59_spill] sm:$0xff] %v9396_v14  ;;  %7179 = vmatpush1.bf16.msra.mxu1 %v9396_v14  ;;  %v9407_v26 = vld [vmem:[%s10942_s5 + $0x254] ss:$8 sps:$4 sm:$0xff]   ;;  %v9432_v14 = vld [vmem:[%s10942_s5 + $0x260] ss:$8 sps:$4 sm:$0xff]  }
 0x33e   :  { %11092 = vst [vmem:[#allocation60_spill] sm:$0xff] %v9407_v26  ;;  %7164 = vmatprep.subr.bf16.mxu1 %v9407_v26  ;;  %11095 = vst [vmem:[#allocation63_spill] sm:$0xff] %v9432_v14 }
 0x33f   :  { %2654 = vmatmul.mubr.bf16.gmra.mrb[192].mxu0 %v8731_v53  ;;  %v9414_v53 = vld [vmem:[%s10942_s5 + $0x250] ss:$8 sps:$4 sm:$0xff]  }
 0x340   :  { %6781 = vmatprep.mubr.msk.bf16.mxu0 %vm1803_vm7, %v8764_v40  ;;  %3315 = vmatpush1.bf16.msra.mxu0 %v7884_v2  ;;  %11093 = vst [vmem:[#allocation61_spill] sm:$0xff] %v9414_v53  ;;  %v9427_v2 = vld [vmem:[%s10942_s5 + $0x264] ss:$8 sps:$4 sm:$0xff]  }
 0x341   :  { %4458 = vmatprep.subr.bf16.mxu0 %v9169_v56  ;;  %7180 = vmatpush1.bf16.msra.mxu1 %v9414_v53  ;;  %11094 = vst [vmem:[#allocation62_spill] sm:$0xff] %v9427_v2  ;;  %v9442_v53 = vld [vmem:[%s10942_s5 + $0x274] ss:$8 sps:$4 sm:$0xff]  }
 0x342   :  { %v9409_v41 = vpop.f32.mrb[88].mxu0  ;;  %7165 = vmatprep.subr.bf16.mxu1 %v9427_v2  ;;  %11096 = vst [vmem:[#allocation64_spill] sm:$0xff] %v9442_v53 }
 0x343   :  { %v9416_v49 = vpop.f32.mrb[89].mxu0 }
 0x344   :  { %v9419_v40 = vpop.f32.mrb[90].mxu0 }
 0x345   :  { %v9421_v56 = vpop.f32.mrb[91].mxu0  ;;  %7181 = vmatpush1.bf16.msra.mxu1 %v9432_v14 }
 0x346   :  { %7166 = vmatprep.subr.bf16.mxu1 %v9442_v53 }
 0x347   :  { %2662 = vmatmul.mubr.bf16.gmra.mrb[196].mxu0 %v8757_v38 }
 0x348   :  { %6782 = vmatprep.mubr.msk.bf16.mxu0 %vm1803_vm7, %v8790_v22 }
 0x349   :  { %7182 = vmatpush1.bf16.msra.mxu1 %v9449_v18 }
 0x34a   :  { %v9444_v26 = vpop.f32.mrb[92].mxu0 }
 0x34b   :  { %11097 = vst [vmem:[#allocation65_spill] sm:$0xff] %v9444_v26  ;;  %v9451_v38 = vpop.f32.mrb[93].mxu0 }
 0x34c   :  { %11099 = vst [vmem:[#allocation67_spill] sm:$0xff] %v9451_v38  ;;  %v9454_v2 = vpop.f32.mrb[94].mxu0 }
 0x34d   :  { %11100 = vst [vmem:[#allocation68_spill] sm:$0xff] %v9454_v2  ;;  %v9456_v22 = vpop.f32.mrb[95].mxu0 }
 0x34e   :  { %11101 = vst [vmem:[#allocation69_spill] sm:$0xff] %v9456_v22 }
 0x34f   :  { %2670 = vmatmul.mubr.bf16.gmra.mrb[200].mxu0 %v8783_v23 }
 0x350   :  { %6783 = vmatprep.mubr.msk.bf16.mxu0 %vm1803_vm7, %v8815_v19 }
 0x352   :  { %v9462_v14 = vpop.f32.mrb[96].mxu0 }
 0x353   :  { %11102 = vst [vmem:[#allocation70_spill] sm:$0xff] %v9462_v14  ;;  %v9464_v26 = vpop.f32.mrb[97].mxu0  ;;  %v11115_v14 = vld [vmem:[#allocation15_spill] sm:$0xff] }
 0x354   :  { %11103 = vst [vmem:[#allocation71_spill] sm:$0xff] %v9464_v26  ;;  %v9466_v28 = vpop.f32.mrb[98].mxu0 }
 0x355   :  { %11104 = vst [vmem:[#allocation72_spill] sm:$0xff] %v9466_v28  ;;  %v9468_v38 = vpop.f32.mrb[99].mxu0  ;;  %v3519_v28 = vld [vmem:[#allocation7] sm:$0x7] }
 0x356   :  { %11105 = vst [vmem:[#allocation73_spill] sm:$0xff] %v9468_v38 }
 0x357   :  { %2678 = vmatmul.mubr.bf16.gmra.mrb[204].mxu0 %v8808_v9 }
 0x358   :  { %6784 = vmatprep.mubr.msk.bf16.mxu0 %vm1803_vm7, %v8839_v32  ;;  %v11113_v32 = vld [vmem:[#allocation14_spill] sm:$0xff] }
 0x35a   :  { %v9473_v53 = vpop.f32.mrb[100].mxu0 }
 0x35b   :  { %11106 = vst [vmem:[#allocation74_spill] sm:$0xff] %v9473_v53  ;;  %v9475_v18 = vpop.f32.mrb[101].mxu0  ;;  %v9491_v53 = vrot.slane %v3519_v28, %v11113_v32 }
 0x35c   :  { %11107 = vst [vmem:[#allocation75_spill] sm:$0xff] %v9475_v18  ;;  %v9477_v23 = vpop.f32.mrb[102].mxu0 }
 0x35d   :  { %11108 = vst [vmem:[#allocation76_spill] sm:$0xff] %v9477_v23  ;;  %v9479_v19 = vpop.f32.mrb[103].mxu0 }
 0x35e   :  { %11109 = vst [vmem:[#allocation77_spill] sm:$0xff] %v9479_v19  ;;  %v9496_v19 = vrot.slane %v3519_v28, %v11115_v14 }
 0x35f   :  { %2686 = vmatmul.mubr.bf16.gmra.mrb[208].mxu0 %v8832_v10 }
 0x360   :  { %6785 = vmatprep.mubr.msk.bf16.mxu0 %vm1803_vm7, %v11054_v20 }
 0x362   :  { %v9484_v38 = vpop.f32.mrb[104].mxu0 }
 0x363   :  { %11110 = vst [vmem:[#allocation78_spill] sm:$0xff] %v9484_v38  ;;  %v9486_v9 = vpop.f32.mrb[105].mxu0 }
 0x364   :  { %11111 = vst [vmem:[#allocation79_spill] sm:$0xff] %v9486_v9  ;;  %v9488_v26 = vpop.f32.mrb[106].mxu0 }
 0x365   :  { %11112 = vst [vmem:[#allocation80_spill] sm:$0xff] %v9488_v26  ;;  %v9493_v18 = vpop.f32.mrb[107].mxu0  ;;  %v3151_v23 = vpop.f32.mrb[0].mxu1 }
 0x366   :  { %11114 = vst [vmem:[#allocation81_spill] sm:$0xff] %v9493_v18  ;;  %v7183_v10 = vadd.f32 %v3151_v23, %v9147_v17  ;;  %v3153_v22 = vpop.f32.mrb[1].mxu1 }
 0x367   :  { %v7184_v20 = vadd.f32 %v3153_v22, %v9149_v29  ;;  %2694 = vmatmul.mubr.bf16.gmra.mrb[212].mxu0 %v8856_v7  ;;  %v3155_v38 = vpop.f32.mrb[2].mxu1 }
 0x368   :  { %v3536_v9 = vadd.f32 %v7183_v10, %v9491_v53  ;;  %v7185_v26 = vadd.f32 %v3155_v38, %v9151_v37  ;;  %6786 = vmatprep.mubr.msk.bf16.mxu0 %vm1803_vm7, %v8887_v34  ;;  %v3157_v32 = vpop.f32.mrb[3].mxu1 }
 0x369   :  { %v3537_v18 = vadd.f32 %v7184_v20, %v9496_v19  ;;  %v7186_v28 = vadd.f32 %v3157_v32, %v9153_v21 }
 0x36a   :  { %v3539_v17 = vadd.f32 %v7185_v26, %v9491_v53  ;;  %v9508_v23 = vpop.f32.mrb[108].mxu0  ;;  %v3620_v22 = vmax.f32 %v3536_v9, 0.0 }
 0x36b   :  { %v3540_v29 = vadd.f32 %v7186_v28, %v9496_v19  ;;  %v9511_v7 = vpop.f32.mrb[109].mxu0  ;;  %v3621_v37 = vmax.f32 %v3537_v18, 0.0 }
 0x36c   :  { %v3623_v10 = vmax.f32 %v3539_v17, 0.0  ;;  %v9513_v14 = vpop.f32.mrb[110].mxu0 }
 0x36d   :  { %v3624_v38 = vmax.f32 %v3540_v29, 0.0  ;;  %v9515_v34 = vpop.f32.mrb[111].mxu0  ;;  %v3161_v2 = vpop.f32.mrb[4].mxu1 }
 0x36e   :  { %v9517_v20 = vpack.c.bf16 %v3623_v10, %v3620_v22  ;;  %v7187_v21 = vadd.f32 %v3161_v2, %v9158_v4  ;;  %v3163_v26 = vpop.f32.mrb[5].mxu1 }
 0x36f   :  { %v9520_v32 = vpack.c.bf16 %v3624_v38, %v3621_v37  ;;  %v7188_v28 = vadd.f32 %v3163_v26, %v9160_v55  ;;  %2702 = vmatmul.mubr.bf16.gmra.mrb[216].mxu0 %v8880_v25  ;;  %v3165_v9 = vpop.f32.mrb[6].mxu1 }
 0x370   :  { %11116 = vst [vmem:[#allocation82_spill] sm:$0xff] %v9517_v20  ;;  %v3542_v17 = vadd.f32 %v7187_v21, %v9491_v53  ;;  %v7189_v18 = vadd.f32 %v3165_v9, %v9162_v54  ;;  %6787 = vmatprep.mubr.msk.bf16.mxu0 %vm1803_vm7, %v8912_v57  ;;  %v3167_v29 = vpop.f32.mrb[7].mxu1 }
 0x371   :  { %v3543_v22 = vadd.f32 %v7188_v28, %v9496_v19  ;;  %v7190_v4 = vadd.f32 %v3167_v29, %v9164_v8 }
 0x372   :  { %v3545_v2 = vadd.f32 %v7189_v18, %v9491_v53  ;;  %v9531_v10 = vpop.f32.mrb[112].mxu0  ;;  %v3626_v37 = vmax.f32 %v3542_v17, 0.0 }
 0x373   :  { %v3546_v55 = vadd.f32 %v7190_v4, %v9496_v19  ;;  %v2055_v25 = vpop.f32.mrb[113].mxu0  ;;  %v3627_v54 = vmax.f32 %v3543_v22, 0.0 }
 0x374   :  { %v3629_v38 = vmax.f32 %v3545_v2, 0.0  ;;  %v9534_v21 = vpop.f32.mrb[114].mxu0 }
 0x375   :  { %v3630_v26 = vmax.f32 %v3546_v55, 0.0  ;;  %v2058_v9 = vpop.f32.mrb[115].mxu0  ;;  %v3171_v57 = vpop.f32.mrb[8].mxu1 }
 0x376   :  { %v9536_v20 = vpack.c.bf16 %v3629_v38, %v3626_v37  ;;  %v7191_v28 = vadd.f32 %v3171_v57, %v9187_v35  ;;  %v3173_v8 = vpop.f32.mrb[9].mxu1 }
 0x377   :  { %v9539_v29 = vpack.c.bf16 %v3630_v26, %v3627_v54  ;;  %v7192_v18 = vadd.f32 %v3173_v8, %v9194_v36  ;;  %2710 = vmatmul.mubr.bf16.gmra.mrb[220].mxu0 %v8904_v33  ;;  %v3175_v4 = vpop.f32.mrb[10].mxu1 }
 0x378   :  { %v3548_v17 = vadd.f32 %v7191_v28, %v9491_v53  ;;  %v7193_v2 = vadd.f32 %v3175_v4, %v9197_v45  ;;  %v3177_v22 = vpop.f32.mrb[11].mxu1  ;;  %6841 = vmatprep.mubr.msk.bf16.mxu0 %vm1803_vm7, %v8923_v39 }
 0x379   :  { %v3549_v55 = vadd.f32 %v7192_v18, %v9496_v19  ;;  %v7194_v35 = vadd.f32 %v3177_v22, %v9199_v50 }
 0x37a   :  { %v3551_v25 = vadd.f32 %v7193_v2, %v9491_v53  ;;  %v9550_v37 = vpop.f32.mrb[116].mxu0  ;;  %v3632_v38 = vmax.f32 %v3548_v17, 0.0 }
 0x37b   :  { %v3552_v36 = vadd.f32 %v7194_v35, %v9496_v19  ;;  %v2063_v33 = vpop.f32.mrb[117].mxu0  ;;  %v3633_v45 = vmax.f32 %v3549_v55, 0.0 }
 0x37c   :  { %v3635_v54 = vmax.f32 %v3551_v25, 0.0  ;;  %v9553_v26 = vpop.f32.mrb[118].mxu0 }
 0x37d   :  { %v3636_v9 = vmax.f32 %v3552_v36, 0.0  ;;  %v2066_v57 = vpop.f32.mrb[119].mxu0  ;;  %v3181_v28 = vpop.f32.mrb[12].mxu1 }
 0x37e   :  { %v9555_v39 = vpack.c.bf16 %v3635_v54, %v3632_v38  ;;  %v7195_v8 = vadd.f32 %v3181_v28, %v9224_v61  ;;  %v3183_v50 = vpop.f32.mrb[13].mxu1 }
 0x37f   :  { %v9558_v18 = vpack.c.bf16 %v3636_v9, %v3633_v45  ;;  %v7196_v4 = vadd.f32 %v3183_v50, %v9231_v11  ;;  %v3185_v2 = vpop.f32.mrb[14].mxu1  ;;  %3323 = vmatmul.mubr.bf16.vlgmr.msra.gmra.mrb[224].mxu0 %v8946_v60 }
 0x380   :  { %v3554_v17 = vadd.f32 %v7195_v8, %v9491_v53  ;;  %v7197_v22 = vadd.f32 %v3185_v2, %v9234_v16  ;;  %v3187_v55 = vpop.f32.mrb[15].mxu1  ;;  %6842 = vmatprep.mubr.msk.bf16.mxu0 %vm1803_vm7, %v8950_v43  ;;  %4459 = vmatpush1.bf16.msra.mxu0 %v9174_v58 }
 0x381   :  { %v3555_v61 = vadd.f32 %v7196_v4, %v9496_v19  ;;  %v7198_v35 = vadd.f32 %v3187_v55, %v9236_v27  ;;  %4460 = vmatprep.subr.bf16.mxu0 %v9185_v52 }
 0x382   :  { %v3557_v11 = vadd.f32 %v7197_v22, %v9491_v53  ;;  %v9571_v25 = vpop.f32.mrb[120].mxu0  ;;  %v3638_v16 = vmax.f32 %v3554_v17, 0.0 }
 0x383   :  { %v3558_v60 = vadd.f32 %v7198_v35, %v9496_v19  ;;  %v2071_v36 = vpop.f32.mrb[121].mxu0  ;;  %v3639_v43 = vmax.f32 %v3555_v61, 0.0 }
 0x384   :  { %v3641_v33 = vmax.f32 %v3557_v11, 0.0  ;;  %v9574_v38 = vpop.f32.mrb[122].mxu0  ;;  %4461 = vmatpush1.bf16.msra.mxu0 %v9192_v24 }
 0x385   :  { %v3642_v58 = vmax.f32 %v3558_v60, 0.0  ;;  %v2074_v54 = vpop.f32.mrb[123].mxu0  ;;  %v3191_v45 = vpop.f32.mrb[16].mxu1  ;;  %4462 = vmatprep.subr.bf16.mxu0 %v9206_v47 }
 0x386   :  { %v9578_v27 = vpack.c.bf16 %v3641_v33, %v3638_v16  ;;  %v7199_v52 = vadd.f32 %v3191_v45, %v9261_v6  ;;  %v3193_v9 = vpop.f32.mrb[17].mxu1  ;;  %v11117_v33 = vld [vmem:[#allocation24_spill] sm:$0xff]  ;;  %v11118_v54 = vld [vmem:[#allocation25_spill] sm:$0xff] }
 0x387   :  { %v9581_v57 = vpack.c.bf16 %v3642_v58, %v3639_v43  ;;  %v7200_v28 = vadd.f32 %v3193_v9, %v9268_v0  ;;  %v3195_v8 = vpop.f32.mrb[18].mxu1  ;;  %3331 = vmatmul.mubr.bf16.gmra.mrb[228].mxu0 %v8963_v31 }
 0x388   :  { %v3560_v24 = vadd.f32 %v7199_v52, %v9491_v53  ;;  %v7201_v50 = vadd.f32 %v3195_v8, %v9271_v51  ;;  %v3197_v4 = vpop.f32.mrb[19].mxu1  ;;  %6843 = vmatprep.mubr.msk.bf16.mxu0 %vm1803_vm7, %v8967_v5  ;;  %4463 = vmatpush1.bf16.msra.mxu0 %v9211_v15  ;;  %v11120_v52 = vld [vmem:[#allocation40_spill] sm:$0xff] }
 0x389   :  { %v3561_v6 = vadd.f32 %v7200_v28, %v9496_v19  ;;  %v7202_v47 = vadd.f32 %v3197_v4, %v9273_v42  ;;  %4464 = vmatprep.subr.bf16.mxu0 %v9222_v62  ;;  %v11121_v4 = vld [vmem:[#allocation41_spill] sm:$0xff] }
 0x38a   :  { %v3563_v0 = vadd.f32 %v7201_v50, %v9491_v53  ;;  %v9594_v2 = vpop.f32.mrb[124].mxu0  ;;  %v3644_v51 = vmax.f32 %v3560_v24, 0.0 }
 0x38b   :  { %v3564_v31 = vadd.f32 %v7202_v47, %v9496_v19  ;;  %v2079_v17 = vpop.f32.mrb[125].mxu0  ;;  %v3645_v5 = vmax.f32 %v3561_v6, 0.0 }
 0x38c   :  { %v3647_v22 = vmax.f32 %v3563_v0, 0.0  ;;  %v9597_v55 = vpop.f32.mrb[126].mxu0  ;;  %4465 = vmatpush1.bf16.msra.mxu0 %v9229_v44 }
 0x38d   :  { %v3648_v15 = vmax.f32 %v3564_v31, 0.0  ;;  %v2082_v61 = vpop.f32.mrb[127].mxu0  ;;  %v3201_v35 = vpop.f32.mrb[20].mxu1  ;;  %4466 = vmatprep.subr.bf16.mxu0 %v9243_v12  ;;  %v11119_v12 = vld [vmem:[#allocation39_spill] sm:$0xff] }
 0x38e   :  { %v9601_v42 = vpack.c.bf16 %v3647_v22, %v3644_v51  ;;  %v7203_v62 = vadd.f32 %v3201_v35, %v9298_v1  ;;  %v3203_v11 = vpop.f32.mrb[21].mxu1  ;;  %v11123_v51 = vld [vmem:[#allocation49_spill] sm:$0xff]  ;;  %v11124_v61 = vld [vmem:[#allocation51_spill] sm:$0xff] }
 0x38f   :  { %v9604_v60 = vpack.c.bf16 %v3648_v15, %v3645_v5  ;;  %v7204_v36 = vadd.f32 %v3203_v11, %v9305_v59  ;;  %v3205_v16 = vpop.f32.mrb[22].mxu1  ;;  %3339 = vmatmul.mubr.bf16.gmra.mrb[232].mxu0 %v11117_v33  ;;  %v11125_v11 = vld [vmem:[#allocation26_spill] sm:$0xff] }
 0x390   :  { %v3566_v44 = vadd.f32 %v7203_v62, %v9491_v53  ;;  %v7205_v43 = vadd.f32 %v3205_v16, %v9308_v30  ;;  %v3207_v58 = vpop.f32.mrb[23].mxu1  ;;  %6844 = vmatprep.mubr.msk.bf16.mxu0 %vm1803_vm7, %v11118_v54  ;;  %4467 = vmatpush1.bf16.msra.mxu0 %v11119_v12  ;;  %v11128_v12 = vld [vmem:[#allocation44_spill] sm:$0xff] }
 0x391   :  { %v3567_v1 = vadd.f32 %v7204_v36, %v9496_v19  ;;  %v7206_v45 = vadd.f32 %v3207_v58, %v9310_v48  ;;  %4468 = vmatprep.subr.bf16.mxu0 %v11120_v52  ;;  %v11122_v48 = vld [vmem:[#allocation42_spill] sm:$0xff] }
 0x392   :  { %v3569_v59 = vadd.f32 %v7205_v43, %v9491_v53  ;;  %v9617_v9 = vpop.f32.mrb[128].mxu0  ;;  %v3650_v30 = vmax.f32 %v3566_v44, 0.0  ;;  %v11126_v44 = vld [vmem:[#allocation27_spill] sm:$0xff] }
 0x393   :  { %v3570_v28 = vadd.f32 %v7206_v45, %v9496_v19  ;;  %v2087_v8 = vpop.f32.mrb[129].mxu0  ;;  %v3651_v6 = vmax.f32 %v3567_v1, 0.0  ;;  %v11127_v43 = vld [vmem:[#allocation43_spill] sm:$0xff] }
 0x394   :  { %v3653_v24 = vmax.f32 %v3569_v59, 0.0  ;;  %v9620_v50 = vpop.f32.mrb[130].mxu0  ;;  %4469 = vmatpush1.bf16.msra.mxu0 %v11121_v4 }
 0x395   :  { %v3654_v47 = vmax.f32 %v3570_v28, 0.0  ;;  %v2090_v0 = vpop.f32.mrb[131].mxu0  ;;  %v3211_v31 = vpop.f32.mrb[24].mxu1  ;;  %4470 = vmatprep.subr.bf16.mxu0 %v11122_v48 }
 0x396   :  { %v9624_v17 = vpack.c.bf16 %v3653_v24, %v3650_v30  ;;  %v7207_v22 = vadd.f32 %v3211_v31, %v11123_v51  ;;  %v3213_v5 = vpop.f32.mrb[25].mxu1  ;;  %v11129_v30 = vld [vmem:[#allocation45_spill] sm:$0xff]  ;;  %v11131_v31 = vld [vmem:[#allocation55_spill] sm:$0xff] }
 0x397   :  { %v9627_v15 = vpack.c.bf16 %v3654_v47, %v3651_v6  ;;  %v7208_v35 = vadd.f32 %v3213_v5, %v11124_v61  ;;  %v3215_v62 = vpop.f32.mrb[26].mxu1  ;;  %3347 = vmatmul.mubr.bf16.gmra.mrb[236].mxu0 %v11125_v11  ;;  %v11132_v5 = vld [vmem:[#allocation57_spill] sm:$0xff] }
 0x398   :  { %v3572_v36 = vadd.f32 %v7207_v22, %v9491_v53  ;;  %v7209_v16 = vadd.f32 %v3215_v62, %v9345_v63  ;;  %v3217_v33 = vpop.f32.mrb[27].mxu1  ;;  %6845 = vmatprep.mubr.msk.bf16.mxu0 %vm1803_vm7, %v11126_v44  ;;  %4471 = vmatpush1.bf16.msra.mxu0 %v11127_v43  ;;  %v11133_v62 = vld [vmem:[#allocation28_spill] sm:$0xff]  ;;  %v11135_v44 = vld [vmem:[#allocation47_spill] sm:$0xff] }
 0x399   :  { %v3573_v58 = vadd.f32 %v7208_v35, %v9496_v19  ;;  %v7210_v54 = vadd.f32 %v3217_v33, %v9347_v3  ;;  %4472 = vmatprep.subr.bf16.mxu0 %v11128_v12  ;;  %v11130_v3 = vld [vmem:[#allocation46_spill] sm:$0xff]  ;;  %v11134_v33 = vld [vmem:[#allocation29_spill] sm:$0xff] }
 0x39a   :  { %v3575_v1 = vadd.f32 %v7209_v16, %v9491_v53  ;;  %v9640_v45 = vpop.f32.mrb[132].mxu0  ;;  %v3656_v63 = vmax.f32 %v3572_v36, 0.0 }
 0x39b   :  { %v3576_v52 = vadd.f32 %v7210_v54, %v9496_v19  ;;  %v2095_v59 = vpop.f32.mrb[133].mxu0  ;;  %v3657_v24 = vmax.f32 %v3573_v58, 0.0  ;;  %v11136_v54 = vld [vmem:[#allocation48_spill] sm:$0xff] }
 0x39c   :  { %v3659_v28 = vmax.f32 %v3575_v1, 0.0  ;;  %v9643_v8 = vpop.f32.mrb[134].mxu0  ;;  %4473 = vmatpush1.bf16.msra.mxu0 %v11129_v30  ;;  %v11137_v30 = vld [vmem:[#allocation50_spill] sm:$0xff] }
 0x39d   :  { %v3660_v4 = vmax.f32 %v3576_v52, 0.0  ;;  %v2098_v6 = vpop.f32.mrb[135].mxu0  ;;  %v3221_v47 = vpop.f32.mrb[28].mxu1  ;;  %4474 = vmatprep.subr.bf16.mxu0 %v11130_v3 }
 0x39e   :  { %v9647_v0 = vpack.c.bf16 %v3659_v28, %v3656_v63  ;;  %v7211_v48 = vadd.f32 %v3221_v47, %v11131_v31  ;;  %v3223_v51 = vpop.f32.mrb[29].mxu1 }
 0x39f   :  { %v9650_v22 = vpack.c.bf16 %v3660_v4, %v3657_v24  ;;  %v7212_v61 = vadd.f32 %v3223_v51, %v11132_v5  ;;  %v3225_v35 = vpop.f32.mrb[30].mxu1  ;;  %3355 = vmatmul.mubr.bf16.gmra.mrb[240].mxu0 %v11133_v62 }
 0x3a0   :  { %v3578_v11 = vadd.f32 %v7211_v48, %v9491_v53  ;;  %v7213_v36 = vadd.f32 %v3225_v35, %v9382_v46  ;;  %v3227_v16 = vpop.f32.mrb[31].mxu1  ;;  %6846 = vmatprep.mubr.msk.bf16.mxu0 %vm1803_vm7, %v11134_v33  ;;  %4475 = vmatpush1.bf16.msra.mxu0 %v11135_v44  ;;  %v11139_v35 = vld [vmem:[#allocation30_spill] sm:$0xff]  ;;  %v11141_v33 = vld [vmem:[#allocation53_spill] sm:$0xff] }
 0x3a1   :  { %v3579_v43 = vadd.f32 %v7212_v61, %v9496_v19  ;;  %v7214_v58 = vadd.f32 %v3227_v16, %v9384_v13  ;;  %4476 = vmatprep.subr.bf16.mxu0 %v11136_v54  ;;  %v11138_v13 = vld [vmem:[#allocation52_spill] sm:$0xff]  ;;  %v11140_v16 = vld [vmem:[#allocation31_spill] sm:$0xff] }
 0x3a2   :  { %v3581_v12 = vadd.f32 %v7213_v36, %v9491_v53  ;;  %v9663_v1 = vpop.f32.mrb[136].mxu0  ;;  %v3662_v46 = vmax.f32 %v3578_v11, 0.0 }
 0x3a3   :  { %v3582_v52 = vadd.f32 %v7214_v58, %v9496_v19  ;;  %v2103_v59 = vpop.f32.mrb[137].mxu0  ;;  %v3663_v24 = vmax.f32 %v3579_v43, 0.0  ;;  %v11142_v43 = vld [vmem:[#allocation54_spill] sm:$0xff] }
 0x3a4   :  { %v3665_v63 = vmax.f32 %v3581_v12, 0.0  ;;  %v9666_v28 = vpop.f32.mrb[138].mxu0  ;;  %4477 = vmatpush1.bf16.msra.mxu0 %v11137_v30 }
 0x3a5   :  { %v3666_v4 = vmax.f32 %v3582_v52, 0.0  ;;  %v2106_v6 = vpop.f32.mrb[139].mxu0  ;;  %v3231_v47 = vpop.f32.mrb[32].mxu1  ;;  %4478 = vmatprep.subr.bf16.mxu0 %v11138_v13 }
 0x3a6   :  { %v9670_v3 = vpack.c.bf16 %v3665_v63, %v3662_v46  ;;  %v7215_v31 = vadd.f32 %v3231_v47, %v9409_v41  ;;  %v3233_v48 = vpop.f32.mrb[33].mxu1  ;;  %v11143_v46 = vld [vmem:[#allocation56_spill] sm:$0xff]  ;;  %v11145_v47 = vld [vmem:[#allocation65_spill] sm:$0xff] }
 0x3a7   :  { %v9673_v51 = vpack.c.bf16 %v3666_v4, %v3663_v24  ;;  %v7216_v5 = vadd.f32 %v3233_v48, %v9416_v49  ;;  %v3235_v61 = vpop.f32.mrb[34].mxu1  ;;  %3363 = vmatmul.mubr.bf16.gmra.mrb[244].mxu0 %v11139_v35 }
 0x3a8   :  { %v3584_v62 = vadd.f32 %v7215_v31, %v9491_v53  ;;  %v7217_v11 = vadd.f32 %v3235_v61, %v9419_v40  ;;  %v3237_v36 = vpop.f32.mrb[35].mxu1  ;;  %6847 = vmatprep.mubr.msk.bf16.mxu0 %vm1803_vm7, %v11140_v16  ;;  %4479 = vmatpush1.bf16.msra.mxu0 %v11141_v33 }
 0x3a9   :  { %v3585_v41 = vadd.f32 %v7216_v5, %v9496_v19  ;;  %v7218_v44 = vadd.f32 %v3237_v36, %v9421_v56  ;;  %4480 = vmatprep.subr.bf16.mxu0 %v11142_v43  ;;  %v11144_v56 = vld [vmem:[#allocation58_spill] sm:$0xff]  ;;  %v11146_v5 = vld [vmem:[#allocation67_spill] sm:$0xff]  ;;  %v11148_v36 = vld [vmem:[#allocation68_spill] sm:$0xff] }
 0x3aa   :  { %v3587_v49 = vadd.f32 %v7217_v11, %v9491_v53  ;;  %v9686_v58 = vpop.f32.mrb[140].mxu0  ;;  %v3668_v40 = vmax.f32 %v3584_v62, 0.0  ;;  %v11147_v62 = vld [vmem:[#allocation32_spill] sm:$0xff] }
 0x3ab   :  { %v3588_v54 = vadd.f32 %v7218_v44, %v9496_v19  ;;  %v2111_v12 = vpop.f32.mrb[141].mxu0  ;;  %v3669_v63 = vmax.f32 %v3585_v41, 0.0  ;;  %v11149_v41 = vld [vmem:[#allocation33_spill] sm:$0xff]  ;;  %v11150_v44 = vld [vmem:[#allocation59_spill] sm:$0xff] }
 0x3ac   :  { %v3671_v52 = vmax.f32 %v3587_v49, 0.0  ;;  %v9689_v59 = vpop.f32.mrb[142].mxu0  ;;  %4481 = vmatpush1.bf16.msra.mxu0 %v11143_v46  ;;  %v11151_v49 = vld [vmem:[#allocation69_spill] sm:$0xff]  ;;  %v11152_v12 = vld [vmem:[#allocation60_spill] sm:$0xff] }
 0x3ad   :  { %v3672_v30 = vmax.f32 %v3588_v54, 0.0  ;;  %v2114_v24 = vpop.f32.mrb[143].mxu0  ;;  %v3241_v4 = vpop.f32.mrb[36].mxu1  ;;  %4482 = vmatprep.subr.bf16.mxu0 %v11144_v56  ;;  %v11155_v56 = vld [vmem:[#allocation61_spill] sm:$0xff] }
 0x3ae   :  { %v9693_v6 = vpack.c.bf16 %v3671_v52, %v3668_v40  ;;  %v7219_v13 = vadd.f32 %v3241_v4, %v11145_v47  ;;  %v3243_v31 = vpop.f32.mrb[37].mxu1 }
 0x3af   :  { %v9696_v48 = vpack.c.bf16 %v3672_v30, %v3669_v63  ;;  %v7220_v61 = vadd.f32 %v3243_v31, %v11146_v5  ;;  %v3245_v35 = vpop.f32.mrb[38].mxu1  ;;  %3371 = vmatmul.mubr.bf16.gmra.mrb[248].mxu0 %v11147_v62  ;;  %v11158_v62 = vld [vmem:[#allocation70_spill] sm:$0xff] }
 0x3b0   :  { %v3590_v11 = vadd.f32 %v7219_v13, %v9491_v53  ;;  %v7221_v16 = vadd.f32 %v3245_v35, %v11148_v36  ;;  %v3247_v33 = vpop.f32.mrb[39].mxu1  ;;  %6848 = vmatprep.mubr.msk.bf16.mxu0 %vm1803_vm7, %v11149_v41  ;;  %4483 = vmatpush1.bf16.msra.mxu0 %v11150_v44  ;;  %v11160_v41 = vld [vmem:[#allocation71_spill] sm:$0xff] }
 0x3b1   :  { %v3591_v43 = vadd.f32 %v7220_v61, %v9496_v19  ;;  %v7222_v54 = vadd.f32 %v3247_v33, %v11151_v49  ;;  %4484 = vmatprep.subr.bf16.mxu0 %v11152_v12  ;;  %v11156_v61 = vld [vmem:[#allocation62_spill] sm:$0xff] }
 0x3b2   :  { %v3593_v40 = vadd.f32 %v7221_v16, %v9491_v53  ;;  %v9709_v52 = vpop.f32.mrb[144].mxu0  ;;  %v3674_v30 = vmax.f32 %v3590_v11, 0.0  ;;  %v11161_v49 = vld [vmem:[#allocation34_spill] sm:$0xff] }
 0x3b3   :  { %11153 = vst [vmem:[#allocation24_spill] sm:$0xff] %v9709_v52  ;;  %v3594_v46 = vadd.f32 %v7222_v54, %v9496_v19  ;;  %v2119_v63 = vpop.f32.mrb[145].mxu0  ;;  %v3675_v47 = vmax.f32 %v3591_v43, 0.0  ;;  %v11162_v43 = vld [vmem:[#allocation72_spill] sm:$0xff] }
 0x3b4   :  { %v3677_v24 = vmax.f32 %v3593_v40, 0.0  ;;  %v9712_v4 = vpop.f32.mrb[146].mxu0  ;;  %4485 = vmatpush1.bf16.msra.mxu0 %v11155_v56  ;;  %v11164_v63 = vld [vmem:[#allocation63_spill] sm:$0xff]  ;;  %v11186_v52 = vld [vmem:[#allocation16_spill] sm:$0xff] }
 0x3b5   :  { %11154 = vst [vmem:[#allocation25_spill] sm:$0xff] %v9712_v4  ;;  %v3678_v13 = vmax.f32 %v3594_v46, 0.0  ;;  %v2122_v31 = vpop.f32.mrb[147].mxu0  ;;  %v3251_v5 = vpop.f32.mrb[40].mxu1  ;;  %4486 = vmatprep.subr.bf16.mxu0 %v11156_v61  ;;  %v11163_v46 = vld [vmem:[#allocation35_spill] sm:$0xff] }
 0x3b6   :  { %v9716_v35 = vpack.c.bf16 %v3677_v24, %v3674_v30  ;;  %v7223_v36 = vadd.f32 %v3251_v5, %v11158_v62  ;;  %v3253_v16 = vpop.f32.mrb[41].mxu1  ;;  %v11165_v24 = vld [vmem:[#allocation73_spill] sm:$0xff] }
 0x3b7   :  { %v9719_v33 = vpack.c.bf16 %v3678_v13, %v3675_v47  ;;  %v7224_v11 = vadd.f32 %v3253_v16, %v11160_v41  ;;  %v3255_v44 = vpop.f32.mrb[42].mxu1  ;;  %3379 = vmatmul.mubr.bf16.gmra.mrb[252].mxu0 %v11161_v49  ;;  %v11166_v47 = vld [vmem:[#allocation64_spill] sm:$0xff]  ;;  %v11169_v41 = vld [vmem:[#allocation66_spill] sm:$0xff] }
 0x3b8   :  { %11157 = vst [vmem:[#allocation39_spill] sm:$0xff] %v9716_v35  ;;  %v3596_v54 = vadd.f32 %v7223_v36, %v9491_v53  ;;  %v7225_v12 = vadd.f32 %v3255_v44, %v11162_v43  ;;  %v3257_v40 = vpop.f32.mrb[43].mxu1  ;;  %6849 = vmatprep.mubr.msk.bf16.mxu0 %vm1803_vm7, %v11163_v46  ;;  %4487 = vmatpush1.bf16.msra.mxu0 %v11164_v63  ;;  %v11171_v46 = vld [vmem:[#allocation74_spill] sm:$0xff] }
 0x3b9   :  { %11159 = vst [vmem:[#allocation40_spill] sm:$0xff] %v9719_v33  ;;  %v3597_v30 = vadd.f32 %v7224_v11, %v9496_v19  ;;  %v7226_v56 = vadd.f32 %v3257_v40, %v11165_v24  ;;  %4488 = vmatprep.subr.bf16.mxu0 %v11166_v47  ;;  %v11173_v47 = vld [vmem:[#allocation75_spill] sm:$0xff] }
 0x3ba   :  { %v3599_v13 = vadd.f32 %v7225_v12, %v9491_v53  ;;  %v9732_v31 = vpop.f32.mrb[148].mxu0  ;;  %v3680_v62 = vmax.f32 %v3596_v54, 0.0  ;;  %v11174_v54 = vld [vmem:[#allocation36_spill] sm:$0xff] }
 0x3bb   :  { %11167 = vst [vmem:[#allocation41_spill] sm:$0xff] %v9732_v31  ;;  %v3600_v5 = vadd.f32 %v7226_v56, %v9496_v19  ;;  %v2127_v61 = vpop.f32.mrb[149].mxu0  ;;  %v3681_v44 = vmax.f32 %v3597_v30, 0.0 }
 0x3bc   :  { %v3683_v36 = vmax.f32 %v3599_v13, 0.0  ;;  %v9735_v16 = vpop.f32.mrb[150].mxu0  ;;  %4489 = vmatpush1.bf16.msra.mxu0 %v11169_v41 }
 0x3bd   :  { %11168 = vst [vmem:[#allocation42_spill] sm:$0xff] %v9735_v16  ;;  %v3684_v49 = vmax.f32 %v3600_v5, 0.0  ;;  %v2130_v11 = vpop.f32.mrb[151].mxu0  ;;  %v3261_v43 = vpop.f32.mrb[44].mxu1  ;;  %v11175_v16 = vld [vmem:[#allocation76_spill] sm:$0xff]  ;;  %v11176_v5 = vld [vmem:[#allocation37_spill] sm:$0xff] }
 0x3be   :  { %v9738_v40 = vpack.c.bf16 %v3683_v36, %v3680_v62  ;;  %v7227_v63 = vadd.f32 %v3261_v43, %v11171_v46  ;;  %v3263_v12 = vpop.f32.mrb[45].mxu1  ;;  %v11177_v36 = vld [vmem:[#allocation77_spill] sm:$0xff] }
 0x3bf   :  { %v9741_v24 = vpack.c.bf16 %v3684_v49, %v3681_v44  ;;  %v7228_v56 = vadd.f32 %v3263_v12, %v11173_v47  ;;  %v3265_v61 = vpop.f32.mrb[46].mxu1  ;;  %3387 = vmatmul.mubr.bf16.gmra.mrb[0].mxu0 %v11174_v54 }
 0x3c0   :  { %11170 = vst [vmem:[#allocation49_spill] sm:$0xff] %v9738_v40  ;;  %v3602_v13 = vadd.f32 %v7227_v63, %v9491_v53  ;;  %v7229_v41 = vadd.f32 %v3265_v61, %v11175_v16  ;;  %v3267_v30 = vpop.f32.mrb[47].mxu1  ;;  %6850 = vmatprep.mubr.msk.bf16.mxu0 %vm1803_vm7, %v11176_v5  ;;  %v4075_v61 = vshll.u32 %v9738_v40, 16 }
 0x3c1   :  { %11172 = vst [vmem:[#allocation51_spill] sm:$0xff] %v9741_v24  ;;  %v3603_v62 = vadd.f32 %v7228_v56, %v9496_v19  ;;  %v7230_v11 = vadd.f32 %v3267_v30, %v11177_v36  ;;  %v4083_v12 = vshll.u32 %v9741_v24, 16 }
 0x3c2   :  { %v3605_v44 = vadd.f32 %v7229_v41, %v9491_v53  ;;  %v9752_v49 = vpop.f32.mrb[152].mxu0  ;;  %v3686_v63 = vmax.f32 %v3602_v13, 0.0  ;;  %v11181_v41 = vld [vmem:[#allocation78_spill] sm:$0xff]  ;;  %v11184_v13 = vld [vmem:[#allocation21_spill] sm:$0xff] }
 0x3c3   :  { %11178 = vst [vmem:[#allocation26_spill] sm:$0xff] %v9752_v49  ;;  %v3606_v43 = vadd.f32 %v7230_v11, %v9496_v19  ;;  %v2135_v46 = vpop.f32.mrb[153].mxu0  ;;  %v3687_v54 = vmax.f32 %v3603_v62, 0.0  ;;  %v11183_v11 = vld [vmem:[#allocation79_spill] sm:$0xff]  ;;  %v11185_v62 = vld [vmem:[#allocation80_spill] sm:$0xff] }
 0x3c4   :  { %v3689_v47 = vmax.f32 %v3605_v44, 0.0  ;;  %v9756_v16 = vpop.f32.mrb[154].mxu0  ;;  %v9766_v44 = vrot.slane %v4083_v12, 1  ;;  %v11187_v12 = vld [vmem:[#allocation81_spill] sm:$0xff] }
 0x3c5   :  { %11179 = vst [vmem:[#allocation27_spill] sm:$0xff] %v9756_v16  ;;  %v3690_v5 = vmax.f32 %v3606_v43, 0.0  ;;  %v2138_v56 = vpop.f32.mrb[155].mxu0  ;;  %v3271_v31 = vpop.f32.mrb[48].mxu1 }
 0x3c6   :  { %v9759_v30 = vpack.c.bf16 %v3689_v47, %v3686_v63  ;;  %v7231_v36 = vadd.f32 %v3271_v31, %v11181_v41  ;;  %v3273_v49 = vpop.f32.mrb[49].mxu1  ;;  %v9772_v63 = vrot.slane %v4075_v61, 1 }
 0x3c7   :  { %v9762_v35 = vpack.c.bf16 %v3690_v5, %v3687_v54  ;;  %v7232_v46 = vadd.f32 %v3273_v49, %v11183_v11  ;;  %v3275_v4 = vpop.f32.mrb[50].mxu1  ;;  %3395 = vmatmul.mubr.bf16.gmra.mrb[4].mxu0 %v11184_v13  ;;  %v7935_v49 = vld [vmem:[%s10942_s5 + $0x284] ss:$8 sps:$4 sm:$0xff]   ;;  %v4103_v5 = vshrl.u32 %v9741_v24, 16 }
 0x3c8   :  { %11180 = vst [vmem:[#allocation43_spill] sm:$0xff] %v9759_v30  ;;  %v3608_v16 = vadd.f32 %v7231_v36, %v9491_v53  ;;  %v7233_v43 = vadd.f32 %v3275_v4, %v11185_v62  ;;  %v3277_v56 = vpop.f32.mrb[51].mxu1  ;;  %6851 = vmatprep.mubr.msk.bf16.mxu0 %vm1803_vm7, %v11186_v52  ;;  %v4099_v31 = vshll.u32 %v9759_v30, 16  ;;  %v4095_v52 = vshrl.u32 %v9738_v40, 16  ;;  %4631 = vmatprep.subr.bf16.mxu1 %v7935_v49 }
 0x3c9   :  { %11182 = vst [vmem:[#allocation44_spill] sm:$0xff] %v9762_v35  ;;  %v3609_v47 = vadd.f32 %v7232_v46, %v9496_v19  ;;  %v7234_v54 = vadd.f32 %v3277_v56, %v11187_v12  ;;  %v4107_v4 = vshll.u32 %v9762_v35, 16  ;;  %v4105_v62 = vor.u32 %v4103_v5, %v9766_v44  ;;  %v7938_v5 = vld [vmem:[%s10942_s5 + $0x294] ss:$8 sps:$4 sm:$0xff]  }
 0x3ca   :  { %v3611_v41 = vadd.f32 %v7233_v43, %v9491_v53  ;;  %v9783_v36 = vpop.f32.mrb[156].mxu0  ;;  %v4101_v61 = vrot.slane %v4099_v31, 1  ;;  %v3692_v33 = vmax.f32 %v3608_v16, 0.0  ;;  %v4097_v24 = vor.u32 %v4095_v52, %v9772_v63  ;;  %v7933_v43 = vld [vmem:[%s10942_s5 + $0x280] ss:$8 sps:$4 sm:$0xff]  }
 0x3cb   :  { %11188 = vst [vmem:[#allocation45_spill] sm:$0xff] %v9783_v36  ;;  %v3612_v11 = vadd.f32 %v7234_v54, %v9496_v19  ;;  %v2143_v13 = vpop.f32.mrb[157].mxu0  ;;  %v4109_v46 = vrot.slane %v4107_v4, 1  ;;  %v3693_v36 = vmax.f32 %v3609_v47, 0.0 }
 0x3cc   :  { %v3695_v56 = vmax.f32 %v3611_v41, 0.0  ;;  %v9788_v12 = vpop.f32.mrb[158].mxu0  ;;  %v4102_v52 = vsel %vm196_vm4, %v4097_v24, %v4101_v61 }
 0x3cd   :  { %11189 = vst [vmem:[#allocation46_spill] sm:$0xff] %v9788_v12  ;;  %v3696_v40 = vmax.f32 %v3612_v11, 0.0  ;;  %v2146_v31 = vpop.f32.mrb[159].mxu0  ;;  %v3281_v49 = vpop.f32.mrb[52].mxu1  ;;  %v4110_v54 = vsel %vm196_vm4, %v4105_v62, %v4109_v46 }
 0x3ce   :  { %v9798_v16 = vpack.c.bf16 %v3695_v56, %v3692_v33  ;;  %v7235_v4 = vadd.f32 %v3281_v49, %v9508_v23  ;;  %v3283_v41 = vpop.f32.mrb[53].mxu1  ;;  %4590 = vmatprep.mubr.bf16.mxu1 %v4110_v54  ;;  %v11192_v31 = vld [vmem:[#allocation17_spill] sm:$0xff]  ;;  %v11193_v56 = vld [vmem:[#allocation18_spill] sm:$0xff] }
 0x3cf   :  { %v9802_v13 = vpack.c.bf16 %v3696_v40, %v3693_v36  ;;  %v7236_v47 = vadd.f32 %v3283_v41, %v9511_v7  ;;  %v3285_v11 = vpop.f32.mrb[54].mxu1  ;;  %3403 = vmatmul.mubr.bf16.gmra.mrb[8].mxu0 %v11192_v31  ;;  %4591 = vmatmul.mubr.bf16.vlgmr.msra.gmra.mrb[56].mxu1 %v4102_v52  ;;  %v7936_v40 = vld [vmem:[%s10942_s5 + $0x290] ss:$8 sps:$4 sm:$0xff]   ;;  %v4127_v36 = vshrl.u32 %v9762_v35, 16 }
 0x3d0   :  { %11190 = vst [vmem:[#allocation55_spill] sm:$0xff] %v9798_v16  ;;  %v3614_v62 = vadd.f32 %v7235_v4, %v9491_v53  ;;  %v7237_v12 = vadd.f32 %v3285_v11, %v9513_v14  ;;  %v3287_v33 = vpop.f32.mrb[55].mxu1  ;;  %6852 = vmatprep.mubr.msk.bf16.mxu0 %vm1803_vm7, %v11193_v56  ;;  %v4123_v23 = vshll.u32 %v9798_v16, 16  ;;  %4632 = vmatpush1.bf16.msra.mxu1 %v7933_v43  ;;  %v7941_v14 = vld [vmem:[%s10942_s5 + $0x2a4] ss:$8 sps:$4 sm:$0xff]   ;;  %v4119_v4 = vshrl.u32 %v9759_v30, 16 }
 0x3d1   :  { %11191 = vst [vmem:[#allocation57_spill] sm:$0xff] %v9802_v13  ;;  %v3615_v7 = vadd.f32 %v7236_v47, %v9496_v19  ;;  %v7238_v24 = vadd.f32 %v3287_v33, %v9515_v34  ;;  %v4131_v49 = vshll.u32 %v9802_v13, 16  ;;  %4633 = vmatprep.subr.bf16.mxu1 %v7938_v5  ;;  %v4129_v34 = vor.u32 %v4127_v36, %v4109_v46  ;;  %v7942_v36 = vld [vmem:[%s10942_s5 + $0x2b0] ss:$8 sps:$4 sm:$0xff]  }
 0x3d2   :  { %v3617_v54 = vadd.f32 %v7237_v12, %v9491_v53  ;;  %v9822_v43 = vpop.f32.mrb[160].mxu0  ;;  %v4125_v41 = vrot.slane %v4123_v23, 1  ;;  %v3698_v31 = vmax.f32 %v3614_v62, 0.0  ;;  %v4121_v5 = vor.u32 %v4119_v4, %v4101_v61  ;;  %v7939_v53 = vld [vmem:[%s10942_s5 + $0x2a0] ss:$8 sps:$4 sm:$0xff]  }
 0x3d3   :  { %11194 = vst [vmem:[#allocation28_spill] sm:$0xff] %v9822_v43  ;;  %v3618_v52 = vadd.f32 %v7238_v24, %v9496_v19  ;;  %v2151_v47 = vpop.f32.mrb[161].mxu0  ;;  %v4133_v11 = vrot.slane %v4131_v49, 1  ;;  %v3699_v12 = vmax.f32 %v3615_v7, 0.0  ;;  %v7944_v19 = vld [vmem:[%s10942_s5 + $0x2b4] ss:$8 sps:$4 sm:$0xff]  }
 0x3d4   :  { %v3701_v33 = vmax.f32 %v3617_v54, 0.0  ;;  %v9826_v56 = vpop.f32.mrb[162].mxu0  ;;  %4634 = vmatpush1.bf16.msra.mxu1 %v7936_v40  ;;  %v4126_v61 = vsel %vm196_vm4, %v4121_v5, %v4125_v41  ;;  %v11197_v40 = vld [vmem:[#allocation20_spill] sm:$0xff]  ;;  %v11198_v7 = vld [vmem:[#allocation22_spill] sm:$0xff]  ;;  %v4151_v49 = vshrl.u32 %v9802_v13, 16 }
 0x3d5   :  { %v3702_v35 = vmax.f32 %v3618_v52, 0.0  ;;  %v2154_v43 = vpop.f32.mrb[163].mxu0  ;;  %v4134_v23 = vsel %vm196_vm4, %v4129_v34, %v4133_v11  ;;  %4635 = vmatprep.subr.bf16.mxu1 %v7941_v14 }
 0x3d6   :  { %v9835_v46 = vpack.c.bf16 %v3701_v33, %v3698_v31  ;;  %4600 = vmatprep.mubr.bf16.mxu1 %v4134_v23  ;;  %v4143_v43 = vshrl.u32 %v9798_v16, 16  ;;  %v4153_v47 = vor.u32 %v4151_v49, %v4133_v11  ;;  %v7948_v49 = vld [vmem:[%s10942_s5 + $0x2d0] ss:$8 sps:$4 sm:$0xff]  }
 0x3d7   :  { %v9838_v62 = vpack.c.bf16 %v3702_v35, %v3699_v12  ;;  %3411 = vmatmul.mubr.bf16.gmra.mrb[12].mxu0 %v11197_v40  ;;  %4601 = vmatmul.mubr.bf16.gmra.mrb[60].mxu1 %v4126_v61  ;;  %v7947_v35 = vld [vmem:[%s10942_s5 + $0x2c4] ss:$8 sps:$4 sm:$0xff]   ;;  %v7945_v61 = vld [vmem:[%s10942_s5 + $0x2c0] ss:$8 sps:$4 sm:$0xff]   ;;  %v7950_v40 = vld [vmem:[%s10942_s5 + $0x2d4] ss:$8 sps:$4 sm:$0xff]  }
 0x3d8   :  { %11195 = vst [vmem:[#allocation29_spill] sm:$0xff] %v9835_v46  ;;  %6853 = vmatprep.mubr.msk.bf16.mxu0 %vm1803_vm7, %v11198_v7  ;;  %v4147_v24 = vshll.u32 %v9835_v46, 16  ;;  %4636 = vmatpush1.bf16.msra.mxu1 %v7939_v53  ;;  %v4145_v5 = vor.u32 %v4143_v43, %v4125_v41  ;;  %v11199_v41 = vld [vmem:[#allocation23_spill] sm:$0xff]  ;;  %v3863_v7 = vshll.u32 %v9539_v29, 16 }
 0x3d9   :  { %11196 = vst [vmem:[#allocation47_spill] sm:$0xff] %v9838_v62  ;;  %v4155_v14 = vshll.u32 %v9838_v62, 16  ;;  %4637 = vmatprep.subr.bf16.mxu1 %v7944_v19  ;;  %v4170_v31 = vshrl.u32 %v9838_v62, 16  ;;  %v3858_v19 = vshll.u32 %v9520_v32, 16  ;;  %v11207_v62 = vld [vmem:[#allocation39_spill] sm:$0xff] }
 0x3da   :  { %v9852_v54 = vpop.f32.mrb[164].mxu0  ;;  %v4149_v4 = vrot.slane %v4147_v24, 1  ;;  %v11200_v24 = vld [vmem:[#allocation19_spill] sm:$0xff] }
 0x3db   :  { %v2159_v52 = vpop.f32.mrb[165].mxu0  ;;  %v4157_v34 = vrot.slane %v4155_v14, 1 }
 0x3dc   :  { %v9856_v33 = vpop.f32.mrb[166].mxu0  ;;  %4638 = vmatpush1.bf16.msra.mxu1 %v7942_v36  ;;  %v4150_v11 = vsel %vm196_vm4, %v4145_v5, %v4149_v4  ;;  %v3860_v36 = vrot.slane %v3858_v19, 1  ;;  %v11201_v5 = vld [vmem:[#allocation82_spill] sm:$0xff] }
 0x3dd   :  { %v2162_v53 = vpop.f32.mrb[167].mxu0  ;;  %v4158_v12 = vsel %vm196_vm4, %v4153_v47, %v4157_v34  ;;  %v4172_v23 = vor.u32 %v4170_v31, %v4157_v34  ;;  %4639 = vmatprep.subr.bf16.mxu1 %v7947_v35  ;;  %v7953_v35 = vld [vmem:[%s10942_s5 + $0x2e4] ss:$8 sps:$4 sm:$0xff]   ;;  %v4167_v47 = vshrl.u32 %v9835_v46, 16  ;;  %v3856_v34 = vshrl.u32 %v9520_v32, 16 }
 0x3de   :  { %4610 = vmatprep.mubr.bf16.mxu1 %v4158_v12  ;;  %v3865_v31 = vrot.slane %v3863_v7, 1  ;;  %v3846_v53 = vshll.u32 %v11201_v5, 16  ;;  %v11202_v7 = vld [vmem:[#allocation38_spill] sm:$0xff] }
 0x3df   :  { %3419 = vmatmul.mubr.bf16.gmra.mrb[16].mxu0 %v11199_v41  ;;  %4611 = vmatmul.mubr.bf16.gmra.mrb[64].mxu1 %v4150_v11  ;;  %v3861_v11 = vor.u32 %v3860_v36, %v3856_v34  ;;  %v7956_v41 = vld [vmem:[%s10942_s5 + $0x2f4] ss:$8 sps:$4 sm:$0xff]   ;;  %v11203_v36 = vmov 0  }
 0x3e0   :  { %6854 = vmatprep.mubr.msk.bf16.mxu0 %vm1803_vm7, %v11200_v24  ;;  %4620 = vmatprep.mubr.bf16.mxu1 %v4172_v23  ;;  %v3848_v24 = vrot.slane %v3846_v53, 1 }
 0x3e1   :  { %4640 = vmatpush1.bf16.msra.mxu1 %v7945_v61  ;;  %v4169_v61 = vor.u32 %v4167_v47, %v4149_v4  ;;  %v3891_v4 = vshll.u32 %v9558_v18, 16 }
 0x3e2   :  { %v2607_v14 = vpop.f32.mrb[168].mxu0  ;;  %4641 = vmatprep.subr.bf16.mxu1 %v7950_v40  ;;  %v3851_v40 = vshll.u32 %v9536_v20, 16 }
 0x3e3   :  { %v9878_v43 = vadd.f32 %v2607_v14, %v9531_v10  ;;  %v2609_v52 = vpop.f32.mrb[169].mxu0  ;;  %v7951_v10 = vld [vmem:[%s10942_s5 + $0x2e0] ss:$8 sps:$4 sm:$0xff]   ;;  %v3844_v14 = vshrl.u32 %v11201_v5, 16  ;;  %v3893_v53 = vrot.slane %v3891_v4, 1 }
 0x3e4   :  { %v2610_v12 = vpop.f32.mrb[170].mxu0  ;;  %v7959_v4 = vld [vmem:[%s10942_s5 + $0x4] ss:$8 sps:$4 sm:$0xff]  }
 0x3e5   :  { %v9884_v23 = vadd.f32 %v2610_v12, %v9534_v21  ;;  %v2612_v19 = vpop.f32.mrb[171].mxu0  ;;  %4642 = vmatpush1.bf16.msra.mxu1 %v7948_v49  ;;  %v3866_v21 = vsel %vm196_vm4, %v3861_v11, %v3865_v31  ;;  %v7954_v49 = vld [vmem:[%s10942_s5 + $0x2f0] ss:$8 sps:$4 sm:$0xff]   ;;  %v3887_v12 = vshrl.u32 %v9539_v29, 16 }
 0x3e6   :  { %4643 = vmatprep.subr.bf16.mxu1 %v7953_v35  ;;  %v3853_v35 = vrot.slane %v3851_v40, 1  ;;  %v3849_v19 = vor.u32 %v3848_v24, %v3844_v14  ;;  %v3883_v40 = vshll.u32 %v9555_v39, 16 }
 0x3e7   :  { %3427 = vmatmul.mubr.bf16.gmra.mrb[20].mxu0 %v11202_v7  ;;  %4621 = vmatmul.mubr.bf16.gmra.mrb[68].mxu1 %v4169_v61  ;;  %v3889_v7 = vor.u32 %v3887_v12, %v3865_v31 }
 0x3e8   :  { %4490 = vmatprep.mubr.bf16.mxu0 %v3866_v21  ;;  %4663 = vmatprep.mubr.bf16.mxu1 %v11203_v36  ;;  %v3854_v21 = vsel %vm196_vm4, %v3849_v19, %v3853_v35  ;;  %v3885_v24 = vrot.slane %v3883_v40, 1 }
 0x3e9   :  { %4644 = vmatpush1.bf16.msra.mxu1 %v7951_v10 }
 0x3ea   :  { %v2615_v52 = vpop.f32.mrb[172].mxu0  ;;  %4645 = vmatprep.subr.bf16.mxu1 %v7956_v41  ;;  %v3915_v41 = vshll.u32 %v9581_v57, 16 }
 0x3eb   :  { %v9902_v47 = vadd.f32 %v2615_v52, %v9550_v37  ;;  %v2617_v34 = vpop.f32.mrb[173].mxu0  ;;  %v3894_v37 = vsel %vm196_vm4, %v3889_v7, %v3893_v53  ;;  %v3911_v52 = vshrl.u32 %v9558_v18, 16 }
 0x3ec   :  { %v2618_v61 = vpop.f32.mrb[174].mxu0  ;;  %v3917_v34 = vrot.slane %v3915_v41, 1 }
 0x3ed   :  { %v9906_v11 = vadd.f32 %v2618_v61, %v9553_v26  ;;  %v2620_v10 = vpop.f32.mrb[175].mxu0  ;;  %4646 = vmatpush1.bf16.msra.mxu1 %v7954_v49  ;;  %v3879_v26 = vshrl.u32 %v9536_v20, 16  ;;  %v3913_v7 = vor.u32 %v3911_v52, %v3893_v53  ;;  %v3935_v53 = vshrl.u32 %v9581_v57, 16 }
 0x3ee   :  { %5044 = vmatprep.subr.bf16.mxu1 %v7959_v4  ;;  %v3903_v4 = vshrl.u32 %v9555_v39, 16 }
 0x3ef   :  { %4491 = vmatmul.mubr.bf16.vlgmr.msra.gmra.mrb[24].mxu0 %v3854_v21  ;;  %v3881_v12 = vor.u32 %v3879_v26, %v3853_v35  ;;  %v3907_v21 = vshll.u32 %v9578_v27, 16  ;;  %v3918_v40 = vsel %vm196_vm4, %v3913_v7, %v3917_v34  ;;  %v3931_v7 = vshll.u32 %v9601_v42, 16 }
 0x3f0   :  { %4500 = vmatprep.mubr.bf16.mxu0 %v3894_v37 }
 0x3f1   :  { %v3886_v37 = vsel %vm196_vm4, %v3881_v12, %v3885_v24  ;;  %v3909_v41 = vrot.slane %v3907_v21, 1 }
 0x3f2   :  { %v2623_v31 = vpop.f32.mrb[176].mxu0 }
 0x3f3   :  { %v9917_v49 = vadd.f32 %v2623_v31, %v9571_v25  ;;  %v2625_v14 = vpop.f32.mrb[177].mxu0  ;;  %v3939_v25 = vshll.u32 %v9604_v60, 16 }
 0x3f4   :  { %v2626_v19 = vpop.f32.mrb[178].mxu0  ;;  %v3905_v14 = vor.u32 %v3903_v4, %v3885_v24 }
 0x3f5   :  { %v9921_v61 = vadd.f32 %v2626_v19, %v9574_v38  ;;  %v2628_v10 = vpop.f32.mrb[179].mxu0  ;;  %v3941_v31 = vrot.slane %v3939_v25, 1  ;;  %v3933_v25 = vrot.slane %v3931_v7, 1 }
 0x3f6   :  { %v3937_v10 = vor.u32 %v3935_v53, %v3917_v34  ;;  %v3959_v34 = vshrl.u32 %v9604_v60, 16 }
 0x3f7   :  { %4501 = vmatmul.mubr.bf16.gmra.mrb[28].mxu0 %v3886_v37  ;;  %v3910_v37 = vsel %vm196_vm4, %v3905_v14, %v3909_v41 }
 0x3f8   :  { %4510 = vmatprep.mubr.bf16.mxu0 %v3918_v40  ;;  %v3942_v21 = vsel %vm196_vm4, %v3937_v10, %v3941_v31  ;;  %v3927_v40 = vshrl.u32 %v9578_v27, 16  ;;  %v3955_v10 = vshll.u32 %v9624_v17, 16 }
 0x3fa   :  { %v2631_v35 = vpop.f32.mrb[180].mxu0 }
 0x3fb   :  { %v9929_v26 = vadd.f32 %v2631_v35, %v9594_v2  ;;  %v2633_v38 = vpop.f32.mrb[181].mxu0  ;;  %v3963_v2 = vshll.u32 %v9627_v15, 16 }
 0x3fc   :  { %v2634_v52 = vpop.f32.mrb[182].mxu0  ;;  %v3929_v38 = vor.u32 %v3927_v40, %v3909_v41 }
 0x3fd   :  { %v9933_v12 = vadd.f32 %v2634_v52, %v9597_v55  ;;  %v2636_v19 = vpop.f32.mrb[183].mxu0  ;;  %v3965_v35 = vrot.slane %v3963_v2, 1  ;;  %v3957_v2 = vrot.slane %v3955_v10, 1 }
 0x3fe   :  { %v3961_v19 = vor.u32 %v3959_v34, %v3941_v31  ;;  %v3983_v31 = vshrl.u32 %v9627_v15, 16 }
 0x3ff   :  { %4511 = vmatmul.mubr.bf16.gmra.mrb[32].mxu0 %v3910_v37  ;;  %v3934_v37 = vsel %vm196_vm4, %v3929_v38, %v3933_v25 }
 0x400   :  { %4520 = vmatprep.mubr.bf16.mxu0 %v3942_v21  ;;  %v3966_v7 = vsel %vm196_vm4, %v3961_v19, %v3965_v35  ;;  %v3951_v21 = vshrl.u32 %v9601_v42, 16  ;;  %v3979_v19 = vshll.u32 %v9647_v0, 16 }
 0x402   :  { %v2639_v24 = vpop.f32.mrb[184].mxu0 }
 0x403   :  { %v9941_v4 = vadd.f32 %v2639_v24, %v9617_v9  ;;  %v2641_v55 = vpop.f32.mrb[185].mxu0  ;;  %v3987_v9 = vshll.u32 %v9650_v22, 16 }
 0x404   :  { %v2642_v53 = vpop.f32.mrb[186].mxu0  ;;  %v3953_v55 = vor.u32 %v3951_v21, %v3933_v25 }
 0x405   :  { %v9945_v14 = vadd.f32 %v2642_v53, %v9620_v50  ;;  %v2644_v52 = vpop.f32.mrb[187].mxu0  ;;  %v3989_v24 = vrot.slane %v3987_v9, 1  ;;  %v3981_v9 = vrot.slane %v3979_v19, 1 }
 0x406   :  { %v3985_v52 = vor.u32 %v3983_v31, %v3965_v35  ;;  %v4007_v35 = vshrl.u32 %v9650_v22, 16 }
 0x407   :  { %4521 = vmatmul.mubr.bf16.gmra.mrb[36].mxu0 %v3934_v37  ;;  %v3958_v37 = vsel %vm196_vm4, %v3953_v55, %v3957_v2 }
 0x408   :  { %4530 = vmatprep.mubr.bf16.mxu0 %v3966_v7  ;;  %v3990_v10 = vsel %vm196_vm4, %v3985_v52, %v3989_v24  ;;  %v3975_v7 = vshrl.u32 %v9624_v17, 16  ;;  %v4003_v52 = vshll.u32 %v9670_v3, 16 }
 0x40a   :  { %v2647_v41 = vpop.f32.mrb[188].mxu0 }
 0x40b   :  { %v9953_v40 = vadd.f32 %v2647_v41, %v9640_v45  ;;  %v2649_v50 = vpop.f32.mrb[189].mxu0  ;;  %v4011_v45 = vshll.u32 %v9673_v51, 16 }
 0x40c   :  { %v2650_v34 = vpop.f32.mrb[190].mxu0  ;;  %v3977_v50 = vor.u32 %v3975_v7, %v3957_v2 }
 0x40d   :  { %v9957_v38 = vadd.f32 %v2650_v34, %v9643_v8  ;;  %v2652_v53 = vpop.f32.mrb[191].mxu0  ;;  %v4013_v41 = vrot.slane %v4011_v45, 1  ;;  %v4005_v45 = vrot.slane %v4003_v52, 1 }
 0x40e   :  { %v4009_v53 = vor.u32 %v4007_v35, %v3989_v24  ;;  %v4031_v24 = vshrl.u32 %v9673_v51, 16 }
 0x40f   :  { %4531 = vmatmul.mubr.bf16.gmra.mrb[40].mxu0 %v3958_v37  ;;  %v3982_v37 = vsel %vm196_vm4, %v3977_v50, %v3981_v9 }
 0x410   :  { %4540 = vmatprep.mubr.bf16.mxu0 %v3990_v10  ;;  %v4014_v19 = vsel %vm196_vm4, %v4009_v53, %v4013_v41  ;;  %v3999_v10 = vshrl.u32 %v9647_v0, 16  ;;  %v4027_v53 = vshll.u32 %v9693_v6, 16 }
 0x412   :  { %v2655_v25 = vpop.f32.mrb[192].mxu0 }
 0x413   :  { %v9965_v21 = vadd.f32 %v2655_v25, %v9663_v1  ;;  %v2657_v8 = vpop.f32.mrb[193].mxu0  ;;  %v4035_v1 = vshll.u32 %v9696_v48, 16 }
 0x414   :  { %v2658_v31 = vpop.f32.mrb[194].mxu0  ;;  %v4001_v8 = vor.u32 %v3999_v10, %v3981_v9  ;;  %v11205_v10 = vld [vmem:[#allocation24_spill] sm:$0xff] }
 0x415   :  { %v9969_v55 = vadd.f32 %v2658_v31, %v9666_v28  ;;  %v2660_v34 = vpop.f32.mrb[195].mxu0  ;;  %v4037_v25 = vrot.slane %v4035_v1, 1  ;;  %v4029_v1 = vrot.slane %v4027_v53, 1 }
 0x416   :  { %v4033_v34 = vor.u32 %v4031_v24, %v4013_v41  ;;  %v4055_v41 = vshrl.u32 %v9696_v48, 16 }
 0x417   :  { %4541 = vmatmul.mubr.bf16.gmra.mrb[44].mxu0 %v3982_v37  ;;  %v4006_v37 = vsel %vm196_vm4, %v4001_v8, %v4005_v45  ;;  %v11206_v8 = vld [vmem:[#allocation25_spill] sm:$0xff] }
 0x418   :  { %4550 = vmatprep.mubr.bf16.mxu0 %v4014_v19  ;;  %v4038_v52 = vsel %vm196_vm4, %v4033_v34, %v4037_v25  ;;  %v4057_v46 = vor.u32 %v4055_v41, %v4037_v25  ;;  %v11209_v41 = vld [vmem:[#allocation42_spill] sm:$0xff] }
 0x41a   :  { %v2663_v2 = vpop.f32.mrb[196].mxu0 }
 0x41b   :  { %v9977_v7 = vadd.f32 %v2663_v2, %v9686_v58  ;;  %v2665_v28 = vpop.f32.mrb[197].mxu0  ;;  %v11204_v58 = vld [vmem:[#allocation40_spill] sm:$0xff]  ;;  %v4023_v2 = vshrl.u32 %v9670_v3, 16 }
 0x41c   :  { %v2666_v35 = vpop.f32.mrb[198].mxu0  ;;  %v4059_v19 = vshll.u32 %v11204_v58, 16 }
 0x41d   :  { %v9981_v50 = vadd.f32 %v2666_v35, %v9689_v59  ;;  %v2668_v31 = vpop.f32.mrb[199].mxu0  ;;  %v4025_v35 = vor.u32 %v4023_v2, %v4005_v45 }
 0x41e   :  { %v4061_v24 = vrot.slane %v4059_v19, 1  ;;  %v11208_v19 = vld [vmem:[#allocation41_spill] sm:$0xff] }
 0x41f   :  { %4551 = vmatmul.mubr.bf16.gmra.mrb[48].mxu0 %v4006_v37  ;;  %v4030_v16 = vsel %vm196_vm4, %v4025_v35, %v4029_v1 }
 0x420   :  { %4560 = vmatprep.mubr.bf16.mxu0 %v4038_v52  ;;  %v4051_v52 = vshll.u32 %v11207_v62, 16  ;;  %v4062_v53 = vsel %vm196_vm4, %v4057_v46, %v4061_v24 }
 0x422   :  { %v2671_v9 = vpop.f32.mrb[200].mxu0 }
 0x423   :  { %v9989_v28 = vadd.f32 %v2671_v9, %v11205_v10  ;;  %v2673_v59 = vpop.f32.mrb[201].mxu0  ;;  %v4047_v9 = vshrl.u32 %v9693_v6, 16  ;;  %v4053_v10 = vrot.slane %v4051_v52, 1 }
 0x424   :  { %v2674_v31 = vpop.f32.mrb[202].mxu0 }
 0x425   :  { %v9993_v37 = vadd.f32 %v2674_v31, %v11206_v8  ;;  %v2676_v34 = vpop.f32.mrb[203].mxu0  ;;  %v4079_v31 = vshrl.u32 %v11204_v58, 16  ;;  %v4049_v8 = vor.u32 %v4047_v9, %v4029_v1 }
 0x427   :  { %4561 = vmatmul.mubr.bf16.gmra.mrb[52].mxu0 %v4030_v16  ;;  %v4081_v16 = vor.u32 %v4079_v31, %v4061_v24  ;;  %v4054_v46 = vsel %vm196_vm4, %v4049_v8, %v4053_v10 }
 0x428   :  { %4570 = vmatprep.mubr.bf16.mxu0 %v4062_v53  ;;  %v4071_v53 = vshrl.u32 %v11207_v62, 16 }
 0x429   :  { %v4086_v52 = vsel %vm196_vm4, %v4081_v16, %v9766_v44  ;;  %v11212_v44 = vld [vmem:[#allocation45_spill] sm:$0xff] }
 0x42a   :  { %v2679_v59 = vpop.f32.mrb[204].mxu0  ;;  %v4073_v9 = vor.u32 %v4071_v53, %v4053_v10  ;;  %v11214_v53 = vld [vmem:[#allocation28_spill] sm:$0xff] }
 0x42b   :  { %v10000_v45 = vadd.f32 %v2679_v59, %v11208_v19  ;;  %v2681_v2 = vpop.f32.mrb[205].mxu0  ;;  %v11210_v19 = vld [vmem:[#allocation26_spill] sm:$0xff] }
 0x42c   :  { %v2682_v25 = vpop.f32.mrb[206].mxu0  ;;  %v4078_v31 = vsel %vm196_vm4, %v4073_v9, %v9772_v63 }
 0x42d   :  { %v10004_v34 = vadd.f32 %v2682_v25, %v11209_v41  ;;  %v2684_v35 = vpop.f32.mrb[207].mxu0  ;;  %v11211_v25 = vld [vmem:[#allocation27_spill] sm:$0xff] }
 0x42f   :  { %4571 = vmatmul.mubr.bf16.gmra.mrb[112].mxu0 %v4054_v46 }
 0x430   :  { %4580 = vmatprep.mubr.bf16.mxu0 %v4086_v52  ;;  %v11213_v52 = vld [vmem:[#allocation46_spill] sm:$0xff] }
 0x432   :  { %v2687_v59 = vpop.f32.mrb[208].mxu0 }
 0x433   :  { %v10011_v2 = vadd.f32 %v2687_v59, %v11210_v19  ;;  %v2689_v1 = vpop.f32.mrb[209].mxu0 }
 0x434   :  { %v2690_v13 = vpop.f32.mrb[210].mxu0 }
 0x435   :  { %v10014_v41 = vadd.f32 %v2690_v13, %v11211_v25  ;;  %v2692_v24 = vpop.f32.mrb[211].mxu0 }
 0x437   :  { %4581 = vmatmul.mubr.bf16.gmra.mrb[116].mxu0 %v4078_v31 }
 0x43a   :  { %v2695_v8 = vpop.f32.mrb[212].mxu0 }
 0x43b   :  { %v10019_v35 = vadd.f32 %v2695_v8, %v11212_v44  ;;  %v2697_v16 = vpop.f32.mrb[213].mxu0 }
 0x43c   :  { %v2698_v46 = vpop.f32.mrb[214].mxu0 }
 0x43d   :  { %v10022_v59 = vadd.f32 %v2698_v46, %v11213_v52  ;;  %v2700_v19 = vpop.f32.mrb[215].mxu0  ;;  %v11215_v52 = vld [vmem:[#allocation13_spill] sm:$0xff] }
 0x43e   :  { %v3531_v19 = vsub.s32 2, %v11215_v52 }
 0x442   :  { %v2703_v10 = vpop.f32.mrb[216].mxu0 }
 0x443   :  { %v10025_v1 = vadd.f32 %v2703_v10, %v11214_v53  ;;  %v2705_v13 = vpop.f32.mrb[217].mxu0  ;;  %v8102_v10 = vld [vmem:[#allocation7] sm:$0x7] }
 0x444   :  { %v2706_v25 = vpop.f32.mrb[218].mxu0  ;;  %v10037_v53 = vrot.slane %v8102_v10, %v3531_v19 }
 0x445   :  { %v10028_v24 = vadd.f32 %v2706_v25, %v9826_v56  ;;  %v2708_v63 = vpop.f32.mrb[219].mxu0 }
 0x44a   :  { %v2711_v9 = vpop.f32.mrb[220].mxu0 }
 0x44b   :  { %v10031_v31 = vadd.f32 %v2711_v9, %v9852_v54  ;;  %v2713_v8 = vpop.f32.mrb[221].mxu0 }
 0x44c   :  { %v2714_v44 = vpop.f32.mrb[222].mxu0 }
 0x44d   :  { %v10034_v16 = vadd.f32 %v2714_v44, %v9856_v33  ;;  %v2716_v46 = vpop.f32.mrb[223].mxu0 }
 0x452   :  { %v3324_v13 = vpop.f32.mrb[224].mxu0 }
 0x453   :  { %v3437_v56 = vadd.f32 %v3324_v13, %v9878_v43  ;;  %v3326_v25 = vpop.f32.mrb[225].mxu0 }
 0x454   :  { %v3327_v63 = vpop.f32.mrb[226].mxu0 }
 0x455   :  { %v3538_v30 = vadd.f32 %v10037_v53, %v3437_v56  ;;  %v3440_v54 = vadd.f32 %v3327_v63, %v9884_v23  ;;  %v3329_v9 = vpop.f32.mrb[227].mxu0 }
 0x457   :  { %v3541_v8 = vadd.f32 %v10037_v53, %v3440_v54  ;;  %v3622_v33 = vmax.f32 %v3538_v30, 0.0 }
 0x459   :  { %v3625_v44 = vmax.f32 %v3541_v8, 0.0 }
 0x45a   :  { %v3332_v46 = vpop.f32.mrb[228].mxu0 }
 0x45b   :  { %v10043_v62 = vpack.c.bf16 %v3625_v44, %v3622_v33  ;;  %v3443_v52 = vadd.f32 %v3332_v46, %v9902_v47  ;;  %v3334_v19 = vpop.f32.mrb[229].mxu0 }
 0x45c   :  { %v3335_v10 = vpop.f32.mrb[230].mxu0 }
 0x45d   :  { %v3544_v43 = vadd.f32 %v10037_v53, %v3443_v52  ;;  %v3446_v13 = vadd.f32 %v3335_v10, %v9906_v11  ;;  %v3337_v25 = vpop.f32.mrb[231].mxu0  ;;  %v3870_v23 = vshll.u32 %v10043_v62, 16  ;;  %v3868_v19 = vshrl.u32 %v10043_v62, 16 }
 0x45f   :  { %v3547_v56 = vadd.f32 %v10037_v53, %v3446_v13  ;;  %v3628_v63 = vmax.f32 %v3544_v43, 0.0  ;;  %v3872_v47 = vrot.slane %v3870_v23, 1 }
 0x461   :  { %v3631_v54 = vmax.f32 %v3547_v56, 0.0  ;;  %v3873_v13 = vor.u32 %v3872_v47, %v3868_v19  ;;  %v7962_v56 = vld [vmem:[%s10942_s5 + $0x14] ss:$8 sps:$4 sm:$0xff]   ;;  %v7960_v47 = vld [vmem:[%s10942_s5 + $0x10] ss:$8 sps:$4 sm:$0xff]  }
 0x462   :  { %v3340_v30 = vpop.f32.mrb[232].mxu0 }
 0x463   :  { %v10050_v9 = vpack.c.bf16 %v3631_v54, %v3628_v63  ;;  %v3449_v8 = vadd.f32 %v3340_v30, %v9917_v49  ;;  %v3342_v33 = vpop.f32.mrb[233].mxu0  ;;  %v7957_v49 = vld [vmem:[%s10942_s5] ss:$8 sps:$4 sm:$0xff]  }
 0x464   :  { %v3343_v44 = vpop.f32.mrb[234].mxu0 }
 0x465   :  { %v3550_v46 = vadd.f32 %v10037_v53, %v3449_v8  ;;  %v3452_v52 = vadd.f32 %v3343_v44, %v9921_v61  ;;  %v3345_v11 = vpop.f32.mrb[235].mxu0  ;;  %v3875_v10 = vshll.u32 %v10050_v9, 16 }
 0x467   :  { %v3553_v43 = vadd.f32 %v10037_v53, %v3452_v52  ;;  %v3877_v25 = vrot.slane %v3875_v10, 1  ;;  %v3634_v23 = vmax.f32 %v3550_v46, 0.0  ;;  %v7965_v46 = vld [vmem:[%s10942_s5 + $0x24] ss:$8 sps:$4 sm:$0xff]  }
 0x469   :  { %v3637_v63 = vmax.f32 %v3553_v43, 0.0  ;;  %v3878_v61 = vsel %vm196_vm4, %v3873_v13, %v3877_v25 }
 0x46a   :  { %v3348_v54 = vpop.f32.mrb[236].mxu0  ;;  %4664 = vmatmul.mubr.bf16.vlgmr.msra.gmra.mrb[72].mxu1 %v3878_v61 }
 0x46b   :  { %v10065_v30 = vpack.c.bf16 %v3637_v63, %v3634_v23  ;;  %v3455_v8 = vadd.f32 %v3348_v54, %v9929_v26  ;;  %v3350_v33 = vpop.f32.mrb[237].mxu0  ;;  %5045 = vmatpush1.bf16.msra.mxu1 %v7957_v49  ;;  %4673 = vmatprep.mubr.bf16.mxu1 %v11203_v36  ;;  %v3895_v26 = vshrl.u32 %v10050_v9, 16  ;;  %v7968_v23 = vld [vmem:[%s10942_s5 + $0x34] ss:$8 sps:$4 sm:$0xff]  }
 0x46c   :  { %v3351_v44 = vpop.f32.mrb[238].mxu0  ;;  %5046 = vmatprep.subr.bf16.mxu1 %v7962_v56  ;;  %v7963_v56 = vld [vmem:[%s10942_s5 + $0x20] ss:$8 sps:$4 sm:$0xff]  }
 0x46d   :  { %v3556_v52 = vadd.f32 %v10037_v53, %v3455_v8  ;;  %v3458_v11 = vadd.f32 %v3351_v44, %v9933_v12  ;;  %v3353_v19 = vpop.f32.mrb[239].mxu0  ;;  %v3899_v10 = vshll.u32 %v10065_v30, 16  ;;  %v3897_v13 = vor.u32 %v3895_v26, %v3877_v25 }
 0x46f   :  { %v3559_v43 = vadd.f32 %v10037_v53, %v3458_v11  ;;  %v3901_v49 = vrot.slane %v3899_v10, 1  ;;  %5047 = vmatpush1.bf16.msra.mxu1 %v7960_v47  ;;  %v3640_v12 = vmax.f32 %v3556_v52, 0.0  ;;  %v7966_v47 = vld [vmem:[%s10942_s5 + $0x30] ss:$8 sps:$4 sm:$0xff]  }
 0x470   :  { %5048 = vmatprep.subr.bf16.mxu1 %v7965_v46  ;;  %v7971_v46 = vld [vmem:[%s10942_s5 + $0x44] ss:$8 sps:$4 sm:$0xff]  }
 0x471   :  { %v3643_v63 = vmax.f32 %v3559_v43, 0.0  ;;  %v3902_v61 = vsel %vm196_vm4, %v3897_v13, %v3901_v49 }
 0x472   :  { %v3356_v54 = vpop.f32.mrb[240].mxu0  ;;  %4674 = vmatmul.mubr.bf16.gmra.mrb[76].mxu1 %v3902_v61 }
 0x473   :  { %v10087_v8 = vpack.c.bf16 %v3643_v63, %v3640_v12  ;;  %v3461_v25 = vadd.f32 %v3356_v54, %v9941_v4  ;;  %v3358_v33 = vpop.f32.mrb[241].mxu0  ;;  %4683 = vmatprep.mubr.bf16.mxu1 %v11203_v36  ;;  %5049 = vmatpush1.bf16.msra.mxu1 %v7963_v56  ;;  %v3919_v4 = vshrl.u32 %v10065_v30, 16  ;;  %v7969_v56 = vld [vmem:[%s10942_s5 + $0x40] ss:$8 sps:$4 sm:$0xff]  }
 0x474   :  { %v3359_v44 = vpop.f32.mrb[242].mxu0  ;;  %5050 = vmatprep.subr.bf16.mxu1 %v7968_v23  ;;  %v7974_v23 = vld [vmem:[%s10942_s5 + $0x54] ss:$8 sps:$4 sm:$0xff]   ;;  %v7972_v33 = vld [vmem:[%s10942_s5 + $0x50] ss:$8 sps:$4 sm:$0xff]  }
 0x475   :  { %v3562_v52 = vadd.f32 %v10037_v53, %v3461_v25  ;;  %v3464_v11 = vadd.f32 %v3359_v44, %v9945_v14  ;;  %v3361_v19 = vpop.f32.mrb[243].mxu0  ;;  %v3923_v26 = vshll.u32 %v10087_v8, 16  ;;  %v3921_v43 = vor.u32 %v3919_v4, %v3901_v49  ;;  %v7977_v44 = vld [vmem:[%s10942_s5 + $0x64] ss:$8 sps:$4 sm:$0xff]  }
 0x477   :  { %v3565_v10 = vadd.f32 %v10037_v53, %v3464_v11  ;;  %v3925_v13 = vrot.slane %v3923_v26, 1  ;;  %5051 = vmatpush1.bf16.msra.mxu1 %v7966_v47  ;;  %v3646_v14 = vmax.f32 %v3562_v52, 0.0 }
 0x478   :  { %5052 = vmatprep.subr.bf16.mxu1 %v7971_v46 }
 0x479   :  { %v3649_v12 = vmax.f32 %v3565_v10, 0.0  ;;  %v3926_v63 = vsel %vm196_vm4, %v3921_v43, %v3925_v13  ;;  %v7975_v43 = vld [vmem:[%s10942_s5 + $0x60] ss:$8 sps:$4 sm:$0xff]  }
 0x47a   :  { %v3364_v61 = vpop.f32.mrb[244].mxu0  ;;  %4684 = vmatmul.mubr.bf16.gmra.mrb[80].mxu1 %v3926_v63 }
 0x47b   :  { %v10109_v54 = vpack.c.bf16 %v3649_v12, %v3646_v14  ;;  %v3467_v49 = vadd.f32 %v3364_v61, %v9953_v40  ;;  %v3366_v25 = vpop.f32.mrb[245].mxu0  ;;  %4693 = vmatprep.mubr.bf16.mxu1 %v11203_v36  ;;  %5053 = vmatpush1.bf16.msra.mxu1 %v7969_v56  ;;  %v3943_v40 = vshrl.u32 %v10087_v8, 16  ;;  %v7980_v56 = vld [vmem:[%s10942_s5 + $0x74] ss:$8 sps:$4 sm:$0xff]  }
 0x47c   :  { %v3367_v47 = vpop.f32.mrb[246].mxu0  ;;  %5054 = vmatprep.subr.bf16.mxu1 %v7974_v23 }
 0x47d   :  { %v3568_v46 = vadd.f32 %v10037_v53, %v3467_v49  ;;  %v3470_v52 = vadd.f32 %v3367_v47, %v9957_v38  ;;  %v3369_v11 = vpop.f32.mrb[247].mxu0  ;;  %v3947_v19 = vshll.u32 %v10109_v54, 16  ;;  %v3945_v26 = vor.u32 %v3943_v40, %v3925_v13  ;;  %v7978_v49 = vld [vmem:[%s10942_s5 + $0x70] ss:$8 sps:$4 sm:$0xff]  }
 0x47f   :  { %v3571_v4 = vadd.f32 %v10037_v53, %v3470_v52  ;;  %v3949_v10 = vrot.slane %v3947_v19, 1  ;;  %5055 = vmatpush1.bf16.msra.mxu1 %v7972_v33  ;;  %v3652_v38 = vmax.f32 %v3568_v46, 0.0  ;;  %v7983_v33 = vld [vmem:[%s10942_s5 + $0x84] ss:$8 sps:$4 sm:$0xff]  }
 0x480   :  { %5056 = vmatprep.subr.bf16.mxu1 %v7977_v44 }
 0x481   :  { %v3655_v23 = vmax.f32 %v3571_v4, 0.0  ;;  %v3950_v14 = vsel %vm196_vm4, %v3945_v26, %v3949_v10  ;;  %v7981_v4 = vld [vmem:[%s10942_s5 + $0x80] ss:$8 sps:$4 sm:$0xff]   ;;  %v7986_v26 = vld [vmem:[%s10942_s5 + $0x94] ss:$8 sps:$4 sm:$0xff]  }
 0x482   :  { %v3372_v12 = vpop.f32.mrb[248].mxu0  ;;  %4694 = vmatmul.mubr.bf16.gmra.mrb[84].mxu1 %v3950_v14 }
 0x483   :  { %v10131_v63 = vpack.c.bf16 %v3655_v23, %v3652_v38  ;;  %v3473_v13 = vadd.f32 %v3372_v12, %v9965_v21  ;;  %v3374_v61 = vpop.f32.mrb[249].mxu0  ;;  %4703 = vmatprep.mubr.bf16.mxu1 %v11203_v36  ;;  %5057 = vmatpush1.bf16.msra.mxu1 %v7975_v43  ;;  %v3967_v21 = vshrl.u32 %v10109_v54, 16  ;;  %v7984_v12 = vld [vmem:[%s10942_s5 + $0x90] ss:$8 sps:$4 sm:$0xff]  }
 0x484   :  { %v3375_v25 = vpop.f32.mrb[250].mxu0  ;;  %5058 = vmatprep.subr.bf16.mxu1 %v7980_v56  ;;  %v7989_v61 = vld [vmem:[%s10942_s5 + $0xa4] ss:$8 sps:$4 sm:$0xff]  }
 0x485   :  { %v3574_v47 = vadd.f32 %v10037_v53, %v3473_v13  ;;  %v3476_v44 = vadd.f32 %v3375_v25, %v9969_v55  ;;  %v3377_v46 = vpop.f32.mrb[251].mxu0  ;;  %v3971_v52 = vshll.u32 %v10131_v63, 16  ;;  %v3969_v40 = vor.u32 %v3967_v21, %v3949_v10 }
 0x487   :  { %v3577_v11 = vadd.f32 %v10037_v53, %v3476_v44  ;;  %v3973_v19 = vrot.slane %v3971_v52, 1  ;;  %5059 = vmatpush1.bf16.msra.mxu1 %v7978_v49  ;;  %v3658_v55 = vmax.f32 %v3574_v47, 0.0  ;;  %v7987_v52 = vld [vmem:[%s10942_s5 + $0xa0] ss:$8 sps:$4 sm:$0xff]  }
 0x488   :  { %5060 = vmatprep.subr.bf16.mxu1 %v7983_v33 }
 0x489   :  { %v3661_v43 = vmax.f32 %v3577_v11, 0.0  ;;  %v3974_v56 = vsel %vm196_vm4, %v3969_v40, %v3973_v19  ;;  %v7992_v11 = vld [vmem:[%s10942_s5 + $0xb4] ss:$8 sps:$4 sm:$0xff]  }
 0x48a   :  { %v3380_v38 = vpop.f32.mrb[252].mxu0  ;;  %4704 = vmatmul.mubr.bf16.gmra.mrb[88].mxu1 %v3974_v56  ;;  %v7990_v56 = vld [vmem:[%s10942_s5 + $0xb0] ss:$8 sps:$4 sm:$0xff]  }
 0x48b   :  { %v10153_v23 = vpack.c.bf16 %v3661_v43, %v3658_v55  ;;  %v3479_v10 = vadd.f32 %v3380_v38, %v9977_v7  ;;  %v3382_v14 = vpop.f32.mrb[253].mxu0  ;;  %4713 = vmatprep.mubr.bf16.mxu1 %v11203_v36  ;;  %5061 = vmatpush1.bf16.msra.mxu1 %v7981_v4  ;;  %v3991_v7 = vshrl.u32 %v10131_v63, 16 }
 0x48c   :  { %v3383_v13 = vpop.f32.mrb[254].mxu0  ;;  %5062 = vmatprep.subr.bf16.mxu1 %v7986_v26 }
 0x48d   :  { %v3580_v49 = vadd.f32 %v10037_v53, %v3479_v10  ;;  %v3482_v25 = vadd.f32 %v3383_v13, %v9981_v50  ;;  %v3385_v33 = vpop.f32.mrb[255].mxu0  ;;  %v3995_v47 = vshll.u32 %v10153_v23, 16  ;;  %v3993_v46 = vor.u32 %v3991_v7, %v3973_v19  ;;  %v7995_v10 = vld [vmem:[%s10942_s5 + $0xc4] ss:$8 sps:$4 sm:$0xff]   ;;  %v7993_v7 = vld [vmem:[%s10942_s5 + $0xc0] ss:$8 sps:$4 sm:$0xff]  }
 0x48f   :  { %v3583_v44 = vadd.f32 %v10037_v53, %v3482_v25  ;;  %v3997_v21 = vrot.slane %v3995_v47, 1  ;;  %5063 = vmatpush1.bf16.msra.mxu1 %v7984_v12  ;;  %v3664_v50 = vmax.f32 %v3580_v49, 0.0  ;;  %v7998_v47 = vld [vmem:[%s10942_s5 + $0xd4] ss:$8 sps:$4 sm:$0xff]  }
 0x490   :  { %5064 = vmatprep.subr.bf16.mxu1 %v7989_v61 }
 0x491   :  { %v3667_v40 = vmax.f32 %v3583_v44, 0.0  ;;  %v3998_v4 = vsel %vm196_vm4, %v3993_v46, %v3997_v21 }
 0x492   :  { %v3388_v26 = vpop.f32.mrb[0].mxu0  ;;  %4714 = vmatmul.mubr.bf16.gmra.mrb[92].mxu1 %v3998_v4 }
 0x493   :  { %v10175_v55 = vpack.c.bf16 %v3667_v40, %v3664_v50  ;;  %v3485_v19 = vadd.f32 %v3388_v26, %v9989_v28  ;;  %v3390_v43 = vpop.f32.mrb[1].mxu0  ;;  %4723 = vmatprep.mubr.bf16.mxu1 %v11203_v36  ;;  %5065 = vmatpush1.bf16.msra.mxu1 %v7987_v52  ;;  %v4015_v28 = vshrl.u32 %v10153_v23, 16  ;;  %v7996_v40 = vld [vmem:[%s10942_s5 + $0xd0] ss:$8 sps:$4 sm:$0xff]   ;;  %v8001_v26 = vld [vmem:[%s10942_s5 + $0xe4] ss:$8 sps:$4 sm:$0xff]  }
 0x494   :  { %v3391_v38 = vpop.f32.mrb[2].mxu0  ;;  %5066 = vmatprep.subr.bf16.mxu1 %v7992_v11 }
 0x495   :  { %v3586_v14 = vadd.f32 %v10037_v53, %v3485_v19  ;;  %v3488_v12 = vadd.f32 %v3391_v38, %v9993_v37  ;;  %v3393_v13 = vpop.f32.mrb[3].mxu0  ;;  %v4019_v61 = vshll.u32 %v10175_v55, 16  ;;  %v4017_v25 = vor.u32 %v4015_v28, %v3997_v21  ;;  %v8004_v28 = vld [vmem:[%s10942_s5 + $0xf4] ss:$8 sps:$4 sm:$0xff]  }
 0x496   :  { %v7999_v13 = vld [vmem:[%s10942_s5 + $0xe0] ss:$8 sps:$4 sm:$0xff]  }
 0x497   :  { %v3589_v49 = vadd.f32 %v10037_v53, %v3488_v12  ;;  %v4021_v33 = vrot.slane %v4019_v61, 1  ;;  %5067 = vmatpush1.bf16.msra.mxu1 %v7990_v56  ;;  %v3670_v37 = vmax.f32 %v3586_v14, 0.0 }
 0x498   :  { %5068 = vmatprep.subr.bf16.mxu1 %v7995_v10 }
 0x499   :  { %v3673_v44 = vmax.f32 %v3589_v49, 0.0  ;;  %v4022_v46 = vsel %vm196_vm4, %v4017_v25, %v4021_v33 }
 0x49a   :  { %v3396_v52 = vpop.f32.mrb[4].mxu0  ;;  %4724 = vmatmul.mubr.bf16.gmra.mrb[96].mxu1 %v4022_v46  ;;  %v8007_v46 = vld [vmem:[%s10942_s5 + $0x104] ss:$8 sps:$4 sm:$0xff]  }
 0x49b   :  { %v10197_v11 = vpack.c.bf16 %v3673_v44, %v3670_v37  ;;  %v3491_v21 = vadd.f32 %v3396_v52, %v10000_v45  ;;  %v3398_v50 = vpop.f32.mrb[5].mxu0  ;;  %4733 = vmatprep.mubr.bf16.mxu1 %v11203_v36  ;;  %5069 = vmatpush1.bf16.msra.mxu1 %v7993_v7  ;;  %v4039_v45 = vshrl.u32 %v10175_v55, 16  ;;  %v8002_v37 = vld [vmem:[%s10942_s5 + $0xf0] ss:$8 sps:$4 sm:$0xff]  }
 0x49c   :  { %v3399_v4 = vpop.f32.mrb[6].mxu0  ;;  %5070 = vmatprep.subr.bf16.mxu1 %v7998_v47 }
 0x49d   :  { %v3592_v19 = vadd.f32 %v10037_v53, %v3491_v21  ;;  %v3494_v43 = vadd.f32 %v3399_v4, %v10004_v34  ;;  %v3401_v56 = vpop.f32.mrb[7].mxu0  ;;  %v4043_v38 = vshll.u32 %v10197_v11, 16  ;;  %v4041_v14 = vor.u32 %v4039_v45, %v4021_v33 }
 0x49f   :  { %v3595_v10 = vadd.f32 %v10037_v53, %v3494_v43  ;;  %v4045_v12 = vrot.slane %v4043_v38, 1  ;;  %5071 = vmatpush1.bf16.msra.mxu1 %v7996_v40  ;;  %v3676_v34 = vmax.f32 %v3592_v19, 0.0 }
 0x4a0   :  { %5072 = vmatprep.subr.bf16.mxu1 %v8001_v26 }
 0x4a1   :  { %v3679_v61 = vmax.f32 %v3595_v10, 0.0  ;;  %v4046_v49 = vsel %vm196_vm4, %v4041_v14, %v4045_v12 }
 0x4a2   :  { %v3404_v25 = vpop.f32.mrb[8].mxu0  ;;  %4734 = vmatmul.mubr.bf16.gmra.mrb[100].mxu1 %v4046_v49 }
 0x4a3   :  { %v10219_v7 = vpack.c.bf16 %v3679_v61, %v3676_v34  ;;  %v3497_v33 = vadd.f32 %v3404_v25, %v10011_v2  ;;  %v3406_v47 = vpop.f32.mrb[9].mxu0  ;;  %4743 = vmatprep.mubr.bf16.mxu1 %v11203_v36  ;;  %5073 = vmatpush1.bf16.msra.mxu1 %v7999_v13  ;;  %v4063_v2 = vshrl.u32 %v10197_v11, 16 }
 0x4a4   :  { %v3407_v44 = vpop.f32.mrb[10].mxu0  ;;  %5074 = vmatprep.subr.bf16.mxu1 %v8004_v28 }
 0x4a5   :  { %v3598_v52 = vadd.f32 %v10037_v53, %v3497_v33  ;;  %v3500_v21 = vadd.f32 %v3407_v44, %v10014_v41  ;;  %v3409_v50 = vpop.f32.mrb[11].mxu0  ;;  %v4067_v40 = vshll.u32 %v10219_v7, 16  ;;  %v4065_v26 = vor.u32 %v4063_v2, %v4045_v12 }
 0x4a6   :  { %v4087_v61 = vshrl.u32 %v10219_v7, 16 }
 0x4a7   :  { %v3601_v4 = vadd.f32 %v10037_v53, %v3500_v21  ;;  %v4069_v19 = vrot.slane %v4067_v40, 1  ;;  %5075 = vmatpush1.bf16.msra.mxu1 %v8002_v37  ;;  %v3682_v43 = vmax.f32 %v3598_v52, 0.0 }
 0x4a8   :  { %5217 = vmatprep.subr.bf16.mxu1 %v8007_v46 }
 0x4a9   :  { %v3685_v56 = vmax.f32 %v3601_v4, 0.0  ;;  %v4070_v45 = vsel %vm196_vm4, %v4065_v26, %v4069_v19  ;;  %v4089_v33 = vor.u32 %v4087_v61, %v4069_v19 }
 0x4aa   :  { %v3412_v38 = vpop.f32.mrb[12].mxu0  ;;  %4744 = vmatmul.mubr.bf16.gmra.mrb[104].mxu1 %v4070_v45 }
 0x4ab   :  { %v10235_v10 = vpack.c.bf16 %v3685_v56, %v3682_v43  ;;  %v3503_v41 = vadd.f32 %v3412_v38, %v10019_v35  ;;  %v3414_v14 = vpop.f32.mrb[13].mxu0  ;;  %4753 = vmatprep.mubr.bf16.mxu1 %v11203_v36 }
 0x4ac   :  { %v3415_v13 = vpop.f32.mrb[14].mxu0 }
 0x4ad   :  { %v3604_v28 = vadd.f32 %v10037_v53, %v3503_v41  ;;  %v3506_v12 = vadd.f32 %v3415_v13, %v10022_v59  ;;  %v3417_v34 = vpop.f32.mrb[15].mxu0  ;;  %v4091_v49 = vshll.u32 %v10235_v10, 16  ;;  %v4111_v26 = vshrl.u32 %v10235_v10, 16 }
 0x4af   :  { %v3607_v25 = vadd.f32 %v10037_v53, %v3506_v12  ;;  %v4093_v47 = vrot.slane %v4091_v49, 1  ;;  %v3688_v37 = vmax.f32 %v3604_v28, 0.0 }
 0x4b1   :  { %v3691_v44 = vmax.f32 %v3607_v25, 0.0  ;;  %v4094_v35 = vsel %vm196_vm4, %v4089_v33, %v4093_v47  ;;  %v4113_v56 = vor.u32 %v4111_v26, %v4093_v47 }
 0x4b2   :  { %v3420_v46 = vpop.f32.mrb[16].mxu0  ;;  %4754 = vmatmul.mubr.bf16.gmra.mrb[108].mxu1 %v4094_v35 }
 0x4b3   :  { %v10245_v52 = vpack.c.bf16 %v3691_v44, %v3688_v37  ;;  %v3509_v21 = vadd.f32 %v3420_v46, %v10025_v1  ;;  %v3422_v59 = vpop.f32.mrb[17].mxu0  ;;  %4763 = vmatprep.mubr.bf16.mxu1 %v11203_v36 }
 0x4b4   :  { %v3423_v50 = vpop.f32.mrb[18].mxu0 }
 0x4b5   :  { %v3610_v2 = vadd.f32 %v10037_v53, %v3509_v21  ;;  %v3512_v40 = vadd.f32 %v3423_v50, %v10028_v24  ;;  %v3425_v4 = vpop.f32.mrb[19].mxu0  ;;  %v4115_v19 = vshll.u32 %v10245_v52, 16  ;;  %v4135_v25 = vshrl.u32 %v10245_v52, 16 }
 0x4b7   :  { %v3613_v43 = vadd.f32 %v10037_v53, %v3512_v40  ;;  %v4117_v45 = vrot.slane %v4115_v19, 1  ;;  %v3694_v38 = vmax.f32 %v3610_v2, 0.0 }
 0x4b9   :  { %v3697_v41 = vmax.f32 %v3613_v43, 0.0  ;;  %v4118_v1 = vsel %vm196_vm4, %v4113_v56, %v4117_v45  ;;  %v4137_v37 = vor.u32 %v4135_v25, %v4117_v45 }
 0x4ba   :  { %v3428_v14 = vpop.f32.mrb[20].mxu0  ;;  %4764 = vmatmul.mubr.bf16.gmra.mrb[56].mxu1 %v4118_v1 }
 0x4bb   :  { %v10255_v13 = vpack.c.bf16 %v3697_v41, %v3694_v38  ;;  %v3515_v28 = vadd.f32 %v3428_v14, %v10031_v31  ;;  %v3430_v24 = vpop.f32.mrb[21].mxu0  ;;  %4773 = vmatprep.mubr.bf16.mxu1 %v11203_v36 }
 0x4bc   :  { %v3431_v12 = vpop.f32.mrb[22].mxu0 }
 0x4bd   :  { %v3616_v34 = vadd.f32 %v10037_v53, %v3515_v28  ;;  %v3518_v61 = vadd.f32 %v3431_v12, %v10034_v16  ;;  %v3433_v49 = vpop.f32.mrb[23].mxu0  ;;  %v4139_v33 = vshll.u32 %v10255_v13, 16 }
 0x4bf   :  { %v3619_v47 = vadd.f32 %v10037_v53, %v3518_v61  ;;  %v4141_v44 = vrot.slane %v4139_v33, 1  ;;  %v3700_v35 = vmax.f32 %v3616_v34, 0.0  ;;  %v4159_v53 = vshrl.u32 %v10255_v13, 16  ;;  %v8005_v34 = vld [vmem:[%s10942_s5 + $0x100] ss:$8 sps:$4 sm:$0xff]  }
 0x4c0   :  { %v8010_v61 = vld [vmem:[%s10942_s5 + $0x114] ss:$8 sps:$4 sm:$0xff]   ;;  %v8008_v33 = vld [vmem:[%s10942_s5 + $0x110] ss:$8 sps:$4 sm:$0xff]  }
 0x4c1   :  { %v3703_v46 = vmax.f32 %v3619_v47, 0.0  ;;  %v4142_v31 = vsel %vm196_vm4, %v4137_v37, %v4141_v44  ;;  %v4161_v4 = vor.u32 %v4159_v53, %v4141_v44  ;;  %v8013_v37 = vld [vmem:[%s10942_s5 + $0x124] ss:$8 sps:$4 sm:$0xff]  }
 0x4c2   :  { %v10265_v21 = vpop.f32.mrb[24].mxu0  ;;  %4774 = vmatmul.mubr.bf16.gmra.mrb[60].mxu1 %v4142_v31 }
 0x4c3   :  { %v10267_v59 = vpack.c.bf16 %v3703_v46, %v3700_v35  ;;  %v10269_v50 = vpop.f32.mrb[25].mxu0  ;;  %4783 = vmatprep.mubr.bf16.mxu1 %v11203_v36  ;;  %v8011_v35 = vld [vmem:[%s10942_s5 + $0x120] ss:$8 sps:$4 sm:$0xff]   ;;  %v8016_v46 = vld [vmem:[%s10942_s5 + $0x134] ss:$8 sps:$4 sm:$0xff]  }
 0x4c4   :  { %v10272_v16 = vpop.f32.mrb[26].mxu0 }
 0x4c5   :  { %v10274_v2 = vpop.f32.mrb[27].mxu0  ;;  %v4163_v40 = vshll.u32 %v10267_v59, 16  ;;  %v4173_v41 = vshrl.u32 %v10267_v59, 16 }
 0x4c7   :  { %v4165_v26 = vrot.slane %v4163_v40, 1  ;;  %v8014_v40 = vld [vmem:[%s10942_s5 + $0x130] ss:$8 sps:$4 sm:$0xff]  }
 0x4c9   :  { %v4166_v19 = vsel %vm196_vm4, %v4161_v4, %v4165_v26  ;;  %v4175_v1 = vor.u32 %v4173_v41, %v4165_v26  ;;  %v8019_v26 = vld [vmem:[%s10942_s5 + $0x144] ss:$8 sps:$4 sm:$0xff]   ;;  %v8017_v41 = vld [vmem:[%s10942_s5 + $0x140] ss:$8 sps:$4 sm:$0xff]  }
 0x4ca   :  { %v10279_v43 = vpop.f32.mrb[28].mxu0  ;;  %4784 = vmatmul.mubr.bf16.gmra.mrb[64].mxu1 %v4166_v19 }
 0x4cb   :  { %v10281_v56 = vpop.f32.mrb[29].mxu0  ;;  %4793 = vmatprep.mubr.bf16.mxu1 %v11203_v36 }
 0x4cc   :  { %v10284_v45 = vpop.f32.mrb[30].mxu0 }
 0x4cd   :  { %v10286_v38 = vpop.f32.mrb[31].mxu0 }
 0x4d2   :  { %v10289_v14 = vpop.f32.mrb[32].mxu0  ;;  %4794 = vmatmul.mubr.bf16.gmra.mrb[68].mxu1 %v4175_v1  ;;  %v8022_v1 = vld [vmem:[%s10942_s5 + $0x154] ss:$8 sps:$4 sm:$0xff]  }
 0x4d3   :  { %v10291_v28 = vpop.f32.mrb[33].mxu0  ;;  %5076 = vmatprep.mubr.bf16.mxu1 %v9520_v32 }
 0x4d4   :  { %v10294_v24 = vpop.f32.mrb[34].mxu0 }
 0x4d5   :  { %v10296_v12 = vpop.f32.mrb[35].mxu0 }
 0x4da   :  { %v10304_v49 = vpop.f32.mrb[36].mxu0  ;;  %5077 = vmatmul.mubr.bf16.vlgmr.msra.gmra.mrb[72].mxu1 %v11201_v5 }
 0x4db   :  { %v10307_v25 = vpop.f32.mrb[37].mxu0  ;;  %5086 = vmatprep.mubr.bf16.mxu1 %v9539_v29  ;;  %5218 = vmatpush1.bf16.msra.mxu1 %v8005_v34 }
 0x4dc   :  { %v10313_v47 = vpop.f32.mrb[38].mxu0  ;;  %5219 = vmatprep.subr.bf16.mxu1 %v8010_v61 }
 0x4dd   :  { %11216 = vst [vmem:[#allocation48_spill] sm:$0xff] %v10313_v47  ;;  %v10318_v44 = vpop.f32.mrb[39].mxu0  ;;  %v8077_v47 = vld [vmem:[%s10942_s5 + $0x400] ss:$8 sps:$4 sm:$0xff]  }
 0x4de   :  { %11217 = vst [vmem:[#allocation50_spill] sm:$0xff] %v10318_v44  ;;  %v8046_v44 = vld [vmem:[%s10942_s5 + $0x354] ss:$8 sps:$4 sm:$0xff]  }
 0x4df   :  { %5220 = vmatpush1.bf16.msra.mxu1 %v8008_v33  ;;  %v8020_v33 = vld [vmem:[%s10942_s5 + $0x150] ss:$8 sps:$4 sm:$0xff]  }
 0x4e0   :  { %5221 = vmatprep.subr.bf16.mxu1 %v8013_v37 }
 0x4e2   :  { %v10326_v31 = vpop.f32.mrb[40].mxu0  ;;  %5087 = vmatmul.mubr.bf16.gmra.mrb[76].mxu1 %v9536_v20 }
 0x4e3   :  { %11218 = vst [vmem:[#allocation52_spill] sm:$0xff] %v10326_v31  ;;  %v10329_v53 = vpop.f32.mrb[41].mxu0  ;;  %5096 = vmatprep.mubr.bf16.mxu1 %v9558_v18  ;;  %5222 = vmatpush1.bf16.msra.mxu1 %v8011_v35  ;;  %v8025_v35 = vld [vmem:[%s10942_s5 + $0x164] ss:$8 sps:$4 sm:$0xff]   ;;  %v8035_v31 = vld [vmem:[%s10942_s5 + $0x320] ss:$8 sps:$4 sm:$0xff]  }
 0x4e4   :  { %11219 = vst [vmem:[#allocation30_spill] sm:$0xff] %v10329_v53  ;;  %v10335_v4 = vpop.f32.mrb[42].mxu0  ;;  %5223 = vmatprep.subr.bf16.mxu1 %v8016_v46  ;;  %v8037_v53 = vld [vmem:[%s10942_s5 + $0x324] ss:$8 sps:$4 sm:$0xff]  }
 0x4e5   :  { %11220 = vst [vmem:[#allocation31_spill] sm:$0xff] %v10335_v4  ;;  %v10340_v19 = vpop.f32.mrb[43].mxu0  ;;  %v8032_v4 = vld [vmem:[%s10942_s5 + $0x310] ss:$8 sps:$4 sm:$0xff]  }
 0x4e6   :  { %11221 = vst [vmem:[#allocation53_spill] sm:$0xff] %v10340_v19  ;;  %v8034_v19 = vld [vmem:[%s10942_s5 + $0x314] ss:$8 sps:$4 sm:$0xff]  }
 0x4e7   :  { %5224 = vmatpush1.bf16.msra.mxu1 %v8014_v40  ;;  %v8023_v40 = vld [vmem:[%s10942_s5 + $0x160] ss:$8 sps:$4 sm:$0xff]  }
 0x4e8   :  { %5225 = vmatprep.subr.bf16.mxu1 %v8019_v26  ;;  %v8028_v26 = vld [vmem:[%s10942_s5 + $0x174] ss:$8 sps:$4 sm:$0xff]  }
 0x4ea   :  { %v10348_v34 = vpop.f32.mrb[44].mxu0  ;;  %5097 = vmatmul.mubr.bf16.gmra.mrb[80].mxu1 %v9555_v39 }
 0x4eb   :  { %11222 = vst [vmem:[#allocation54_spill] sm:$0xff] %v10348_v34  ;;  %v10351_v61 = vpop.f32.mrb[45].mxu0  ;;  %5106 = vmatprep.mubr.bf16.mxu1 %v9581_v57  ;;  %5226 = vmatpush1.bf16.msra.mxu1 %v8017_v41  ;;  %v8029_v34 = vld [vmem:[%s10942_s5 + $0x300] ss:$8 sps:$4 sm:$0xff]  }
 0x4ec   :  { %11223 = vst [vmem:[#allocation56_spill] sm:$0xff] %v10351_v61  ;;  %v10357_v37 = vpop.f32.mrb[46].mxu0  ;;  %5227 = vmatprep.subr.bf16.mxu1 %v8022_v1 }
 0x4ed   :  { %11224 = vst [vmem:[#allocation58_spill] sm:$0xff] %v10357_v37  ;;  %v10362_v46 = vpop.f32.mrb[47].mxu0 }
 0x4ee   :  { %11225 = vst [vmem:[#allocation65_spill] sm:$0xff] %v10362_v46 }
 0x4ef   :  { %5228 = vmatpush1.bf16.msra.mxu1 %v8020_v33  ;;  %v8026_v33 = vld [vmem:[%s10942_s5 + $0x170] ss:$8 sps:$4 sm:$0xff]  }
 0x4f0   :  { %5229 = vmatprep.subr.bf16.mxu1 %v8025_v35  ;;  %v8031_v35 = vld [vmem:[%s10942_s5 + $0x304] ss:$8 sps:$4 sm:$0xff]  }
 0x4f2   :  { %v10370_v41 = vpop.f32.mrb[48].mxu0  ;;  %5107 = vmatmul.mubr.bf16.gmra.mrb[84].mxu1 %v9578_v27 }
 0x4f3   :  { %11226 = vst [vmem:[#allocation67_spill] sm:$0xff] %v10370_v41  ;;  %v10373_v1 = vpop.f32.mrb[49].mxu0  ;;  %5116 = vmatprep.mubr.bf16.mxu1 %v9604_v60  ;;  %5230 = vmatpush1.bf16.msra.mxu1 %v8023_v40 }
 0x4f4   :  { %11227 = vst [vmem:[#allocation32_spill] sm:$0xff] %v10373_v1  ;;  %v10379_v46 = vpop.f32.mrb[50].mxu0  ;;  %5231 = vmatprep.subr.bf16.mxu1 %v8028_v26 }
 0x4f5   :  { %11228 = vst [vmem:[#allocation68_spill] sm:$0xff] %v10379_v46  ;;  %v10384_v37 = vpop.f32.mrb[51].mxu0 }
 0x4f6   :  { %11229 = vst [vmem:[#allocation33_spill] sm:$0xff] %v10384_v37  ;;  %v11250_v37 = vld [vmem:[#allocation29_spill] sm:$0xff] }
 0x4f7   :  { %5232 = vmatpush1.bf16.msra.mxu1 %v8026_v33 }
 0x4f8   :  { %5844 = vmatprep.subr.bf16.mxu1 %v8031_v35 }
 0x4fa   :  { %v10386_v41 = vpop.f32.mrb[52].mxu0  ;;  %5117 = vmatmul.mubr.bf16.gmra.mrb[88].mxu1 %v9601_v42 }
 0x4fb   :  { %11230 = vst [vmem:[#allocation59_spill] sm:$0xff] %v10386_v41  ;;  %v10389_v40 = vpop.f32.mrb[53].mxu0  ;;  %5126 = vmatprep.mubr.bf16.mxu1 %v9627_v15 }
 0x4fc   :  { %11231 = vst [vmem:[#allocation69_spill] sm:$0xff] %v10389_v40  ;;  %v10392_v1 = vpop.f32.mrb[54].mxu0 }
 0x4fd   :  { %11232 = vst [vmem:[#allocation60_spill] sm:$0xff] %v10392_v1  ;;  %v10394_v46 = vpop.f32.mrb[55].mxu0  ;;  %v11249_v1 = vld [vmem:[#allocation47_spill] sm:$0xff] }
 0x4fe   :  { %11233 = vst [vmem:[#allocation61_spill] sm:$0xff] %v10394_v46 }
 0x502   :  { %v10396_v26 = vpop.f32.mrb[112].mxu0  ;;  %5127 = vmatmul.mubr.bf16.gmra.mrb[92].mxu1 %v9624_v17 }
 0x503   :  { %11234 = vst [vmem:[#allocation62_spill] sm:$0xff] %v10396_v26  ;;  %v10399_v61 = vpop.f32.mrb[113].mxu0  ;;  %5136 = vmatprep.mubr.bf16.mxu1 %v9650_v22 }
 0x504   :  { %11235 = vst [vmem:[#allocation70_spill] sm:$0xff] %v10399_v61  ;;  %v10402_v33 = vpop.f32.mrb[114].mxu0  ;;  %v11246_v61 = vld [vmem:[#allocation43_spill] sm:$0xff] }
 0x505   :  { %11236 = vst [vmem:[#allocation71_spill] sm:$0xff] %v10402_v33  ;;  %v10404_v35 = vpop.f32.mrb[115].mxu0  ;;  %v11244_v33 = vld [vmem:[#allocation49_spill] sm:$0xff] }
 0x506   :  { %11237 = vst [vmem:[#allocation34_spill] sm:$0xff] %v10404_v35  ;;  %v11242_v35 = vld [vmem:[#allocation39_spill] sm:$0xff] }
 0x50a   :  { %v10406_v41 = vpop.f32.mrb[116].mxu0  ;;  %5137 = vmatmul.mubr.bf16.gmra.mrb[96].mxu1 %v9647_v0 }
 0x50b   :  { %11238 = vst [vmem:[#allocation72_spill] sm:$0xff] %v10406_v41  ;;  %v10409_v40 = vpop.f32.mrb[117].mxu0  ;;  %5146 = vmatprep.mubr.bf16.mxu1 %v9673_v51  ;;  %v11243_v41 = vld [vmem:[#allocation51_spill] sm:$0xff] }
 0x50c   :  { %11239 = vst [vmem:[#allocation35_spill] sm:$0xff] %v10409_v40  ;;  %v10412_v46 = vpop.f32.mrb[118].mxu0  ;;  %v11245_v40 = vld [vmem:[#allocation44_spill] sm:$0xff] }
 0x50d   :  { %11240 = vst [vmem:[#allocation63_spill] sm:$0xff] %v10412_v46  ;;  %v10414_v26 = vpop.f32.mrb[119].mxu0  ;;  %v11247_v46 = vld [vmem:[#allocation57_spill] sm:$0xff] }
 0x50e   :  { %11241 = vst [vmem:[#allocation73_spill] sm:$0xff] %v10414_v26  ;;  %v11248_v26 = vld [vmem:[#allocation55_spill] sm:$0xff] }
 0x512   :  { %5147 = vmatmul.mubr.bf16.gmra.mrb[100].mxu1 %v9670_v3 }
 0x513   :  { %5156 = vmatprep.mubr.bf16.mxu1 %v9696_v48 }
 0x51a   :  { %5157 = vmatmul.mubr.bf16.gmra.mrb[104].mxu1 %v9693_v6 }
 0x51b   :  { %5166 = vmatprep.mubr.bf16.mxu1 %v11204_v58 }
 0x522   :  { %5167 = vmatmul.mubr.bf16.gmra.mrb[108].mxu1 %v11242_v35 }
 0x523   :  { %5176 = vmatprep.mubr.bf16.mxu1 %v11243_v41 }
 0x52a   :  { %5177 = vmatmul.mubr.bf16.gmra.mrb[56].mxu1 %v11244_v33 }
 0x52b   :  { %5186 = vmatprep.mubr.bf16.mxu1 %v11245_v40 }
 0x532   :  { %5187 = vmatmul.mubr.bf16.gmra.mrb[60].mxu1 %v11246_v61 }
 0x533   :  { %5196 = vmatprep.mubr.bf16.mxu1 %v11247_v46 }
 0x53a   :  { %5197 = vmatmul.mubr.bf16.gmra.mrb[64].mxu1 %v11248_v26 }
 0x53b   :  { %5206 = vmatprep.mubr.bf16.mxu1 %v11249_v1 }
 0x542   :  { %5207 = vmatmul.mubr.bf16.gmra.mrb[68].mxu1 %v11250_v37 }
 0x543   :  { %5249 = vmatprep.mubr.bf16.mxu1 %v11203_v36 }
 0x54a   :  { %5250 = vmatmul.mubr.bf16.vlgmr.msra.gmra.mrb[72].mxu1 %v10043_v62 }
 0x54b   :  { %5845 = vmatpush1.bf16.msra.mxu1 %v8029_v34  ;;  %5259 = vmatprep.mubr.bf16.mxu1 %v11203_v36  ;;  %v8040_v34 = vld [vmem:[%s10942_s5 + $0x334] ss:$8 sps:$4 sm:$0xff]  }
 0x54c   :  { %5846 = vmatprep.subr.bf16.mxu1 %v8034_v19  ;;  %v8038_v19 = vld [vmem:[%s10942_s5 + $0x330] ss:$8 sps:$4 sm:$0xff]  }
 0x54f   :  { %5847 = vmatpush1.bf16.msra.mxu1 %v8032_v4  ;;  %v8043_v4 = vld [vmem:[%s10942_s5 + $0x344] ss:$8 sps:$4 sm:$0xff]  }
 0x550   :  { %5848 = vmatprep.subr.bf16.mxu1 %v8037_v53  ;;  %v8041_v53 = vld [vmem:[%s10942_s5 + $0x340] ss:$8 sps:$4 sm:$0xff]  }
 0x552   :  { %5260 = vmatmul.mubr.bf16.gmra.mrb[76].mxu1 %v10050_v9 }
 0x553   :  { %5269 = vmatprep.mubr.bf16.mxu1 %v11203_v36  ;;  %5849 = vmatpush1.bf16.msra.mxu1 %v8035_v31  ;;  %v8044_v31 = vld [vmem:[%s10942_s5 + $0x350] ss:$8 sps:$4 sm:$0xff]  }
 0x554   :  { %5850 = vmatprep.subr.bf16.mxu1 %v8040_v34  ;;  %v8049_v34 = vld [vmem:[%s10942_s5 + $0x364] ss:$8 sps:$4 sm:$0xff]  }
 0x557   :  { %5851 = vmatpush1.bf16.msra.mxu1 %v8038_v19  ;;  %v8047_v19 = vld [vmem:[%s10942_s5 + $0x360] ss:$8 sps:$4 sm:$0xff]  }
 0x558   :  { %5852 = vmatprep.subr.bf16.mxu1 %v8043_v4  ;;  %v8052_v4 = vld [vmem:[%s10942_s5 + $0x374] ss:$8 sps:$4 sm:$0xff]  }
 0x55a   :  { %5270 = vmatmul.mubr.bf16.gmra.mrb[80].mxu1 %v10065_v30 }
 0x55b   :  { %5279 = vmatprep.mubr.bf16.mxu1 %v11203_v36  ;;  %5853 = vmatpush1.bf16.msra.mxu1 %v8041_v53  ;;  %v8055_v53 = vld [vmem:[%s10942_s5 + $0x384] ss:$8 sps:$4 sm:$0xff]  }
 0x55c   :  { %5854 = vmatprep.subr.bf16.mxu1 %v8046_v44  ;;  %v8050_v44 = vld [vmem:[%s10942_s5 + $0x370] ss:$8 sps:$4 sm:$0xff]  }
 0x55f   :  { %5855 = vmatpush1.bf16.msra.mxu1 %v8044_v31  ;;  %v8053_v31 = vld [vmem:[%s10942_s5 + $0x380] ss:$8 sps:$4 sm:$0xff]  }
 0x560   :  { %5856 = vmatprep.subr.bf16.mxu1 %v8049_v34  ;;  %v8058_v34 = vld [vmem:[%s10942_s5 + $0x394] ss:$8 sps:$4 sm:$0xff]  }
 0x562   :  { %5280 = vmatmul.mubr.bf16.gmra.mrb[84].mxu1 %v10087_v8 }
 0x563   :  { %5289 = vmatprep.mubr.bf16.mxu1 %v11203_v36  ;;  %5857 = vmatpush1.bf16.msra.mxu1 %v8047_v19  ;;  %v8056_v19 = vld [vmem:[%s10942_s5 + $0x390] ss:$8 sps:$4 sm:$0xff]  }
 0x564   :  { %5858 = vmatprep.subr.bf16.mxu1 %v8052_v4  ;;  %v8061_v4 = vld [vmem:[%s10942_s5 + $0x3a4] ss:$8 sps:$4 sm:$0xff]  }
 0x567   :  { %5859 = vmatpush1.bf16.msra.mxu1 %v8050_v44  ;;  %v8059_v44 = vld [vmem:[%s10942_s5 + $0x3a0] ss:$8 sps:$4 sm:$0xff]  }
 0x568   :  { %5860 = vmatprep.subr.bf16.mxu1 %v8055_v53  ;;  %v8064_v53 = vld [vmem:[%s10942_s5 + $0x3b4] ss:$8 sps:$4 sm:$0xff]  }
 0x56a   :  { %5290 = vmatmul.mubr.bf16.gmra.mrb[88].mxu1 %v10109_v54 }
 0x56b   :  { %5299 = vmatprep.mubr.bf16.mxu1 %v11203_v36  ;;  %5861 = vmatpush1.bf16.msra.mxu1 %v8053_v31  ;;  %v8062_v31 = vld [vmem:[%s10942_s5 + $0x3b0] ss:$8 sps:$4 sm:$0xff]  }
 0x56c   :  { %5862 = vmatprep.subr.bf16.mxu1 %v8058_v34  ;;  %v8067_v34 = vld [vmem:[%s10942_s5 + $0x3c4] ss:$8 sps:$4 sm:$0xff]  }
 0x56f   :  { %5863 = vmatpush1.bf16.msra.mxu1 %v8056_v19  ;;  %v8065_v19 = vld [vmem:[%s10942_s5 + $0x3c0] ss:$8 sps:$4 sm:$0xff]  }
 0x570   :  { %5864 = vmatprep.subr.bf16.mxu1 %v8061_v4  ;;  %v8070_v4 = vld [vmem:[%s10942_s5 + $0x3d4] ss:$8 sps:$4 sm:$0xff]  }
 0x572   :  { %5300 = vmatmul.mubr.bf16.gmra.mrb[92].mxu1 %v10131_v63 }
 0x573   :  { %5309 = vmatprep.mubr.bf16.mxu1 %v11203_v36  ;;  %5865 = vmatpush1.bf16.msra.mxu1 %v8059_v44  ;;  %v8068_v44 = vld [vmem:[%s10942_s5 + $0x3d0] ss:$8 sps:$4 sm:$0xff]  }
 0x574   :  { %5866 = vmatprep.subr.bf16.mxu1 %v8064_v53  ;;  %v8073_v53 = vld [vmem:[%s10942_s5 + $0x3e4] ss:$8 sps:$4 sm:$0xff]  }
 0x577   :  { %5867 = vmatpush1.bf16.msra.mxu1 %v8062_v31  ;;  %v8071_v31 = vld [vmem:[%s10942_s5 + $0x3e0] ss:$8 sps:$4 sm:$0xff]  }
 0x578   :  { %5868 = vmatprep.subr.bf16.mxu1 %v8067_v34  ;;  %v8076_v34 = vld [vmem:[%s10942_s5 + $0x3f4] ss:$8 sps:$4 sm:$0xff]  }
 0x57a   :  { %5310 = vmatmul.mubr.bf16.gmra.mrb[96].mxu1 %v10153_v23 }
 0x57b   :  { %5319 = vmatprep.mubr.bf16.mxu1 %v11203_v36  ;;  %5869 = vmatpush1.bf16.msra.mxu1 %v8065_v19  ;;  %v8074_v19 = vld [vmem:[%s10942_s5 + $0x3f0] ss:$8 sps:$4 sm:$0xff]  }
 0x57c   :  { %5870 = vmatprep.subr.bf16.mxu1 %v8070_v4  ;;  %v8079_v4 = vld [vmem:[%s10942_s5 + $0x404] ss:$8 sps:$4 sm:$0xff]  }
 0x57f   :  { %5871 = vmatpush1.bf16.msra.mxu1 %v8068_v44  ;;  %v5485_v44 = vrot.slane %v9539_v29, 1  ;;  %v8082_v29 = vld [vmem:[%s10942_s5 + $0x414] ss:$8 sps:$4 sm:$0xff]  }
 0x580   :  { %5872 = vmatprep.subr.bf16.mxu1 %v8073_v53  ;;  %v5484_v53 = vrot.slane %v9520_v32, 1 }
 0x582   :  { %5320 = vmatmul.mubr.bf16.gmra.mrb[100].mxu1 %v10175_v55 }
 0x583   :  { %5329 = vmatprep.mubr.bf16.mxu1 %v11203_v36  ;;  %5873 = vmatpush1.bf16.msra.mxu1 %v8071_v31  ;;  %v5486_v31 = vsel %vm779_vm6, %v5484_v53, %v5485_v44 }
 0x584   :  { %5874 = vmatprep.subr.bf16.mxu1 %v8076_v34  ;;  %v5482_v34 = vrot.slane %v9536_v20, 1  ;;  %v8080_v20 = vld [vmem:[%s10942_s5 + $0x410] ss:$8 sps:$4 sm:$0xff]  }
 0x587   :  { %5875 = vmatpush1.bf16.msra.mxu1 %v8074_v19  ;;  %v5492_v19 = vrot.slane %v9558_v18, 1  ;;  %v8085_v18 = vld [vmem:[%s10942_s5 + $0x424] ss:$8 sps:$4 sm:$0xff]  }
 0x588   :  { %6017 = vmatprep.subr.bf16.mxu1 %v8079_v4  ;;  %v5481_v4 = vrot.slane %v11201_v5, 1  ;;  %v5490_v5 = vrot.slane %v9555_v39, 1  ;;  %v8086_v39 = vld [vmem:[%s10942_s5 + $0x430] ss:$8 sps:$4 sm:$0xff]  }
 0x589   :  { %v5493_v53 = vsel %vm779_vm6, %v5485_v44, %v5492_v19  ;;  %v8083_v44 = vld [vmem:[%s10942_s5 + $0x420] ss:$8 sps:$4 sm:$0xff]  }
 0x58a   :  { %5330 = vmatmul.mubr.bf16.gmra.mrb[104].mxu1 %v10197_v11  ;;  %v5483_v32 = vsel %vm779_vm6, %v5481_v4, %v5482_v34  ;;  %v5491_v4 = vsel %vm779_vm6, %v5482_v34, %v5490_v5  ;;  %v8089_v34 = vld [vmem:[%s10942_s5 + $0x440] ss:$8 sps:$4 sm:$0xff]  }
 0x58b   :  { %5339 = vmatprep.mubr.bf16.mxu1 %v11203_v36 }
 0x592   :  { %5340 = vmatmul.mubr.bf16.gmra.mrb[108].mxu1 %v10219_v7 }
 0x593   :  { %5349 = vmatprep.mubr.bf16.mxu1 %v11203_v36 }
 0x59a   :  { %5350 = vmatmul.mubr.bf16.gmra.mrb[56].mxu1 %v10235_v10 }
 0x59b   :  { %5359 = vmatprep.mubr.bf16.mxu1 %v11203_v36 }
 0x5a2   :  { %5360 = vmatmul.mubr.bf16.gmra.mrb[60].mxu1 %v10245_v52 }
 0x5a3   :  { %5369 = vmatprep.mubr.bf16.mxu1 %v11203_v36 }
 0x5aa   :  { %5370 = vmatmul.mubr.bf16.gmra.mrb[64].mxu1 %v10255_v13 }
 0x5ab   :  { %5379 = vmatprep.mubr.bf16.mxu1 %v11203_v36 }
 0x5b2   :  { %5380 = vmatmul.mubr.bf16.gmra.mrb[68].mxu1 %v10267_v59 }
 0x5b3   :  { %5876 = vmatprep.mubr.bf16.mxu1 %v5486_v31  ;;  %v5498_v31 = vrot.slane %v9581_v57, 1  ;;  %v8091_v57 = vld [vmem:[%s10942_s5 + $0x444] ss:$8 sps:$4 sm:$0xff]  }
 0x5ba   :  { %5877 = vmatmul.mubr.bf16.vlgmr.msra.gmra.mrb[72].mxu1 %v5483_v32  ;;  %v5496_v32 = vrot.slane %v9578_v27, 1  ;;  %v8092_v27 = vld [vmem:[%s10942_s5 + $0x450] ss:$8 sps:$4 sm:$0xff]  }
 0x5bb   :  { %5886 = vmatprep.mubr.bf16.mxu1 %v5493_v53  ;;  %6018 = vmatpush1.bf16.msra.mxu1 %v8077_v47  ;;  %v8088_v47 = vld [vmem:[%s10942_s5 + $0x434] ss:$8 sps:$4 sm:$0xff]   ;;  %v5504_v53 = vrot.slane %v9604_v60, 1  ;;  %v8097_v60 = vld [vmem:[%s10942_s5 + $0x464] ss:$8 sps:$4 sm:$0xff]  }
 0x5bc   :  { %6019 = vmatprep.subr.bf16.mxu1 %v8082_v29  ;;  %v5499_v29 = vsel %vm779_vm6, %v5492_v19, %v5498_v31  ;;  %v8094_v19 = vld [vmem:[%s10942_s5 + $0x454] ss:$8 sps:$4 sm:$0xff]  }
 0x5bf   :  { %6020 = vmatpush1.bf16.msra.mxu1 %v8080_v20  ;;  %v5497_v20 = vsel %vm779_vm6, %v5490_v5, %v5496_v32  ;;  %v8095_v5 = vld [vmem:[%s10942_s5 + $0x460] ss:$8 sps:$4 sm:$0xff]  }
 0x5c0   :  { %6021 = vmatprep.subr.bf16.mxu1 %v8085_v18  ;;  %v5505_v18 = vsel %vm779_vm6, %v5498_v31, %v5504_v53  ;;  %v8100_v31 = vld [vmem:[%s10942_s5 + $0x474] ss:$8 sps:$4 sm:$0xff]  }
 0x5c2   :  { %5887 = vmatmul.mubr.bf16.gmra.mrb[76].mxu1 %v5491_v4 }
 0x5c3   :  { %5896 = vmatprep.mubr.bf16.mxu1 %v5499_v29  ;;  %6022 = vmatpush1.bf16.msra.mxu1 %v8083_v44  ;;  %v5502_v44 = vrot.slane %v9601_v42, 1  ;;  %v8098_v42 = vld [vmem:[%s10942_s5 + $0x470] ss:$8 sps:$4 sm:$0xff]  }
 0x5c4   :  { %6023 = vmatprep.subr.bf16.mxu1 %v8088_v47  ;;  %v5510_v47 = vrot.slane %v9627_v15, 1  ;;  %v5508_v15 = vrot.slane %v9624_v17, 1  ;;  %v5520_v17 = vrot.slane %v9670_v3, 1  ;;  %v5532_v3 = vrot.slane %v11242_v35, 1 }
 0x5c5   :  { %v5503_v4 = vsel %vm779_vm6, %v5496_v32, %v5502_v44  ;;  %v5544_v35 = vrot.slane %v11246_v61, 1  ;;  %v5556_v61 = vrot.slane %v11250_v37, 1 }
 0x5c6   :  { %v5511_v29 = vsel %vm779_vm6, %v5504_v53, %v5510_v47  ;;  %v5514_v53 = vrot.slane %v9647_v0, 1  ;;  %v5526_v0 = vrot.slane %v9693_v6, 1  ;;  %v5538_v6 = vrot.slane %v11244_v33, 1 }
 0x5c7   :  { %6024 = vmatpush1.bf16.msra.mxu1 %v8086_v39  ;;  %v5516_v39 = vrot.slane %v9650_v22, 1  ;;  %v5528_v22 = vrot.slane %v9696_v48, 1  ;;  %v5540_v48 = vrot.slane %v11243_v41, 1  ;;  %v5552_v41 = vrot.slane %v11247_v46, 1 }
 0x5c8   :  { %6025 = vmatprep.subr.bf16.mxu1 %v8091_v57  ;;  %v5509_v57 = vsel %vm779_vm6, %v5502_v44, %v5508_v15  ;;  %v5550_v33 = vrot.slane %v11248_v26, 1  ;;  %v5487_v26 = vrot.slane %v10043_v62, 1  ;;  %v5506_v62 = vrot.slane %v10109_v54, 1 }
 0x5c9   :  { %v5517_v32 = vsel %vm779_vm6, %v5510_v47, %v5516_v39  ;;  %v5533_v47 = vsel %vm779_vm6, %v5526_v0, %v5532_v3  ;;  %v5524_v54 = vrot.slane %v10175_v55, 1  ;;  %v5542_v55 = vrot.slane %v10235_v10, 1 }
 0x5ca   :  { %5897 = vmatmul.mubr.bf16.gmra.mrb[80].mxu1 %v5497_v20  ;;  %v5557_v46 = vsel %vm779_vm6, %v5550_v33, %v5556_v61  ;;  %v5560_v10 = vrot.slane %v10267_v59, 1 }
 0x5cb   :  { %5906 = vmatprep.mubr.bf16.mxu1 %v5505_v18  ;;  %6026 = vmatpush1.bf16.msra.mxu1 %v8089_v34  ;;  %v5522_v34 = vrot.slane %v9673_v51, 1  ;;  %v5521_v18 = vsel %vm779_vm6, %v5514_v53, %v5520_v17  ;;  %v5534_v51 = vrot.slane %v11204_v58, 1  ;;  %v5546_v58 = vrot.slane %v11245_v40, 1 }
 0x5cc   :  { %6027 = vmatprep.subr.bf16.mxu1 %v8094_v19  ;;  %v5515_v19 = vsel %vm779_vm6, %v5508_v15, %v5514_v53  ;;  %v5558_v40 = vrot.slane %v11249_v1, 1  ;;  %v5551_v15 = vsel %vm779_vm6, %v5544_v35, %v5550_v33  ;;  %v5500_v53 = vrot.slane %v10087_v8, 1 }
 0x5cd   :  { %v5523_v20 = vsel %vm779_vm6, %v5516_v39, %v5522_v34  ;;  %v5535_v44 = vsel %vm779_vm6, %v5528_v22, %v5534_v51  ;;  %v5518_v8 = vrot.slane %v10153_v23, 1  ;;  %v5536_v23 = vrot.slane %v10219_v7, 1 }
 0x5ce   :  { %v5559_v39 = vsel %vm779_vm6, %v5552_v41, %v5558_v40  ;;  %v5554_v7 = vrot.slane %v10255_v13, 1 }
 0x5cf   :  { %6028 = vmatpush1.bf16.msra.mxu1 %v8092_v27  ;;  %v5529_v27 = vsel %vm779_vm6, %v5522_v34, %v5528_v22 }
 0x5d0   :  { %6029 = vmatprep.subr.bf16.mxu1 %v8097_v60  ;;  %v5527_v60 = vsel %vm779_vm6, %v5520_v17, %v5526_v0  ;;  %v5525_v17 = vsel %vm779_vm6, %v5518_v8, %v5524_v54 }
 0x5d2   :  { %5907 = vmatmul.mubr.bf16.gmra.mrb[84].mxu1 %v5503_v4  ;;  %v5547_v4 = vsel %vm779_vm6, %v5540_v48, %v5546_v58 }
 0x5d3   :  { %5916 = vmatprep.mubr.bf16.mxu1 %v5511_v29  ;;  %6030 = vmatpush1.bf16.msra.mxu1 %v8095_v5  ;;  %v5541_v5 = vsel %vm779_vm6, %v5534_v51, %v5540_v48  ;;  %v5545_v29 = vsel %vm779_vm6, %v5538_v6, %v5544_v35 }
 0x5d4   :  { %6031 = vmatprep.subr.bf16.mxu1 %v8100_v31  ;;  %v5539_v31 = vsel %vm779_vm6, %v5532_v3, %v5538_v6 }
 0x5d7   :  { %6032 = vmatpush1.bf16.msra.mxu1 %v8098_v42  ;;  %v5553_v42 = vsel %vm779_vm6, %v5546_v58, %v5552_v41 }
 0x5da   :  { %5917 = vmatmul.mubr.bf16.gmra.mrb[88].mxu1 %v5509_v57  ;;  %v5488_v57 = vrot.slane %v10050_v9, 1  ;;  %v5507_v9 = vsel %vm779_vm6, %v5500_v53, %v5506_v62 }
 0x5db   :  { %5926 = vmatprep.mubr.bf16.mxu1 %v5517_v32  ;;  %v5494_v32 = vrot.slane %v10065_v30, 1  ;;  %v5512_v30 = vrot.slane %v10131_v63, 1  ;;  %v5530_v63 = vrot.slane %v10197_v11, 1  ;;  %v5548_v11 = vrot.slane %v10245_v52, 1  ;;  %v6246_v52 = vld [vmem:[#allocation9] sm:$0x3] }
 0x5dc   :  { %v5489_v1 = vsel %vm779_vm6, %v5487_v26, %v5488_v57 }
 0x5dd   :  { %v5495_v37 = vsel %vm779_vm6, %v5488_v57, %v5494_v32  ;;  %v5501_v34 = vsel %vm779_vm6, %v5494_v32, %v5500_v53  ;;  %v5531_v22 = vsel %vm779_vm6, %v5524_v54, %v5530_v63  ;;  %v5549_v0 = vsel %vm779_vm6, %v5542_v55, %v5548_v11 }
 0x5de   :  { %v5555_v51 = vsel %vm779_vm6, %v5548_v11, %v5554_v7 }
 0x5e2   :  { %5927 = vmatmul.mubr.bf16.gmra.mrb[92].mxu1 %v5515_v19  ;;  %v5513_v19 = vsel %vm779_vm6, %v5506_v62, %v5512_v30 }
 0x5e3   :  { %5936 = vmatprep.mubr.bf16.mxu1 %v5523_v20  ;;  %v5519_v20 = vsel %vm779_vm6, %v5512_v30, %v5518_v8 }
 0x5ea   :  { %5937 = vmatmul.mubr.bf16.gmra.mrb[96].mxu1 %v5521_v18  ;;  %v5537_v18 = vsel %vm779_vm6, %v5530_v63, %v5536_v23 }
 0x5eb   :  { %5946 = vmatprep.mubr.bf16.mxu1 %v5529_v27  ;;  %v5543_v27 = vsel %vm779_vm6, %v5536_v23, %v5542_v55 }
 0x5f2   :  { %5947 = vmatmul.mubr.bf16.gmra.mrb[100].mxu1 %v5527_v60  ;;  %v5561_v60 = vsel %vm779_vm6, %v5554_v7, %v5560_v10 }
 0x5f3   :  { %5956 = vmatprep.mubr.bf16.mxu1 %v5535_v44  ;;  %v11251_v44 = vld [vmem:[#allocation14_spill] sm:$0xff] }
 0x5f4   :  { %v10694_v3 = vrot.slane %v6246_v52, %v11251_v44 }
 0x5fa   :  { %5957 = vmatmul.mubr.bf16.gmra.mrb[104].mxu1 %v5533_v47  ;;  %v11252_v47 = vld [vmem:[#allocation15_spill] sm:$0xff] }
 0x5fb   :  { %5966 = vmatprep.mubr.bf16.mxu1 %v5541_v5  ;;  %v10697_v13 = vrot.slane %v6246_v52, %v11252_v47 }
 0x602   :  { %5967 = vmatmul.mubr.bf16.gmra.mrb[108].mxu1 %v5539_v31 }
 0x603   :  { %5976 = vmatprep.mubr.bf16.mxu1 %v5547_v4 }
 0x60a   :  { %5977 = vmatmul.mubr.bf16.gmra.mrb[56].mxu1 %v5545_v29 }
 0x60b   :  { %5986 = vmatprep.mubr.bf16.mxu1 %v5553_v42 }
 0x612   :  { %5987 = vmatmul.mubr.bf16.gmra.mrb[60].mxu1 %v5551_v15 }
 0x613   :  { %5996 = vmatprep.mubr.bf16.mxu1 %v5559_v39 }
 0x61a   :  { %5997 = vmatmul.mubr.bf16.gmra.mrb[64].mxu1 %v5557_v46 }
 0x61b   :  { %6006 = vmatprep.mubr.bf16.mxu1 %v5558_v40 }
 0x622   :  { %6007 = vmatmul.mubr.bf16.gmra.mrb[68].mxu1 %v5556_v61 }
 0x623   :  { %6049 = vmatprep.mubr.bf16.mxu1 %v11203_v36 }
 0x62a   :  { %6050 = vmatmul.mubr.bf16.vlgmr.msra.gmra.mrb[72].mxu1 %v5489_v1 }
 0x62b   :  { %6059 = vmatprep.mubr.bf16.mxu1 %v11203_v36 }
 0x632   :  { %6060 = vmatmul.mubr.bf16.gmra.mrb[76].mxu1 %v5495_v37 }
 0x633   :  { %6069 = vmatprep.mubr.bf16.mxu1 %v11203_v36 }
 0x63a   :  { %6070 = vmatmul.mubr.bf16.gmra.mrb[80].mxu1 %v5501_v34 }
 0x63b   :  { %6079 = vmatprep.mubr.bf16.mxu1 %v11203_v36 }
 0x642   :  { %6080 = vmatmul.mubr.bf16.gmra.mrb[84].mxu1 %v5507_v9 }
 0x643   :  { %6089 = vmatprep.mubr.bf16.mxu1 %v11203_v36 }
 0x64a   :  { %6090 = vmatmul.mubr.bf16.gmra.mrb[88].mxu1 %v5513_v19 }
 0x64b   :  { %6099 = vmatprep.mubr.bf16.mxu1 %v11203_v36 }
 0x652   :  { %6100 = vmatmul.mubr.bf16.gmra.mrb[92].mxu1 %v5519_v20 }
 0x653   :  { %6109 = vmatprep.mubr.bf16.mxu1 %v11203_v36 }
 0x65a   :  { %6110 = vmatmul.mubr.bf16.gmra.mrb[96].mxu1 %v5525_v17 }
 0x65b   :  { %6119 = vmatprep.mubr.bf16.mxu1 %v11203_v36 }
 0x662   :  { %6120 = vmatmul.mubr.bf16.gmra.mrb[100].mxu1 %v5531_v22 }
 0x663   :  { %6129 = vmatprep.mubr.bf16.mxu1 %v11203_v36 }
 0x66a   :  { %6130 = vmatmul.mubr.bf16.gmra.mrb[104].mxu1 %v5537_v18 }
 0x66b   :  { %6139 = vmatprep.mubr.bf16.mxu1 %v11203_v36 }
 0x672   :  { %6140 = vmatmul.mubr.bf16.gmra.mrb[108].mxu1 %v5543_v27 }
 0x673   :  { %6149 = vmatprep.mubr.bf16.mxu1 %v11203_v36 }
 0x67a   :  { %6150 = vmatmul.mubr.bf16.gmra.mrb[56].mxu1 %v5549_v0 }
 0x67b   :  { %6159 = vmatprep.mubr.bf16.mxu1 %v11203_v36 }
 0x682   :  { %6160 = vmatmul.mubr.bf16.gmra.mrb[60].mxu1 %v5555_v51 }
 0x683   :  { %6169 = vmatprep.mubr.bf16.mxu1 %v11203_v36 }
 0x68a   :  { %6170 = vmatmul.mubr.bf16.gmra.mrb[64].mxu1 %v5561_v60 }
 0x68b   :  { %6179 = vmatprep.mubr.bf16.mxu1 %v11203_v36 }
 0x692   :  { %6180 = vmatmul.mubr.bf16.gmra.mrb[68].mxu1 %v5560_v10 }
 0x6fd   :  { %v6051_v48 = vpop.f32.mrb[72].mxu1 }
 0x6fe   :  { %v7239_v5 = vadd.f32 %v6051_v48, %v10265_v21  ;;  %v6053_v6 = vpop.f32.mrb[73].mxu1 }
 0x6ff   :  { %v7240_v58 = vadd.f32 %v6053_v6, %v10269_v50  ;;  %v6055_v59 = vpop.f32.mrb[74].mxu1 }
 0x700   :  { %v6258_v31 = vadd.f32 %v7239_v5, %v10694_v3  ;;  %v7241_v4 = vadd.f32 %v6055_v59, %v10272_v16  ;;  %v6057_v36 = vpop.f32.mrb[75].mxu1  ;;  %v11255_v5 = vld [vmem:[#allocation48_spill] sm:$0xff]  ;;  %v11256_v59 = vld [vmem:[#allocation50_spill] sm:$0xff] }
 0x701   :  { %v6259_v35 = vadd.f32 %v7240_v58, %v10697_v13  ;;  %v7242_v41 = vadd.f32 %v6057_v36, %v10274_v2 }
 0x702   :  { %v6314_v29 = vmax.f32 %v6258_v31, 0.0  ;;  %v6260_v42 = vadd.f32 %v7241_v4, %v10694_v3 }
 0x703   :  { %v6315_v33 = vmax.f32 %v6259_v35, 0.0  ;;  %v6261_v21 = vadd.f32 %v7242_v41, %v10697_v13 }
 0x704   :  { %v6316_v40 = vmax.f32 %v6260_v42, 0.0 }
 0x705   :  { %v7123_v15 = vpack.c.bf16 %v6315_v33, %v6314_v29  ;;  %v6317_v16 = vmax.f32 %v6261_v21, 0.0  ;;  %v6061_v39 = vpop.f32.mrb[76].mxu1  ;;  %v11257_v21 = vld [vmem:[#allocation52_spill] sm:$0xff] }
 0x706   :  { %v7243_v61 = vadd.f32 %v6061_v39, %v10279_v43  ;;  %v6063_v46 = vpop.f32.mrb[77].mxu1  ;;  %v11258_v39 = vld [vmem:[#allocation30_spill] sm:$0xff] }
 0x707   :  { %6541 = vst.msk [vmem:[%s10944_s7] sm:$0xff] %vm10707_vm10, %v7123_v15  ;;  %v7124_v2 = vpack.c.bf16 %v6317_v16, %v6316_v40  ;;  %v7244_v57 = vadd.f32 %v6063_v46, %v10281_v56  ;;  %v6065_v26 = vpop.f32.mrb[78].mxu1 }
 0x708   :  { %v6262_v1 = vadd.f32 %v7243_v61, %v10694_v3  ;;  %v7245_v32 = vadd.f32 %v6065_v26, %v10284_v45  ;;  %v6067_v37 = vpop.f32.mrb[79].mxu1 }
 0x709   :  { %6542 = vst.msk [vmem:[%s10944_s7 + $0x8] sm:$0xff] %vm10707_vm10, %v7124_v2  ;;  %v6263_v43 = vadd.f32 %v7244_v57, %v10697_v13  ;;  %v7246_v53 = vadd.f32 %v6067_v37, %v10286_v38  ;;  %v11259_v57 = vld [vmem:[#allocation31_spill] sm:$0xff]  ;;  %v11260_v37 = vld [vmem:[#allocation53_spill] sm:$0xff] }
 0x70a   :  { %v6318_v34 = vmax.f32 %v6262_v1, 0.0  ;;  %v6264_v62 = vadd.f32 %v7245_v32, %v10694_v3 }
 0x70b   :  { %v6319_v56 = vmax.f32 %v6263_v43, 0.0  ;;  %v6265_v9 = vadd.f32 %v7246_v53, %v10697_v13 }
 0x70c   :  { %v6320_v30 = vmax.f32 %v6264_v62, 0.0 }
 0x70d   :  { %v7125_v19 = vpack.c.bf16 %v6319_v56, %v6318_v34  ;;  %v6321_v45 = vmax.f32 %v6265_v9, 0.0  ;;  %v6071_v8 = vpop.f32.mrb[80].mxu1 }
 0x70e   :  { %v7247_v20 = vadd.f32 %v6071_v8, %v10289_v14  ;;  %v6073_v54 = vpop.f32.mrb[81].mxu1  ;;  %v11261_v8 = vld [vmem:[#allocation54_spill] sm:$0xff] }
 0x70f   :  { %6543 = vst.msk [vmem:[%s10944_s7 + $0x10] sm:$0xff] %vm10707_vm10, %v7125_v19  ;;  %v7126_v38 = vpack.c.bf16 %v6321_v45, %v6320_v30  ;;  %v7248_v17 = vadd.f32 %v6073_v54, %v10291_v28  ;;  %v6075_v63 = vpop.f32.mrb[82].mxu1 }
 0x710   :  { %v6266_v22 = vadd.f32 %v7247_v20, %v10694_v3  ;;  %v7249_v23 = vadd.f32 %v6075_v63, %v10294_v24  ;;  %v6077_v18 = vpop.f32.mrb[83].mxu1 }
 0x711   :  { %6544 = vst.msk [vmem:[%s10944_s7 + $0x18] sm:$0xff] %vm10707_vm10, %v7126_v38  ;;  %v6267_v14 = vadd.f32 %v7248_v17, %v10697_v13  ;;  %v7250_v55 = vadd.f32 %v6077_v18, %v10296_v12  ;;  %v11262_v17 = vld [vmem:[#allocation56_spill] sm:$0xff]  ;;  %v11263_v18 = vld [vmem:[#allocation58_spill] sm:$0xff] }
 0x712   :  { %v6322_v27 = vmax.f32 %v6266_v22, 0.0  ;;  %v6268_v11 = vadd.f32 %v7249_v23, %v10694_v3 }
 0x713   :  { %v6323_v28 = vmax.f32 %v6267_v14, 0.0  ;;  %v6269_v0 = vadd.f32 %v7250_v55, %v10697_v13 }
 0x714   :  { %v6324_v7 = vmax.f32 %v6268_v11, 0.0  ;;  %v11264_v11 = vld [vmem:[#allocation65_spill] sm:$0xff] }
 0x715   :  { %v7127_v51 = vpack.c.bf16 %v6323_v28, %v6322_v27  ;;  %v6325_v24 = vmax.f32 %v6269_v0, 0.0  ;;  %v6081_v10 = vpop.f32.mrb[84].mxu1 }
 0x716   :  { %v7251_v60 = vadd.f32 %v6081_v10, %v10304_v49  ;;  %v6083_v52 = vpop.f32.mrb[85].mxu1 }
 0x717   :  { %6545 = vst.msk [vmem:[%s10944_s7 + $0x20] sm:$0xff] %vm10707_vm10, %v7127_v51  ;;  %v7128_v12 = vpack.c.bf16 %v6325_v24, %v6324_v7  ;;  %v7252_v44 = vadd.f32 %v6083_v52, %v10307_v25  ;;  %v6085_v48 = vpop.f32.mrb[86].mxu1 }
 0x718   :  { %v6270_v47 = vadd.f32 %v7251_v60, %v10694_v3  ;;  %v7253_v6 = vadd.f32 %v6085_v48, %v11255_v5  ;;  %v6087_v58 = vpop.f32.mrb[87].mxu1 }
 0x719   :  { %6546 = vst.msk [vmem:[%s10944_s7 + $0x28] sm:$0xff] %vm10707_vm10, %v7128_v12  ;;  %v6271_v49 = vadd.f32 %v7252_v44, %v10697_v13  ;;  %v7254_v31 = vadd.f32 %v6087_v58, %v11256_v59  ;;  %v11265_v44 = vld [vmem:[#allocation67_spill] sm:$0xff] }
 0x71a   :  { %v6326_v4 = vmax.f32 %v6270_v47, 0.0  ;;  %v6272_v36 = vadd.f32 %v7253_v6, %v10694_v3  ;;  %v11266_v6 = vld [vmem:[#allocation32_spill] sm:$0xff] }
 0x71b   :  { %v6327_v25 = vmax.f32 %v6271_v49, 0.0  ;;  %v6273_v35 = vadd.f32 %v7254_v31, %v10697_v13  ;;  %v11267_v31 = vld [vmem:[#allocation68_spill] sm:$0xff] }
 0x71c   :  { %v6328_v41 = vmax.f32 %v6272_v36, 0.0 }
 0x71d   :  { %v7129_v29 = vpack.c.bf16 %v6327_v25, %v6326_v4  ;;  %v6329_v42 = vmax.f32 %v6273_v35, 0.0  ;;  %v6091_v33 = vpop.f32.mrb[88].mxu1  ;;  %v11268_v35 = vld [vmem:[#allocation33_spill] sm:$0xff] }
 0x71e   :  { %v7255_v40 = vadd.f32 %v6091_v33, %v11257_v21  ;;  %v6093_v15 = vpop.f32.mrb[89].mxu1 }
 0x71f   :  { %6547 = vst.msk [vmem:[%s10944_s7 + $0x30] sm:$0xff] %vm10707_vm10, %v7129_v29  ;;  %v7130_v16 = vpack.c.bf16 %v6329_v42, %v6328_v41  ;;  %v7256_v61 = vadd.f32 %v6093_v15, %v11258_v39  ;;  %v6095_v46 = vpop.f32.mrb[90].mxu1 }
 0x720   :  { %v6274_v2 = vadd.f32 %v7255_v40, %v10694_v3  ;;  %v7257_v26 = vadd.f32 %v6095_v46, %v11259_v57  ;;  %v6097_v1 = vpop.f32.mrb[91].mxu1 }
 0x721   :  { %6548 = vst.msk [vmem:[%s10944_s7 + $0x38] sm:$0xff] %vm10707_vm10, %v7130_v16  ;;  %v6275_v32 = vadd.f32 %v7256_v61, %v10697_v13  ;;  %v7258_v43 = vadd.f32 %v6097_v1, %v11260_v37  ;;  %v11269_v61 = vld [vmem:[#allocation59_spill] sm:$0xff] }
 0x722   :  { %v6330_v53 = vmax.f32 %v6274_v2, 0.0  ;;  %v6276_v34 = vadd.f32 %v7257_v26, %v10694_v3  ;;  %v11270_v26 = vld [vmem:[#allocation69_spill] sm:$0xff] }
 0x723   :  { %v6331_v62 = vmax.f32 %v6275_v32, 0.0  ;;  %v6277_v56 = vadd.f32 %v7258_v43, %v10697_v13  ;;  %v11271_v43 = vld [vmem:[#allocation60_spill] sm:$0xff] }
 0x724   :  { %v6332_v9 = vmax.f32 %v6276_v34, 0.0 }
 0x725   :  { %v7131_v30 = vpack.c.bf16 %v6331_v62, %v6330_v53  ;;  %v6333_v19 = vmax.f32 %v6277_v56, 0.0  ;;  %v6101_v45 = vpop.f32.mrb[92].mxu1  ;;  %v11272_v56 = vld [vmem:[#allocation61_spill] sm:$0xff] }
 0x726   :  { %v7259_v20 = vadd.f32 %v6101_v45, %v11261_v8  ;;  %v6103_v54 = vpop.f32.mrb[93].mxu1 }
 0x727   :  { %6549 = vst.msk [vmem:[%s10944_s7 + $0x40] sm:$0xff] %vm10707_vm10, %v7131_v30  ;;  %v7132_v38 = vpack.c.bf16 %v6333_v19, %v6332_v9  ;;  %v7260_v63 = vadd.f32 %v6103_v54, %v11262_v17  ;;  %v6105_v22 = vpop.f32.mrb[94].mxu1 }
 0x728   :  { %v6278_v23 = vadd.f32 %v7259_v20, %v10694_v3  ;;  %v7261_v14 = vadd.f32 %v6105_v22, %v11263_v18  ;;  %v6107_v55 = vpop.f32.mrb[95].mxu1 }
 0x729   :  { %6550 = vst.msk [vmem:[%s10944_s7 + $0x48] sm:$0xff] %vm10707_vm10, %v7132_v38  ;;  %v6279_v27 = vadd.f32 %v7260_v63, %v10697_v13  ;;  %v7262_v28 = vadd.f32 %v6107_v55, %v11264_v11  ;;  %v11273_v63 = vld [vmem:[#allocation62_spill] sm:$0xff] }
 0x72a   :  { %v6334_v0 = vmax.f32 %v6278_v23, 0.0  ;;  %v6280_v7 = vadd.f32 %v7261_v14, %v10694_v3  ;;  %v11274_v14 = vld [vmem:[#allocation70_spill] sm:$0xff] }
 0x72b   :  { %v6335_v51 = vmax.f32 %v6279_v27, 0.0  ;;  %v6281_v24 = vadd.f32 %v7262_v28, %v10697_v13  ;;  %v11275_v28 = vld [vmem:[#allocation71_spill] sm:$0xff] }
 0x72c   :  { %v6336_v10 = vmax.f32 %v6280_v7, 0.0 }
 0x72d   :  { %v7133_v60 = vpack.c.bf16 %v6335_v51, %v6334_v0  ;;  %v6337_v52 = vmax.f32 %v6281_v24, 0.0  ;;  %v6111_v12 = vpop.f32.mrb[96].mxu1  ;;  %v11276_v24 = vld [vmem:[#allocation34_spill] sm:$0xff] }
 0x72e   :  { %v7263_v48 = vadd.f32 %v6111_v12, %v11265_v44  ;;  %v6113_v47 = vpop.f32.mrb[97].mxu1 }
 0x72f   :  { %6551 = vst.msk [vmem:[%s10944_s7 + $0x50] sm:$0xff] %vm10707_vm10, %v7133_v60  ;;  %v7134_v5 = vpack.c.bf16 %v6337_v52, %v6336_v10  ;;  %v7264_v58 = vadd.f32 %v6113_v47, %v11266_v6  ;;  %v6115_v49 = vpop.f32.mrb[98].mxu1 }
 0x730   :  { %v6282_v59 = vadd.f32 %v7263_v48, %v10694_v3  ;;  %v7265_v4 = vadd.f32 %v6115_v49, %v11267_v31  ;;  %v6117_v36 = vpop.f32.mrb[99].mxu1 }
 0x731   :  { %6552 = vst.msk [vmem:[%s10944_s7 + $0x58] sm:$0xff] %vm10707_vm10, %v7134_v5  ;;  %v6283_v25 = vadd.f32 %v7264_v58, %v10697_v13  ;;  %v7266_v41 = vadd.f32 %v6117_v36, %v11268_v35  ;;  %v11277_v58 = vld [vmem:[#allocation72_spill] sm:$0xff] }
 0x732   :  { %v6338_v29 = vmax.f32 %v6282_v59, 0.0  ;;  %v6284_v42 = vadd.f32 %v7265_v4, %v10694_v3  ;;  %v11278_v4 = vld [vmem:[#allocation35_spill] sm:$0xff] }
 0x733   :  { %v6339_v33 = vmax.f32 %v6283_v25, 0.0  ;;  %v6285_v21 = vadd.f32 %v7266_v41, %v10697_v13  ;;  %v11279_v41 = vld [vmem:[#allocation63_spill] sm:$0xff] }
 0x734   :  { %v6340_v40 = vmax.f32 %v6284_v42, 0.0 }
 0x735   :  { %v7135_v15 = vpack.c.bf16 %v6339_v33, %v6338_v29  ;;  %v6341_v16 = vmax.f32 %v6285_v21, 0.0  ;;  %v6121_v39 = vpop.f32.mrb[100].mxu1  ;;  %v11280_v21 = vld [vmem:[#allocation73_spill] sm:$0xff] }
 0x736   :  { %v7267_v46 = vadd.f32 %v6121_v39, %v11269_v61  ;;  %v6123_v2 = vpop.f32.mrb[101].mxu1 }
 0x737   :  { %6553 = vst.msk [vmem:[%s10944_s7 + $0x60] sm:$0xff] %vm10707_vm10, %v7135_v15  ;;  %v7136_v57 = vpack.c.bf16 %v6341_v16, %v6340_v40  ;;  %v7268_v1 = vadd.f32 %v6123_v2, %v11270_v26  ;;  %v6125_v32 = vpop.f32.mrb[102].mxu1 }
 0x738   :  { %v6286_v37 = vadd.f32 %v7267_v46, %v10694_v3  ;;  %v7269_v53 = vadd.f32 %v6125_v32, %v11271_v43  ;;  %v6127_v34 = vpop.f32.mrb[103].mxu1 }
 0x739   :  { %6554 = vst.msk [vmem:[%s10944_s7 + $0x68] sm:$0xff] %vm10707_vm10, %v7136_v57  ;;  %v6287_v62 = vadd.f32 %v7268_v1, %v10697_v13  ;;  %v7270_v9 = vadd.f32 %v6127_v34, %v11272_v56 }
 0x73a   :  { %v6342_v30 = vmax.f32 %v6286_v37, 0.0  ;;  %v6288_v19 = vadd.f32 %v7269_v53, %v10694_v3 }
 0x73b   :  { %v6343_v45 = vmax.f32 %v6287_v62, 0.0  ;;  %v6289_v8 = vadd.f32 %v7270_v9, %v10697_v13 }
 0x73c   :  { %v6344_v20 = vmax.f32 %v6288_v19, 0.0 }
 0x73d   :  { %v7137_v54 = vpack.c.bf16 %v6343_v45, %v6342_v30  ;;  %v6345_v38 = vmax.f32 %v6289_v8, 0.0  ;;  %v6131_v17 = vpop.f32.mrb[104].mxu1 }
 0x73e   :  { %v7271_v22 = vadd.f32 %v6131_v17, %v11273_v63  ;;  %v6133_v23 = vpop.f32.mrb[105].mxu1 }
 0x73f   :  { %6555 = vst.msk [vmem:[%s10944_s7 + $0x70] sm:$0xff] %vm10707_vm10, %v7137_v54  ;;  %v7138_v18 = vpack.c.bf16 %v6345_v38, %v6344_v20  ;;  %v7272_v55 = vadd.f32 %v6133_v23, %v11274_v14  ;;  %v6135_v27 = vpop.f32.mrb[106].mxu1 }
 0x740   :  { %v6290_v11 = vadd.f32 %v7271_v22, %v10694_v3  ;;  %v7273_v0 = vadd.f32 %v6135_v27, %v11275_v28  ;;  %v6137_v7 = vpop.f32.mrb[107].mxu1 }
 0x741   :  { %6556 = vst.msk [vmem:[%s10944_s7 + $0x78] sm:$0xff] %vm10707_vm10, %v7138_v18  ;;  %v6291_v51 = vadd.f32 %v7272_v55, %v10697_v13  ;;  %v7274_v10 = vadd.f32 %v6137_v7, %v11276_v24 }
 0x742   :  { %v6346_v60 = vmax.f32 %v6290_v11, 0.0  ;;  %v6292_v52 = vadd.f32 %v7273_v0, %v10694_v3 }
 0x743   :  { %v6347_v12 = vmax.f32 %v6291_v51, 0.0  ;;  %v6293_v44 = vadd.f32 %v7274_v10, %v10697_v13 }
 0x744   :  { %v6348_v48 = vmax.f32 %v6292_v52, 0.0 }
 0x745   :  { %v7139_v47 = vpack.c.bf16 %v6347_v12, %v6346_v60  ;;  %v6349_v5 = vmax.f32 %v6293_v44, 0.0  ;;  %v6141_v6 = vpop.f32.mrb[108].mxu1 }
 0x746   :  { %v7275_v49 = vadd.f32 %v6141_v6, %v11277_v58  ;;  %v6143_v59 = vpop.f32.mrb[109].mxu1 }
 0x747   :  { %6557 = vst.msk [vmem:[%s10944_s7 + $0x80] sm:$0xff] %vm10707_vm10, %v7139_v47  ;;  %v7140_v31 = vpack.c.bf16 %v6349_v5, %v6348_v48  ;;  %v7276_v36 = vadd.f32 %v6143_v59, %v11278_v4  ;;  %v6145_v25 = vpop.f32.mrb[110].mxu1 }
 0x748   :  { %v6294_v35 = vadd.f32 %v7275_v49, %v10694_v3  ;;  %v7277_v29 = vadd.f32 %v6145_v25, %v11279_v41  ;;  %v6147_v42 = vpop.f32.mrb[111].mxu1 }
 0x749   :  { %6558 = vst.msk [vmem:[%s10944_s7 + $0x88] sm:$0xff] %vm10707_vm10, %v7140_v31  ;;  %v6295_v33 = vadd.f32 %v7276_v36, %v10697_v13  ;;  %v7278_v40 = vadd.f32 %v6147_v42, %v11280_v21 }
 0x74a   :  { %v6350_v15 = vmax.f32 %v6294_v35, 0.0  ;;  %v6296_v16 = vadd.f32 %v7277_v29, %v10694_v3 }
 0x74b   :  { %v6351_v39 = vmax.f32 %v6295_v33, 0.0  ;;  %v6297_v61 = vadd.f32 %v7278_v40, %v10697_v13 }
 0x74c   :  { %v6352_v46 = vmax.f32 %v6296_v16, 0.0 }
 0x74d   :  { %v7141_v2 = vpack.c.bf16 %v6351_v39, %v6350_v15  ;;  %v6353_v57 = vmax.f32 %v6297_v61, 0.0  ;;  %v6151_v26 = vpop.f32.mrb[56].mxu1 }
 0x74e   :  { %v6298_v1 = vadd.f32 %v10694_v3, %v6151_v26  ;;  %v6153_v32 = vpop.f32.mrb[57].mxu1 }
 0x74f   :  { %6559 = vst.msk [vmem:[%s10944_s7 + $0x90] sm:$0xff] %vm10707_vm10, %v7141_v2  ;;  %v7142_v37 = vpack.c.bf16 %v6353_v57, %v6352_v46  ;;  %v6299_v43 = vadd.f32 %v10697_v13, %v6153_v32  ;;  %v6155_v53 = vpop.f32.mrb[58].mxu1 }
 0x750   :  { %v6354_v34 = vmax.f32 %v6298_v1, 0.0  ;;  %v6300_v62 = vadd.f32 %v10694_v3, %v6155_v53  ;;  %v6157_v56 = vpop.f32.mrb[59].mxu1 }
 0x751   :  { %6560 = vst.msk [vmem:[%s10944_s7 + $0x98] sm:$0xff] %vm10707_vm10, %v7142_v37  ;;  %v6355_v9 = vmax.f32 %v6299_v43, 0.0  ;;  %v6301_v30 = vadd.f32 %v10697_v13, %v6157_v56 }
 0x752   :  { %v6356_v19 = vmax.f32 %v6300_v62, 0.0 }
 0x753   :  { %v7143_v45 = vpack.c.bf16 %v6355_v9, %v6354_v34  ;;  %v6357_v8 = vmax.f32 %v6301_v30, 0.0 }
 0x755   :  { %6561 = vst.msk [vmem:[%s10944_s7 + $0xa0] sm:$0xff] %vm10707_vm10, %v7143_v45  ;;  %v7144_v20 = vpack.c.bf16 %v6357_v8, %v6356_v19  ;;  %v6161_v54 = vpop.f32.mrb[60].mxu1 }
 0x756   :  { %v6302_v38 = vadd.f32 %v10694_v3, %v6161_v54  ;;  %v6163_v17 = vpop.f32.mrb[61].mxu1 }
 0x757   :  { %6562 = vst.msk [vmem:[%s10944_s7 + $0xa8] sm:$0xff] %vm10707_vm10, %v7144_v20  ;;  %v6303_v63 = vadd.f32 %v10697_v13, %v6163_v17  ;;  %v6165_v22 = vpop.f32.mrb[62].mxu1 }
 0x758   :  { %v6358_v23 = vmax.f32 %v6302_v38, 0.0  ;;  %v6304_v18 = vadd.f32 %v10694_v3, %v6165_v22  ;;  %v6167_v14 = vpop.f32.mrb[63].mxu1 }
 0x759   :  { %v6359_v55 = vmax.f32 %v6303_v63, 0.0  ;;  %v6305_v27 = vadd.f32 %v10697_v13, %v6167_v14 }
 0x75a   :  { %v6360_v11 = vmax.f32 %v6304_v18, 0.0 }
 0x75b   :  { %v7145_v28 = vpack.c.bf16 %v6359_v55, %v6358_v23  ;;  %v6361_v0 = vmax.f32 %v6305_v27, 0.0 }
 0x75d   :  { %6563 = vst.msk [vmem:[%s10944_s7 + $0xb0] sm:$0xff] %vm10707_vm10, %v7145_v28  ;;  %v7146_v7 = vpack.c.bf16 %v6361_v0, %v6360_v11  ;;  %v6171_v51 = vpop.f32.mrb[64].mxu1 }
 0x75e   :  { %v6306_v24 = vadd.f32 %v10694_v3, %v6171_v51  ;;  %v6173_v10 = vpop.f32.mrb[65].mxu1 }
 0x75f   :  { %6564 = vst.msk [vmem:[%s10944_s7 + $0xb8] sm:$0xff] %vm10707_vm10, %v7146_v7  ;;  %v6307_v60 = vadd.f32 %v10697_v13, %v6173_v10  ;;  %v6175_v52 = vpop.f32.mrb[66].mxu1 }
 0x760   :  { %v6362_v12 = vmax.f32 %v6306_v24, 0.0  ;;  %v6308_v44 = vadd.f32 %v10694_v3, %v6175_v52  ;;  %v6177_v48 = vpop.f32.mrb[67].mxu1 }
 0x761   :  { %v6363_v47 = vmax.f32 %v6307_v60, 0.0  ;;  %v6309_v5 = vadd.f32 %v10697_v13, %v6177_v48 }
 0x762   :  { %v6364_v6 = vmax.f32 %v6308_v44, 0.0 }
 0x763   :  { %v7147_v58 = vpack.c.bf16 %v6363_v47, %v6362_v12  ;;  %v6365_v49 = vmax.f32 %v6309_v5, 0.0 }
 0x765   :  { %6565 = vst.msk [vmem:[%s10944_s7 + $0xc0] sm:$0xff] %vm10707_vm10, %v7147_v58  ;;  %v7148_v59 = vpack.c.bf16 %v6365_v49, %v6364_v6  ;;  %v6181_v31 = vpop.f32.mrb[68].mxu1 }
 0x766   :  { %v6310_v4 = vadd.f32 %v10694_v3, %v6181_v31  ;;  %v6183_v36 = vpop.f32.mrb[69].mxu1 }
 0x767   :  { %6566 = vst.msk [vmem:[%s10944_s7 + $0xc8] sm:$0xff] %vm10707_vm10, %v7148_v59  ;;  %v6311_v25 = vadd.f32 %v10697_v13, %v6183_v36  ;;  %v6185_v35 = vpop.f32.mrb[70].mxu1 }
 0x768   :  { %v6366_v41 = vmax.f32 %v6310_v4, 0.0  ;;  %v6312_v29 = vadd.f32 %v10694_v3, %v6185_v35  ;;  %v6187_v42 = vpop.f32.mrb[71].mxu1 }
 0x769   :  { %v6367_v33 = vmax.f32 %v6311_v25, 0.0  ;;  %v6313_v21 = vadd.f32 %v10697_v13, %v6187_v42 }
 0x76a   :  { %v6368_v40 = vmax.f32 %v6312_v29, 0.0 }
 0x76b   :  { %v7149_v15 = vpack.c.bf16 %v6367_v33, %v6366_v41  ;;  %v6369_v16 = vmax.f32 %v6313_v21, 0.0 }
 0x76d   :  { %6567 = vst.msk [vmem:[%s10944_s7 + $0xd0] sm:$0xff] %vm10707_vm10, %v7149_v15  ;;  %v7150_v39 = vpack.c.bf16 %v6369_v16, %v6368_v40 }
 0x76f   :  { %6571 = vst.msk [vmem:[%s10944_s7 + $0xd8] sm:$0x11] %vm6570_vm13, %v7150_v39 }
 0x770   :  { %6580 = vsyncpa [#allocation3], 1 }
 0x771   :  { %6581 = vsyncpa [#allocation5], 1 }
 0x772   :  { %6582 = vsyncpa [#allocation8], 1 }

// kernel: forward.3
= control target key start
LH: loop header
LB: loop body
LE: loop exit
PB: predicated region body
PF: predicated region fallthrough
CT: control target
= control target key end

     0   :  { %s12591_s0 = inlined_call_operand.vmem [shape: bf16[22,8,176], index: 0, kind: input, shape index: {}]   ;;  %s12592_s1 = inlined_call_operand.hbm [shape: s8[22,176,1024], index: 1, kind: input, shape index: {}]   ;;  %s12593_s2 = inlined_call_operand.hbm [shape: f32[1,1024], index: 2, kind: input, shape index: {}]   ;;  %s12594_s3 = inlined_call_operand.hbm [shape: f32[1,1024], index: 3, kind: input, shape index: {}]   ;;  %s12595_s4 = inlined_call_operand.hbm [shape: bf16[1024,128], index: 4, kind: input, shape index: {}]   ;;  %s12596_s5 = inlined_call_operand.vmem [shape: f32[1,8,128], index: 5, kind: output, shape index: {}]  }
   0x1   :  { %12604 = sst [smem:[#allocation16_spill]] %s12592_s1 }
   0x2   :  { %12605 = sst [smem:[#allocation17_spill]] %s12593_s2 }
   0x3   :  { %10 = vsyncpa [#allocation4], 0 }
   0x4   :  { %12 = vsyncpa [#allocation4 + $0x1], 0 }
   0x5   :  { %13 = vsyncpa [#allocation6], 0 }
   0x6   :  { %15 = vsyncpa [#allocation6 + $0x1], 0 }
   0x7   :  { %16 = vsyncpa [#allocation9], 0 }
   0x8   :  { %18 = vsyncpa [#allocation9 + $0x1], 0  ;;  %s11582_s18 = smov 0   ;;  %s11584_s19 = smov 0  }
   0x9   :  { %s11586_s20 = smov 0   ;;  %s11588_s21 = smov 0  }
   0xa   :  { %s11590_s22 = smov 0   ;;  %s11592_s23 = smov 0  }
   0xb LB: > { %12606 = sst [smem:[#allocation13_spill]] %s11528_s20  ;;  %s12598_s24 = sadd.s32 4294967295, %s11540_s23   ;;  %s11540_s23 = sphi %s11592_s23, %s24_s23   ;;  %s11536_s22 = sphi %s11590_s22, %s12626_s22   ;;  %s11532_s21 = sphi %s11588_s21, %s12625_s21   ;;  %s11528_s20 = sphi %s11586_s20, %s12621_s20   ;;  %s11524_s19 = sphi %s11584_s19, %s12624_s19   ;;  %s11520_s18 = sphi %s11582_s18, %s12623_s18  }
   0xc   : > { %s33_s25 = sadd.s32 1, %s11536_s22  ;;  %s68_s26 = sadd.s32 1, %s11528_s20 }
   0xd   : > { %p34_p0 = scmp.ge.s32.totalorder %s33_s25, 2  ;;  %p75_p1 = scmp.ne.s32.totalorder %s11528_s20, %s11524_s19 }
   0xe   : > { %p76_p2 = scmp.eq.s32.totalorder %s11540_s23, 0  ;;  %p81_p4 = scmp.ne.s32.totalorder %s11524_s19, %s11520_s18 }
   0xf   : > { %s12628_s25 = smov (%p34_p0, %s33_s25), 0  ;;  %p82_p5 = scmp.eq.s32.totalorder %s12598_s24, 0 }
  0x10   : > { %12607 = sst [smem:[#allocation14_spill]] %s12628_s25  ;;  %p77_p3 = por %p76_p2, %p75_p1 }
  0x11   : > { %s65_s27 = ssub.s32 %s11536_s22, %s12628_s25  ;;  %p11623_p7 = por %p82_p5, %p81_p4 }
  0x12   : > { %p66_p6 = scmp.eq.s32.totalorder %s65_s27, 0  ;;  %p11231_p8 = scmp.lt.s32.totalorder %s11540_s23, 2 }
  0x13   : > { %s12608_s28 = scalar_select %p11623_p7, 1, 0 }
  0x14   : > { %s11629_s29 = scalar_select %p66_p6, %s11528_s20, %s68_s26  }
  0x15   : > { %s11632_s30 = sand.u32 1, %s11528_s20   ;;  %p11634_p9 = pnand %p11231_p8, %p77_p3 }
  0x16   : > { %12609 = sst [smem:[#allocation15_spill]] %s11629_s29  ;;  %s247_s7 = sand.u32 1, %s11540_s23  }
  0x17   : > { %s12610_s6 = scalar_select %p11634_p9, 1, 0 }
  0x18   : > { %s12599_s8 = sshll.u32 %s11632_s30, 2  ;;  %s10993_s9 = sshll.u32 %s11536_s22, 6 }
  0x19   : > { %s12611_s2 = sld [smem:[#allocation17_spill]]  ;;  %s251_s13 = scalar_lea.vmem [#allocation5], %s12599_s8 }
  0x1a   : > { %s261_s14 = sshll.u32 %s251_s13, 4  ;;  %s11652_s15 = scalar_lea.sflag [#allocation6], %s247_s7  ;;  %s11650_s14 = int_to_ptr.vmem [resolvable:$true] %s261_s14 }
  0x1b   : > { %p11658_p11 = pneg %p11634_p9 }
  0x1f   : > { %s11646_s12 = scalar_lea.hbm %s12611_s2, %s10993_s9  ;;  %s11367_s27 = scalar_lea.hbm %s12611_s2, 128 }
  0x20   : > { %s11362_s16 = scalar_lea.hbm %s11646_s12, 64  ;;  %p11368_p0 = scmp.lt.u32.totalorder %s11646_s12, %s12611_s2 }
  0x21   : > { %p11363_p10 = scmp.ne.s32.totalorder %s11646_s12, %s11362_s16  ;;  %p11369_p1 = scmp.lt.u32.totalorder %s11367_s27, %s11362_s16 }
  0x22   : > { %p11371_p3 = scmp.lt.u32.totalorder %s11362_s16, %s11646_s12 }
  0x23   : > { %p11365_p12 = pnand %p11658_p11, %p11363_p10  ;;  %p11370_p2 = por %p11369_p1, %p11368_p0 }
  0x25   : > { %p11366_p13 = pneg %p11365_p12  ;;  %p11372_p4 = por %p11371_p3, %p11370_p2 }
  0x27   : > { %p11373_p5 = pnand %p11372_p4, %p11366_p13 }
  0x29   : > { %11376 = shalt.err (!%p11373_p5)
}
  0x2a   : > { %s11377_s7 = scalar_lea.vmem %s11650_s14, 64  ;;  %s11542_s13 = smov [#allocation5]  }
  0x2b   : > { %p11378_p6 = scmp.ne.s32.totalorder %s11650_s14, %s11377_s7  ;;  %s11382_s18 = sshll.u32 %s11542_s13, 4  ;;  %s11383_s18 = int_to_ptr.vmem [resolvable:$false] %s11382_s18 }
  0x2c   : > { %s11384_s26 = scalar_lea.vmem %s11383_s18, 128  ;;  %p11385_p12 = scmp.lt.s32.totalorder %s11650_s14, %s11383_s18 }
  0x2d   : > { %p11380_p8 = pnand %p11378_p6, %p11658_p11  ;;  %p11386_p7 = scmp.lt.s32.totalorder %s11384_s26, %s11377_s7 }
  0x2f   : > { %p11381_p10 = pneg %p11380_p8  ;;  %p11387_p0 = por %p11386_p7, %p11385_p12 }
  0x31   : > { %p11388_p1 = pnand %p11387_p0, %p11381_p10 }
  0x33   : > { %11391 = shalt.err (!%p11388_p1)
}
  0x34   : > { %11224 = dma.hbm_to_vmem [thread:$0]  (!%p11634_p9), %s11646_s12, 64, %s11650_s14, %s11652_s15  }
  0x35   : > { %s11687_s10 = scalar_lea.hbm %s12594_s3, %s10993_s9  ;;  %p9412_p7 = scmp.ge.s32.totalorder %s11540_s23, 1 }
  0x36   : > { %p310_p13 = scmp.lt.s32.totalorder %s11540_s23, 3  ;;  %s11208_s7 = smul.u32 3872, %s11632_s30 }
  0x37   : > { %s10992_s13 = sshll.u32 %s11536_s22, 7  ;;  %s12614_s1 = sld [smem:[#allocation16_spill]] }
  0x38   : > { %p11691_p2 = pnand %p9412_p7, %p310_p13  ;;  %s228_s12 = scalar_lea.vmem [#allocation3], %s11208_s7 }
  0x39   : > { %s237_s9 = sshll.u32 %s228_s12, 4  ;;  %s225_s14 = scalar_lea.sflag [#allocation4], %s11632_s30  ;;  %s11702_s9 = int_to_ptr.vmem [resolvable:$true] %s237_s9 }
  0x3a   : > { %s12613_s11 = scalar_select %p11691_p2, 1, 0 }
  0x3d   : > { %s11700_s24 = scalar_lea.hbm %s12614_s1, %s10992_s13  ;;  %s11397_s18 = scalar_lea.hbm %s12614_s1, 123904 }
  0x3e   : > { %s11392_s16 = scalar_lea.hbm %s11700_s24, 61952  ;;  %p11398_p6 = scmp.lt.u32.totalorder %s11700_s24, %s12614_s1 }
  0x3f   : > { %p11393_p3 = scmp.ne.s32.totalorder %s11700_s24, %s11392_s16  ;;  %p11399_p8 = scmp.lt.u32.totalorder %s11397_s18, %s11392_s16 }
  0x40   : > { %p11401_p12 = scmp.lt.u32.totalorder %s11392_s16, %s11700_s24 }
  0x41   : > { %p11395_p4 = pnand %p11393_p3, %p11658_p11  ;;  %p11400_p10 = por %p11399_p8, %p11398_p6 }
  0x43   : > { %p11396_p5 = pneg %p11395_p4  ;;  %p11402_p0 = por %p11401_p12, %p11400_p10 }
  0x45   : > { %p11403_p1 = pnand %p11402_p0, %p11396_p5 }
  0x47   : > { %11406 = shalt.err (!%p11403_p1)
}
  0x48   : > { %s11407_s7 = scalar_lea.vmem %s11702_s9, 61952  ;;  %s11543_s8 = smov [#allocation3]  }
  0x49   : > { %p11408_p7 = scmp.ne.s32.totalorder %s11702_s9, %s11407_s7  ;;  %s11412_s12 = sshll.u32 %s11543_s8, 4  ;;  %s11413_s12 = int_to_ptr.vmem [resolvable:$false] %s11412_s12 }
  0x4a   : > { %s11414_s27 = scalar_lea.vmem %s11413_s12, 123904  ;;  %p11415_p4 = scmp.lt.s32.totalorder %s11702_s9, %s11413_s12 }
  0x4b   : > { %p11410_p13 = pnand %p11408_p7, %p11658_p11  ;;  %p11416_p2 = scmp.lt.s32.totalorder %s11414_s27, %s11407_s7 }
  0x4d   : > { %p11411_p3 = pneg %p11410_p13  ;;  %p11417_p6 = por %p11416_p2, %p11415_p4 }
  0x4f   : > { %p11418_p8 = pnand %p11417_p6, %p11411_p3 }
  0x51   : > { %11421 = shalt.err (!%p11418_p8)
}
  0x52   : > { %s11544_s16 = smov 256   ;;  %s11545_s18 = smov 128  }
  0x53   : > { %s11546_s13 = smov 8   ;;  %s12615_s26 = sshll.u32 %s11632_s30, 2 }
  0x54   : > { %11221 = dma.hbm_to_vmem [thread:$0]  (!%p11634_p9), %s11700_s24, 61952, %s11702_s9, %s225_s14, %s11544_s16, %s11545_s18, %s11546_s13  }
  0x55   : > { %s272_s7 = scalar_lea.vmem [#allocation7], %s12615_s26  ;;  %s9409_s12 = sshll.u32 %s11632_s30, 8 }
  0x56   : > { %s282_s8 = sshll.u32 %s272_s7, 4  ;;  %s11422_s27 = scalar_lea.hbm %s11687_s10, 64  ;;  %s283_s8 = int_to_ptr.vmem [resolvable:$true] %s282_s8 }
  0x57   : > { %p11423_p2 = scmp.ne.s32.totalorder %s11687_s10, %s11422_s27  ;;  %s11427_s25 = scalar_lea.hbm %s12594_s3, 128 }
  0x58   : > { %p11428_p12 = scmp.lt.u32.totalorder %s11687_s10, %s12594_s3  ;;  %p11429_p0 = scmp.lt.u32.totalorder %s11427_s25, %s11422_s27 }
  0x59   : > { %p11425_p5 = pnand %p11423_p2, %p11658_p11  ;;  %p11431_p7 = scmp.lt.u32.totalorder %s11422_s27, %s11687_s10 }
  0x5a   : > { %p11430_p1 = por %p11429_p0, %p11428_p12 }
  0x5b   : > { %p11426_p10 = pneg %p11425_p5 }
  0x5c   : > { %p11432_p13 = por %p11431_p7, %p11430_p1 }
  0x5e   : > { %p11433_p3 = pnand %p11432_p13, %p11426_p10 }
  0x60   : > { %11436 = shalt.err (!%p11433_p3)
}
  0x61   : > { %s11437_s24 = scalar_lea.vmem %s283_s8, 64  ;;  %s11547_s9 = smov [#allocation7]  }
  0x62   : > { %p11438_p4 = scmp.ne.s32.totalorder %s283_s8, %s11437_s24  ;;  %s11442_s14 = sshll.u32 %s11547_s9, 4  ;;  %s11443_s14 = int_to_ptr.vmem [resolvable:$false] %s11442_s14 }
  0x63   : > { %s11444_s1 = scalar_lea.vmem %s11443_s14, 128  ;;  %p11445_p2 = scmp.lt.s32.totalorder %s283_s8, %s11443_s14 }
  0x64   : > { %p11440_p6 = pnand %p11438_p4, %p11658_p11  ;;  %p11446_p5 = scmp.lt.s32.totalorder %s11444_s1, %s11437_s24 }
  0x66   : > { %p11441_p8 = pneg %p11440_p6  ;;  %p11447_p9 = por %p11446_p5, %p11445_p2 }
  0x68   : > { %p11448_p0 = pnand %p11447_p9, %p11441_p8 }
  0x6a   : > { %11451 = shalt.err (!%p11448_p0)
}
  0x6b   : > { %p12616_p12 = scmp.ne.s32.totalorder %s12610_s6, 0  ;;  %s10995_s2 = sshll.u32 %s11536_s22, 12 }
  0x6c   : > { %s11753_s29 = scalar_lea.hbm %s12595_s4, %s10995_s2  ;;  %s293_s16 = scalar_lea.vmem [#allocation8], %s9409_s12 }
  0x6d   : > { %11227 = dma.hbm_to_vmem [thread:$0]  (!%p12616_p12), %s11687_s10, 64, %s283_s8, %s11652_s15  }
  0x6e   : > { %s302_s18 = sshll.u32 %s293_s16, 4  ;;  %s290_s13 = scalar_lea.sflag [#allocation9], %s11632_s30  ;;  %s11757_s18 = int_to_ptr.vmem [resolvable:$true] %s302_s18 }
  0x6f   : > { %s11452_s26 = scalar_lea.hbm %s11753_s29, 4096  ;;  %s11457_s7 = scalar_lea.hbm %s12595_s4, 8192 }
  0x70   : > { %p11453_p9 = scmp.ne.s32.totalorder %s11753_s29, %s11452_s26  ;;  %p11458_p7 = scmp.lt.u32.totalorder %s11753_s29, %s12595_s4 }
  0x71   : > { %p11459_p13 = scmp.lt.u32.totalorder %s11457_s7, %s11452_s26  ;;  %p11461_p4 = scmp.lt.u32.totalorder %s11452_s26, %s11753_s29 }
  0x72   : > { %p11455_p10 = pnand %p11453_p9, %p11658_p11 }
  0x73   : > { %p11460_p3 = por %p11459_p13, %p11458_p7 }
  0x74   : > { %p11456_p1 = pneg %p11455_p10 }
  0x75   : > { %p11462_p6 = por %p11461_p4, %p11460_p3 }
  0x77   : > { %p11463_p8 = pnand %p11462_p6, %p11456_p1 }
  0x79   : > { %11466 = shalt.err (!%p11463_p8)
}
  0x7a   : > { %s11467_s12 = scalar_lea.vmem %s11757_s18, 4096  ;;  %s11548_s24 = smov [#allocation8]  }
  0x7b   : > { %p11468_p2 = scmp.ne.s32.totalorder %s11757_s18, %s11467_s12  ;;  %s11472_s9 = sshll.u32 %s11548_s24, 4  ;;  %s11473_s9 = int_to_ptr.vmem [resolvable:$false] %s11472_s9 }
  0x7c   : > { %s11474_s14 = scalar_lea.vmem %s11473_s9, 8192  ;;  %p11475_p9 = scmp.lt.s32.totalorder %s11757_s18, %s11473_s9 }
  0x7d   : > { %p11470_p5 = pnand %p11468_p2, %p11658_p11  ;;  %p11476_p10 = scmp.lt.s32.totalorder %s11474_s14, %s11467_s12 }
  0x7f   : > { %p11471_p0 = pneg %p11470_p5  ;;  %p11477_p7 = por %p11476_p10, %p11475_p9 }
  0x81   : > { %p11478_p13 = pnand %p11477_p7, %p11471_p0 }
  0x83   : > { %11481 = shalt.err (!%p11478_p13)
}
  0x84   : > { %s11549_s1 = smov 64   ;;  %s11550_s2 = smov 4  }
  0x85   : > { %11230 = dma.hbm_to_vmem [thread:$0]  (!%p12616_p12), %s11753_s29, 4096, %s11757_s18, %s290_s13, %s11549_s1, %s11549_s1, %s11550_s2  }
  0x86   : > { %p12617_p11 = scmp.ne.s32.totalorder %s12613_s11, 0 }
  0x87   : > { %s316_s17 = sand.u32 (!%p12617_p11), 1, %s11524_s19   ;;  %p12618_p1 = scmp.ne.s32.totalorder (!%p12617_p11), %s12608_s28, 0 }
  0x88   : > { %314 = sbr.rel (%p12617_p11) target bundleno = 1583 (0x62f), region = 40  ;;  %s317_s25 = scalar_lea.sflag (!%p12617_p11), [#allocation4], %s316_s17 }
  0x89   : > { %s11209_s20 = smul.u32 (!%p12617_p11), 3872, %s316_s17 }
  0x8b   : > { %s11786_s16 = scalar_lea.vmem (!%p12617_p11), [#allocation3], %s11209_s20 }
  0x8f   : > { %11507 = dma.done.wait (%p12618_p1), %s317_s25, 61952  }
  0x90   : > { %11509 = vsyncadd (%p12618_p1), %s317_s25, 4294905344  ;;  %s12619_s26 = sadd.s32 4294967295, %s11540_s23   ;;  %s9413_s6 = sshll.u32 %s316_s17, 2 }
  0x91   : > { %s325_s30 = sand.u32 1, %s12619_s26   ;;  %s11794_s11 = scalar_lea.vmem [#allocation5], %s9413_s6 }
  0x92   : > { %s326_s29 = scalar_lea.sflag [#allocation6], %s325_s30 }
  0x93   : > { %11511 = dma.done.wait (%p12618_p1), %s326_s29, 128  }
  0x94   : > { %11513 = vsyncadd (%p12618_p1), %s326_s29, 4294967168  ;;  %s9415_s18 = sshll.u32 %s316_s17, 8  ;;  %s11800_s13 = scalar_lea.vmem [#allocation7], %s9413_s6 }
  0x95   : > { %s344_s15 = scalar_lea.sflag [#allocation9], %s316_s17  ;;  %s11802_s10 = scalar_lea.vmem [#allocation8], %s9415_s18 }
  0x96   : > { %11515 = dma.done.wait (%p12618_p1), %s344_s15, 4096  }
  0x97   : > { %11517 = vsyncadd (%p12618_p1), %s344_s15, 4294963200  ;;  %p9416_p12 = scmp.ne.s32.totalorder %s11532_s21, 0 }
  0x98   : > { %v11551_v0 = vmov (!%p9416_p12), 0.0  }
  0x99   : > { %408 = sbr.rel (%p9416_p12) target bundleno = 160 (0xa0), region = 60  ;;  %409 = vst [vmem:[#allocation2] sm:$0xff] (!%p9416_p12), %v11551_v0 }
  0xa0 PF: > { %v9418_v1 = vld [vmem:[%s11786_s16 + $0xb0] sm:$0xff]  ;;  %v9419_v2 = vld [vmem:[%s11786_s16 + $0xb8] sm:$0xff]  ;;  %v9420_v3 = vld [vmem:[%s11786_s16 + $0xc0] sm:$0xff]  ;;  %vm772_vm0 = vcmask 392192   ;;  %p10988_p3 = scmp.ne.s32.totalorder %s11532_s21, 1 }
  0xa1   : > { %v502_v4 = vunpack.c.l.s8.bf16 %v9418_v1  ;;  %v504_v5 = vunpack.c.l.s8.bf16 %v9419_v2  ;;  %v503_v6 = vunpack.c.h.s8.bf16 %v9418_v1  ;;  %v505_v7 = vunpack.c.h.s8.bf16 %v9419_v2  ;;  %v9421_v8 = vld [vmem:[%s11786_s16 + $0xc8] sm:$0xff]  ;;  %v9422_v13 = vld [vmem:[%s11786_s16 + $0xd0] sm:$0xff]  ;;  %v9423_v14 = vld [vmem:[%s11786_s16 + $0xd8] sm:$0xff] }
  0xa2   : > { %v506_v9 = vunpack.c.l.s8.bf16 %v9420_v3  ;;  %v508_v10 = vunpack.c.l.s8.bf16 %v9421_v8  ;;  %v507_v11 = vunpack.c.h.s8.bf16 %v9420_v3  ;;  %v509_v12 = vunpack.c.h.s8.bf16 %v9421_v8  ;;  %v9424_v19 = vld [vmem:[%s11786_s16 + $0xe0] sm:$0xff]  ;;  %v9425_v20 = vld [vmem:[%s11786_s16 + $0xe8] sm:$0xff]  ;;  %v9426_v35 = vld [vmem:[%s11786_s16 + $0xf0] sm:$0xff] }
  0xa3   : > { %v9443_v15 = vcombine.high %v502_v4, %v504_v5  ;;  %v9445_v16 = vcombine.high %v503_v6, %v505_v7  ;;  %v9442_v17 = vcombine.low %v502_v4, %v504_v5  ;;  %v9444_v18 = vcombine.low %v503_v6, %v505_v7  ;;  %v9427_v36 = vld [vmem:[%s11786_s16 + $0xf8] sm:$0xff]  ;;  %v9428_v45 = vld [vmem:[%s11786_s16 + $0x100] sm:$0xff]  ;;  %v9429_v46 = vld [vmem:[%s11786_s16 + $0x108] sm:$0xff] }
  0xa4   : > { %v9447_v21 = vcombine.high %v506_v9, %v508_v10  ;;  %v9449_v22 = vcombine.high %v507_v11, %v509_v12  ;;  %v510_v23 = vunpack.c.l.s8.bf16 %v9422_v13  ;;  %v512_v24 = vunpack.c.l.s8.bf16 %v9423_v14  ;;  %v9430_v55 = vld [vmem:[%s11786_s16 + $0x110] sm:$0xff]  ;;  %v9431_v56 = vld [vmem:[%s11786_s16 + $0x118] sm:$0xff]  ;;  %v9432_v1 = vld [vmem:[%s11786_s16 + $0x120] sm:$0xff] }
  0xa5   : > { %776 = vmatprep.subr.bf16.mxu0 %v9443_v15  ;;  %817 = vmatprep.subr.bf16.mxu1 %v9445_v16  ;;  %v511_v25 = vunpack.c.h.s8.bf16 %v9422_v13  ;;  %v513_v26 = vunpack.c.h.s8.bf16 %v9423_v14  ;;  %v9446_v27 = vcombine.low %v506_v9, %v508_v10  ;;  %v9448_v28 = vcombine.low %v507_v11, %v509_v12  ;;  %v9433_v2 = vld [vmem:[%s11786_s16 + $0x128] sm:$0xff]  ;;  %v11828_v3 = vld [vmem:[%s12591_s0 + $0x8] sm:$0xff]  ;;  %v9434_v13 = vld [vmem:[%s11786_s16 + $0x130] sm:$0xff] }
  0xa6   : > { %777 = vmatpush1.bf16.msra.mxu0 %v9442_v17  ;;  %818 = vmatpush1.bf16.msra.mxu1 %v9444_v18  ;;  %v514_v29 = vunpack.c.l.s8.bf16 %v9424_v19  ;;  %v516_v30 = vunpack.c.l.s8.bf16 %v9425_v20  ;;  %v9451_v31 = vcombine.high %v510_v23, %v512_v24  ;;  %v515_v33 = vunpack.c.h.s8.bf16 %v9424_v19  ;;  %v9435_v14 = vld [vmem:[%s11786_s16 + $0x138] sm:$0xff]  ;;  %v9436_v19 = vld [vmem:[%s11786_s16 + $0x140] sm:$0xff] }
  0xa7   : > { %778 = vmatprep.subr.bf16.mxu0 %v9447_v21  ;;  %819 = vmatprep.subr.bf16.mxu1 %v9449_v22  ;;  %v9453_v32 = vcombine.high %v511_v25, %v513_v26  ;;  %v517_v34 = vunpack.c.h.s8.bf16 %v9425_v20  ;;  %v9450_v37 = vcombine.low %v510_v23, %v512_v24  ;;  %v9452_v38 = vcombine.low %v511_v25, %v513_v26  ;;  %v9437_v20 = vld [vmem:[%s11786_s16 + $0x148] sm:$0xff]  ;;  %v9438_v25 = vld [vmem:[%s11786_s16 + $0x150] sm:$0xff] }
  0xa8   : > { %v9455_v39 = vcombine.high %v514_v29, %v516_v30  ;;  %v518_v40 = vunpack.c.l.s8.bf16 %v9426_v35  ;;  %v520_v42 = vunpack.c.l.s8.bf16 %v9427_v36  ;;  %v519_v43 = vunpack.c.h.s8.bf16 %v9426_v35  ;;  %v411_v35 = vld [vmem:[%s11786_s16] sm:$0xff] }
  0xa9   : > { %v9457_v41 = vcombine.high %v515_v33, %v517_v34  ;;  %v521_v44 = vunpack.c.h.s8.bf16 %v9427_v36  ;;  %v9454_v47 = vcombine.low %v514_v29, %v516_v30  ;;  %v9456_v48 = vcombine.low %v515_v33, %v517_v34  ;;  %v9439_v34 = vld [vmem:[%s11786_s16 + $0x158] sm:$0xff]  ;;  %v412_v36 = vld [vmem:[%s11786_s16 + $0x8] sm:$0xff] }
  0xaa   : > { %779 = vmatpush1.bf16.msra.mxu0 %v9446_v27  ;;  %820 = vmatpush1.bf16.msra.mxu1 %v9448_v28  ;;  %v522_v49 = vunpack.c.l.s8.bf16 %v9428_v45  ;;  %v524_v50 = vunpack.c.l.s8.bf16 %v9429_v46  ;;  %v9459_v51 = vcombine.high %v518_v40, %v520_v42  ;;  %v523_v53 = vunpack.c.h.s8.bf16 %v9428_v45  ;;  %v413_v45 = vld [vmem:[%s11786_s16 + $0x10] sm:$0xff] }
  0xab   : > { %780 = vmatprep.subr.bf16.mxu0 %v9451_v31  ;;  %821 = vmatprep.subr.bf16.mxu1 %v9453_v32  ;;  %v9461_v52 = vcombine.high %v519_v43, %v521_v44  ;;  %v525_v54 = vunpack.c.h.s8.bf16 %v9429_v46  ;;  %v9458_v57 = vcombine.low %v518_v40, %v520_v42  ;;  %v9460_v58 = vcombine.low %v519_v43, %v521_v44 }
  0xac   : > { %v9463_v59 = vcombine.high %v522_v49, %v524_v50  ;;  %v526_v60 = vunpack.c.l.s8.bf16 %v9430_v55  ;;  %v528_v62 = vunpack.c.l.s8.bf16 %v9431_v56  ;;  %v527_v63 = vunpack.c.h.s8.bf16 %v9430_v55  ;;  %v415_v55 = vld [vmem:[%s11786_s16 + $0x20] sm:$0xff] }
  0xad   : > { %v9465_v61 = vcombine.high %v523_v53, %v525_v54  ;;  %v529_v0 = vunpack.c.h.s8.bf16 %v9431_v56  ;;  %v9462_v4 = vcombine.low %v522_v49, %v524_v50  ;;  %v9464_v5 = vcombine.low %v523_v53, %v525_v54  ;;  %v414_v54 = vld [vmem:[%s11786_s16 + $0x18] sm:$0xff]  ;;  %v416_v56 = vld [vmem:[%s11786_s16 + $0x28] sm:$0xff] }
  0xae   : > { %781 = vmatpush1.bf16.msra.mxu0 %v9450_v37  ;;  %822 = vmatpush1.bf16.msra.mxu1 %v9452_v38  ;;  %v530_v6 = vunpack.c.l.s8.bf16 %v9432_v1  ;;  %v532_v7 = vunpack.c.l.s8.bf16 %v9433_v2  ;;  %v9441_v8 = vcombine.high %v11828_v3, %v11828_v3  ;;  %v9467_v9 = vcombine.high %v526_v60, %v528_v62 }
  0xaf   : > { %782 = vmatprep.subr.bf16.mxu0 %v9455_v39  ;;  %823 = vmatprep.subr.bf16.mxu1 %v9457_v41  ;;  %v9469_v10 = vcombine.high %v527_v63, %v529_v0  ;;  %v531_v11 = vunpack.c.h.s8.bf16 %v9432_v1  ;;  %v533_v12 = vunpack.c.h.s8.bf16 %v9433_v2  ;;  %v9466_v15 = vcombine.low %v526_v60, %v528_v62  ;;  %v11849_v1 = vld [vmem:[%s12591_s0] sm:$0xff] }
  0xb0   : > { %9486 = vmatprep.mubr.msk.bf16.mxu0 %vm772_vm0, %v9441_v8  ;;  %9487 = vmatprep.mubr.msk.bf16.mxu1 %vm772_vm0, %v9441_v8  ;;  %v9468_v16 = vcombine.low %v527_v63, %v529_v0  ;;  %v9471_v17 = vcombine.high %v530_v6, %v532_v7  ;;  %v534_v18 = vunpack.c.l.s8.bf16 %v9434_v13  ;;  %v536_v22 = vunpack.c.l.s8.bf16 %v9435_v14 }
  0xb1   : > { %v9473_v21 = vcombine.high %v531_v11, %v533_v12  ;;  %v535_v23 = vunpack.c.h.s8.bf16 %v9434_v13  ;;  %v537_v24 = vunpack.c.h.s8.bf16 %v9435_v14  ;;  %v9470_v26 = vcombine.low %v530_v6, %v532_v7  ;;  %v418_v13 = vld [vmem:[%s11786_s16 + $0x38] sm:$0xff] }
  0xb2   : > { %783 = vmatpush1.bf16.msra.mxu0 %v9454_v47  ;;  %824 = vmatpush1.bf16.msra.mxu1 %v9456_v48  ;;  %v9472_v27 = vcombine.low %v531_v11, %v533_v12  ;;  %v538_v28 = vunpack.c.l.s8.bf16 %v9436_v19  ;;  %v540_v29 = vunpack.c.l.s8.bf16 %v9437_v20  ;;  %v9475_v30 = vcombine.high %v534_v18, %v536_v22 }
  0xb3   : > { %784 = vmatprep.subr.bf16.mxu0 %v9459_v51  ;;  %825 = vmatprep.subr.bf16.mxu1 %v9461_v52  ;;  %v9477_v31 = vcombine.high %v535_v23, %v537_v24  ;;  %v539_v32 = vunpack.c.h.s8.bf16 %v9436_v19  ;;  %v541_v33 = vunpack.c.h.s8.bf16 %v9437_v20  ;;  %v9474_v37 = vcombine.low %v534_v18, %v536_v22  ;;  %v420_v19 = vld [vmem:[%s11786_s16 + $0x48] sm:$0xff] }
  0xb4   : > { %v9476_v38 = vcombine.low %v535_v23, %v537_v24  ;;  %v9479_v39 = vcombine.high %v538_v28, %v540_v29  ;;  %v542_v40 = vunpack.c.l.s8.bf16 %v9438_v25  ;;  %v544_v42 = vunpack.c.l.s8.bf16 %v9439_v34 }
  0xb5   : > { %v9481_v41 = vcombine.high %v539_v32, %v541_v33  ;;  %v543_v43 = vunpack.c.h.s8.bf16 %v9438_v25  ;;  %v545_v44 = vunpack.c.h.s8.bf16 %v9439_v34  ;;  %v9478_v46 = vcombine.low %v538_v28, %v540_v29 }
  0xb6   : > { %785 = vmatpush1.bf16.msra.mxu0 %v9458_v57  ;;  %826 = vmatpush1.bf16.msra.mxu1 %v9460_v58  ;;  %v9480_v47 = vcombine.low %v539_v32, %v541_v33  ;;  %v433_v48 = vunpack.c.l.s8.bf16 %v411_v35  ;;  %v435_v49 = vunpack.c.l.s8.bf16 %v412_v36  ;;  %v9483_v50 = vcombine.high %v542_v40, %v544_v42  ;;  %v421_v32 = vld [vmem:[%s11786_s16 + $0x50] sm:$0xff]  ;;  %v422_v33 = vld [vmem:[%s11786_s16 + $0x58] sm:$0xff] }
  0xb7   : > { %786 = vmatprep.subr.bf16.mxu0 %v9463_v59  ;;  %827 = vmatprep.subr.bf16.mxu1 %v9465_v61  ;;  %v9485_v51 = vcombine.high %v543_v43, %v545_v44  ;;  %v434_v52 = vunpack.c.h.s8.bf16 %v411_v35  ;;  %v436_v53 = vunpack.c.h.s8.bf16 %v412_v36  ;;  %v9482_v57 = vcombine.low %v542_v40, %v544_v42  ;;  %v423_v42 = vld [vmem:[%s11786_s16 + $0x60] sm:$0xff] }
  0xb8   : > { %v9484_v58 = vcombine.low %v543_v43, %v545_v44  ;;  %v9491_v59 = vcombine.high %v433_v48, %v435_v49  ;;  %v437_v60 = vunpack.c.l.s8.bf16 %v413_v45  ;;  %v439_v62 = vunpack.c.l.s8.bf16 %v414_v54  ;;  %v424_v43 = vld [vmem:[%s11786_s16 + $0x68] sm:$0xff] }
  0xb9   : > { %v9493_v61 = vcombine.high %v434_v52, %v436_v53  ;;  %v438_v63 = vunpack.c.h.s8.bf16 %v413_v45  ;;  %v440_v0 = vunpack.c.h.s8.bf16 %v414_v54  ;;  %v9440_v2 = vcombine.low %v11828_v3, %v11828_v3  ;;  %v419_v3 = vld [vmem:[%s11786_s16 + $0x40] sm:$0xff] }
  0xba   : > { %787 = vmatpush1.bf16.msra.mxu0 %v9462_v4  ;;  %828 = vmatpush1.bf16.msra.mxu1 %v9464_v5  ;;  %v417_v4 = vld [vmem:[%s11786_s16 + $0x30] sm:$0xff]  ;;  %v9490_v5 = vcombine.low %v433_v48, %v435_v49  ;;  %v9492_v6 = vcombine.low %v434_v52, %v436_v53  ;;  %v441_v7 = vunpack.c.l.s8.bf16 %v415_v55  ;;  %v443_v8 = vunpack.c.l.s8.bf16 %v416_v56  ;;  %v426_v53 = vld [vmem:[%s11786_s16 + $0x78] sm:$0xff] }
  0xbb   : > { %788 = vmatprep.subr.bf16.mxu0 %v9467_v9  ;;  %829 = vmatprep.subr.bf16.mxu1 %v9469_v10  ;;  %v9495_v9 = vcombine.high %v437_v60, %v439_v62  ;;  %v9497_v10 = vcombine.high %v438_v63, %v440_v0  ;;  %v442_v11 = vunpack.c.h.s8.bf16 %v415_v55  ;;  %v444_v12 = vunpack.c.h.s8.bf16 %v416_v56  ;;  %v425_v52 = vld [vmem:[%s11786_s16 + $0x70] sm:$0xff] }
  0xbc   : > { %v9489_v14 = vcombine.high %v11849_v1, %v11849_v1  ;;  %v445_v18 = vunpack.c.l.s8.bf16 %v417_v4  ;;  %v446_v22 = vunpack.c.h.s8.bf16 %v417_v4  ;;  %v448_v23 = vunpack.c.h.s8.bf16 %v418_v13 }
  0xbd   : > { %v9501_v20 = vcombine.high %v442_v11, %v444_v12  ;;  %v9498_v24 = vcombine.low %v441_v7, %v443_v8  ;;  %v9500_v25 = vcombine.low %v442_v11, %v444_v12  ;;  %v454_v40 = vunpack.c.h.s8.bf16 %v421_v32  ;;  %v430_v11 = vld [vmem:[%s11786_s16 + $0x98] sm:$0xff] }
  0xbe   : > { %789 = vmatpush1.bf16.msra.mxu0 %v9466_v15  ;;  %830 = vmatpush1.bf16.msra.mxu1 %v9468_v16  ;;  %v9494_v15 = vcombine.low %v437_v60, %v439_v62  ;;  %v9496_v16 = vcombine.low %v438_v63, %v440_v0  ;;  %v9505_v29 = vcombine.high %v446_v22, %v448_v23  ;;  %v462_v60 = vunpack.c.h.s8.bf16 %v425_v52  ;;  %v427_v62 = vld [vmem:[%s11786_s16 + $0x80] sm:$0xff]  ;;  %v428_v63 = vld [vmem:[%s11786_s16 + $0x88] sm:$0xff] }
  0xbf   : > { %790 = vmatprep.subr.bf16.mxu0 %v9471_v17  ;;  %831 = vmatprep.subr.bf16.mxu1 %v9473_v21  ;;  %v9499_v17 = vcombine.high %v441_v7, %v443_v8  ;;  %v447_v21 = vunpack.c.l.s8.bf16 %v418_v13  ;;  %v9504_v35 = vcombine.low %v446_v22, %v448_v23  ;;  %v465_v4 = vunpack.c.l.s8.bf16 %v427_v62 }
  0xc0   : > { %v466_v8 = vunpack.c.h.s8.bf16 %v427_v62  ;;  %v9544_v62 = vld [vmem:[%s11786_s16 + $0x198] sm:$0xff] }
  0xc1   : > { %v9503_v28 = vcombine.high %v445_v18, %v447_v21  ;;  %v9502_v34 = vcombine.low %v445_v18, %v447_v21  ;;  %v472_v18 = vunpack.c.h.s8.bf16 %v430_v11 }
  0xc2   : > { %791 = vmatpush1.bf16.msra.mxu0 %v9470_v26  ;;  %832 = vmatpush1.bf16.msra.mxu1 %v9472_v27  ;;  %v449_v26 = vunpack.c.l.s8.bf16 %v419_v3  ;;  %v451_v27 = vunpack.c.l.s8.bf16 %v420_v19 }
  0xc3   : > { %792 = vmatprep.subr.bf16.mxu0 %v9475_v30  ;;  %833 = vmatprep.subr.bf16.mxu1 %v9477_v31  ;;  %v450_v30 = vunpack.c.h.s8.bf16 %v419_v3  ;;  %v452_v31 = vunpack.c.h.s8.bf16 %v420_v19  ;;  %v431_v19 = vld [vmem:[%s11786_s16 + $0xa0] sm:$0xff] }
  0xc4   : > { %v9507_v36 = vcombine.high %v449_v26, %v451_v27  ;;  %v9506_v44 = vcombine.low %v449_v26, %v451_v27  ;;  %v473_v23 = vunpack.c.l.s8.bf16 %v431_v19  ;;  %v474_v27 = vunpack.c.h.s8.bf16 %v431_v19  ;;  %v9548_v19 = vld [vmem:[%s11786_s16 + $0x1b8] sm:$0xff] }
  0xc5   : > { %v9508_v45 = vcombine.low %v450_v30, %v452_v31 }
  0xc6   : > { %793 = vmatpush1.bf16.msra.mxu0 %v9474_v37  ;;  %834 = vmatpush1.bf16.msra.mxu1 %v9476_v38  ;;  %v453_v37 = vunpack.c.l.s8.bf16 %v421_v32  ;;  %v9509_v38 = vcombine.high %v450_v30, %v452_v31  ;;  %v9538_v30 = vld [vmem:[%s11786_s16 + $0x168] sm:$0xff] }
  0xc7   : > { %794 = vmatprep.subr.bf16.mxu0 %v9479_v39  ;;  %835 = vmatprep.subr.bf16.mxu1 %v9481_v41  ;;  %v455_v39 = vunpack.c.l.s8.bf16 %v422_v33  ;;  %v456_v41 = vunpack.c.h.s8.bf16 %v422_v33 }
  0xc9   : > { %v9511_v48 = vcombine.high %v453_v37, %v455_v39  ;;  %v9513_v49 = vcombine.high %v454_v40, %v456_v41  ;;  %v9510_v54 = vcombine.low %v453_v37, %v455_v39  ;;  %v9512_v55 = vcombine.low %v454_v40, %v456_v41  ;;  %v9539_v39 = vld [vmem:[%s11786_s16 + $0x170] sm:$0xff]  ;;  %v9540_v40 = vld [vmem:[%s11786_s16 + $0x178] sm:$0xff] }
  0xca   : > { %795 = vmatpush1.bf16.msra.mxu0 %v9478_v46  ;;  %836 = vmatpush1.bf16.msra.mxu1 %v9480_v47  ;;  %v457_v46 = vunpack.c.l.s8.bf16 %v423_v42  ;;  %v459_v47 = vunpack.c.l.s8.bf16 %v424_v43 }
  0xcb   : > { %796 = vmatprep.subr.bf16.mxu0 %v9483_v50  ;;  %837 = vmatprep.subr.bf16.mxu1 %v9485_v51  ;;  %v458_v50 = vunpack.c.h.s8.bf16 %v423_v42  ;;  %v460_v51 = vunpack.c.h.s8.bf16 %v424_v43 }
  0xcc   : > { %v9515_v56 = vcombine.high %v457_v46, %v459_v47  ;;  %v9514_v0 = vcombine.low %v457_v46, %v459_v47  ;;  %v1200_v46 = vunpack.c.l.s8.bf16 %v9540_v40  ;;  %v1199_v47 = vunpack.c.h.s8.bf16 %v9539_v39 }
  0xce   : > { %797 = vmatpush1.bf16.msra.mxu0 %v9482_v57  ;;  %838 = vmatpush1.bf16.msra.mxu1 %v9484_v58  ;;  %v461_v57 = vunpack.c.l.s8.bf16 %v425_v52  ;;  %v9517_v58 = vcombine.high %v458_v50, %v460_v51  ;;  %v11884_v52 = vld [vmem:[%s12591_s0 + $0x10] sm:$0xff] }
  0xcf   : > { %1087 = vmatprep.subr.bf16.mxu0 %v9491_v59  ;;  %1128 = vmatprep.subr.bf16.mxu1 %v9493_v61  ;;  %v463_v59 = vunpack.c.l.s8.bf16 %v426_v53  ;;  %v464_v61 = vunpack.c.h.s8.bf16 %v426_v53 }
  0xd1   : > { %809 = vmatmul.mubr.bf16.vlgmr.msra.gmra.mrb[0].mxu0 %v9440_v2  ;;  %850 = vmatmul.mubr.bf16.vlgmr.msra.gmra.mrb[0].mxu1 %v9440_v2  ;;  %v9516_v2 = vcombine.low %v458_v50, %v460_v51  ;;  %v9521_v7 = vcombine.high %v462_v60, %v464_v61  ;;  %v9518_v12 = vcombine.low %v461_v57, %v463_v59  ;;  %v9542_v50 = vld [vmem:[%s11786_s16 + $0x188] sm:$0xff] }
  0xd2   : > { %1088 = vmatpush1.bf16.msra.mxu0 %v9490_v5  ;;  %1129 = vmatpush1.bf16.msra.mxu1 %v9492_v6  ;;  %v467_v5 = vunpack.c.l.s8.bf16 %v428_v63  ;;  %v9519_v6 = vcombine.high %v461_v57, %v463_v59  ;;  %v9520_v13 = vcombine.low %v462_v60, %v464_v61  ;;  %v9488_v51 = vcombine.low %v11849_v1, %v11849_v1  ;;  %v9543_v61 = vld [vmem:[%s11786_s16 + $0x190] sm:$0xff] }
  0xd3   : > { %1089 = vmatprep.subr.bf16.mxu0 %v9495_v9  ;;  %1130 = vmatprep.subr.bf16.mxu1 %v9497_v10  ;;  %v468_v9 = vunpack.c.h.s8.bf16 %v428_v63  ;;  %v429_v10 = vld [vmem:[%s11786_s16 + $0x90] sm:$0xff]  ;;  %v1205_v60 = vunpack.c.h.s8.bf16 %v9542_v50  ;;  %v9560_v1 = vcombine.high %v11884_v52, %v11884_v52 }
  0xd4   : > { %9534 = vmatprep.mubr.msk.bf16.mxu0 %vm772_vm0, %v9489_v14  ;;  %9535 = vmatprep.mubr.msk.bf16.mxu1 %vm772_vm0, %v9489_v14  ;;  %v9523_v14 = vcombine.high %v465_v4, %v467_v5  ;;  %v469_v3 = vunpack.c.l.s8.bf16 %v429_v10  ;;  %v9522_v21 = vcombine.low %v465_v4, %v467_v5  ;;  %v1206_v4 = vunpack.c.l.s8.bf16 %v9543_v61 }
  0xd5   : > { %v9524_v22 = vcombine.low %v466_v8, %v468_v9 }
  0xd6   : > { %1090 = vmatpush1.bf16.msra.mxu0 %v9494_v15  ;;  %1131 = vmatpush1.bf16.msra.mxu1 %v9496_v16  ;;  %v9525_v15 = vcombine.high %v466_v8, %v468_v9  ;;  %v471_v16 = vunpack.c.l.s8.bf16 %v430_v11  ;;  %v1209_v8 = vunpack.c.h.s8.bf16 %v9544_v62  ;;  %v9545_v9 = vld [vmem:[%s11786_s16 + $0x1a0] sm:$0xff] }
  0xd7   : > { %1091 = vmatprep.subr.bf16.mxu0 %v9499_v17  ;;  %1132 = vmatprep.subr.bf16.mxu1 %v9501_v20  ;;  %v470_v17 = vunpack.c.h.s8.bf16 %v429_v10  ;;  %v432_v20 = vld [vmem:[%s11786_s16 + $0xa8] sm:$0xff] }
  0xd8   : > { %v9526_v31 = vcombine.low %v469_v3, %v471_v16  ;;  %v9546_v10 = vld [vmem:[%s11786_s16 + $0x1a8] sm:$0xff] }
  0xd9   : > { %v9529_v26 = vcombine.high %v470_v17, %v472_v18  ;;  %v9528_v32 = vcombine.low %v470_v17, %v472_v18  ;;  %v1213_v17 = vunpack.c.h.s8.bf16 %v9546_v10  ;;  %v9547_v18 = vld [vmem:[%s11786_s16 + $0x1b0] sm:$0xff] }
  0xda   : > { %1092 = vmatpush1.bf16.msra.mxu0 %v9498_v24  ;;  %1133 = vmatpush1.bf16.msra.mxu1 %v9500_v25  ;;  %v475_v24 = vunpack.c.l.s8.bf16 %v432_v20  ;;  %v9527_v25 = vcombine.high %v469_v3, %v471_v16  ;;  %v1211_v16 = vunpack.c.h.s8.bf16 %v9545_v9 }
  0xdb   : > { %1093 = vmatprep.subr.bf16.mxu0 %v9503_v28  ;;  %1134 = vmatprep.subr.bf16.mxu1 %v9505_v29  ;;  %v476_v28 = vunpack.c.h.s8.bf16 %v432_v20  ;;  %v9537_v29 = vld [vmem:[%s11786_s16 + $0x160] sm:$0xff] }
  0xdc   : > { %v1194_v33 = vunpack.c.l.s8.bf16 %v9537_v29  ;;  %v1195_v37 = vunpack.c.h.s8.bf16 %v9537_v29  ;;  %v9530_v41 = vcombine.low %v473_v23, %v475_v24  ;;  %v9550_v29 = vld [vmem:[%s11786_s16 + $0x1c8] sm:$0xff] }
  0xdd   : > { %v9532_v42 = vcombine.low %v474_v27, %v476_v28 }
  0xde   : > { %1094 = vmatpush1.bf16.msra.mxu0 %v9502_v34  ;;  %1135 = vmatpush1.bf16.msra.mxu1 %v9504_v35  ;;  %v1196_v34 = vunpack.c.l.s8.bf16 %v9538_v30  ;;  %v9531_v35 = vcombine.high %v473_v23, %v475_v24  ;;  %v1214_v23 = vunpack.c.l.s8.bf16 %v9547_v18  ;;  %v9580_v24 = vcombine.high %v1211_v16, %v1213_v17 }
  0xdf   : > { %1095 = vmatprep.subr.bf16.mxu0 %v9507_v36  ;;  %1136 = vmatprep.subr.bf16.mxu1 %v9509_v38  ;;  %v9533_v36 = vcombine.high %v474_v27, %v476_v28  ;;  %v1197_v38 = vunpack.c.h.s8.bf16 %v9538_v30  ;;  %v1217_v27 = vunpack.c.h.s8.bf16 %v9548_v19  ;;  %v9549_v28 = vld [vmem:[%s11786_s16 + $0x1c0] sm:$0xff] }
  0xe0   : > { %v9562_v43 = vcombine.high %v1194_v33, %v1196_v34  ;;  %v9561_v53 = vcombine.low %v1194_v33, %v1196_v34  ;;  %v1220_v33 = vunpack.c.l.s8.bf16 %v9550_v29 }
  0xe2   : > { %1096 = vmatpush1.bf16.msra.mxu0 %v9506_v44  ;;  %1137 = vmatpush1.bf16.msra.mxu1 %v9508_v45  ;;  %v1198_v44 = vunpack.c.l.s8.bf16 %v9539_v39  ;;  %v9564_v45 = vcombine.high %v1195_v37, %v1197_v38  ;;  %v9552_v39 = vld [vmem:[%s11786_s16 + $0x1d8] sm:$0xff] }
  0xe3   : > { %1097 = vmatprep.subr.bf16.mxu0 %v9511_v48  ;;  %1138 = vmatprep.subr.bf16.mxu1 %v9513_v49  ;;  %v1201_v48 = vunpack.c.h.s8.bf16 %v9540_v40  ;;  %v9541_v49 = vld [vmem:[%s11786_s16 + $0x180] sm:$0xff] }
  0xe4   : > { %v9566_v57 = vcombine.high %v1198_v44, %v1200_v46  ;;  %v1203_v59 = vunpack.c.h.s8.bf16 %v9541_v49  ;;  %v9565_v63 = vcombine.low %v1198_v44, %v1200_v46 }
  0xe6   : > { %1098 = vmatpush1.bf16.msra.mxu0 %v9510_v54  ;;  %1139 = vmatpush1.bf16.msra.mxu1 %v9512_v55  ;;  %v9563_v54 = vcombine.low %v1195_v37, %v1197_v38  ;;  %v1202_v55 = vunpack.c.l.s8.bf16 %v9541_v49  ;;  %v9572_v5 = vcombine.high %v1203_v59, %v1205_v60  ;;  %v1221_v37 = vunpack.c.h.s8.bf16 %v9550_v29  ;;  %v9551_v38 = vld [vmem:[%s11786_s16 + $0x1d0] sm:$0xff]  ;;  %v9554_v49 = vld [vmem:[%s11786_s16 + $0x1e8] sm:$0xff] }
  0xe7   : > { %1099 = vmatprep.subr.bf16.mxu0 %v9515_v56  ;;  %1140 = vmatprep.subr.bf16.mxu1 %v9517_v58  ;;  %v1204_v56 = vunpack.c.l.s8.bf16 %v9542_v50  ;;  %v9568_v58 = vcombine.high %v1199_v47, %v1201_v48  ;;  %v1223_v46 = vunpack.c.h.s8.bf16 %v9551_v38 }
  0xe9   : > { %v9569_v11 = vcombine.low %v1202_v55, %v1204_v56 }
  0xea   : > { %1100 = vmatpush1.bf16.msra.mxu0 %v9514_v0  ;;  %1141 = vmatpush1.bf16.msra.mxu1 %v9516_v2  ;;  %v9567_v0 = vcombine.low %v1199_v47, %v1201_v48  ;;  %v9570_v2 = vcombine.high %v1202_v55, %v1204_v56  ;;  %v1225_v47 = vunpack.c.h.s8.bf16 %v9552_v39  ;;  %v9553_v48 = vld [vmem:[%s11786_s16 + $0x1e0] sm:$0xff] }
  0xeb   : > { %1101 = vmatprep.subr.bf16.mxu0 %v9519_v6  ;;  %1142 = vmatprep.subr.bf16.mxu1 %v9521_v7  ;;  %v1208_v6 = vunpack.c.l.s8.bf16 %v9544_v62  ;;  %v1207_v7 = vunpack.c.h.s8.bf16 %v9543_v61 }
  0xec   : > { %v9592_v56 = vcombine.high %v1223_v46, %v1225_v47  ;;  %v9591_v62 = vcombine.low %v1223_v46, %v1225_v47  ;;  %v9614_v47 = vld [vmem:[%s11786_s16 + $0x240] sm:$0xff] }
  0xed   : > { %v9574_v3 = vcombine.high %v1206_v4, %v1208_v6  ;;  %v9573_v20 = vcombine.low %v1206_v4, %v1208_v6  ;;  %v9557_v6 = vld [vmem:[%s11786_s16 + $0x200] sm:$0xff] }
  0xee   : > { %1102 = vmatpush1.bf16.msra.mxu0 %v9518_v12  ;;  %1143 = vmatpush1.bf16.msra.mxu1 %v9520_v13  ;;  %v9571_v12 = vcombine.low %v1203_v59, %v1205_v60  ;;  %v1210_v13 = vunpack.c.l.s8.bf16 %v9545_v9  ;;  %v9555_v59 = vld [vmem:[%s11786_s16 + $0x1f0] sm:$0xff]  ;;  %v9556_v60 = vld [vmem:[%s11786_s16 + $0x1f8] sm:$0xff] }
  0xef   : > { %1103 = vmatprep.subr.bf16.mxu0 %v9523_v14  ;;  %1144 = vmatprep.subr.bf16.mxu1 %v9525_v15  ;;  %v1212_v14 = vunpack.c.l.s8.bf16 %v9546_v10  ;;  %v9576_v15 = vcombine.high %v1207_v7, %v1209_v8  ;;  %v1231_v4 = vunpack.c.h.s8.bf16 %v9555_v59  ;;  %v1234_v10 = vunpack.c.l.s8.bf16 %v9557_v6 }
  0xf1   : > { %v9577_v30 = vcombine.low %v1210_v13, %v1212_v14 }
  0xf2   : > { %1104 = vmatpush1.bf16.msra.mxu0 %v9522_v21  ;;  %1145 = vmatpush1.bf16.msra.mxu1 %v9524_v22  ;;  %v9575_v21 = vcombine.low %v1207_v7, %v1209_v8  ;;  %v9578_v22 = vcombine.high %v1210_v13, %v1212_v14  ;;  %v9558_v7 = vld [vmem:[%s11786_s16 + $0x208] sm:$0xff]  ;;  %v1235_v14 = vunpack.c.h.s8.bf16 %v9557_v6 }
  0xf3   : > { %1105 = vmatprep.subr.bf16.mxu0 %v9527_v25  ;;  %1146 = vmatprep.subr.bf16.mxu1 %v9529_v26  ;;  %v1216_v25 = vunpack.c.l.s8.bf16 %v9548_v19  ;;  %v1215_v26 = vunpack.c.h.s8.bf16 %v9547_v18  ;;  %v9619_v6 = vld [vmem:[%s11786_s16 + $0x268] sm:$0xff] }
  0xf5   : > { %v9582_v34 = vcombine.high %v1214_v23, %v1216_v25  ;;  %v9581_v40 = vcombine.low %v1214_v23, %v1216_v25  ;;  %v9610_v25 = vld [vmem:[%s11786_s16 + $0x220] sm:$0xff] }
  0xf6   : > { %1106 = vmatpush1.bf16.msra.mxu0 %v9526_v31  ;;  %1147 = vmatpush1.bf16.msra.mxu1 %v9528_v32  ;;  %v9579_v31 = vcombine.low %v1211_v16, %v1213_v17  ;;  %v1218_v32 = vunpack.c.l.s8.bf16 %v9549_v28  ;;  %v9609_v16 = vld [vmem:[%s11786_s16 + $0x218] sm:$0xff]  ;;  %v1582_v29 = vunpack.c.l.s8.bf16 %v9610_v25 }
  0xf7   : > { %1107 = vmatprep.subr.bf16.mxu0 %v9531_v35  ;;  %1148 = vmatprep.subr.bf16.mxu1 %v9533_v36  ;;  %v9584_v35 = vcombine.high %v1215_v26, %v1217_v27  ;;  %v1219_v36 = vunpack.c.h.s8.bf16 %v9549_v28 }
  0xf8   : > { %v9585_v50 = vcombine.low %v1218_v32, %v1220_v33 }
  0xf9   : > { %v9588_v44 = vcombine.high %v1219_v36, %v1221_v37 }
  0xfa   : > { %1108 = vmatpush1.bf16.msra.mxu0 %v9530_v41  ;;  %1149 = vmatpush1.bf16.msra.mxu1 %v9532_v42  ;;  %v9583_v41 = vcombine.low %v1215_v26, %v1217_v27  ;;  %v9586_v42 = vcombine.high %v1218_v32, %v1220_v33  ;;  %v9611_v26 = vld [vmem:[%s11786_s16 + $0x228] sm:$0xff]  ;;  %v1583_v33 = vunpack.c.h.s8.bf16 %v9610_v25 }
  0xfb   : > { %1467 = vmatprep.subr.bf16.mxu0 %v9562_v43  ;;  %1508 = vmatprep.subr.bf16.mxu1 %v9564_v45  ;;  %v1222_v43 = vunpack.c.l.s8.bf16 %v9551_v38  ;;  %v1224_v45 = vunpack.c.l.s8.bf16 %v9552_v39  ;;  %v11917_v38 = vld [vmem:[%s12591_s0 + $0x18] sm:$0xff]  ;;  %v9623_v25 = vld [vmem:[%s11786_s16 + $0x288] sm:$0xff] }
  0xfd   : > { %1120 = vmatmul.mubr.bf16.vlgmr.msra.gmra.mrb[0].mxu0 %v9488_v51  ;;  %1161 = vmatmul.mubr.bf16.vlgmr.msra.gmra.mrb[0].mxu1 %v9488_v51  ;;  %v9587_v51 = vcombine.low %v1219_v36, %v1221_v37  ;;  %v9590_v55 = vcombine.high %v1222_v43, %v1224_v45  ;;  %v9589_v61 = vcombine.low %v1222_v43, %v1224_v45  ;;  %v9613_v36 = vld [vmem:[%s11786_s16 + $0x238] sm:$0xff] }
  0xfe   : > { %1468 = vmatpush1.bf16.msra.mxu0 %v9561_v53  ;;  %1509 = vmatpush1.bf16.msra.mxu1 %v9563_v54  ;;  %v1226_v53 = vunpack.c.l.s8.bf16 %v9553_v48  ;;  %v1228_v54 = vunpack.c.l.s8.bf16 %v9554_v49  ;;  %v9559_v37 = vcombine.low %v11884_v52, %v11884_v52  ;;  %v1589_v46 = vunpack.c.h.s8.bf16 %v9613_v36 }
  0xff   : > { %1469 = vmatprep.subr.bf16.mxu0 %v9566_v57  ;;  %1510 = vmatprep.subr.bf16.mxu1 %v9568_v58  ;;  %v1227_v57 = vunpack.c.h.s8.bf16 %v9553_v48  ;;  %v1229_v58 = vunpack.c.h.s8.bf16 %v9554_v49  ;;  %v9615_v48 = vld [vmem:[%s11786_s16 + $0x248] sm:$0xff]  ;;  %v9631_v52 = vcombine.high %v11917_v38, %v11917_v38 }
 0x100   : > { %9605 = vmatprep.mubr.msk.bf16.mxu0 %vm772_vm0, %v9560_v1  ;;  %9606 = vmatprep.mubr.msk.bf16.mxu1 %vm772_vm0, %v9560_v1  ;;  %v9594_v1 = vcombine.high %v1226_v53, %v1228_v54  ;;  %v9593_v8 = vcombine.low %v1226_v53, %v1228_v54  ;;  %v1592_v53 = vunpack.c.l.s8.bf16 %v9615_v48 }
 0x101   : > { %v9595_v9 = vcombine.low %v1227_v57, %v1229_v58 }
 0x102   : > { %1470 = vmatpush1.bf16.msra.mxu0 %v9565_v63  ;;  %1511 = vmatpush1.bf16.msra.mxu1 %v9567_v0  ;;  %v1230_v63 = vunpack.c.l.s8.bf16 %v9555_v59  ;;  %v9596_v0 = vcombine.high %v1227_v57, %v1229_v58  ;;  %v1593_v57 = vunpack.c.h.s8.bf16 %v9615_v48  ;;  %v9616_v58 = vld [vmem:[%s11786_s16 + $0x250] sm:$0xff]  ;;  %v9617_v59 = vld [vmem:[%s11786_s16 + $0x258] sm:$0xff] }
 0x103   : > { %1471 = vmatprep.subr.bf16.mxu0 %v9570_v2  ;;  %1512 = vmatprep.subr.bf16.mxu1 %v9572_v5  ;;  %v1232_v2 = vunpack.c.l.s8.bf16 %v9556_v60  ;;  %v1233_v5 = vunpack.c.h.s8.bf16 %v9556_v60 }
 0x105   : > { %v9600_v13 = vcombine.high %v1231_v4, %v1233_v5  ;;  %v9597_v17 = vcombine.low %v1230_v63, %v1232_v2  ;;  %v9599_v18 = vcombine.low %v1231_v4, %v1233_v5  ;;  %v1597_v4 = vunpack.c.h.s8.bf16 %v9617_v59  ;;  %v9618_v5 = vld [vmem:[%s11786_s16 + $0x260] sm:$0xff] }
 0x106   : > { %1472 = vmatpush1.bf16.msra.mxu0 %v9569_v11  ;;  %1513 = vmatpush1.bf16.msra.mxu1 %v9571_v12  ;;  %v1236_v11 = vunpack.c.l.s8.bf16 %v9558_v7  ;;  %v9598_v12 = vcombine.high %v1230_v63, %v1232_v2  ;;  %v1595_v2 = vunpack.c.h.s8.bf16 %v9616_v58 }
 0x107   : > { %1473 = vmatprep.subr.bf16.mxu0 %v9574_v3  ;;  %1514 = vmatprep.subr.bf16.mxu1 %v9576_v15  ;;  %v1237_v3 = vunpack.c.h.s8.bf16 %v9558_v7  ;;  %v9608_v15 = vld [vmem:[%s11786_s16 + $0x210] sm:$0xff] }
 0x108   : > { %v9602_v19 = vcombine.high %v1234_v10, %v1236_v11  ;;  %v1579_v23 = vunpack.c.h.s8.bf16 %v9608_v15  ;;  %v9601_v27 = vcombine.low %v1234_v10, %v1236_v11  ;;  %v1600_v10 = vunpack.c.l.s8.bf16 %v9619_v6 }
 0x109   : > { %v9603_v28 = vcombine.low %v1235_v14, %v1237_v3 }
 0x10a   : > { %1474 = vmatpush1.bf16.msra.mxu0 %v9573_v20  ;;  %1515 = vmatpush1.bf16.msra.mxu1 %v9575_v21  ;;  %v1578_v20 = vunpack.c.l.s8.bf16 %v9608_v15  ;;  %v9604_v21 = vcombine.high %v1235_v14, %v1237_v3  ;;  %v1601_v14 = vunpack.c.h.s8.bf16 %v9619_v6  ;;  %v9620_v3 = vld [vmem:[%s11786_s16 + $0x270] sm:$0xff]  ;;  %v9621_v15 = vld [vmem:[%s11786_s16 + $0x278] sm:$0xff] }
 0x10b   : > { %1475 = vmatprep.subr.bf16.mxu0 %v9578_v22  ;;  %1516 = vmatprep.subr.bf16.mxu1 %v9580_v24  ;;  %v1580_v22 = vunpack.c.l.s8.bf16 %v9609_v16  ;;  %v1581_v24 = vunpack.c.h.s8.bf16 %v9609_v16 }
 0x10d   : > { %v9635_v32 = vcombine.high %v1579_v23, %v1581_v24  ;;  %v9632_v39 = vcombine.low %v1578_v20, %v1580_v22 }
 0x10e   : > { %1476 = vmatpush1.bf16.msra.mxu0 %v9577_v30  ;;  %1517 = vmatpush1.bf16.msra.mxu1 %v9579_v31  ;;  %v1584_v30 = vunpack.c.l.s8.bf16 %v9611_v26  ;;  %v9633_v31 = vcombine.high %v1578_v20, %v1580_v22  ;;  %v1603_v22 = vunpack.c.h.s8.bf16 %v9620_v3 }
 0x10f   : > { %1477 = vmatprep.subr.bf16.mxu0 %v9582_v34  ;;  %1518 = vmatprep.subr.bf16.mxu1 %v9584_v35  ;;  %v1585_v34 = vunpack.c.h.s8.bf16 %v9611_v26  ;;  %v9612_v35 = vld [vmem:[%s11786_s16 + $0x230] sm:$0xff] }
 0x110   : > { %v1587_v45 = vunpack.c.h.s8.bf16 %v9612_v35  ;;  %v9636_v49 = vcombine.low %v1582_v29, %v1584_v30 }
 0x111   : > { %v9639_v43 = vcombine.high %v1583_v33, %v1585_v34 }
 0x112   : > { %1478 = vmatpush1.bf16.msra.mxu0 %v9581_v40  ;;  %1519 = vmatpush1.bf16.msra.mxu1 %v9583_v41  ;;  %v9634_v40 = vcombine.low %v1579_v23, %v1581_v24  ;;  %v9637_v41 = vcombine.high %v1582_v29, %v1584_v30  ;;  %v1605_v23 = vunpack.c.h.s8.bf16 %v9621_v15  ;;  %v9622_v24 = vld [vmem:[%s11786_s16 + $0x280] sm:$0xff]  ;;  %v1608_v29 = vunpack.c.l.s8.bf16 %v9623_v25 }
 0x113   : > { %1479 = vmatprep.subr.bf16.mxu0 %v9586_v42  ;;  %1520 = vmatprep.subr.bf16.mxu1 %v9588_v44  ;;  %v1586_v42 = vunpack.c.l.s8.bf16 %v9612_v35  ;;  %v1588_v44 = vunpack.c.l.s8.bf16 %v9613_v36  ;;  %v9625_v35 = vld [vmem:[%s11786_s16 + $0x298] sm:$0xff] }
 0x115   : > { %v9641_v54 = vcombine.high %v1586_v42, %v1588_v44  ;;  %v9640_v60 = vcombine.low %v1586_v42, %v1588_v44  ;;  %v1612_v42 = vunpack.c.l.s8.bf16 %v9625_v35  ;;  %v1613_v44 = vunpack.c.h.s8.bf16 %v9625_v35 }
 0x116   : > { %1480 = vmatpush1.bf16.msra.mxu0 %v9585_v50  ;;  %1521 = vmatpush1.bf16.msra.mxu1 %v9587_v51  ;;  %v9638_v50 = vcombine.low %v1583_v33, %v1585_v34  ;;  %v1590_v51 = vunpack.c.l.s8.bf16 %v9614_v47  ;;  %v1609_v33 = vunpack.c.h.s8.bf16 %v9623_v25  ;;  %v9624_v34 = vld [vmem:[%s11786_s16 + $0x290] sm:$0xff] }
 0x117   : > { %1481 = vmatprep.subr.bf16.mxu0 %v9590_v55  ;;  %1522 = vmatprep.subr.bf16.mxu1 %v9592_v56  ;;  %v9643_v55 = vcombine.high %v1587_v45, %v1589_v46  ;;  %v1591_v56 = vunpack.c.h.s8.bf16 %v9614_v47 }
 0x118   : > { %v9644_v7 = vcombine.low %v1590_v51, %v1592_v53 }
 0x119   : > { %v9647_v63 = vcombine.high %v1591_v56, %v1593_v57 }
 0x11a   : > { %1482 = vmatpush1.bf16.msra.mxu0 %v9589_v61  ;;  %1523 = vmatpush1.bf16.msra.mxu1 %v9591_v62  ;;  %v9642_v61 = vcombine.low %v1587_v45, %v1589_v46  ;;  %v9645_v62 = vcombine.high %v1590_v51, %v1592_v53  ;;  %v9626_v45 = vld [vmem:[%s11786_s16 + $0x2a0] sm:$0xff]  ;;  %v9627_v46 = vld [vmem:[%s11786_s16 + $0x2a8] sm:$0xff] }
 0x11b   : > { %1483 = vmatprep.subr.bf16.mxu0 %v9594_v1  ;;  %1524 = vmatprep.subr.bf16.mxu1 %v9596_v0  ;;  %v1594_v1 = vunpack.c.l.s8.bf16 %v9616_v58  ;;  %v1596_v0 = vunpack.c.l.s8.bf16 %v9617_v59  ;;  %v1615_v53 = vunpack.c.h.s8.bf16 %v9626_v45 }
 0x11d   : > { %v9649_v11 = vcombine.high %v1594_v1, %v1596_v0  ;;  %v9648_v16 = vcombine.low %v1594_v1, %v1596_v0  ;;  %v9679_v0 = vld [vmem:[%s11786_s16 + $0x2c0] sm:$0xff] }
 0x11e   : > { %1484 = vmatpush1.bf16.msra.mxu0 %v9593_v8  ;;  %1525 = vmatpush1.bf16.msra.mxu1 %v9595_v9  ;;  %v9646_v8 = vcombine.low %v1591_v56, %v1593_v57  ;;  %v1598_v9 = vunpack.c.l.s8.bf16 %v9618_v5  ;;  %v9629_v56 = vld [vmem:[%s11786_s16 + $0x2b8] sm:$0xff]  ;;  %v1962_v6 = vunpack.c.l.s8.bf16 %v9679_v0 }
 0x11f   : > { %1485 = vmatprep.subr.bf16.mxu0 %v9598_v12  ;;  %1526 = vmatprep.subr.bf16.mxu1 %v9600_v13  ;;  %v9651_v12 = vcombine.high %v1595_v2, %v1597_v4  ;;  %v1599_v13 = vunpack.c.h.s8.bf16 %v9618_v5 }
 0x120   : > { %v9652_v26 = vcombine.low %v1598_v9, %v1600_v10 }
 0x121   : > { %v9655_v20 = vcombine.high %v1599_v13, %v1601_v14 }
 0x122   : > { %1486 = vmatpush1.bf16.msra.mxu0 %v9597_v17  ;;  %1527 = vmatpush1.bf16.msra.mxu1 %v9599_v18  ;;  %v9650_v17 = vcombine.low %v1595_v2, %v1597_v4  ;;  %v9653_v18 = vcombine.high %v1598_v9, %v1600_v10  ;;  %v9680_v2 = vld [vmem:[%s11786_s16 + $0x2c8] sm:$0xff]  ;;  %v1963_v10 = vunpack.c.h.s8.bf16 %v9679_v0 }
 0x123   : > { %1487 = vmatprep.subr.bf16.mxu0 %v9602_v19  ;;  %1528 = vmatprep.subr.bf16.mxu1 %v9604_v21  ;;  %v1602_v19 = vunpack.c.l.s8.bf16 %v9620_v3  ;;  %v1604_v21 = vunpack.c.l.s8.bf16 %v9621_v15  ;;  %v9692_v0 = vld [vmem:[%s11786_s16 + $0x328] sm:$0xff] }
 0x125   : > { %v9657_v30 = vcombine.high %v1602_v19, %v1604_v21  ;;  %v9656_v36 = vcombine.low %v1602_v19, %v1604_v21  ;;  %v9683_v21 = vld [vmem:[%s11786_s16 + $0x2e0] sm:$0xff] }
 0x126   : > { %1488 = vmatpush1.bf16.msra.mxu0 %v9601_v27  ;;  %1529 = vmatpush1.bf16.msra.mxu1 %v9603_v28  ;;  %v9654_v27 = vcombine.low %v1599_v13, %v1601_v14  ;;  %v1606_v28 = vunpack.c.l.s8.bf16 %v9622_v24  ;;  %v9682_v13 = vld [vmem:[%s11786_s16 + $0x2d8] sm:$0xff] }
 0x127   : > { %1851 = vmatprep.subr.bf16.mxu0 %v9633_v31  ;;  %1892 = vmatprep.subr.bf16.mxu1 %v9635_v32  ;;  %v9659_v31 = vcombine.high %v1603_v22, %v1605_v23  ;;  %v1607_v32 = vunpack.c.h.s8.bf16 %v9622_v24  ;;  %v11950_v24 = vld [vmem:[%s12591_s0 + $0x20] sm:$0xff] }
 0x128   : > { %v9660_v47 = vcombine.low %v1606_v28, %v1608_v29 }
 0x129   : > { %1500 = vmatmul.mubr.bf16.vlgmr.msra.gmra.mrb[0].mxu0 %v9559_v37  ;;  %1541 = vmatmul.mubr.bf16.vlgmr.msra.gmra.mrb[0].mxu1 %v9559_v37  ;;  %v9658_v37 = vcombine.low %v1603_v22, %v1605_v23  ;;  %v9662_v48 = vcombine.low %v1607_v32, %v1609_v33  ;;  %v9684_v22 = vld [vmem:[%s11786_s16 + $0x2e8] sm:$0xff]  ;;  %v9630_v23 = vcombine.low %v11917_v38, %v11917_v38 }
 0x12a   : > { %1852 = vmatpush1.bf16.msra.mxu0 %v9632_v39  ;;  %1893 = vmatpush1.bf16.msra.mxu1 %v9634_v40  ;;  %v9661_v39 = vcombine.high %v1606_v28, %v1608_v29  ;;  %v1610_v40 = vunpack.c.l.s8.bf16 %v9624_v34  ;;  %v1972_v28 = vunpack.c.l.s8.bf16 %v9684_v22  ;;  %v9702_v38 = vcombine.high %v11950_v24, %v11950_v24 }
 0x12b   : > { %1853 = vmatprep.subr.bf16.mxu0 %v9637_v41  ;;  %1894 = vmatprep.subr.bf16.mxu1 %v9639_v43  ;;  %v9663_v41 = vcombine.high %v1607_v32, %v1609_v33  ;;  %v1611_v43 = vunpack.c.h.s8.bf16 %v9624_v34  ;;  %v1973_v32 = vunpack.c.h.s8.bf16 %v9684_v22  ;;  %v9685_v33 = vld [vmem:[%s11786_s16 + $0x2f0] sm:$0xff]  ;;  %v9686_v34 = vld [vmem:[%s11786_s16 + $0x2f8] sm:$0xff] }
 0x12c   : > { %9676 = vmatprep.mubr.msk.bf16.mxu0 %vm772_vm0, %v9631_v52  ;;  %9677 = vmatprep.mubr.msk.bf16.mxu1 %vm772_vm0, %v9631_v52  ;;  %v1614_v52 = vunpack.c.l.s8.bf16 %v9626_v45  ;;  %v9664_v57 = vcombine.low %v1610_v40, %v1612_v42  ;;  %v9688_v45 = vld [vmem:[%s11786_s16 + $0x308] sm:$0xff] }
 0x12d   : > { %v9667_v51 = vcombine.high %v1611_v43, %v1613_v44  ;;  %v9666_v58 = vcombine.low %v1611_v43, %v1613_v44  ;;  %v1977_v43 = vunpack.c.h.s8.bf16 %v9686_v34  ;;  %v9687_v44 = vld [vmem:[%s11786_s16 + $0x300] sm:$0xff] }
 0x12e   : > { %1854 = vmatpush1.bf16.msra.mxu0 %v9636_v49  ;;  %1895 = vmatpush1.bf16.msra.mxu1 %v9638_v50  ;;  %v1616_v49 = vunpack.c.l.s8.bf16 %v9627_v46  ;;  %v9665_v50 = vcombine.high %v1610_v40, %v1612_v42  ;;  %v1975_v42 = vunpack.c.h.s8.bf16 %v9685_v33 }
 0x12f   : > { %1855 = vmatprep.subr.bf16.mxu0 %v9641_v54  ;;  %1896 = vmatprep.subr.bf16.mxu1 %v9643_v55  ;;  %v1617_v54 = vunpack.c.h.s8.bf16 %v9627_v46  ;;  %v9628_v55 = vld [vmem:[%s11786_s16 + $0x2b0] sm:$0xff] }
 0x130   : > { %v9669_v59 = vcombine.high %v1614_v52, %v1616_v49  ;;  %v1619_v1 = vunpack.c.h.s8.bf16 %v9628_v55  ;;  %v9668_v4 = vcombine.low %v1614_v52, %v1616_v49  ;;  %v1980_v52 = vunpack.c.l.s8.bf16 %v9688_v45 }
 0x131   : > { %v9670_v5 = vcombine.low %v1615_v53, %v1617_v54 }
 0x132   : > { %1856 = vmatpush1.bf16.msra.mxu0 %v9640_v60  ;;  %1897 = vmatpush1.bf16.msra.mxu1 %v9642_v61  ;;  %v1618_v60 = vunpack.c.l.s8.bf16 %v9628_v55  ;;  %v9671_v61 = vcombine.high %v1615_v53, %v1617_v54  ;;  %v1981_v53 = vunpack.c.h.s8.bf16 %v9688_v45  ;;  %v9689_v54 = vld [vmem:[%s11786_s16 + $0x310] sm:$0xff]  ;;  %v9690_v55 = vld [vmem:[%s11786_s16 + $0x318] sm:$0xff] }
 0x133   : > { %1857 = vmatprep.subr.bf16.mxu0 %v9645_v62  ;;  %1898 = vmatprep.subr.bf16.mxu1 %v9647_v63  ;;  %v1620_v62 = vunpack.c.l.s8.bf16 %v9629_v56  ;;  %v1621_v63 = vunpack.c.h.s8.bf16 %v9629_v56 }
 0x135   : > { %v9675_v9 = vcombine.high %v1619_v1, %v1621_v63  ;;  %v9672_v14 = vcombine.low %v1618_v60, %v1620_v62  ;;  %v9674_v3 = vcombine.low %v1619_v1, %v1621_v63  ;;  %v1985_v1 = vunpack.c.h.s8.bf16 %v9690_v55  ;;  %v9691_v63 = vld [vmem:[%s11786_s16 + $0x320] sm:$0xff] }
 0x136   : > { %1858 = vmatpush1.bf16.msra.mxu0 %v9644_v7  ;;  %1899 = vmatpush1.bf16.msra.mxu1 %v9646_v8  ;;  %v1964_v7 = vunpack.c.l.s8.bf16 %v9680_v2  ;;  %v9673_v8 = vcombine.high %v1618_v60, %v1620_v62  ;;  %v1983_v62 = vunpack.c.h.s8.bf16 %v9689_v54 }
 0x137   : > { %1859 = vmatprep.subr.bf16.mxu0 %v9649_v11  ;;  %1900 = vmatprep.subr.bf16.mxu1 %v9651_v12  ;;  %v1965_v11 = vunpack.c.h.s8.bf16 %v9680_v2  ;;  %v9681_v12 = vld [vmem:[%s11786_s16 + $0x2d0] sm:$0xff] }
 0x138   : > { %v9704_v15 = vcombine.high %v1962_v6, %v1964_v7  ;;  %v1967_v19 = vunpack.c.h.s8.bf16 %v9681_v12  ;;  %v9703_v25 = vcombine.low %v1962_v6, %v1964_v7  ;;  %v1988_v6 = vunpack.c.l.s8.bf16 %v9692_v0 }
 0x13a   : > { %1860 = vmatpush1.bf16.msra.mxu0 %v9648_v16  ;;  %1901 = vmatpush1.bf16.msra.mxu1 %v9650_v17  ;;  %v1966_v16 = vunpack.c.l.s8.bf16 %v9681_v12  ;;  %v9706_v17 = vcombine.high %v1963_v10, %v1965_v11  ;;  %v9694_v12 = vld [vmem:[%s11786_s16 + $0x338] sm:$0xff] }
 0x13b   : > { %1861 = vmatprep.subr.bf16.mxu0 %v9653_v18  ;;  %1902 = vmatprep.subr.bf16.mxu1 %v9655_v20  ;;  %v1968_v18 = vunpack.c.l.s8.bf16 %v9682_v13  ;;  %v1969_v20 = vunpack.c.h.s8.bf16 %v9682_v13 }
 0x13d   : > { %v9708_v29 = vcombine.high %v1966_v16, %v1968_v18  ;;  %v9707_v35 = vcombine.low %v1966_v16, %v1968_v18 }
 0x13e   : > { %1862 = vmatpush1.bf16.msra.mxu0 %v9652_v26  ;;  %1903 = vmatpush1.bf16.msra.mxu1 %v9654_v27  ;;  %v9705_v26 = vcombine.low %v1963_v10, %v1965_v11  ;;  %v1970_v27 = vunpack.c.l.s8.bf16 %v9683_v21  ;;  %v1989_v10 = vunpack.c.h.s8.bf16 %v9692_v0  ;;  %v9693_v11 = vld [vmem:[%s11786_s16 + $0x330] sm:$0xff] }
 0x13f   : > { %1863 = vmatprep.subr.bf16.mxu0 %v9657_v30  ;;  %1904 = vmatprep.subr.bf16.mxu1 %v9659_v31  ;;  %v9710_v30 = vcombine.high %v1967_v19, %v1969_v20  ;;  %v1971_v31 = vunpack.c.h.s8.bf16 %v9683_v21  ;;  %v1991_v18 = vunpack.c.h.s8.bf16 %v9693_v11  ;;  %v9696_v21 = vld [vmem:[%s11786_s16 + $0x348] sm:$0xff] }
 0x140   : > { %v9711_v46 = vcombine.low %v1970_v27, %v1972_v28 }
 0x141   : > { %v9714_v40 = vcombine.high %v1971_v31, %v1973_v32 }
 0x142   : > { %1864 = vmatpush1.bf16.msra.mxu0 %v9656_v36  ;;  %1905 = vmatpush1.bf16.msra.mxu1 %v9658_v37  ;;  %v9709_v36 = vcombine.low %v1967_v19, %v1969_v20  ;;  %v9712_v37 = vcombine.high %v1970_v27, %v1972_v28  ;;  %v1993_v19 = vunpack.c.h.s8.bf16 %v9694_v12  ;;  %v9695_v20 = vld [vmem:[%s11786_s16 + $0x340] sm:$0xff] }
 0x143   : > { %1865 = vmatprep.subr.bf16.mxu0 %v9661_v39  ;;  %1906 = vmatprep.subr.bf16.mxu1 %v9663_v41  ;;  %v1974_v39 = vunpack.c.l.s8.bf16 %v9685_v33  ;;  %v1976_v41 = vunpack.c.l.s8.bf16 %v9686_v34 }
 0x144   : > { %v9734_v28 = vcombine.high %v1991_v18, %v1993_v19  ;;  %v9733_v34 = vcombine.low %v1991_v18, %v1993_v19  ;;  %v9756_v19 = vld [vmem:[%s11786_s16 + $0x3a0] sm:$0xff] }
 0x145   : > { %v9716_v49 = vcombine.high %v1974_v39, %v1976_v41  ;;  %v9715_v56 = vcombine.low %v1974_v39, %v1976_v41  ;;  %v9699_v41 = vld [vmem:[%s11786_s16 + $0x360] sm:$0xff] }
 0x146   : > { %1866 = vmatpush1.bf16.msra.mxu0 %v9660_v47  ;;  %1907 = vmatpush1.bf16.msra.mxu1 %v9662_v48  ;;  %v9713_v47 = vcombine.low %v1971_v31, %v1973_v32  ;;  %v1978_v48 = vunpack.c.l.s8.bf16 %v9687_v44  ;;  %v9697_v31 = vld [vmem:[%s11786_s16 + $0x350] sm:$0xff]  ;;  %v9698_v32 = vld [vmem:[%s11786_s16 + $0x358] sm:$0xff]  ;;  %v2002_v45 = vunpack.c.l.s8.bf16 %v9699_v41 }
 0x147   : > { %1867 = vmatprep.subr.bf16.mxu0 %v9665_v50  ;;  %1908 = vmatprep.subr.bf16.mxu1 %v9667_v51  ;;  %v9718_v50 = vcombine.high %v1975_v42, %v1977_v43  ;;  %v1979_v51 = vunpack.c.h.s8.bf16 %v9687_v44  ;;  %v1999_v39 = vunpack.c.h.s8.bf16 %v9697_v31 }
 0x148   : > { %v9719_v2 = vcombine.low %v1978_v48, %v1980_v52 }
 0x149   : > { %v9722_v60 = vcombine.high %v1979_v51, %v1981_v53 }
 0x14a   : > { %1868 = vmatpush1.bf16.msra.mxu0 %v9664_v57  ;;  %1909 = vmatpush1.bf16.msra.mxu1 %v9666_v58  ;;  %v9717_v57 = vcombine.low %v1975_v42, %v1977_v43  ;;  %v9720_v58 = vcombine.high %v1978_v48, %v1980_v52  ;;  %v9700_v42 = vld [vmem:[%s11786_s16 + $0x368] sm:$0xff]  ;;  %v2003_v52 = vunpack.c.h.s8.bf16 %v9699_v41 }
 0x14b   : > { %1869 = vmatprep.subr.bf16.mxu0 %v9669_v59  ;;  %1910 = vmatprep.subr.bf16.mxu1 %v9671_v61  ;;  %v1982_v59 = vunpack.c.l.s8.bf16 %v9689_v54  ;;  %v1984_v61 = vunpack.c.l.s8.bf16 %v9690_v55  ;;  %v9761_v41 = vld [vmem:[%s11786_s16 + $0x3c8] sm:$0xff] }
 0x14d   : > { %v9724_v7 = vcombine.high %v1982_v59, %v1984_v61  ;;  %v9723_v13 = vcombine.low %v1982_v59, %v1984_v61  ;;  %v9752_v61 = vld [vmem:[%s11786_s16 + $0x380] sm:$0xff] }
 0x14e   : > { %1870 = vmatpush1.bf16.msra.mxu0 %v9668_v4  ;;  %1911 = vmatpush1.bf16.msra.mxu1 %v9670_v5  ;;  %v9721_v4 = vcombine.low %v1979_v51, %v1981_v53  ;;  %v1986_v5 = vunpack.c.l.s8.bf16 %v9691_v63  ;;  %v9751_v51 = vld [vmem:[%s11786_s16 + $0x378] sm:$0xff]  ;;  %v2350_v0 = vunpack.c.l.s8.bf16 %v9752_v61 }
 0x14f   : > { %1871 = vmatprep.subr.bf16.mxu0 %v9673_v8  ;;  %1912 = vmatprep.subr.bf16.mxu1 %v9675_v9  ;;  %v9726_v8 = vcombine.high %v1983_v62, %v1985_v1  ;;  %v1987_v9 = vunpack.c.h.s8.bf16 %v9691_v63 }
 0x150   : > { %v9727_v22 = vcombine.low %v1986_v5, %v1988_v6 }
 0x151   : > { %v9730_v16 = vcombine.high %v1987_v9, %v1989_v10 }
 0x152   : > { %1872 = vmatpush1.bf16.msra.mxu0 %v9672_v14  ;;  %1913 = vmatpush1.bf16.msra.mxu1 %v9674_v3  ;;  %v9725_v14 = vcombine.low %v1983_v62, %v1985_v1  ;;  %v9728_v3 = vcombine.high %v1986_v5, %v1988_v6  ;;  %v9753_v62 = vld [vmem:[%s11786_s16 + $0x388] sm:$0xff] }
 0x153   : > { %2235 = vmatprep.subr.bf16.mxu0 %v9704_v15  ;;  %2276 = vmatprep.subr.bf16.mxu1 %v9706_v17  ;;  %v1990_v15 = vunpack.c.l.s8.bf16 %v9693_v11  ;;  %v1992_v17 = vunpack.c.l.s8.bf16 %v9694_v12  ;;  %v2353_v5 = vunpack.c.h.s8.bf16 %v9753_v62  ;;  %v11983_v12 = vld [vmem:[%s12591_s0 + $0x28] sm:$0xff] }
 0x155   : > { %1884 = vmatmul.mubr.bf16.vlgmr.msra.gmra.mrb[0].mxu0 %v9630_v23  ;;  %1925 = vmatmul.mubr.bf16.vlgmr.msra.gmra.mrb[0].mxu1 %v9630_v23  ;;  %v9729_v23 = vcombine.low %v1987_v9, %v1989_v10  ;;  %v9732_v27 = vcombine.high %v1990_v15, %v1992_v17  ;;  %v9731_v33 = vcombine.low %v1990_v15, %v1992_v17  ;;  %v9755_v9 = vld [vmem:[%s11786_s16 + $0x398] sm:$0xff] }
 0x156   : > { %2236 = vmatpush1.bf16.msra.mxu0 %v9703_v25  ;;  %2277 = vmatpush1.bf16.msra.mxu1 %v9705_v26  ;;  %v1994_v25 = vunpack.c.l.s8.bf16 %v9695_v20  ;;  %v1996_v26 = vunpack.c.l.s8.bf16 %v9696_v21  ;;  %v9701_v10 = vcombine.low %v11950_v24, %v11950_v24  ;;  %v2357_v18 = vunpack.c.h.s8.bf16 %v9755_v9 }
 0x157   : > { %2237 = vmatprep.subr.bf16.mxu0 %v9708_v29  ;;  %2278 = vmatprep.subr.bf16.mxu1 %v9710_v30  ;;  %v1995_v29 = vunpack.c.h.s8.bf16 %v9695_v20  ;;  %v1997_v30 = vunpack.c.h.s8.bf16 %v9696_v21  ;;  %v9757_v20 = vld [vmem:[%s11786_s16 + $0x3a8] sm:$0xff]  ;;  %v9773_v24 = vcombine.high %v11983_v12, %v11983_v12 }
 0x158   : > { %9747 = vmatprep.mubr.msk.bf16.mxu0 %vm772_vm0, %v9702_v38  ;;  %9748 = vmatprep.mubr.msk.bf16.mxu1 %vm772_vm0, %v9702_v38  ;;  %v9736_v38 = vcombine.high %v1994_v25, %v1996_v26  ;;  %v9735_v43 = vcombine.low %v1994_v25, %v1996_v26  ;;  %v2360_v25 = vunpack.c.l.s8.bf16 %v9757_v20  ;;  %v2359_v26 = vunpack.c.h.s8.bf16 %v9756_v19 }
 0x159   : > { %v9737_v44 = vcombine.low %v1995_v29, %v1997_v30 }
 0x15a   : > { %2238 = vmatpush1.bf16.msra.mxu0 %v9707_v35  ;;  %2279 = vmatpush1.bf16.msra.mxu1 %v9709_v36  ;;  %v1998_v35 = vunpack.c.l.s8.bf16 %v9697_v31  ;;  %v9738_v36 = vcombine.high %v1995_v29, %v1997_v30  ;;  %v9758_v30 = vld [vmem:[%s11786_s16 + $0x3b0] sm:$0xff]  ;;  %v9759_v31 = vld [vmem:[%s11786_s16 + $0x3b8] sm:$0xff] }
 0x15b   : > { %2239 = vmatprep.subr.bf16.mxu0 %v9712_v37  ;;  %2280 = vmatprep.subr.bf16.mxu1 %v9714_v40  ;;  %v2000_v37 = vunpack.c.l.s8.bf16 %v9698_v32  ;;  %v2001_v40 = vunpack.c.h.s8.bf16 %v9698_v32 }
 0x15d   : > { %v9742_v48 = vcombine.high %v1999_v39, %v2001_v40  ;;  %v9739_v53 = vcombine.low %v1998_v35, %v2000_v37  ;;  %v9741_v54 = vcombine.low %v1999_v39, %v2001_v40  ;;  %v2365_v39 = vunpack.c.h.s8.bf16 %v9759_v31  ;;  %v9760_v40 = vld [vmem:[%s11786_s16 + $0x3c0] sm:$0xff] }
 0x15e   : > { %2240 = vmatpush1.bf16.msra.mxu0 %v9711_v46  ;;  %2281 = vmatpush1.bf16.msra.mxu1 %v9713_v47  ;;  %v2004_v46 = vunpack.c.l.s8.bf16 %v9700_v42  ;;  %v9740_v47 = vcombine.high %v1998_v35, %v2000_v37  ;;  %v2362_v35 = vunpack.c.l.s8.bf16 %v9758_v30  ;;  %v2363_v37 = vunpack.c.h.s8.bf16 %v9758_v30 }
 0x15f   : > { %2241 = vmatprep.subr.bf16.mxu0 %v9716_v49  ;;  %2282 = vmatprep.subr.bf16.mxu1 %v9718_v50  ;;  %v2005_v49 = vunpack.c.h.s8.bf16 %v9700_v42  ;;  %v9750_v50 = vld [vmem:[%s11786_s16 + $0x370] sm:$0xff] }
 0x160   : > { %v9744_v55 = vcombine.high %v2002_v45, %v2004_v46  ;;  %v2347_v59 = vunpack.c.h.s8.bf16 %v9750_v50  ;;  %v9743_v1 = vcombine.low %v2002_v45, %v2004_v46  ;;  %v2368_v45 = vunpack.c.l.s8.bf16 %v9761_v41 }
 0x161   : > { %v9745_v63 = vcombine.low %v2003_v52, %v2005_v49  ;;  %v2367_v46 = vunpack.c.h.s8.bf16 %v9760_v40 }
 0x162   : > { %2242 = vmatpush1.bf16.msra.mxu0 %v9715_v56  ;;  %2283 = vmatpush1.bf16.msra.mxu1 %v9717_v57  ;;  %v2346_v56 = vunpack.c.l.s8.bf16 %v9750_v50  ;;  %v9746_v57 = vcombine.high %v2003_v52, %v2005_v49  ;;  %v9793_v52 = vcombine.high %v2363_v37, %v2365_v39  ;;  %v9762_v49 = vld [vmem:[%s11786_s16 + $0x3d0] sm:$0xff]  ;;  %v9763_v50 = vld [vmem:[%s11786_s16 + $0x3d8] sm:$0xff] }
 0x163   : > { %2243 = vmatprep.subr.bf16.mxu0 %v9720_v58  ;;  %2284 = vmatprep.subr.bf16.mxu1 %v9722_v60  ;;  %v2348_v58 = vunpack.c.l.s8.bf16 %v9751_v51  ;;  %v2349_v60 = vunpack.c.h.s8.bf16 %v9751_v51 }
 0x165   : > { %v9775_v6 = vcombine.high %v2346_v56, %v2348_v58  ;;  %v9774_v11 = vcombine.low %v2346_v56, %v2348_v58  ;;  %v2370_v56 = vunpack.c.l.s8.bf16 %v9762_v49  ;;  %v2371_v58 = vunpack.c.h.s8.bf16 %v9762_v49 }
 0x166   : > { %2244 = vmatpush1.bf16.msra.mxu0 %v9719_v2  ;;  %2285 = vmatpush1.bf16.msra.mxu1 %v9721_v4  ;;  %v2352_v2 = vunpack.c.l.s8.bf16 %v9753_v62  ;;  %v2351_v4 = vunpack.c.h.s8.bf16 %v9752_v61  ;;  %v9765_v61 = vld [vmem:[%s11786_s16 + $0x3e8] sm:$0xff] }
 0x167   : > { %2245 = vmatprep.subr.bf16.mxu0 %v9724_v7  ;;  %2286 = vmatprep.subr.bf16.mxu1 %v9726_v8  ;;  %v9777_v7 = vcombine.high %v2347_v59, %v2349_v60  ;;  %v9754_v8 = vld [vmem:[%s11786_s16 + $0x390] sm:$0xff] }
 0x168   : > { %v2354_v15 = vunpack.c.l.s8.bf16 %v9754_v8  ;;  %v2355_v17 = vunpack.c.h.s8.bf16 %v9754_v8  ;;  %v9778_v21 = vcombine.low %v2350_v0, %v2352_v2  ;;  %v9767_v8 = vld [vmem:[%s11786_s16 + $0x3f8] sm:$0xff] }
 0x16a   : > { %2246 = vmatpush1.bf16.msra.mxu0 %v9723_v13  ;;  %2287 = vmatpush1.bf16.msra.mxu1 %v9725_v14  ;;  %v9776_v13 = vcombine.low %v2347_v59, %v2349_v60  ;;  %v9779_v14 = vcombine.high %v2350_v0, %v2352_v2  ;;  %v9785_v29 = vcombine.high %v2355_v17, %v2357_v18  ;;  %v2373_v59 = vunpack.c.h.s8.bf16 %v9763_v50  ;;  %v9764_v60 = vld [vmem:[%s11786_s16 + $0x3e0] sm:$0xff] }
 0x16b   : > { %2247 = vmatprep.subr.bf16.mxu0 %v9728_v3  ;;  %2288 = vmatprep.subr.bf16.mxu1 %v9730_v16  ;;  %v9781_v3 = vcombine.high %v2351_v4, %v2353_v5  ;;  %v2356_v16 = vunpack.c.l.s8.bf16 %v9755_v9  ;;  %v2376_v0 = vunpack.c.l.s8.bf16 %v9765_v61  ;;  %v2375_v2 = vunpack.c.h.s8.bf16 %v9764_v60 }
 0x16d   : > { %v9782_v32 = vcombine.low %v2354_v15, %v2356_v16 }
 0x16e   : > { %2248 = vmatpush1.bf16.msra.mxu0 %v9727_v22  ;;  %2289 = vmatpush1.bf16.msra.mxu1 %v9729_v23  ;;  %v9780_v22 = vcombine.low %v2351_v4, %v2353_v5  ;;  %v2358_v23 = vunpack.c.l.s8.bf16 %v9756_v19  ;;  %v2377_v4 = vunpack.c.h.s8.bf16 %v9765_v61 }
 0x16f   : > { %2249 = vmatprep.subr.bf16.mxu0 %v9732_v27  ;;  %2290 = vmatprep.subr.bf16.mxu1 %v9734_v28  ;;  %v2361_v27 = vunpack.c.h.s8.bf16 %v9757_v20  ;;  %v9783_v28 = vcombine.high %v2354_v15, %v2356_v16  ;;  %v2381_v16 = vunpack.c.h.s8.bf16 %v9767_v8 }
 0x170   : > { %v9786_v42 = vcombine.low %v2358_v23, %v2360_v25  ;;  %v9804_v20 = vcombine.low %v2375_v2, %v2377_v4 }
 0x172   : > { %2250 = vmatpush1.bf16.msra.mxu0 %v9731_v33  ;;  %2291 = vmatpush1.bf16.msra.mxu1 %v9733_v34  ;;  %v9784_v33 = vcombine.low %v2355_v17, %v2357_v18  ;;  %v9787_v34 = vcombine.high %v2358_v23, %v2360_v25  ;;  %v9768_v17 = vld [vmem:[%s11786_s16 + $0x400] sm:$0xff]  ;;  %v9769_v18 = vld [vmem:[%s11786_s16 + $0x408] sm:$0xff] }
 0x173   : > { %2251 = vmatprep.subr.bf16.mxu0 %v9736_v38  ;;  %2292 = vmatprep.subr.bf16.mxu1 %v9738_v36  ;;  %v9789_v38 = vcombine.high %v2359_v26, %v2361_v27  ;;  %v2364_v36 = vunpack.c.l.s8.bf16 %v9759_v31  ;;  %v2385_v23 = vunpack.c.h.s8.bf16 %v9769_v18 }
 0x175   : > { %v9790_v51 = vcombine.low %v2362_v35, %v2364_v36 }
 0x176   : > { %2252 = vmatpush1.bf16.msra.mxu0 %v9735_v43  ;;  %2293 = vmatpush1.bf16.msra.mxu1 %v9737_v44  ;;  %v9788_v43 = vcombine.low %v2359_v26, %v2361_v27  ;;  %v2366_v44 = vunpack.c.l.s8.bf16 %v9760_v40  ;;  %v9770_v27 = vld [vmem:[%s11786_s16 + $0x410] sm:$0xff] }
 0x177   : > { %2253 = vmatprep.subr.bf16.mxu0 %v9740_v47  ;;  %2294 = vmatprep.subr.bf16.mxu1 %v9742_v48  ;;  %v2369_v47 = vunpack.c.h.s8.bf16 %v9761_v41  ;;  %v9791_v48 = vcombine.high %v2362_v35, %v2364_v36  ;;  %v9821_v36 = vld [vmem:[%s11786_s16 + $0x420] sm:$0xff] }
 0x178   : > { %v9794_v62 = vcombine.low %v2366_v44, %v2368_v45  ;;  %v2730_v41 = vunpack.c.l.s8.bf16 %v9821_v36 }
 0x17a   : > { %2254 = vmatpush1.bf16.msra.mxu0 %v9739_v53  ;;  %2295 = vmatpush1.bf16.msra.mxu1 %v9741_v54  ;;  %v9792_v53 = vcombine.low %v2363_v37, %v2365_v39  ;;  %v9795_v54 = vcombine.high %v2366_v44, %v2368_v45  ;;  %v9822_v37 = vld [vmem:[%s11786_s16 + $0x428] sm:$0xff] }
 0x17b   : > { %2255 = vmatprep.subr.bf16.mxu0 %v9744_v55  ;;  %2296 = vmatprep.subr.bf16.mxu1 %v9746_v57  ;;  %v9797_v55 = vcombine.high %v2367_v46, %v2369_v47  ;;  %v2372_v57 = vunpack.c.l.s8.bf16 %v9763_v50  ;;  %v2733_v44 = vunpack.c.h.s8.bf16 %v9822_v37 }
 0x17d   : > { %v9799_v5 = vcombine.high %v2370_v56, %v2372_v57  ;;  %v9798_v9 = vcombine.low %v2370_v56, %v2372_v57  ;;  %v9825_v57 = vld [vmem:[%s11786_s16 + $0x440] sm:$0xff] }
 0x17e   : > { %2256 = vmatpush1.bf16.msra.mxu0 %v9743_v1  ;;  %2297 = vmatpush1.bf16.msra.mxu1 %v9745_v63  ;;  %v9796_v1 = vcombine.low %v2367_v46, %v2369_v47  ;;  %v2374_v63 = vunpack.c.l.s8.bf16 %v9764_v60  ;;  %v9823_v47 = vld [vmem:[%s11786_s16 + $0x430] sm:$0xff] }
 0x17f   : > { %2619 = vmatprep.subr.bf16.mxu0 %v9775_v6  ;;  %2660 = vmatprep.subr.bf16.mxu1 %v9777_v7  ;;  %v9801_v6 = vcombine.high %v2371_v58, %v2373_v59  ;;  %v9766_v7 = vld [vmem:[%s11786_s16 + $0x3f0] sm:$0xff] }
 0x180   : > { %v2379_v15 = vunpack.c.h.s8.bf16 %v9766_v7  ;;  %v9802_v19 = vcombine.low %v2374_v63, %v2376_v0 }
 0x181   : > { %2268 = vmatmul.mubr.bf16.vlgmr.msra.gmra.mrb[0].mxu0 %v9701_v10  ;;  %2309 = vmatmul.mubr.bf16.vlgmr.msra.gmra.mrb[0].mxu1 %v9701_v10  ;;  %v9800_v10 = vcombine.low %v2371_v58, %v2373_v59  ;;  %v9826_v58 = vld [vmem:[%s11786_s16 + $0x448] sm:$0xff]  ;;  %v9772_v59 = vcombine.low %v11983_v12, %v11983_v12 }
 0x182   : > { %2620 = vmatpush1.bf16.msra.mxu0 %v9774_v11  ;;  %2661 = vmatpush1.bf16.msra.mxu1 %v9776_v13  ;;  %v9803_v11 = vcombine.high %v2374_v63, %v2376_v0  ;;  %v9805_v13 = vcombine.high %v2375_v2, %v2377_v4  ;;  %v9809_v26 = vcombine.high %v2379_v15, %v2381_v16  ;;  %v2740_v63 = vunpack.c.l.s8.bf16 %v9826_v58 }
 0x183   : > { %2621 = vmatprep.subr.bf16.mxu0 %v9779_v14  ;;  %2662 = vmatprep.subr.bf16.mxu1 %v9781_v3  ;;  %v2378_v14 = vunpack.c.l.s8.bf16 %v9766_v7  ;;  %v2380_v3 = vunpack.c.l.s8.bf16 %v9767_v8  ;;  %v9808_v30 = vcombine.low %v2379_v15, %v2381_v16  ;;  %v2739_v0 = vunpack.c.h.s8.bf16 %v9825_v57  ;;  %v9828_v7 = vld [vmem:[%s11786_s16 + $0x458] sm:$0xff]  ;;  %v9829_v16 = vld [vmem:[%s11786_s16 + $0x460] sm:$0xff] }
 0x184   : > { %9818 = vmatprep.mubr.msk.bf16.mxu0 %vm772_vm0, %v9773_v24  ;;  %9819 = vmatprep.mubr.msk.bf16.mxu1 %vm772_vm0, %v9773_v24  ;;  %v2382_v24 = vunpack.c.l.s8.bf16 %v9768_v17  ;;  %v2741_v2 = vunpack.c.h.s8.bf16 %v9826_v58  ;;  %v2745_v15 = vunpack.c.h.s8.bf16 %v9828_v7 }
 0x185   : > { %v9807_v25 = vcombine.high %v2378_v14, %v2380_v3 }
 0x186   : > { %2622 = vmatpush1.bf16.msra.mxu0 %v9778_v21  ;;  %2663 = vmatpush1.bf16.msra.mxu1 %v9780_v22  ;;  %v2384_v21 = vunpack.c.l.s8.bf16 %v9769_v18  ;;  %v2383_v22 = vunpack.c.h.s8.bf16 %v9768_v17  ;;  %v9830_v17 = vld [vmem:[%s11786_s16 + $0x468] sm:$0xff] }
 0x187   : > { %2623 = vmatprep.subr.bf16.mxu0 %v9783_v28  ;;  %2664 = vmatprep.subr.bf16.mxu1 %v9785_v29  ;;  %v9771_v28 = vld [vmem:[%s11786_s16 + $0x418] sm:$0xff]  ;;  %v9806_v29 = vcombine.low %v2378_v14, %v2380_v3  ;;  %v2744_v14 = vunpack.c.l.s8.bf16 %v9828_v7 }
 0x188   : > { %v9811_v31 = vcombine.high %v2382_v24, %v2384_v21  ;;  %v2389_v35 = vunpack.c.h.s8.bf16 %v9771_v28  ;;  %v9810_v39 = vcombine.low %v2382_v24, %v2384_v21  ;;  %v9812_v40 = vcombine.low %v2383_v22, %v2385_v23 }
 0x189   : > { %v2748_v24 = vunpack.c.l.s8.bf16 %v9830_v17  ;;  %v2747_v21 = vunpack.c.h.s8.bf16 %v9829_v16 }
 0x18a   : > { %2624 = vmatpush1.bf16.msra.mxu0 %v9782_v32  ;;  %2665 = vmatpush1.bf16.msra.mxu1 %v9784_v33  ;;  %v9813_v32 = vcombine.high %v2383_v22, %v2385_v23  ;;  %v2386_v33 = vunpack.c.l.s8.bf16 %v9770_v27  ;;  %v2749_v22 = vunpack.c.h.s8.bf16 %v9830_v17 }
 0x18b   : > { %2625 = vmatprep.subr.bf16.mxu0 %v9787_v34  ;;  %2666 = vmatprep.subr.bf16.mxu1 %v9789_v38  ;;  %v2388_v34 = vunpack.c.l.s8.bf16 %v9771_v28  ;;  %v2387_v38 = vunpack.c.h.s8.bf16 %v9770_v27  ;;  %v9832_v27 = vld [vmem:[%s11786_s16 + $0x478] sm:$0xff] }
 0x18d   : > { %v9815_v45 = vcombine.high %v2386_v33, %v2388_v34  ;;  %v9817_v46 = vcombine.high %v2387_v38, %v2389_v35  ;;  %v9816_v49 = vcombine.low %v2387_v38, %v2389_v35  ;;  %v2753_v38 = vunpack.c.h.s8.bf16 %v9832_v27  ;;  %v9833_v35 = vld [vmem:[%s11786_s16 + $0x480] sm:$0xff] }
 0x18e   : > { %2626 = vmatpush1.bf16.msra.mxu0 %v9786_v42  ;;  %2667 = vmatpush1.bf16.msra.mxu1 %v9788_v43  ;;  %v2732_v42 = vunpack.c.l.s8.bf16 %v9822_v37  ;;  %v2731_v43 = vunpack.c.h.s8.bf16 %v9821_v36  ;;  %v9834_v36 = vld [vmem:[%s11786_s16 + $0x488] sm:$0xff] }
 0x18f   : > { %2627 = vmatprep.subr.bf16.mxu0 %v9791_v48  ;;  %2668 = vmatprep.subr.bf16.mxu1 %v9793_v52  ;;  %v9824_v48 = vld [vmem:[%s11786_s16 + $0x438] sm:$0xff]  ;;  %v9814_v52 = vcombine.low %v2386_v33, %v2388_v34  ;;  %v2752_v33 = vunpack.c.l.s8.bf16 %v9832_v27 }
 0x190   : > { %v9846_v50 = vcombine.high %v2730_v41, %v2732_v42  ;;  %v2737_v56 = vunpack.c.h.s8.bf16 %v9824_v48  ;;  %v9845_v60 = vcombine.low %v2730_v41, %v2732_v42  ;;  %v9847_v61 = vcombine.low %v2731_v43, %v2733_v44 }
 0x191   : > { %v2756_v41 = vunpack.c.l.s8.bf16 %v9834_v36  ;;  %v2755_v42 = vunpack.c.h.s8.bf16 %v9833_v35 }
 0x192   : > { %2628 = vmatpush1.bf16.msra.mxu0 %v9790_v51  ;;  %2669 = vmatpush1.bf16.msra.mxu1 %v9792_v53  ;;  %v9848_v51 = vcombine.high %v2731_v43, %v2733_v44  ;;  %v2734_v53 = vunpack.c.l.s8.bf16 %v9823_v47  ;;  %v2757_v43 = vunpack.c.h.s8.bf16 %v9834_v36 }
 0x193   : > { %2629 = vmatprep.subr.bf16.mxu0 %v9795_v54  ;;  %2670 = vmatprep.subr.bf16.mxu1 %v9797_v55  ;;  %v2736_v54 = vunpack.c.l.s8.bf16 %v9824_v48  ;;  %v2735_v55 = vunpack.c.h.s8.bf16 %v9823_v47  ;;  %v9836_v47 = vld [vmem:[%s11786_s16 + $0x498] sm:$0xff] }
 0x195   : > { %v9850_v4 = vcombine.high %v2734_v53, %v2736_v54  ;;  %v9849_v8 = vcombine.low %v2734_v53, %v2736_v54  ;;  %v2760_v53 = vunpack.c.l.s8.bf16 %v9836_v47 }
 0x196   : > { %2630 = vmatpush1.bf16.msra.mxu0 %v9794_v62  ;;  %2671 = vmatpush1.bf16.msra.mxu1 %v9796_v1  ;;  %v12016_v62 = vld [vmem:[%s12591_s0 + $0x30] sm:$0xff]  ;;  %v2738_v1 = vunpack.c.l.s8.bf16 %v9825_v57 }
 0x197   : > { %2631 = vmatprep.subr.bf16.mxu0 %v9799_v5  ;;  %2672 = vmatprep.subr.bf16.mxu1 %v9801_v6  ;;  %v9852_v5 = vcombine.high %v2735_v55, %v2737_v56  ;;  %v9827_v6 = vld [vmem:[%s11786_s16 + $0x450] sm:$0xff]  ;;  %v9844_v12 = vcombine.high %v12016_v62, %v12016_v62  ;;  %v9838_v57 = vld [vmem:[%s11786_s16 + $0x4a8] sm:$0xff] }
 0x198   : > { %v2743_v3 = vunpack.c.h.s8.bf16 %v9827_v6  ;;  %v9853_v18 = vcombine.low %v2738_v1, %v2740_v63 }
 0x19a   : > { %2632 = vmatpush1.bf16.msra.mxu0 %v9798_v9  ;;  %2673 = vmatpush1.bf16.msra.mxu1 %v9800_v10  ;;  %v9851_v9 = vcombine.low %v2735_v55, %v2737_v56  ;;  %v9854_v10 = vcombine.high %v2738_v1, %v2740_v63  ;;  %v2761_v55 = vunpack.c.h.s8.bf16 %v9836_v47  ;;  %v9837_v56 = vld [vmem:[%s11786_s16 + $0x4a0] sm:$0xff]  ;;  %v2765_v63 = vunpack.c.h.s8.bf16 %v9838_v57  ;;  %v12049_v47 = vld [vmem:[%s12591_s0 + $0x38] sm:$0xff] }
 0x19b   : > { %2633 = vmatprep.subr.bf16.mxu0 %v9803_v11  ;;  %2674 = vmatprep.subr.bf16.mxu1 %v9805_v13  ;;  %v9856_v11 = vcombine.high %v2739_v0, %v2741_v2  ;;  %v2742_v13 = vunpack.c.l.s8.bf16 %v9827_v6  ;;  %v2763_v1 = vunpack.c.h.s8.bf16 %v9837_v56 }
 0x19d   : > { %v9858_v23 = vcombine.high %v2742_v13, %v2744_v14  ;;  %v9857_v28 = vcombine.low %v2742_v13, %v2744_v14  ;;  %v9841_v14 = vld [vmem:[%s11786_s16 + $0x4c0] sm:$0xff] }
 0x19e   : > { %2634 = vmatpush1.bf16.msra.mxu0 %v9802_v19  ;;  %2675 = vmatpush1.bf16.msra.mxu1 %v9804_v20  ;;  %v9855_v19 = vcombine.low %v2739_v0, %v2741_v2  ;;  %v2746_v20 = vunpack.c.l.s8.bf16 %v9829_v16  ;;  %v9879_v16 = vcombine.low %v2763_v1, %v2765_v63  ;;  %v2770_v17 = vunpack.c.l.s8.bf16 %v9841_v14 }
 0x19f   : > { %2635 = vmatprep.subr.bf16.mxu0 %v9807_v25  ;;  %2676 = vmatprep.subr.bf16.mxu1 %v9809_v26  ;;  %v9860_v25 = vcombine.high %v2743_v3, %v2745_v15  ;;  %v9831_v26 = vld [vmem:[%s11786_s16 + $0x470] sm:$0xff] }
 0x1a0   : > { %v2751_v34 = vunpack.c.h.s8.bf16 %v9831_v26  ;;  %v9861_v37 = vcombine.low %v2746_v20, %v2748_v24 }
 0x1a2   : > { %2636 = vmatpush1.bf16.msra.mxu0 %v9806_v29  ;;  %2677 = vmatpush1.bf16.msra.mxu1 %v9808_v30  ;;  %v9859_v29 = vcombine.low %v2743_v3, %v2745_v15  ;;  %v9862_v30 = vcombine.high %v2746_v20, %v2748_v24  ;;  %v9842_v3 = vld [vmem:[%s11786_s16 + $0x4c8] sm:$0xff] }
 0x1a3   : > { %2637 = vmatprep.subr.bf16.mxu0 %v9811_v31  ;;  %2678 = vmatprep.subr.bf16.mxu1 %v9813_v32  ;;  %v9864_v31 = vcombine.high %v2747_v21, %v2749_v22  ;;  %v2750_v32 = vunpack.c.l.s8.bf16 %v9831_v26  ;;  %v2773_v20 = vunpack.c.h.s8.bf16 %v9842_v3 }
 0x1a5   : > { %v9866_v44 = vcombine.high %v2750_v32, %v2752_v33  ;;  %v9865_v48 = vcombine.low %v2750_v32, %v2752_v33  ;;  %v9894_v33 = vld [vmem:[%s11786_s16 + $0x4e0] sm:$0xff] }
 0x1a6   : > { %2638 = vmatpush1.bf16.msra.mxu0 %v9810_v39  ;;  %2679 = vmatpush1.bf16.msra.mxu1 %v9812_v40  ;;  %v9863_v39 = vcombine.low %v2747_v21, %v2749_v22  ;;  %v2754_v40 = vunpack.c.l.s8.bf16 %v9833_v35  ;;  %v9892_v22 = vld [vmem:[%s11786_s16 + $0x4d0] sm:$0xff]  ;;  %v3118_v36 = vunpack.c.l.s8.bf16 %v9894_v33 }
 0x1a7   : > { %2639 = vmatprep.subr.bf16.mxu0 %v9815_v45  ;;  %2680 = vmatprep.subr.bf16.mxu1 %v9817_v46  ;;  %v9868_v45 = vcombine.high %v2751_v34, %v2753_v38  ;;  %v9835_v46 = vld [vmem:[%s11786_s16 + $0x490] sm:$0xff] }
 0x1a8   : > { %v2759_v54 = vunpack.c.h.s8.bf16 %v9835_v46  ;;  %v9869_v58 = vcombine.low %v2754_v40, %v2756_v41 }
 0x1aa   : > { %2640 = vmatpush1.bf16.msra.mxu0 %v9814_v52  ;;  %2681 = vmatpush1.bf16.msra.mxu1 %v9816_v49  ;;  %v9867_v52 = vcombine.low %v2751_v34, %v2753_v38  ;;  %v9870_v49 = vcombine.high %v2754_v40, %v2756_v41  ;;  %v9876_v2 = vcombine.high %v2759_v54, %v2761_v55  ;;  %v9895_v34 = vld [vmem:[%s11786_s16 + $0x4e8] sm:$0xff] }
 0x1ab   : > { %3003 = vmatprep.subr.bf16.mxu0 %v9846_v50  ;;  %3044 = vmatprep.subr.bf16.mxu1 %v9848_v51  ;;  %v9872_v50 = vcombine.high %v2755_v42, %v2757_v43  ;;  %v2758_v51 = vunpack.c.l.s8.bf16 %v9835_v46  ;;  %v9875_v7 = vcombine.low %v2759_v54, %v2761_v55  ;;  %v3121_v40 = vunpack.c.h.s8.bf16 %v9895_v34  ;;  %v9898_v55 = vld [vmem:[%s11786_s16 + $0x500] sm:$0xff] }
 0x1ad   : > { %2652 = vmatmul.mubr.bf16.vlgmr.msra.gmra.mrb[0].mxu0 %v9772_v59  ;;  %2693 = vmatmul.mubr.bf16.vlgmr.msra.gmra.mrb[0].mxu1 %v9772_v59  ;;  %v9871_v59 = vcombine.low %v2755_v42, %v2757_v43  ;;  %v9874_v0 = vcombine.high %v2758_v51, %v2760_v53  ;;  %v9873_v6 = vcombine.low %v2758_v51, %v2760_v53  ;;  %v9896_v43 = vld [vmem:[%s11786_s16 + $0x4f0] sm:$0xff] }
 0x1ae   : > { %3004 = vmatpush1.bf16.msra.mxu0 %v9845_v60  ;;  %3045 = vmatpush1.bf16.msra.mxu1 %v9847_v61  ;;  %v2762_v60 = vunpack.c.l.s8.bf16 %v9837_v56  ;;  %v2764_v61 = vunpack.c.l.s8.bf16 %v9838_v57  ;;  %v3123_v53 = vunpack.c.h.s8.bf16 %v9896_v43  ;;  %v9899_v56 = vld [vmem:[%s11786_s16 + $0x508] sm:$0xff] }
 0x1af   : > { %3005 = vmatprep.subr.bf16.mxu0 %v9850_v4  ;;  %3046 = vmatprep.subr.bf16.mxu1 %v9852_v5  ;;  %v9839_v4 = vld [vmem:[%s11786_s16 + $0x4b0] sm:$0xff]  ;;  %v9840_v5 = vld [vmem:[%s11786_s16 + $0x4b8] sm:$0xff] }
 0x1b0   : > { %9889 = vmatprep.mubr.msk.bf16.mxu0 %vm772_vm0, %v9844_v12  ;;  %9890 = vmatprep.mubr.msk.bf16.mxu1 %vm772_vm0, %v9844_v12  ;;  %v9878_v12 = vcombine.high %v2762_v60, %v2764_v61  ;;  %v2769_v13 = vunpack.c.h.s8.bf16 %v9840_v5  ;;  %v9877_v15 = vcombine.low %v2762_v60, %v2764_v61  ;;  %v3128_v60 = vunpack.c.l.s8.bf16 %v9899_v56 }
 0x1b1   : > { %v3127_v61 = vunpack.c.h.s8.bf16 %v9898_v55 }
 0x1b2   : > { %3006 = vmatpush1.bf16.msra.mxu0 %v9849_v8  ;;  %3047 = vmatpush1.bf16.msra.mxu1 %v9851_v9  ;;  %v9880_v8 = vcombine.high %v2763_v1, %v2765_v63  ;;  %v2766_v9 = vunpack.c.l.s8.bf16 %v9839_v4  ;;  %v3129_v1 = vunpack.c.h.s8.bf16 %v9899_v56 }
 0x1b3   : > { %3007 = vmatprep.subr.bf16.mxu0 %v9854_v10  ;;  %3048 = vmatprep.subr.bf16.mxu1 %v9856_v11  ;;  %v2768_v10 = vunpack.c.l.s8.bf16 %v9840_v5  ;;  %v2767_v11 = vunpack.c.h.s8.bf16 %v9839_v4  ;;  %v9901_v4 = vld [vmem:[%s11786_s16 + $0x518] sm:$0xff] }
 0x1b5   : > { %v9882_v24 = vcombine.high %v2766_v9, %v2768_v10  ;;  %v9884_v21 = vcombine.high %v2767_v11, %v2769_v13  ;;  %v9883_v26 = vcombine.low %v2767_v11, %v2769_v13  ;;  %v3133_v11 = vunpack.c.h.s8.bf16 %v9901_v4  ;;  %v9902_v13 = vld [vmem:[%s11786_s16 + $0x520] sm:$0xff] }
 0x1b6   : > { %3008 = vmatpush1.bf16.msra.mxu0 %v9853_v18  ;;  %3049 = vmatpush1.bf16.msra.mxu1 %v9855_v19  ;;  %v2772_v18 = vunpack.c.l.s8.bf16 %v9842_v3  ;;  %v2771_v19 = vunpack.c.h.s8.bf16 %v9841_v14  ;;  %v9903_v14 = vld [vmem:[%s11786_s16 + $0x528] sm:$0xff] }
 0x1b7   : > { %3009 = vmatprep.subr.bf16.mxu0 %v9858_v23  ;;  %3050 = vmatprep.subr.bf16.mxu1 %v9860_v25  ;;  %v9893_v23 = vld [vmem:[%s11786_s16 + $0x4d8] sm:$0xff]  ;;  %v9881_v25 = vcombine.low %v2766_v9, %v2768_v10  ;;  %v3132_v9 = vunpack.c.l.s8.bf16 %v9901_v4 }
 0x1b8   : > { %v9886_v27 = vcombine.high %v2770_v17, %v2772_v18  ;;  %v3117_v32 = vunpack.c.h.s8.bf16 %v9893_v23  ;;  %v9885_v38 = vcombine.low %v2770_v17, %v2772_v18  ;;  %v9887_v35 = vcombine.low %v2771_v19, %v2773_v20 }
 0x1b9   : > { %v3136_v17 = vunpack.c.l.s8.bf16 %v9903_v14  ;;  %v3135_v18 = vunpack.c.h.s8.bf16 %v9902_v13 }
 0x1ba   : > { %3010 = vmatpush1.bf16.msra.mxu0 %v9857_v28  ;;  %3051 = vmatpush1.bf16.msra.mxu1 %v9859_v29  ;;  %v9888_v28 = vcombine.high %v2771_v19, %v2773_v20  ;;  %v3114_v29 = vunpack.c.l.s8.bf16 %v9892_v22  ;;  %v3137_v19 = vunpack.c.h.s8.bf16 %v9903_v14 }
 0x1bb   : > { %3011 = vmatprep.subr.bf16.mxu0 %v9862_v30  ;;  %3052 = vmatprep.subr.bf16.mxu1 %v9864_v31  ;;  %v3116_v30 = vunpack.c.l.s8.bf16 %v9893_v23  ;;  %v3115_v31 = vunpack.c.h.s8.bf16 %v9892_v22  ;;  %v9905_v22 = vld [vmem:[%s11786_s16 + $0x538] sm:$0xff] }
 0x1bd   : > { %v9917_v41 = vcombine.high %v3114_v29, %v3116_v30  ;;  %v9919_v42 = vcombine.high %v3115_v31, %v3117_v32  ;;  %v9916_v46 = vcombine.low %v3114_v29, %v3116_v30  ;;  %v3140_v29 = vunpack.c.l.s8.bf16 %v9905_v22 }
 0x1be   : > { %3012 = vmatpush1.bf16.msra.mxu0 %v9861_v37  ;;  %3053 = vmatpush1.bf16.msra.mxu1 %v9863_v39  ;;  %v3120_v37 = vunpack.c.l.s8.bf16 %v9895_v34  ;;  %v3119_v39 = vunpack.c.h.s8.bf16 %v9894_v33  ;;  %v9907_v33 = vld [vmem:[%s11786_s16 + $0x548] sm:$0xff] }
 0x1bf   : > { %3013 = vmatprep.subr.bf16.mxu0 %v9866_v44  ;;  %3054 = vmatprep.subr.bf16.mxu1 %v9868_v45  ;;  %v9897_v44 = vld [vmem:[%s11786_s16 + $0x4f8] sm:$0xff]  ;;  %v9843_v45 = vcombine.low %v12016_v62, %v12016_v62  ;;  %v9915_v62 = vcombine.high %v12049_v47, %v12049_v47 }
 0x1c0   : > { %v3124_v51 = vunpack.c.l.s8.bf16 %v9897_v44  ;;  %v3125_v54 = vunpack.c.h.s8.bf16 %v9897_v44  ;;  %v9920_v57 = vcombine.low %v3118_v36, %v3120_v37 }
 0x1c2   : > { %3014 = vmatpush1.bf16.msra.mxu0 %v9865_v48  ;;  %3055 = vmatpush1.bf16.msra.mxu1 %v9867_v52  ;;  %v9918_v48 = vcombine.low %v3115_v31, %v3117_v32  ;;  %v9921_v52 = vcombine.high %v3118_v36, %v3120_v37  ;;  %v3141_v31 = vunpack.c.h.s8.bf16 %v9905_v22  ;;  %v9906_v32 = vld [vmem:[%s11786_s16 + $0x540] sm:$0xff]  ;;  %v3144_v36 = vunpack.c.l.s8.bf16 %v9907_v33 }
 0x1c3   : > { %3015 = vmatprep.subr.bf16.mxu0 %v9870_v49  ;;  %3056 = vmatprep.subr.bf16.mxu1 %v9872_v50  ;;  %v9923_v49 = vcombine.high %v3119_v39, %v3121_v40  ;;  %v3122_v50 = vunpack.c.l.s8.bf16 %v9896_v43  ;;  %v3143_v37 = vunpack.c.h.s8.bf16 %v9906_v32  ;;  %v9909_v43 = vld [vmem:[%s11786_s16 + $0x558] sm:$0xff] }
 0x1c5   : > { %v9925_v63 = vcombine.high %v3122_v50, %v3124_v51  ;;  %v9924_v5 = vcombine.low %v3122_v50, %v3124_v51  ;;  %v3149_v51 = vunpack.c.h.s8.bf16 %v9909_v43 }
 0x1c6   : > { %3016 = vmatpush1.bf16.msra.mxu0 %v9869_v58  ;;  %3057 = vmatpush1.bf16.msra.mxu1 %v9871_v59  ;;  %v9922_v58 = vcombine.low %v3119_v39, %v3121_v40  ;;  %v3126_v59 = vunpack.c.l.s8.bf16 %v9898_v55  ;;  %v3145_v39 = vunpack.c.h.s8.bf16 %v9907_v33 }
 0x1c7   : > { %3017 = vmatprep.subr.bf16.mxu0 %v9874_v0  ;;  %3058 = vmatprep.subr.bf16.mxu1 %v9876_v2  ;;  %v9927_v0 = vcombine.high %v3123_v53, %v3125_v54  ;;  %v9900_v2 = vld [vmem:[%s11786_s16 + $0x510] sm:$0xff] }
 0x1c8   : > { %v3131_v10 = vunpack.c.h.s8.bf16 %v9900_v2  ;;  %v9928_v3 = vcombine.low %v3126_v59, %v3128_v60  ;;  %v9946_v56 = vcombine.low %v3143_v37, %v3145_v39 }
 0x1ca   : > { %3018 = vmatpush1.bf16.msra.mxu0 %v9873_v6  ;;  %3059 = vmatpush1.bf16.msra.mxu1 %v9875_v7  ;;  %v9926_v6 = vcombine.low %v3123_v53, %v3125_v54  ;;  %v9929_v7 = vcombine.high %v3126_v59, %v3128_v60  ;;  %v9910_v53 = vld [vmem:[%s11786_s16 + $0x560] sm:$0xff]  ;;  %v9911_v54 = vld [vmem:[%s11786_s16 + $0x568] sm:$0xff] }
 0x1cb   : > { %3019 = vmatprep.subr.bf16.mxu0 %v9878_v12  ;;  %3060 = vmatprep.subr.bf16.mxu1 %v9880_v8  ;;  %v9931_v12 = vcombine.high %v3127_v61, %v3129_v1  ;;  %v3130_v8 = vunpack.c.l.s8.bf16 %v9900_v2  ;;  %v3153_v59 = vunpack.c.h.s8.bf16 %v9911_v54 }
 0x1cd   : > { %v9933_v20 = vcombine.high %v3130_v8, %v3132_v9  ;;  %v9932_v23 = vcombine.low %v3130_v8, %v3132_v9  ;;  %v9963_v9 = vld [vmem:[%s11786_s16 + $0x580] sm:$0xff] }
 0x1ce   : > { %3020 = vmatpush1.bf16.msra.mxu0 %v9877_v15  ;;  %3061 = vmatpush1.bf16.msra.mxu1 %v9879_v16  ;;  %v9930_v15 = vcombine.low %v3127_v61, %v3129_v1  ;;  %v3134_v16 = vunpack.c.l.s8.bf16 %v9902_v13  ;;  %v9912_v1 = vld [vmem:[%s11786_s16 + $0x570] sm:$0xff]  ;;  %v3498_v14 = vunpack.c.l.s8.bf16 %v9963_v9 }
 0x1cf   : > { %3021 = vmatprep.subr.bf16.mxu0 %v9882_v24  ;;  %3062 = vmatprep.subr.bf16.mxu1 %v9884_v21  ;;  %v9935_v24 = vcombine.high %v3131_v10, %v3133_v11  ;;  %v9904_v21 = vld [vmem:[%s11786_s16 + $0x530] sm:$0xff] }
 0x1d0   : > { %v3139_v30 = vunpack.c.h.s8.bf16 %v9904_v21  ;;  %v9936_v34 = vcombine.low %v3134_v16, %v3136_v17 }
 0x1d2   : > { %3022 = vmatpush1.bf16.msra.mxu0 %v9881_v25  ;;  %3063 = vmatpush1.bf16.msra.mxu1 %v9883_v26  ;;  %v9934_v25 = vcombine.low %v3131_v10, %v3133_v11  ;;  %v9937_v26 = vcombine.high %v3134_v16, %v3136_v17  ;;  %v9964_v10 = vld [vmem:[%s11786_s16 + $0x588] sm:$0xff] }
 0x1d3   : > { %3023 = vmatprep.subr.bf16.mxu0 %v9886_v27  ;;  %3064 = vmatprep.subr.bf16.mxu1 %v9888_v28  ;;  %v9939_v27 = vcombine.high %v3135_v18, %v3137_v19  ;;  %v3138_v28 = vunpack.c.l.s8.bf16 %v9904_v21  ;;  %v3501_v16 = vunpack.c.h.s8.bf16 %v9964_v10 }
 0x1d5   : > { %v9941_v40 = vcombine.high %v3138_v28, %v3140_v29  ;;  %v9940_v44 = vcombine.low %v3138_v28, %v3140_v29  ;;  %v9967_v29 = vld [vmem:[%s11786_s16 + $0x5a0] sm:$0xff] }
 0x1d6   : > { %3024 = vmatpush1.bf16.msra.mxu0 %v9885_v38  ;;  %3065 = vmatpush1.bf16.msra.mxu1 %v9887_v35  ;;  %v9938_v38 = vcombine.low %v3135_v18, %v3137_v19  ;;  %v3142_v35 = vunpack.c.l.s8.bf16 %v9906_v32  ;;  %v9965_v19 = vld [vmem:[%s11786_s16 + $0x590] sm:$0xff] }
 0x1d7   : > { %3387 = vmatprep.subr.bf16.mxu0 %v9917_v41  ;;  %3428 = vmatprep.subr.bf16.mxu1 %v9919_v42  ;;  %v9943_v41 = vcombine.high %v3139_v30, %v3141_v31  ;;  %v9908_v42 = vld [vmem:[%s11786_s16 + $0x550] sm:$0xff] }
 0x1d8   : > { %v3147_v50 = vunpack.c.h.s8.bf16 %v9908_v42  ;;  %v9944_v55 = vcombine.low %v3142_v35, %v3144_v36 }
 0x1d9   : > { %3036 = vmatmul.mubr.bf16.vlgmr.msra.gmra.mrb[0].mxu0 %v9843_v45  ;;  %3077 = vmatmul.mubr.bf16.vlgmr.msra.gmra.mrb[0].mxu1 %v9843_v45  ;;  %v9942_v45 = vcombine.low %v3139_v30, %v3141_v31  ;;  %v9968_v30 = vld [vmem:[%s11786_s16 + $0x5a8] sm:$0xff]  ;;  %v9914_v31 = vcombine.low %v12049_v47, %v12049_v47 }
 0x1da   : > { %3388 = vmatpush1.bf16.msra.mxu0 %v9916_v46  ;;  %3429 = vmatpush1.bf16.msra.mxu1 %v9918_v48  ;;  %v9945_v46 = vcombine.high %v3142_v35, %v3144_v36  ;;  %v9947_v48 = vcombine.high %v3143_v37, %v3145_v39  ;;  %v9951_v61 = vcombine.high %v3147_v50, %v3149_v51  ;;  %v3508_v35 = vunpack.c.l.s8.bf16 %v9968_v30 }
 0x1db   : > { %3389 = vmatprep.subr.bf16.mxu0 %v9921_v52  ;;  %3430 = vmatprep.subr.bf16.mxu1 %v9923_v49  ;;  %v3146_v52 = vunpack.c.l.s8.bf16 %v9908_v42  ;;  %v3148_v49 = vunpack.c.l.s8.bf16 %v9909_v43  ;;  %v9950_v2 = vcombine.low %v3147_v50, %v3149_v51  ;;  %v3507_v36 = vunpack.c.h.s8.bf16 %v9967_v29  ;;  %v9970_v42 = vld [vmem:[%s11786_s16 + $0x5b8] sm:$0xff]  ;;  %v9971_v51 = vld [vmem:[%s11786_s16 + $0x5c0] sm:$0xff] }
 0x1dc   : > { %9960 = vmatprep.mubr.msk.bf16.mxu0 %vm772_vm0, %v9915_v62  ;;  %9961 = vmatprep.mubr.msk.bf16.mxu1 %vm772_vm0, %v9915_v62  ;;  %v3150_v62 = vunpack.c.l.s8.bf16 %v9910_v53  ;;  %v3509_v37 = vunpack.c.h.s8.bf16 %v9968_v30  ;;  %v3513_v50 = vunpack.c.h.s8.bf16 %v9970_v42 }
 0x1dd   : > { %v9949_v60 = vcombine.high %v3146_v52, %v3148_v49 }
 0x1de   : > { %3390 = vmatpush1.bf16.msra.mxu0 %v9920_v57  ;;  %3431 = vmatpush1.bf16.msra.mxu1 %v9922_v58  ;;  %v3152_v57 = vunpack.c.l.s8.bf16 %v9911_v54  ;;  %v3151_v58 = vunpack.c.h.s8.bf16 %v9910_v53  ;;  %v9972_v53 = vld [vmem:[%s11786_s16 + $0x5c8] sm:$0xff] }
 0x1df   : > { %3391 = vmatprep.subr.bf16.mxu0 %v9925_v63  ;;  %3432 = vmatprep.subr.bf16.mxu1 %v9927_v0  ;;  %v9913_v63 = vld [vmem:[%s11786_s16 + $0x578] sm:$0xff]  ;;  %v9948_v0 = vcombine.low %v3146_v52, %v3148_v49  ;;  %v3512_v52 = vunpack.c.l.s8.bf16 %v9970_v42 }
 0x1e0   : > { %v9953_v4 = vcombine.high %v3150_v62, %v3152_v57  ;;  %v3157_v8 = vunpack.c.h.s8.bf16 %v9913_v63  ;;  %v9952_v11 = vcombine.low %v3150_v62, %v3152_v57  ;;  %v9954_v13 = vcombine.low %v3151_v58, %v3153_v59 }
 0x1e1   : > { %v3516_v62 = vunpack.c.l.s8.bf16 %v9972_v53  ;;  %v3515_v57 = vunpack.c.h.s8.bf16 %v9971_v51 }
 0x1e2   : > { %3392 = vmatpush1.bf16.msra.mxu0 %v9924_v5  ;;  %3433 = vmatpush1.bf16.msra.mxu1 %v9926_v6  ;;  %v9955_v5 = vcombine.high %v3151_v58, %v3153_v59  ;;  %v3154_v6 = vunpack.c.l.s8.bf16 %v9912_v1  ;;  %v3517_v58 = vunpack.c.h.s8.bf16 %v9972_v53 }
 0x1e3   : > { %3393 = vmatprep.subr.bf16.mxu0 %v9929_v7  ;;  %3434 = vmatprep.subr.bf16.mxu1 %v9931_v12  ;;  %v3156_v7 = vunpack.c.l.s8.bf16 %v9913_v63  ;;  %v3155_v12 = vunpack.c.h.s8.bf16 %v9912_v1  ;;  %v9974_v1 = vld [vmem:[%s11786_s16 + $0x5d8] sm:$0xff] }
 0x1e5   : > { %v9957_v17 = vcombine.high %v3154_v6, %v3156_v7  ;;  %v9959_v18 = vcombine.high %v3155_v12, %v3157_v8  ;;  %v9958_v21 = vcombine.low %v3155_v12, %v3157_v8  ;;  %v3521_v12 = vunpack.c.h.s8.bf16 %v9974_v1  ;;  %v9975_v8 = vld [vmem:[%s11786_s16 + $0x5e0] sm:$0xff] }
 0x1e6   : > { %3394 = vmatpush1.bf16.msra.mxu0 %v9928_v3  ;;  %3435 = vmatpush1.bf16.msra.mxu1 %v9930_v15  ;;  %v3500_v3 = vunpack.c.l.s8.bf16 %v9964_v10  ;;  %v3499_v15 = vunpack.c.h.s8.bf16 %v9963_v9  ;;  %v9976_v9 = vld [vmem:[%s11786_s16 + $0x5e8] sm:$0xff] }
 0x1e7   : > { %3395 = vmatprep.subr.bf16.mxu0 %v9933_v20  ;;  %3436 = vmatprep.subr.bf16.mxu1 %v9935_v24  ;;  %v9966_v20 = vld [vmem:[%s11786_s16 + $0x598] sm:$0xff]  ;;  %v9956_v24 = vcombine.low %v3154_v6, %v3156_v7  ;;  %v3520_v6 = vunpack.c.l.s8.bf16 %v9974_v1 }
 0x1e8   : > { %v9988_v22 = vcombine.high %v3498_v14, %v3500_v3  ;;  %v3505_v28 = vunpack.c.h.s8.bf16 %v9966_v20  ;;  %v9987_v32 = vcombine.low %v3498_v14, %v3500_v3  ;;  %v9989_v33 = vcombine.low %v3499_v15, %v3501_v16 }
 0x1e9   : > { %v3524_v14 = vunpack.c.l.s8.bf16 %v9976_v9  ;;  %v3523_v3 = vunpack.c.h.s8.bf16 %v9975_v8 }
 0x1ea   : > { %3396 = vmatpush1.bf16.msra.mxu0 %v9932_v23  ;;  %3437 = vmatpush1.bf16.msra.mxu1 %v9934_v25  ;;  %v9990_v23 = vcombine.high %v3499_v15, %v3501_v16  ;;  %v3502_v25 = vunpack.c.l.s8.bf16 %v9965_v19  ;;  %v3525_v15 = vunpack.c.h.s8.bf16 %v9976_v9 }
 0x1eb   : > { %3397 = vmatprep.subr.bf16.mxu0 %v9937_v26  ;;  %3438 = vmatprep.subr.bf16.mxu1 %v9939_v27  ;;  %v3504_v26 = vunpack.c.l.s8.bf16 %v9966_v20  ;;  %v3503_v27 = vunpack.c.h.s8.bf16 %v9965_v19  ;;  %v9978_v19 = vld [vmem:[%s11786_s16 + $0x5f8] sm:$0xff] }
 0x1ed   : > { %v9992_v39 = vcombine.high %v3502_v25, %v3504_v26  ;;  %v9991_v43 = vcombine.low %v3502_v25, %v3504_v26  ;;  %v3528_v25 = vunpack.c.l.s8.bf16 %v9978_v19 }
 0x1ee   : > { %3398 = vmatpush1.bf16.msra.mxu0 %v9936_v34  ;;  %3439 = vmatpush1.bf16.msra.mxu1 %v9938_v38  ;;  %v12082_v34 = vld [vmem:[%s12591_s0 + $0x40] sm:$0xff]  ;;  %v3506_v38 = vunpack.c.l.s8.bf16 %v9967_v29  ;;  %v9980_v29 = vld [vmem:[%s11786_s16 + $0x608] sm:$0xff] }
 0x1ef   : > { %3399 = vmatprep.subr.bf16.mxu0 %v9941_v40  ;;  %3440 = vmatprep.subr.bf16.mxu1 %v9943_v41  ;;  %v9994_v40 = vcombine.high %v3503_v27, %v3505_v28  ;;  %v9969_v41 = vld [vmem:[%s11786_s16 + $0x5b0] sm:$0xff]  ;;  %v9986_v47 = vcombine.high %v12082_v34, %v12082_v34 }
 0x1f0   : > { %v3511_v49 = vunpack.c.h.s8.bf16 %v9969_v41  ;;  %v9995_v54 = vcombine.low %v3506_v38, %v3508_v35 }
 0x1f2   : > { %3400 = vmatpush1.bf16.msra.mxu0 %v9940_v44  ;;  %3441 = vmatpush1.bf16.msra.mxu1 %v9942_v45  ;;  %v9993_v44 = vcombine.low %v3503_v27, %v3505_v28  ;;  %v9996_v45 = vcombine.high %v3506_v38, %v3508_v35  ;;  %v3529_v27 = vunpack.c.h.s8.bf16 %v9978_v19  ;;  %v9979_v28 = vld [vmem:[%s11786_s16 + $0x600] sm:$0xff]  ;;  %v3533_v35 = vunpack.c.h.s8.bf16 %v9980_v29 }
 0x1f3   : > { %3401 = vmatprep.subr.bf16.mxu0 %v9945_v46  ;;  %3442 = vmatprep.subr.bf16.mxu1 %v9947_v48  ;;  %v9998_v46 = vcombine.high %v3507_v36, %v3509_v37  ;;  %v3510_v48 = vunpack.c.l.s8.bf16 %v9969_v41  ;;  %v3531_v38 = vunpack.c.h.s8.bf16 %v9979_v28  ;;  %v12115_v19 = vld [vmem:[%s12591_s0 + $0x48] sm:$0xff] }
 0x1f5   : > { %v10000_v59 = vcombine.high %v3510_v48, %v3512_v52  ;;  %v9999_v63 = vcombine.low %v3510_v48, %v3512_v52  ;;  %v9983_v52 = vld [vmem:[%s11786_s16 + $0x620] sm:$0xff] }
 0x1f6   : > { %3402 = vmatpush1.bf16.msra.mxu0 %v9944_v55  ;;  %3443 = vmatpush1.bf16.msra.mxu1 %v9946_v56  ;;  %v9997_v55 = vcombine.low %v3507_v36, %v3509_v37  ;;  %v3514_v56 = vunpack.c.l.s8.bf16 %v9971_v51  ;;  %v10021_v51 = vcombine.low %v3531_v38, %v3533_v35  ;;  %v3538_v53 = vunpack.c.l.s8.bf16 %v9983_v52 }
 0x1f7   : > { %3403 = vmatprep.subr.bf16.mxu0 %v9949_v60  ;;  %3444 = vmatprep.subr.bf16.mxu1 %v9951_v61  ;;  %v10002_v60 = vcombine.high %v3511_v49, %v3513_v50  ;;  %v9973_v61 = vld [vmem:[%s11786_s16 + $0x5d0] sm:$0xff] }
 0x1f8   : > { %v3519_v7 = vunpack.c.h.s8.bf16 %v9973_v61  ;;  %v10003_v10 = vcombine.low %v3514_v56, %v3516_v62 }
 0x1fa   : > { %3404 = vmatpush1.bf16.msra.mxu0 %v9948_v0  ;;  %3445 = vmatpush1.bf16.msra.mxu1 %v9950_v2  ;;  %v10001_v0 = vcombine.low %v3511_v49, %v3513_v50  ;;  %v10004_v2 = vcombine.high %v3514_v56, %v3516_v62  ;;  %v9984_v49 = vld [vmem:[%s11786_s16 + $0x628] sm:$0xff] }
 0x1fb   : > { %3405 = vmatprep.subr.bf16.mxu0 %v9953_v4  ;;  %3446 = vmatprep.subr.bf16.mxu1 %v9955_v5  ;;  %v10006_v4 = vcombine.high %v3515_v57, %v3517_v58  ;;  %v3518_v5 = vunpack.c.l.s8.bf16 %v9973_v61  ;;  %v3541_v56 = vunpack.c.h.s8.bf16 %v9984_v49 }
 0x1fd   : > { %v10008_v16 = vcombine.high %v3518_v5, %v3520_v6  ;;  %v10007_v20 = vcombine.low %v3518_v5, %v3520_v6  ;;  %v10036_v6 = vld [vmem:[%s11786_s16 + $0x640] sm:$0xff] }
 0x1fe   : > { %3406 = vmatpush1.bf16.msra.mxu0 %v9952_v11  ;;  %3447 = vmatpush1.bf16.msra.mxu1 %v9954_v13  ;;  %v10005_v11 = vcombine.low %v3515_v57, %v3517_v58  ;;  %v3522_v13 = vunpack.c.l.s8.bf16 %v9975_v8  ;;  %v10034_v58 = vld [vmem:[%s11786_s16 + $0x630] sm:$0xff]  ;;  %v3886_v9 = vunpack.c.l.s8.bf16 %v10036_v6 }
 0x1ff   : > { %3407 = vmatprep.subr.bf16.mxu0 %v9957_v17  ;;  %3448 = vmatprep.subr.bf16.mxu1 %v9959_v18  ;;  %v10010_v17 = vcombine.high %v3519_v7, %v3521_v12  ;;  %v9977_v18 = vld [vmem:[%s11786_s16 + $0x5f0] sm:$0xff] }
 0x200   : > { %v3527_v26 = vunpack.c.h.s8.bf16 %v9977_v18  ;;  %v10011_v30 = vcombine.low %v3522_v13, %v3524_v14 }
 0x202   : > { %3408 = vmatpush1.bf16.msra.mxu0 %v9956_v24  ;;  %3449 = vmatpush1.bf16.msra.mxu1 %v9958_v21  ;;  %v10009_v24 = vcombine.low %v3519_v7, %v3521_v12  ;;  %v10012_v21 = vcombine.high %v3522_v13, %v3524_v14  ;;  %v10018_v37 = vcombine.high %v3527_v26, %v3529_v27  ;;  %v10037_v7 = vld [vmem:[%s11786_s16 + $0x648] sm:$0xff] }
 0x203   : > { %3771 = vmatprep.subr.bf16.mxu0 %v9988_v22  ;;  %3812 = vmatprep.subr.bf16.mxu1 %v9990_v23  ;;  %v10014_v22 = vcombine.high %v3523_v3, %v3525_v15  ;;  %v3526_v23 = vunpack.c.l.s8.bf16 %v9977_v18  ;;  %v10017_v42 = vcombine.low %v3527_v26, %v3529_v27  ;;  %v3889_v13 = vunpack.c.h.s8.bf16 %v10037_v7  ;;  %v10040_v27 = vld [vmem:[%s11786_s16 + $0x660] sm:$0xff] }
 0x205   : > { %3420 = vmatmul.mubr.bf16.vlgmr.msra.gmra.mrb[0].mxu0 %v9914_v31  ;;  %3461 = vmatmul.mubr.bf16.vlgmr.msra.gmra.mrb[0].mxu1 %v9914_v31  ;;  %v10013_v31 = vcombine.low %v3523_v3, %v3525_v15  ;;  %v10016_v36 = vcombine.high %v3526_v23, %v3528_v25  ;;  %v10015_v41 = vcombine.low %v3526_v23, %v3528_v25  ;;  %v10038_v15 = vld [vmem:[%s11786_s16 + $0x650] sm:$0xff] }
 0x206   : > { %3772 = vmatpush1.bf16.msra.mxu0 %v9987_v32  ;;  %3813 = vmatpush1.bf16.msra.mxu1 %v9989_v33  ;;  %v3530_v32 = vunpack.c.l.s8.bf16 %v9979_v28  ;;  %v3532_v33 = vunpack.c.l.s8.bf16 %v9980_v29  ;;  %v3891_v25 = vunpack.c.h.s8.bf16 %v10038_v15  ;;  %v10041_v28 = vld [vmem:[%s11786_s16 + $0x668] sm:$0xff] }
 0x207   : > { %3773 = vmatprep.subr.bf16.mxu0 %v9992_v39  ;;  %3814 = vmatprep.subr.bf16.mxu1 %v9994_v40  ;;  %v9981_v39 = vld [vmem:[%s11786_s16 + $0x610] sm:$0xff]  ;;  %v9982_v40 = vld [vmem:[%s11786_s16 + $0x618] sm:$0xff] }
 0x208   : > { %10031 = vmatprep.mubr.msk.bf16.mxu0 %vm772_vm0, %v9986_v47  ;;  %10032 = vmatprep.mubr.msk.bf16.mxu1 %vm772_vm0, %v9986_v47  ;;  %v10020_v47 = vcombine.high %v3530_v32, %v3532_v33  ;;  %v3537_v48 = vunpack.c.h.s8.bf16 %v9982_v40  ;;  %v10019_v50 = vcombine.low %v3530_v32, %v3532_v33  ;;  %v3896_v32 = vunpack.c.l.s8.bf16 %v10041_v28 }
 0x209   : > { %v3895_v33 = vunpack.c.h.s8.bf16 %v10040_v27 }
 0x20a   : > { %3774 = vmatpush1.bf16.msra.mxu0 %v9991_v43  ;;  %3815 = vmatpush1.bf16.msra.mxu1 %v9993_v44  ;;  %v10022_v43 = vcombine.high %v3531_v38, %v3533_v35  ;;  %v3534_v44 = vunpack.c.l.s8.bf16 %v9981_v39  ;;  %v3897_v38 = vunpack.c.h.s8.bf16 %v10041_v28 }
 0x20b   : > { %3775 = vmatprep.subr.bf16.mxu0 %v9996_v45  ;;  %3816 = vmatprep.subr.bf16.mxu1 %v9998_v46  ;;  %v3536_v45 = vunpack.c.l.s8.bf16 %v9982_v40  ;;  %v3535_v46 = vunpack.c.h.s8.bf16 %v9981_v39  ;;  %v10043_v39 = vld [vmem:[%s11786_s16 + $0x678] sm:$0xff] }
 0x20d   : > { %v10024_v62 = vcombine.high %v3534_v44, %v3536_v45  ;;  %v10026_v57 = vcombine.high %v3535_v46, %v3537_v48  ;;  %v10025_v61 = vcombine.low %v3535_v46, %v3537_v48  ;;  %v3901_v46 = vunpack.c.h.s8.bf16 %v10043_v39  ;;  %v10044_v48 = vld [vmem:[%s11786_s16 + $0x680] sm:$0xff] }
 0x20e   : > { %3776 = vmatpush1.bf16.msra.mxu0 %v9995_v54  ;;  %3817 = vmatpush1.bf16.msra.mxu1 %v9997_v55  ;;  %v3540_v54 = vunpack.c.l.s8.bf16 %v9984_v49  ;;  %v3539_v55 = vunpack.c.h.s8.bf16 %v9983_v52  ;;  %v10045_v52 = vld [vmem:[%s11786_s16 + $0x688] sm:$0xff] }
 0x20f   : > { %3777 = vmatprep.subr.bf16.mxu0 %v10000_v59  ;;  %3818 = vmatprep.subr.bf16.mxu1 %v10002_v60  ;;  %v10035_v59 = vld [vmem:[%s11786_s16 + $0x638] sm:$0xff]  ;;  %v10023_v60 = vcombine.low %v3534_v44, %v3536_v45  ;;  %v3900_v44 = vunpack.c.l.s8.bf16 %v10043_v39 }
 0x210   : > { %v10028_v1 = vcombine.high %v3538_v53, %v3540_v54  ;;  %v3885_v5 = vunpack.c.h.s8.bf16 %v10035_v59  ;;  %v10027_v12 = vcombine.low %v3538_v53, %v3540_v54  ;;  %v10029_v8 = vcombine.low %v3539_v55, %v3541_v56 }
 0x211   : > { %v3904_v53 = vunpack.c.l.s8.bf16 %v10045_v52  ;;  %v3903_v54 = vunpack.c.h.s8.bf16 %v10044_v48 }
 0x212   : > { %3778 = vmatpush1.bf16.msra.mxu0 %v9999_v63  ;;  %3819 = vmatpush1.bf16.msra.mxu1 %v10001_v0  ;;  %v10030_v63 = vcombine.high %v3539_v55, %v3541_v56  ;;  %v3882_v0 = vunpack.c.l.s8.bf16 %v10034_v58  ;;  %v3905_v55 = vunpack.c.h.s8.bf16 %v10045_v52 }
 0x213   : > { %3779 = vmatprep.subr.bf16.mxu0 %v10004_v2  ;;  %3820 = vmatprep.subr.bf16.mxu1 %v10006_v4  ;;  %v3884_v2 = vunpack.c.l.s8.bf16 %v10035_v59  ;;  %v3883_v4 = vunpack.c.h.s8.bf16 %v10034_v58  ;;  %v10047_v58 = vld [vmem:[%s11786_s16 + $0x698] sm:$0xff] }
 0x215   : > { %v10059_v14 = vcombine.high %v3882_v0, %v3884_v2  ;;  %v10061_v3 = vcombine.high %v3883_v4, %v3885_v5  ;;  %v10058_v18 = vcombine.low %v3882_v0, %v3884_v2  ;;  %v3908_v0 = vunpack.c.l.s8.bf16 %v10047_v58 }
 0x216   : > { %3780 = vmatpush1.bf16.msra.mxu0 %v10003_v10  ;;  %3821 = vmatpush1.bf16.msra.mxu1 %v10005_v11  ;;  %v3888_v10 = vunpack.c.l.s8.bf16 %v10037_v7  ;;  %v3887_v11 = vunpack.c.h.s8.bf16 %v10036_v6  ;;  %v10049_v6 = vld [vmem:[%s11786_s16 + $0x6a8] sm:$0xff] }
 0x217   : > { %3781 = vmatprep.subr.bf16.mxu0 %v10008_v16  ;;  %3822 = vmatprep.subr.bf16.mxu1 %v10010_v17  ;;  %v10039_v16 = vld [vmem:[%s11786_s16 + $0x658] sm:$0xff]  ;;  %v9985_v17 = vcombine.low %v12082_v34, %v12082_v34  ;;  %v10057_v34 = vcombine.high %v12115_v19, %v12115_v19 }
 0x218   : > { %v3892_v23 = vunpack.c.l.s8.bf16 %v10039_v16  ;;  %v3893_v26 = vunpack.c.h.s8.bf16 %v10039_v16  ;;  %v10062_v29 = vcombine.low %v3886_v9, %v3888_v10 }
 0x21a   : > { %3782 = vmatpush1.bf16.msra.mxu0 %v10007_v20  ;;  %3823 = vmatpush1.bf16.msra.mxu1 %v10009_v24  ;;  %v10060_v20 = vcombine.low %v3883_v4, %v3885_v5  ;;  %v10063_v24 = vcombine.high %v3886_v9, %v3888_v10  ;;  %v3909_v4 = vunpack.c.h.s8.bf16 %v10047_v58  ;;  %v10048_v5 = vld [vmem:[%s11786_s16 + $0x6a0] sm:$0xff]  ;;  %v3912_v9 = vunpack.c.l.s8.bf16 %v10049_v6 }
 0x21b   : > { %3783 = vmatprep.subr.bf16.mxu0 %v10012_v21  ;;  %3824 = vmatprep.subr.bf16.mxu1 %v10014_v22  ;;  %v10065_v21 = vcombine.high %v3887_v11, %v3889_v13  ;;  %v3890_v22 = vunpack.c.l.s8.bf16 %v10038_v15  ;;  %v3911_v10 = vunpack.c.h.s8.bf16 %v10048_v5  ;;  %v10051_v15 = vld [vmem:[%s11786_s16 + $0x6b8] sm:$0xff] }
 0x21d   : > { %v10067_v35 = vcombine.high %v3890_v22, %v3892_v23  ;;  %v10066_v40 = vcombine.low %v3890_v22, %v3892_v23  ;;  %v3917_v23 = vunpack.c.h.s8.bf16 %v10051_v15 }
 0x21e   : > { %3784 = vmatpush1.bf16.msra.mxu0 %v10011_v30  ;;  %3825 = vmatpush1.bf16.msra.mxu1 %v10013_v31  ;;  %v10064_v30 = vcombine.low %v3887_v11, %v3889_v13  ;;  %v3894_v31 = vunpack.c.l.s8.bf16 %v10040_v27  ;;  %v3913_v11 = vunpack.c.h.s8.bf16 %v10049_v6 }
 0x21f   : > { %3785 = vmatprep.subr.bf16.mxu0 %v10016_v36  ;;  %3826 = vmatprep.subr.bf16.mxu1 %v10018_v37  ;;  %v10069_v36 = vcombine.high %v3891_v25, %v3893_v26  ;;  %v10042_v37 = vld [vmem:[%s11786_s16 + $0x670] sm:$0xff] }
 0x220   : > { %v3899_v45 = vunpack.c.h.s8.bf16 %v10042_v37  ;;  %v10070_v49 = vcombine.low %v3894_v31, %v3896_v32  ;;  %v10088_v28 = vcombine.low %v3911_v10, %v3913_v11 }
 0x222   : > { %3786 = vmatpush1.bf16.msra.mxu0 %v10015_v41  ;;  %3827 = vmatpush1.bf16.msra.mxu1 %v10017_v42  ;;  %v10068_v41 = vcombine.low %v3891_v25, %v3893_v26  ;;  %v10071_v42 = vcombine.high %v3894_v31, %v3896_v32  ;;  %v10052_v25 = vld [vmem:[%s11786_s16 + $0x6c0] sm:$0xff]  ;;  %v10053_v26 = vld [vmem:[%s11786_s16 + $0x6c8] sm:$0xff] }
 0x223   : > { %3787 = vmatprep.subr.bf16.mxu0 %v10020_v47  ;;  %3828 = vmatprep.subr.bf16.mxu1 %v10022_v43  ;;  %v10073_v47 = vcombine.high %v3895_v33, %v3897_v38  ;;  %v3898_v43 = vunpack.c.l.s8.bf16 %v10042_v37  ;;  %v3921_v31 = vunpack.c.h.s8.bf16 %v10053_v26 }
 0x225   : > { %v10075_v56 = vcombine.high %v3898_v43, %v3900_v44  ;;  %v10074_v59 = vcombine.low %v3898_v43, %v3900_v44  ;;  %v10105_v44 = vld [vmem:[%s11786_s16 + $0x6e0] sm:$0xff] }
 0x226   : > { %3788 = vmatpush1.bf16.msra.mxu0 %v10019_v50  ;;  %3829 = vmatpush1.bf16.msra.mxu1 %v10021_v51  ;;  %v10072_v50 = vcombine.low %v3895_v33, %v3897_v38  ;;  %v3902_v51 = vunpack.c.l.s8.bf16 %v10044_v48  ;;  %v10054_v38 = vld [vmem:[%s11786_s16 + $0x6d0] sm:$0xff]  ;;  %v4266_v52 = vunpack.c.l.s8.bf16 %v10105_v44 }
 0x227   : > { %3789 = vmatprep.subr.bf16.mxu0 %v10024_v62  ;;  %3830 = vmatprep.subr.bf16.mxu1 %v10026_v57  ;;  %v10077_v62 = vcombine.high %v3899_v45, %v3901_v46  ;;  %v10046_v57 = vld [vmem:[%s11786_s16 + $0x690] sm:$0xff] }
 0x228   : > { %v3907_v2 = vunpack.c.h.s8.bf16 %v10046_v57  ;;  %v10078_v7 = vcombine.low %v3902_v51, %v3904_v53 }
 0x22a   : > { %3790 = vmatpush1.bf16.msra.mxu0 %v10023_v60  ;;  %3831 = vmatpush1.bf16.msra.mxu1 %v10025_v61  ;;  %v10076_v60 = vcombine.low %v3899_v45, %v3901_v46  ;;  %v10079_v61 = vcombine.high %v3902_v51, %v3904_v53  ;;  %v10106_v45 = vld [vmem:[%s11786_s16 + $0x6e8] sm:$0xff] }
 0x22b   : > { %3791 = vmatprep.subr.bf16.mxu0 %v10028_v1  ;;  %3832 = vmatprep.subr.bf16.mxu1 %v10030_v63  ;;  %v10081_v1 = vcombine.high %v3903_v54, %v3905_v55  ;;  %v3906_v63 = vunpack.c.l.s8.bf16 %v10046_v57  ;;  %v4269_v51 = vunpack.c.h.s8.bf16 %v10106_v45 }
 0x22d   : > { %v10083_v13 = vcombine.high %v3906_v63, %v3908_v0  ;;  %v10082_v16 = vcombine.low %v3906_v63, %v3908_v0  ;;  %v10109_v0 = vld [vmem:[%s11786_s16 + $0x700] sm:$0xff] }
 0x22e   : > { %3792 = vmatpush1.bf16.msra.mxu0 %v10027_v12  ;;  %3833 = vmatpush1.bf16.msra.mxu1 %v10029_v8  ;;  %v10080_v12 = vcombine.low %v3903_v54, %v3905_v55  ;;  %v3910_v8 = vunpack.c.l.s8.bf16 %v10048_v5  ;;  %v10107_v55 = vld [vmem:[%s11786_s16 + $0x6f0] sm:$0xff] }
 0x22f   : > { %4155 = vmatprep.subr.bf16.mxu0 %v10059_v14  ;;  %4196 = vmatprep.subr.bf16.mxu1 %v10061_v3  ;;  %v10085_v14 = vcombine.high %v3907_v2, %v3909_v4  ;;  %v10050_v3 = vld [vmem:[%s11786_s16 + $0x6b0] sm:$0xff] }
 0x230   : > { %v3915_v22 = vunpack.c.h.s8.bf16 %v10050_v3  ;;  %v10086_v27 = vcombine.low %v3910_v8, %v3912_v9 }
 0x231   : > { %3804 = vmatmul.mubr.bf16.vlgmr.msra.gmra.mrb[0].mxu0 %v9985_v17  ;;  %3845 = vmatmul.mubr.bf16.vlgmr.msra.gmra.mrb[0].mxu1 %v9985_v17  ;;  %v10084_v17 = vcombine.low %v3907_v2, %v3909_v4  ;;  %v10110_v2 = vld [vmem:[%s11786_s16 + $0x708] sm:$0xff]  ;;  %v10056_v4 = vcombine.low %v12115_v19, %v12115_v19 }
 0x232   : > { %4156 = vmatpush1.bf16.msra.mxu0 %v10058_v18  ;;  %4197 = vmatpush1.bf16.msra.mxu1 %v10060_v20  ;;  %v10087_v18 = vcombine.high %v3910_v8, %v3912_v9  ;;  %v10089_v20 = vcombine.high %v3911_v10, %v3913_v11  ;;  %v10093_v33 = vcombine.high %v3915_v22, %v3917_v23  ;;  %v4276_v8 = vunpack.c.l.s8.bf16 %v10110_v2 }
 0x233   : > { %4157 = vmatprep.subr.bf16.mxu0 %v10063_v24  ;;  %4198 = vmatprep.subr.bf16.mxu1 %v10065_v21  ;;  %v3914_v24 = vunpack.c.l.s8.bf16 %v10050_v3  ;;  %v3916_v21 = vunpack.c.l.s8.bf16 %v10051_v15  ;;  %v10092_v37 = vcombine.low %v3915_v22, %v3917_v23  ;;  %v4275_v9 = vunpack.c.h.s8.bf16 %v10109_v0  ;;  %v10112_v3 = vld [vmem:[%s11786_s16 + $0x718] sm:$0xff]  ;;  %v10113_v23 = vld [vmem:[%s11786_s16 + $0x720] sm:$0xff] }
 0x234   : > { %10102 = vmatprep.mubr.msk.bf16.mxu0 %vm772_vm0, %v10057_v34  ;;  %10103 = vmatprep.mubr.msk.bf16.mxu1 %vm772_vm0, %v10057_v34  ;;  %v3918_v34 = vunpack.c.l.s8.bf16 %v10052_v25  ;;  %v4277_v10 = vunpack.c.h.s8.bf16 %v10110_v2  ;;  %v4281_v22 = vunpack.c.h.s8.bf16 %v10112_v3 }
 0x235   : > { %v10091_v32 = vcombine.high %v3914_v24, %v3916_v21 }
 0x236   : > { %4158 = vmatpush1.bf16.msra.mxu0 %v10062_v29  ;;  %4199 = vmatpush1.bf16.msra.mxu1 %v10064_v30  ;;  %v3920_v29 = vunpack.c.l.s8.bf16 %v10053_v26  ;;  %v3919_v30 = vunpack.c.h.s8.bf16 %v10052_v25  ;;  %v10114_v25 = vld [vmem:[%s11786_s16 + $0x728] sm:$0xff] }
 0x237   : > { %4159 = vmatprep.subr.bf16.mxu0 %v10067_v35  ;;  %4200 = vmatprep.subr.bf16.mxu1 %v10069_v36  ;;  %v10055_v35 = vld [vmem:[%s11786_s16 + $0x6d8] sm:$0xff]  ;;  %v10090_v36 = vcombine.low %v3914_v24, %v3916_v21  ;;  %v4280_v24 = vunpack.c.l.s8.bf16 %v10112_v3 }
 0x238   : > { %v10095_v39 = vcombine.high %v3918_v34, %v3920_v29  ;;  %v3925_v43 = vunpack.c.h.s8.bf16 %v10055_v35  ;;  %v10094_v46 = vcombine.low %v3918_v34, %v3920_v29  ;;  %v10096_v48 = vcombine.low %v3919_v30, %v3921_v31 }
 0x239   : > { %v4284_v34 = vunpack.c.l.s8.bf16 %v10114_v25  ;;  %v4283_v29 = vunpack.c.h.s8.bf16 %v10113_v23 }
 0x23a   : > { %4160 = vmatpush1.bf16.msra.mxu0 %v10066_v40  ;;  %4201 = vmatpush1.bf16.msra.mxu1 %v10068_v41  ;;  %v10097_v40 = vcombine.high %v3919_v30, %v3921_v31  ;;  %v3922_v41 = vunpack.c.l.s8.bf16 %v10054_v38  ;;  %v4285_v30 = vunpack.c.h.s8.bf16 %v10114_v25 }
 0x23b   : > { %4161 = vmatprep.subr.bf16.mxu0 %v10071_v42  ;;  %4202 = vmatprep.subr.bf16.mxu1 %v10073_v47  ;;  %v3924_v42 = vunpack.c.l.s8.bf16 %v10055_v35  ;;  %v3923_v47 = vunpack.c.h.s8.bf16 %v10054_v38  ;;  %v10116_v38 = vld [vmem:[%s11786_s16 + $0x738] sm:$0xff] }
 0x23d   : > { %v10099_v53 = vcombine.high %v3922_v41, %v3924_v42  ;;  %v10101_v54 = vcombine.high %v3923_v47, %v3925_v43  ;;  %v10100_v57 = vcombine.low %v3923_v47, %v3925_v43  ;;  %v4289_v47 = vunpack.c.h.s8.bf16 %v10116_v38  ;;  %v10117_v43 = vld [vmem:[%s11786_s16 + $0x740] sm:$0xff] }
 0x23e   : > { %4162 = vmatpush1.bf16.msra.mxu0 %v10070_v49  ;;  %4203 = vmatpush1.bf16.msra.mxu1 %v10072_v50  ;;  %v4268_v49 = vunpack.c.l.s8.bf16 %v10106_v45  ;;  %v4267_v50 = vunpack.c.h.s8.bf16 %v10105_v44  ;;  %v10118_v44 = vld [vmem:[%s11786_s16 + $0x748] sm:$0xff] }
 0x23f   : > { %4163 = vmatprep.subr.bf16.mxu0 %v10075_v56  ;;  %4204 = vmatprep.subr.bf16.mxu1 %v10077_v62  ;;  %v10108_v56 = vld [vmem:[%s11786_s16 + $0x6f8] sm:$0xff]  ;;  %v10098_v62 = vcombine.low %v3922_v41, %v3924_v42  ;;  %v4288_v41 = vunpack.c.l.s8.bf16 %v10116_v38 }
 0x240   : > { %v10130_v58 = vcombine.high %v4266_v52, %v4268_v49  ;;  %v4273_v63 = vunpack.c.h.s8.bf16 %v10108_v56  ;;  %v10129_v5 = vcombine.low %v4266_v52, %v4268_v49  ;;  %v10131_v6 = vcombine.low %v4267_v50, %v4269_v51 }
 0x241   : > { %v4292_v52 = vunpack.c.l.s8.bf16 %v10118_v44  ;;  %v4291_v49 = vunpack.c.h.s8.bf16 %v10117_v43 }
 0x242   : > { %4164 = vmatpush1.bf16.msra.mxu0 %v10074_v59  ;;  %4205 = vmatpush1.bf16.msra.mxu1 %v10076_v60  ;;  %v10132_v59 = vcombine.high %v4267_v50, %v4269_v51  ;;  %v4270_v60 = vunpack.c.l.s8.bf16 %v10107_v55  ;;  %v4293_v50 = vunpack.c.h.s8.bf16 %v10118_v44 }
 0x243   : > { %4165 = vmatprep.subr.bf16.mxu0 %v10079_v61  ;;  %4206 = vmatprep.subr.bf16.mxu1 %v10081_v1  ;;  %v4272_v61 = vunpack.c.l.s8.bf16 %v10108_v56  ;;  %v4271_v1 = vunpack.c.h.s8.bf16 %v10107_v55  ;;  %v10120_v55 = vld [vmem:[%s11786_s16 + $0x758] sm:$0xff] }
 0x245   : > { %v10134_v11 = vcombine.high %v4270_v60, %v4272_v61  ;;  %v10133_v15 = vcombine.low %v4270_v60, %v4272_v61  ;;  %v4296_v60 = vunpack.c.l.s8.bf16 %v10120_v55 }
 0x246   : > { %4166 = vmatpush1.bf16.msra.mxu0 %v10078_v7  ;;  %4207 = vmatpush1.bf16.msra.mxu1 %v10080_v12  ;;  %v12148_v7 = vld [vmem:[%s12591_s0 + $0x50] sm:$0xff]  ;;  %v4274_v12 = vunpack.c.l.s8.bf16 %v10109_v0 }
 0x247   : > { %4167 = vmatprep.subr.bf16.mxu0 %v10083_v13  ;;  %4208 = vmatprep.subr.bf16.mxu1 %v10085_v14  ;;  %v10136_v13 = vcombine.high %v4271_v1, %v4273_v63  ;;  %v10111_v14 = vld [vmem:[%s11786_s16 + $0x710] sm:$0xff]  ;;  %v10128_v19 = vcombine.high %v12148_v7, %v12148_v7  ;;  %v10122_v0 = vld [vmem:[%s11786_s16 + $0x768] sm:$0xff] }
 0x248   : > { %v4279_v21 = vunpack.c.h.s8.bf16 %v10111_v14  ;;  %v10137_v26 = vcombine.low %v4274_v12, %v4276_v8 }
 0x24a   : > { %4168 = vmatpush1.bf16.msra.mxu0 %v10082_v16  ;;  %4209 = vmatpush1.bf16.msra.mxu1 %v10084_v17  ;;  %v10135_v16 = vcombine.low %v4271_v1, %v4273_v63  ;;  %v10138_v17 = vcombine.high %v4274_v12, %v4276_v8  ;;  %v4297_v1 = vunpack.c.h.s8.bf16 %v10120_v55  ;;  %v10121_v63 = vld [vmem:[%s11786_s16 + $0x760] sm:$0xff]  ;;  %v4301_v8 = vunpack.c.h.s8.bf16 %v10122_v0  ;;  %v12181_v55 = vld [vmem:[%s12591_s0 + $0x58] sm:$0xff] }
 0x24b   : > { %4169 = vmatprep.subr.bf16.mxu0 %v10087_v18  ;;  %4210 = vmatprep.subr.bf16.mxu1 %v10089_v20  ;;  %v10140_v18 = vcombine.high %v4275_v9, %v4277_v10  ;;  %v4278_v20 = vunpack.c.l.s8.bf16 %v10111_v14  ;;  %v4299_v12 = vunpack.c.h.s8.bf16 %v10121_v63 }
 0x24d   : > { %v10142_v31 = vcombine.high %v4278_v20, %v4280_v24  ;;  %v10141_v35 = vcombine.low %v4278_v20, %v4280_v24  ;;  %v10125_v24 = vld [vmem:[%s11786_s16 + $0x780] sm:$0xff] }
 0x24e   : > { %4170 = vmatpush1.bf16.msra.mxu0 %v10086_v27  ;;  %4211 = vmatpush1.bf16.msra.mxu1 %v10088_v28  ;;  %v10139_v27 = vcombine.low %v4275_v9, %v4277_v10  ;;  %v4282_v28 = vunpack.c.l.s8.bf16 %v10113_v23  ;;  %v10163_v23 = vcombine.low %v4299_v12, %v4301_v8  ;;  %v4306_v25 = vunpack.c.l.s8.bf16 %v10125_v24 }
 0x24f   : > { %4171 = vmatprep.subr.bf16.mxu0 %v10091_v32  ;;  %4212 = vmatprep.subr.bf16.mxu1 %v10093_v33  ;;  %v10144_v32 = vcombine.high %v4279_v21, %v4281_v22  ;;  %v10115_v33 = vld [vmem:[%s11786_s16 + $0x730] sm:$0xff] }
 0x250   : > { %v4287_v42 = vunpack.c.h.s8.bf16 %v10115_v33  ;;  %v10145_v45 = vcombine.low %v4282_v28, %v4284_v34 }
 0x252   : > { %4172 = vmatpush1.bf16.msra.mxu0 %v10090_v36  ;;  %4213 = vmatpush1.bf16.msra.mxu1 %v10092_v37  ;;  %v10143_v36 = vcombine.low %v4279_v21, %v4281_v22  ;;  %v10146_v37 = vcombine.high %v4282_v28, %v4284_v34  ;;  %v10126_v21 = vld [vmem:[%s11786_s16 + $0x788] sm:$0xff] }
 0x253   : > { %4173 = vmatprep.subr.bf16.mxu0 %v10095_v39  ;;  %4214 = vmatprep.subr.bf16.mxu1 %v10097_v40  ;;  %v10148_v39 = vcombine.high %v4283_v29, %v4285_v30  ;;  %v4286_v40 = vunpack.c.l.s8.bf16 %v10115_v33  ;;  %v4309_v28 = vunpack.c.h.s8.bf16 %v10126_v21 }
 0x255   : > { %v10150_v51 = vcombine.high %v4286_v40, %v4288_v41  ;;  %v10149_v56 = vcombine.low %v4286_v40, %v4288_v41  ;;  %v10178_v41 = vld [vmem:[%s11786_s16 + $0x7a0] sm:$0xff] }
 0x256   : > { %4174 = vmatpush1.bf16.msra.mxu0 %v10094_v46  ;;  %4215 = vmatpush1.bf16.msra.mxu1 %v10096_v48  ;;  %v10147_v46 = vcombine.low %v4283_v29, %v4285_v30  ;;  %v4290_v48 = vunpack.c.l.s8.bf16 %v10117_v43  ;;  %v10176_v30 = vld [vmem:[%s11786_s16 + $0x790] sm:$0xff]  ;;  %v4654_v44 = vunpack.c.l.s8.bf16 %v10178_v41 }
 0x257   : > { %4175 = vmatprep.subr.bf16.mxu0 %v10099_v53  ;;  %4216 = vmatprep.subr.bf16.mxu1 %v10101_v54  ;;  %v10152_v53 = vcombine.high %v4287_v42, %v4289_v47  ;;  %v10119_v54 = vld [vmem:[%s11786_s16 + $0x750] sm:$0xff] }
 0x258   : > { %v4295_v61 = vunpack.c.h.s8.bf16 %v10119_v54  ;;  %v10153_v2 = vcombine.low %v4290_v48, %v4292_v52 }
 0x25a   : > { %4176 = vmatpush1.bf16.msra.mxu0 %v10098_v62  ;;  %4217 = vmatpush1.bf16.msra.mxu1 %v10100_v57  ;;  %v10151_v62 = vcombine.low %v4287_v42, %v4289_v47  ;;  %v10154_v57 = vcombine.high %v4290_v48, %v4292_v52  ;;  %v10160_v10 = vcombine.high %v4295_v61, %v4297_v1  ;;  %v10179_v42 = vld [vmem:[%s11786_s16 + $0x7a8] sm:$0xff] }
 0x25b   : > { %4539 = vmatprep.subr.bf16.mxu0 %v10130_v58  ;;  %4580 = vmatprep.subr.bf16.mxu1 %v10132_v59  ;;  %v10156_v58 = vcombine.high %v4291_v49, %v4293_v50  ;;  %v4294_v59 = vunpack.c.l.s8.bf16 %v10119_v54  ;;  %v10159_v3 = vcombine.low %v4295_v61, %v4297_v1  ;;  %v4657_v48 = vunpack.c.h.s8.bf16 %v10179_v42  ;;  %v10182_v1 = vld [vmem:[%s11786_s16 + $0x7c0] sm:$0xff] }
 0x25d   : > { %4188 = vmatmul.mubr.bf16.vlgmr.msra.gmra.mrb[0].mxu0 %v10056_v4  ;;  %4229 = vmatmul.mubr.bf16.vlgmr.msra.gmra.mrb[0].mxu1 %v10056_v4  ;;  %v10155_v4 = vcombine.low %v4291_v49, %v4293_v50  ;;  %v10158_v9 = vcombine.high %v4294_v59, %v4296_v60  ;;  %v10157_v14 = vcombine.low %v4294_v59, %v4296_v60  ;;  %v10180_v50 = vld [vmem:[%s11786_s16 + $0x7b0] sm:$0xff] }
 0x25e   : > { %4540 = vmatpush1.bf16.msra.mxu0 %v10129_v5  ;;  %4581 = vmatpush1.bf16.msra.mxu1 %v10131_v6  ;;  %v4298_v5 = vunpack.c.l.s8.bf16 %v10121_v63  ;;  %v4300_v6 = vunpack.c.l.s8.bf16 %v10122_v0  ;;  %v4659_v60 = vunpack.c.h.s8.bf16 %v10180_v50  ;;  %v10183_v63 = vld [vmem:[%s11786_s16 + $0x7c8] sm:$0xff] }
 0x25f   : > { %4541 = vmatprep.subr.bf16.mxu0 %v10134_v11  ;;  %4582 = vmatprep.subr.bf16.mxu1 %v10136_v13  ;;  %v10123_v11 = vld [vmem:[%s11786_s16 + $0x770] sm:$0xff]  ;;  %v10124_v13 = vld [vmem:[%s11786_s16 + $0x778] sm:$0xff] }
 0x260   : > { %10173 = vmatprep.mubr.msk.bf16.mxu0 %vm772_vm0, %v10128_v19  ;;  %10174 = vmatprep.mubr.msk.bf16.mxu1 %vm772_vm0, %v10128_v19  ;;  %v10162_v19 = vcombine.high %v4298_v5, %v4300_v6  ;;  %v4305_v20 = vunpack.c.h.s8.bf16 %v10124_v13  ;;  %v10161_v22 = vcombine.low %v4298_v5, %v4300_v6  ;;  %v4664_v5 = vunpack.c.l.s8.bf16 %v10183_v63 }
 0x261   : > { %v4663_v6 = vunpack.c.h.s8.bf16 %v10182_v1 }
 0x262   : > { %4542 = vmatpush1.bf16.msra.mxu0 %v10133_v15  ;;  %4583 = vmatpush1.bf16.msra.mxu1 %v10135_v16  ;;  %v10164_v15 = vcombine.high %v4299_v12, %v4301_v8  ;;  %v4302_v16 = vunpack.c.l.s8.bf16 %v10123_v11  ;;  %v4665_v12 = vunpack.c.h.s8.bf16 %v10183_v63 }
 0x263   : > { %4543 = vmatprep.subr.bf16.mxu0 %v10138_v17  ;;  %4584 = vmatprep.subr.bf16.mxu1 %v10140_v18  ;;  %v4304_v17 = vunpack.c.l.s8.bf16 %v10124_v13  ;;  %v4303_v18 = vunpack.c.h.s8.bf16 %v10123_v11  ;;  %v10185_v11 = vld [vmem:[%s11786_s16 + $0x7d8] sm:$0xff] }
 0x265   : > { %v10166_v34 = vcombine.high %v4302_v16, %v4304_v17  ;;  %v10168_v29 = vcombine.high %v4303_v18, %v4305_v20  ;;  %v10167_v33 = vcombine.low %v4303_v18, %v4305_v20  ;;  %v4669_v18 = vunpack.c.h.s8.bf16 %v10185_v11  ;;  %v10186_v20 = vld [vmem:[%s11786_s16 + $0x7e0] sm:$0xff] }
 0x266   : > { %4544 = vmatpush1.bf16.msra.mxu0 %v10137_v26  ;;  %4585 = vmatpush1.bf16.msra.mxu1 %v10139_v27  ;;  %v4308_v26 = vunpack.c.l.s8.bf16 %v10126_v21  ;;  %v4307_v27 = vunpack.c.h.s8.bf16 %v10125_v24  ;;  %v10187_v24 = vld [vmem:[%s11786_s16 + $0x7e8] sm:$0xff] }
 0x267   : > { %4545 = vmatprep.subr.bf16.mxu0 %v10142_v31  ;;  %4586 = vmatprep.subr.bf16.mxu1 %v10144_v32  ;;  %v10177_v31 = vld [vmem:[%s11786_s16 + $0x798] sm:$0xff]  ;;  %v10165_v32 = vcombine.low %v4302_v16, %v4304_v17  ;;  %v4668_v16 = vunpack.c.l.s8.bf16 %v10185_v11 }
 0x268   : > { %v10170_v38 = vcombine.high %v4306_v25, %v4308_v26  ;;  %v4653_v40 = vunpack.c.h.s8.bf16 %v10177_v31  ;;  %v10169_v47 = vcombine.low %v4306_v25, %v4308_v26  ;;  %v10171_v43 = vcombine.low %v4307_v27, %v4309_v28 }
 0x269   : > { %v4672_v25 = vunpack.c.l.s8.bf16 %v10187_v24  ;;  %v4671_v26 = vunpack.c.h.s8.bf16 %v10186_v20 }
 0x26a   : > { %4546 = vmatpush1.bf16.msra.mxu0 %v10141_v35  ;;  %4587 = vmatpush1.bf16.msra.mxu1 %v10143_v36  ;;  %v10172_v35 = vcombine.high %v4307_v27, %v4309_v28  ;;  %v4650_v36 = vunpack.c.l.s8.bf16 %v10176_v30  ;;  %v4673_v27 = vunpack.c.h.s8.bf16 %v10187_v24 }
 0x26b   : > { %4547 = vmatprep.subr.bf16.mxu0 %v10146_v37  ;;  %4588 = vmatprep.subr.bf16.mxu1 %v10148_v39  ;;  %v4652_v37 = vunpack.c.l.s8.bf16 %v10177_v31  ;;  %v4651_v39 = vunpack.c.h.s8.bf16 %v10176_v30  ;;  %v10189_v30 = vld [vmem:[%s11786_s16 + $0x7f8] sm:$0xff] }
 0x26d   : > { %v10201_v52 = vcombine.high %v4650_v36, %v4652_v37  ;;  %v10203_v49 = vcombine.high %v4651_v39, %v4653_v40  ;;  %v10200_v54 = vcombine.low %v4650_v36, %v4652_v37  ;;  %v4676_v36 = vunpack.c.l.s8.bf16 %v10189_v30 }
 0x26e   : > { %4548 = vmatpush1.bf16.msra.mxu0 %v10145_v45  ;;  %4589 = vmatpush1.bf16.msra.mxu1 %v10147_v46  ;;  %v4656_v45 = vunpack.c.l.s8.bf16 %v10179_v42  ;;  %v4655_v46 = vunpack.c.h.s8.bf16 %v10178_v41  ;;  %v10191_v41 = vld [vmem:[%s11786_s16 + $0x808] sm:$0xff] }
 0x26f   : > { %4549 = vmatprep.subr.bf16.mxu0 %v10150_v51  ;;  %4590 = vmatprep.subr.bf16.mxu1 %v10152_v53  ;;  %v10181_v51 = vld [vmem:[%s11786_s16 + $0x7b8] sm:$0xff]  ;;  %v10127_v53 = vcombine.low %v12148_v7, %v12148_v7  ;;  %v10199_v7 = vcombine.high %v12181_v55, %v12181_v55 }
 0x270   : > { %v4660_v59 = vunpack.c.l.s8.bf16 %v10181_v51  ;;  %v4661_v61 = vunpack.c.h.s8.bf16 %v10181_v51  ;;  %v10204_v0 = vcombine.low %v4654_v44, %v4656_v45 }
 0x272   : > { %4550 = vmatpush1.bf16.msra.mxu0 %v10149_v56  ;;  %4591 = vmatpush1.bf16.msra.mxu1 %v10151_v62  ;;  %v10202_v56 = vcombine.low %v4651_v39, %v4653_v40  ;;  %v10205_v62 = vcombine.high %v4654_v44, %v4656_v45  ;;  %v4677_v39 = vunpack.c.h.s8.bf16 %v10189_v30  ;;  %v10190_v40 = vld [vmem:[%s11786_s16 + $0x800] sm:$0xff]  ;;  %v4680_v44 = vunpack.c.l.s8.bf16 %v10191_v41 }
 0x273   : > { %4551 = vmatprep.subr.bf16.mxu0 %v10154_v57  ;;  %4592 = vmatprep.subr.bf16.mxu1 %v10156_v58  ;;  %v10207_v57 = vcombine.high %v4655_v46, %v4657_v48  ;;  %v4658_v58 = vunpack.c.l.s8.bf16 %v10180_v50  ;;  %v4679_v45 = vunpack.c.h.s8.bf16 %v10190_v40  ;;  %v10193_v50 = vld [vmem:[%s11786_s16 + $0x818] sm:$0xff] }
 0x275   : > { %v10209_v8 = vcombine.high %v4658_v58, %v4660_v59  ;;  %v10208_v13 = vcombine.low %v4658_v58, %v4660_v59  ;;  %v4685_v59 = vunpack.c.h.s8.bf16 %v10193_v50 }
 0x276   : > { %4552 = vmatpush1.bf16.msra.mxu0 %v10153_v2  ;;  %4593 = vmatpush1.bf16.msra.mxu1 %v10155_v4  ;;  %v10206_v2 = vcombine.low %v4655_v46, %v4657_v48  ;;  %v4662_v4 = vunpack.c.l.s8.bf16 %v10182_v1  ;;  %v4681_v46 = vunpack.c.h.s8.bf16 %v10191_v41 }
 0x277   : > { %4553 = vmatprep.subr.bf16.mxu0 %v10158_v9  ;;  %4594 = vmatprep.subr.bf16.mxu1 %v10160_v10  ;;  %v10211_v9 = vcombine.high %v4659_v60, %v4661_v61  ;;  %v10184_v10 = vld [vmem:[%s11786_s16 + $0x7d0] sm:$0xff] }
 0x278   : > { %v4667_v17 = vunpack.c.h.s8.bf16 %v10184_v10  ;;  %v10212_v21 = vcombine.low %v4662_v4, %v4664_v5  ;;  %v10230_v63 = vcombine.low %v4679_v45, %v4681_v46 }
 0x27a   : > { %4554 = vmatpush1.bf16.msra.mxu0 %v10157_v14  ;;  %4595 = vmatpush1.bf16.msra.mxu1 %v10159_v3  ;;  %v10210_v14 = vcombine.low %v4659_v60, %v4661_v61  ;;  %v10213_v3 = vcombine.high %v4662_v4, %v4664_v5  ;;  %v10194_v60 = vld [vmem:[%s11786_s16 + $0x820] sm:$0xff]  ;;  %v10195_v61 = vld [vmem:[%s11786_s16 + $0x828] sm:$0xff] }
 0x27b   : > { %4555 = vmatprep.subr.bf16.mxu0 %v10162_v19  ;;  %4596 = vmatprep.subr.bf16.mxu1 %v10164_v15  ;;  %v10215_v19 = vcombine.high %v4663_v6, %v4665_v12  ;;  %v4666_v15 = vunpack.c.l.s8.bf16 %v10184_v10  ;;  %v4689_v4 = vunpack.c.h.s8.bf16 %v10195_v61 }
 0x27d   : > { %v10217_v28 = vcombine.high %v4666_v15, %v4668_v16  ;;  %v10216_v31 = vcombine.low %v4666_v15, %v4668_v16  ;;  %v10247_v16 = vld [vmem:[%s11786_s16 + $0x840] sm:$0xff] }
 0x27e   : > { %4556 = vmatpush1.bf16.msra.mxu0 %v10161_v22  ;;  %4597 = vmatpush1.bf16.msra.mxu1 %v10163_v23  ;;  %v10214_v22 = vcombine.low %v4663_v6, %v4665_v12  ;;  %v4670_v23 = vunpack.c.l.s8.bf16 %v10186_v20  ;;  %v10196_v12 = vld [vmem:[%s11786_s16 + $0x830] sm:$0xff]  ;;  %v5034_v24 = vunpack.c.l.s8.bf16 %v10247_v16 }
 0x27f   : > { %4557 = vmatprep.subr.bf16.mxu0 %v10166_v34  ;;  %4598 = vmatprep.subr.bf16.mxu1 %v10168_v29  ;;  %v10219_v34 = vcombine.high %v4667_v17, %v4669_v18  ;;  %v10188_v29 = vld [vmem:[%s11786_s16 + $0x7f0] sm:$0xff] }
 0x280   : > { %v4675_v37 = vunpack.c.h.s8.bf16 %v10188_v29  ;;  %v10220_v42 = vcombine.low %v4670_v23, %v4672_v25 }
 0x282   : > { %4558 = vmatpush1.bf16.msra.mxu0 %v10165_v32  ;;  %4599 = vmatpush1.bf16.msra.mxu1 %v10167_v33  ;;  %v10218_v32 = vcombine.low %v4667_v17, %v4669_v18  ;;  %v10221_v33 = vcombine.high %v4670_v23, %v4672_v25  ;;  %v10248_v17 = vld [vmem:[%s11786_s16 + $0x848] sm:$0xff] }
 0x283   : > { %4559 = vmatprep.subr.bf16.mxu0 %v10170_v38  ;;  %4600 = vmatprep.subr.bf16.mxu1 %v10172_v35  ;;  %v10223_v38 = vcombine.high %v4671_v26, %v4673_v27  ;;  %v4674_v35 = vunpack.c.l.s8.bf16 %v10188_v29  ;;  %v5037_v23 = vunpack.c.h.s8.bf16 %v10248_v17 }
 0x285   : > { %v10225_v48 = vcombine.high %v4674_v35, %v4676_v36  ;;  %v10224_v51 = vcombine.low %v4674_v35, %v4676_v36  ;;  %v10251_v36 = vld [vmem:[%s11786_s16 + $0x860] sm:$0xff] }
 0x286   : > { %4560 = vmatpush1.bf16.msra.mxu0 %v10169_v47  ;;  %4601 = vmatpush1.bf16.msra.mxu1 %v10171_v43  ;;  %v10222_v47 = vcombine.low %v4671_v26, %v4673_v27  ;;  %v4678_v43 = vunpack.c.l.s8.bf16 %v10190_v40  ;;  %v10249_v27 = vld [vmem:[%s11786_s16 + $0x850] sm:$0xff] }
 0x287   : > { %4923 = vmatprep.subr.bf16.mxu0 %v10201_v52  ;;  %4964 = vmatprep.subr.bf16.mxu1 %v10203_v49  ;;  %v10227_v52 = vcombine.high %v4675_v37, %v4677_v39  ;;  %v10192_v49 = vld [vmem:[%s11786_s16 + $0x810] sm:$0xff] }
 0x288   : > { %v4683_v58 = vunpack.c.h.s8.bf16 %v10192_v49  ;;  %v10228_v1 = vcombine.low %v4678_v43, %v4680_v44 }
 0x289   : > { %4572 = vmatmul.mubr.bf16.vlgmr.msra.gmra.mrb[0].mxu0 %v10127_v53  ;;  %4613 = vmatmul.mubr.bf16.vlgmr.msra.gmra.mrb[0].mxu1 %v10127_v53  ;;  %v10226_v53 = vcombine.low %v4675_v37, %v4677_v39  ;;  %v10252_v37 = vld [vmem:[%s11786_s16 + $0x868] sm:$0xff]  ;;  %v10198_v39 = vcombine.low %v12181_v55, %v12181_v55 }
 0x28a   : > { %4924 = vmatpush1.bf16.msra.mxu0 %v10200_v54  ;;  %4965 = vmatpush1.bf16.msra.mxu1 %v10202_v56  ;;  %v10229_v54 = vcombine.high %v4678_v43, %v4680_v44  ;;  %v10231_v56 = vcombine.high %v4679_v45, %v4681_v46  ;;  %v10235_v6 = vcombine.high %v4683_v58, %v4685_v59  ;;  %v5044_v43 = vunpack.c.l.s8.bf16 %v10252_v37 }
 0x28b   : > { %4925 = vmatprep.subr.bf16.mxu0 %v10205_v62  ;;  %4966 = vmatprep.subr.bf16.mxu1 %v10207_v57  ;;  %v4682_v62 = vunpack.c.l.s8.bf16 %v10192_v49  ;;  %v4684_v57 = vunpack.c.l.s8.bf16 %v10193_v50  ;;  %v10234_v10 = vcombine.low %v4683_v58, %v4685_v59  ;;  %v5043_v44 = vunpack.c.h.s8.bf16 %v10251_v36  ;;  %v10254_v49 = vld [vmem:[%s11786_s16 + $0x878] sm:$0xff]  ;;  %v10255_v59 = vld [vmem:[%s11786_s16 + $0x880] sm:$0xff] }
 0x28c   : > { %10244 = vmatprep.mubr.msk.bf16.mxu0 %vm772_vm0, %v10199_v7  ;;  %10245 = vmatprep.mubr.msk.bf16.mxu1 %vm772_vm0, %v10199_v7  ;;  %v4686_v7 = vunpack.c.l.s8.bf16 %v10194_v60  ;;  %v5045_v45 = vunpack.c.h.s8.bf16 %v10252_v37  ;;  %v5049_v58 = vunpack.c.h.s8.bf16 %v10254_v49 }
 0x28d   : > { %v10233_v5 = vcombine.high %v4682_v62, %v4684_v57 }
 0x28e   : > { %4926 = vmatpush1.bf16.msra.mxu0 %v10204_v0  ;;  %4967 = vmatpush1.bf16.msra.mxu1 %v10206_v2  ;;  %v4688_v0 = vunpack.c.l.s8.bf16 %v10195_v61  ;;  %v4687_v2 = vunpack.c.h.s8.bf16 %v10194_v60  ;;  %v10256_v60 = vld [vmem:[%s11786_s16 + $0x888] sm:$0xff] }
 0x28f   : > { %4927 = vmatprep.subr.bf16.mxu0 %v10209_v8  ;;  %4968 = vmatprep.subr.bf16.mxu1 %v10211_v9  ;;  %v10197_v8 = vld [vmem:[%s11786_s16 + $0x838] sm:$0xff]  ;;  %v10232_v9 = vcombine.low %v4682_v62, %v4684_v57  ;;  %v5048_v62 = vunpack.c.l.s8.bf16 %v10254_v49 }
 0x290   : > { %v10237_v11 = vcombine.high %v4686_v7, %v4688_v0  ;;  %v4693_v15 = vunpack.c.h.s8.bf16 %v10197_v8  ;;  %v10236_v18 = vcombine.low %v4686_v7, %v4688_v0  ;;  %v10238_v20 = vcombine.low %v4687_v2, %v4689_v4 }
 0x291   : > { %v5052_v7 = vunpack.c.l.s8.bf16 %v10256_v60  ;;  %v5051_v0 = vunpack.c.h.s8.bf16 %v10255_v59 }
 0x292   : > { %4928 = vmatpush1.bf16.msra.mxu0 %v10208_v13  ;;  %4969 = vmatpush1.bf16.msra.mxu1 %v10210_v14  ;;  %v10239_v13 = vcombine.high %v4687_v2, %v4689_v4  ;;  %v4690_v14 = vunpack.c.l.s8.bf16 %v10196_v12  ;;  %v5053_v2 = vunpack.c.h.s8.bf16 %v10256_v60 }
 0x293   : > { %4929 = vmatprep.subr.bf16.mxu0 %v10213_v3  ;;  %4970 = vmatprep.subr.bf16.mxu1 %v10215_v19  ;;  %v4692_v3 = vunpack.c.l.s8.bf16 %v10197_v8  ;;  %v4691_v19 = vunpack.c.h.s8.bf16 %v10196_v12  ;;  %v10258_v12 = vld [vmem:[%s11786_s16 + $0x898] sm:$0xff] }
 0x295   : > { %v10241_v25 = vcombine.high %v4690_v14, %v4692_v3  ;;  %v10243_v26 = vcombine.high %v4691_v19, %v4693_v15  ;;  %v10242_v29 = vcombine.low %v4691_v19, %v4693_v15  ;;  %v5057_v19 = vunpack.c.h.s8.bf16 %v10258_v12  ;;  %v10259_v15 = vld [vmem:[%s11786_s16 + $0x8a0] sm:$0xff] }
 0x296   : > { %4930 = vmatpush1.bf16.msra.mxu0 %v10212_v21  ;;  %4971 = vmatpush1.bf16.msra.mxu1 %v10214_v22  ;;  %v5036_v21 = vunpack.c.l.s8.bf16 %v10248_v17  ;;  %v5035_v22 = vunpack.c.h.s8.bf16 %v10247_v16  ;;  %v10260_v16 = vld [vmem:[%s11786_s16 + $0x8a8] sm:$0xff] }
 0x297   : > { %4931 = vmatprep.subr.bf16.mxu0 %v10217_v28  ;;  %4972 = vmatprep.subr.bf16.mxu1 %v10219_v34  ;;  %v10250_v28 = vld [vmem:[%s11786_s16 + $0x858] sm:$0xff]  ;;  %v10240_v34 = vcombine.low %v4690_v14, %v4692_v3  ;;  %v5056_v14 = vunpack.c.l.s8.bf16 %v10258_v12 }
 0x298   : > { %v10272_v30 = vcombine.high %v5034_v24, %v5036_v21  ;;  %v5041_v35 = vunpack.c.h.s8.bf16 %v10250_v28  ;;  %v10271_v40 = vcombine.low %v5034_v24, %v5036_v21  ;;  %v10273_v41 = vcombine.low %v5035_v22, %v5037_v23 }
 0x299   : > { %v5060_v24 = vunpack.c.l.s8.bf16 %v10260_v16  ;;  %v5059_v21 = vunpack.c.h.s8.bf16 %v10259_v15 }
 0x29a   : > { %4932 = vmatpush1.bf16.msra.mxu0 %v10216_v31  ;;  %4973 = vmatpush1.bf16.msra.mxu1 %v10218_v32  ;;  %v10274_v31 = vcombine.high %v5035_v22, %v5037_v23  ;;  %v5038_v32 = vunpack.c.l.s8.bf16 %v10249_v27  ;;  %v5061_v22 = vunpack.c.h.s8.bf16 %v10260_v16 }
 0x29b   : > { %4933 = vmatprep.subr.bf16.mxu0 %v10221_v33  ;;  %4974 = vmatprep.subr.bf16.mxu1 %v10223_v38  ;;  %v5040_v33 = vunpack.c.l.s8.bf16 %v10250_v28  ;;  %v5039_v38 = vunpack.c.h.s8.bf16 %v10249_v27  ;;  %v10262_v27 = vld [vmem:[%s11786_s16 + $0x8b8] sm:$0xff] }
 0x29d   : > { %v10276_v46 = vcombine.high %v5038_v32, %v5040_v33  ;;  %v10275_v50 = vcombine.low %v5038_v32, %v5040_v33  ;;  %v5064_v32 = vunpack.c.l.s8.bf16 %v10262_v27 }
 0x29e   : > { %4934 = vmatpush1.bf16.msra.mxu0 %v10220_v42  ;;  %4975 = vmatpush1.bf16.msra.mxu1 %v10222_v47  ;;  %v12214_v42 = vld [vmem:[%s12591_s0 + $0x60] sm:$0xff]  ;;  %v5042_v47 = vunpack.c.l.s8.bf16 %v10251_v36  ;;  %v10264_v36 = vld [vmem:[%s11786_s16 + $0x8c8] sm:$0xff] }
 0x29f   : > { %4935 = vmatprep.subr.bf16.mxu0 %v10225_v48  ;;  %4976 = vmatprep.subr.bf16.mxu1 %v10227_v52  ;;  %v10278_v48 = vcombine.high %v5039_v38, %v5041_v35  ;;  %v10253_v52 = vld [vmem:[%s11786_s16 + $0x870] sm:$0xff]  ;;  %v10270_v55 = vcombine.high %v12214_v42, %v12214_v42 }
 0x2a0   : > { %v5047_v57 = vunpack.c.h.s8.bf16 %v10253_v52  ;;  %v10279_v61 = vcombine.low %v5042_v47, %v5044_v43 }
 0x2a2   : > { %4936 = vmatpush1.bf16.msra.mxu0 %v10224_v51  ;;  %4977 = vmatpush1.bf16.msra.mxu1 %v10226_v53  ;;  %v10277_v51 = vcombine.low %v5039_v38, %v5041_v35  ;;  %v10280_v53 = vcombine.high %v5042_v47, %v5044_v43  ;;  %v5065_v38 = vunpack.c.h.s8.bf16 %v10262_v27  ;;  %v10263_v35 = vld [vmem:[%s11786_s16 + $0x8c0] sm:$0xff]  ;;  %v5069_v43 = vunpack.c.h.s8.bf16 %v10264_v36 }
 0x2a3   : > { %4937 = vmatprep.subr.bf16.mxu0 %v10229_v54  ;;  %4978 = vmatprep.subr.bf16.mxu1 %v10231_v56  ;;  %v10282_v54 = vcombine.high %v5043_v44, %v5045_v45  ;;  %v5046_v56 = vunpack.c.l.s8.bf16 %v10253_v52  ;;  %v5067_v47 = vunpack.c.h.s8.bf16 %v10263_v35  ;;  %v12247_v27 = vld [vmem:[%s12591_s0 + $0x68] sm:$0xff] }
 0x2a5   : > { %v10284_v4 = vcombine.high %v5046_v56, %v5048_v62  ;;  %v10283_v8 = vcombine.low %v5046_v56, %v5048_v62  ;;  %v10267_v62 = vld [vmem:[%s11786_s16 + $0x8e0] sm:$0xff] }
 0x2a6   : > { %4938 = vmatpush1.bf16.msra.mxu0 %v10228_v1  ;;  %4979 = vmatpush1.bf16.msra.mxu1 %v10230_v63  ;;  %v10281_v1 = vcombine.low %v5043_v44, %v5045_v45  ;;  %v5050_v63 = vunpack.c.l.s8.bf16 %v10255_v59  ;;  %v10305_v59 = vcombine.low %v5067_v47, %v5069_v43  ;;  %v5074_v60 = vunpack.c.l.s8.bf16 %v10267_v62 }
 0x2a7   : > { %4939 = vmatprep.subr.bf16.mxu0 %v10233_v5  ;;  %4980 = vmatprep.subr.bf16.mxu1 %v10235_v6  ;;  %v10286_v5 = vcombine.high %v5047_v57, %v5049_v58  ;;  %v10257_v6 = vld [vmem:[%s11786_s16 + $0x890] sm:$0xff] }
 0x2a8   : > { %v5055_v3 = vunpack.c.h.s8.bf16 %v10257_v6  ;;  %v10287_v17 = vcombine.low %v5050_v63, %v5052_v7 }
 0x2aa   : > { %4940 = vmatpush1.bf16.msra.mxu0 %v10232_v9  ;;  %4981 = vmatpush1.bf16.msra.mxu1 %v10234_v10  ;;  %v10285_v9 = vcombine.low %v5047_v57, %v5049_v58  ;;  %v10288_v10 = vcombine.high %v5050_v63, %v5052_v7  ;;  %v10268_v57 = vld [vmem:[%s11786_s16 + $0x8e8] sm:$0xff] }
 0x2ab   : > { %4941 = vmatprep.subr.bf16.mxu0 %v10237_v11  ;;  %4982 = vmatprep.subr.bf16.mxu1 %v10239_v13  ;;  %v10290_v11 = vcombine.high %v5051_v0, %v5053_v2  ;;  %v5054_v13 = vunpack.c.l.s8.bf16 %v10257_v6  ;;  %v5077_v63 = vunpack.c.h.s8.bf16 %v10268_v57 }
 0x2ad   : > { %v10292_v23 = vcombine.high %v5054_v13, %v5056_v14  ;;  %v10291_v28 = vcombine.low %v5054_v13, %v5056_v14  ;;  %v10320_v14 = vld [vmem:[%s11786_s16 + $0x900] sm:$0xff] }
 0x2ae   : > { %4942 = vmatpush1.bf16.msra.mxu0 %v10236_v18  ;;  %4983 = vmatpush1.bf16.msra.mxu1 %v10238_v20  ;;  %v10289_v18 = vcombine.low %v5051_v0, %v5053_v2  ;;  %v5058_v20 = vunpack.c.l.s8.bf16 %v10259_v15  ;;  %v10318_v2 = vld [vmem:[%s11786_s16 + $0x8f0] sm:$0xff]  ;;  %v5422_v16 = vunpack.c.l.s8.bf16 %v10320_v14 }
 0x2af   : > { %4943 = vmatprep.subr.bf16.mxu0 %v10241_v25  ;;  %4984 = vmatprep.subr.bf16.mxu1 %v10243_v26  ;;  %v10294_v25 = vcombine.high %v5055_v3, %v5057_v19  ;;  %v10261_v26 = vld [vmem:[%s11786_s16 + $0x8b0] sm:$0xff] }
 0x2b0   : > { %v5063_v33 = vunpack.c.h.s8.bf16 %v10261_v26  ;;  %v10295_v37 = vcombine.low %v5058_v20, %v5060_v24 }
 0x2b2   : > { %4944 = vmatpush1.bf16.msra.mxu0 %v10240_v34  ;;  %4985 = vmatpush1.bf16.msra.mxu1 %v10242_v29  ;;  %v10293_v34 = vcombine.low %v5055_v3, %v5057_v19  ;;  %v10296_v29 = vcombine.high %v5058_v20, %v5060_v24  ;;  %v10302_v45 = vcombine.high %v5063_v33, %v5065_v38  ;;  %v10321_v3 = vld [vmem:[%s11786_s16 + $0x908] sm:$0xff] }
 0x2b3   : > { %5307 = vmatprep.subr.bf16.mxu0 %v10272_v30  ;;  %5348 = vmatprep.subr.bf16.mxu1 %v10274_v31  ;;  %v10298_v30 = vcombine.high %v5059_v21, %v5061_v22  ;;  %v5062_v31 = vunpack.c.l.s8.bf16 %v10261_v26  ;;  %v10301_v49 = vcombine.low %v5063_v33, %v5065_v38  ;;  %v5425_v20 = vunpack.c.h.s8.bf16 %v10321_v3  ;;  %v10324_v38 = vld [vmem:[%s11786_s16 + $0x920] sm:$0xff] }
 0x2b5   : > { %4956 = vmatmul.mubr.bf16.vlgmr.msra.gmra.mrb[0].mxu0 %v10198_v39  ;;  %4997 = vmatmul.mubr.bf16.vlgmr.msra.gmra.mrb[0].mxu1 %v10198_v39  ;;  %v10297_v39 = vcombine.low %v5059_v21, %v5061_v22  ;;  %v10300_v44 = vcombine.high %v5062_v31, %v5064_v32  ;;  %v10299_v52 = vcombine.low %v5062_v31, %v5064_v32  ;;  %v10322_v22 = vld [vmem:[%s11786_s16 + $0x910] sm:$0xff] }
 0x2b6   : > { %5308 = vmatpush1.bf16.msra.mxu0 %v10271_v40  ;;  %5349 = vmatpush1.bf16.msra.mxu1 %v10273_v41  ;;  %v5066_v40 = vunpack.c.l.s8.bf16 %v10263_v35  ;;  %v5068_v41 = vunpack.c.l.s8.bf16 %v10264_v36  ;;  %v5427_v32 = vunpack.c.h.s8.bf16 %v10322_v22  ;;  %v10325_v35 = vld [vmem:[%s11786_s16 + $0x928] sm:$0xff] }
 0x2b7   : > { %5309 = vmatprep.subr.bf16.mxu0 %v10276_v46  ;;  %5350 = vmatprep.subr.bf16.mxu1 %v10278_v48  ;;  %v10265_v46 = vld [vmem:[%s11786_s16 + $0x8d0] sm:$0xff]  ;;  %v10266_v48 = vld [vmem:[%s11786_s16 + $0x8d8] sm:$0xff] }
 0x2b8   : > { %10315 = vmatprep.mubr.msk.bf16.mxu0 %vm772_vm0, %v10270_v55  ;;  %10316 = vmatprep.mubr.msk.bf16.mxu1 %vm772_vm0, %v10270_v55  ;;  %v10304_v55 = vcombine.high %v5066_v40, %v5068_v41  ;;  %v5073_v56 = vunpack.c.h.s8.bf16 %v10266_v48  ;;  %v10303_v58 = vcombine.low %v5066_v40, %v5068_v41  ;;  %v5432_v40 = vunpack.c.l.s8.bf16 %v10325_v35 }
 0x2b9   : > { %v5431_v41 = vunpack.c.h.s8.bf16 %v10324_v38 }
 0x2ba   : > { %5310 = vmatpush1.bf16.msra.mxu0 %v10275_v50  ;;  %5351 = vmatpush1.bf16.msra.mxu1 %v10277_v51  ;;  %v10306_v50 = vcombine.high %v5067_v47, %v5069_v43  ;;  %v5070_v51 = vunpack.c.l.s8.bf16 %v10265_v46  ;;  %v5433_v47 = vunpack.c.h.s8.bf16 %v10325_v35 }
 0x2bb   : > { %5311 = vmatprep.subr.bf16.mxu0 %v10280_v53  ;;  %5352 = vmatprep.subr.bf16.mxu1 %v10282_v54  ;;  %v5072_v53 = vunpack.c.l.s8.bf16 %v10266_v48  ;;  %v5071_v54 = vunpack.c.h.s8.bf16 %v10265_v46  ;;  %v10327_v46 = vld [vmem:[%s11786_s16 + $0x938] sm:$0xff] }
 0x2bd   : > { %v10308_v7 = vcombine.high %v5070_v51, %v5072_v53  ;;  %v10310_v0 = vcombine.high %v5071_v54, %v5073_v56  ;;  %v10309_v6 = vcombine.low %v5071_v54, %v5073_v56  ;;  %v5437_v54 = vunpack.c.h.s8.bf16 %v10327_v46  ;;  %v10328_v56 = vld [vmem:[%s11786_s16 + $0x940] sm:$0xff] }
 0x2be   : > { %5312 = vmatpush1.bf16.msra.mxu0 %v10279_v61  ;;  %5353 = vmatpush1.bf16.msra.mxu1 %v10281_v1  ;;  %v5076_v61 = vunpack.c.l.s8.bf16 %v10268_v57  ;;  %v5075_v1 = vunpack.c.h.s8.bf16 %v10267_v62  ;;  %v10329_v62 = vld [vmem:[%s11786_s16 + $0x948] sm:$0xff] }
 0x2bf   : > { %5313 = vmatprep.subr.bf16.mxu0 %v10284_v4  ;;  %5354 = vmatprep.subr.bf16.mxu1 %v10286_v5  ;;  %v10319_v4 = vld [vmem:[%s11786_s16 + $0x8f8] sm:$0xff]  ;;  %v10307_v5 = vcombine.low %v5070_v51, %v5072_v53  ;;  %v5436_v51 = vunpack.c.l.s8.bf16 %v10327_v46 }
 0x2c0   : > { %v10312_v12 = vcombine.high %v5074_v60, %v5076_v61  ;;  %v5421_v13 = vunpack.c.h.s8.bf16 %v10319_v4  ;;  %v10311_v19 = vcombine.low %v5074_v60, %v5076_v61  ;;  %v10313_v15 = vcombine.low %v5075_v1, %v5077_v63 }
 0x2c1   : > { %v5440_v60 = vunpack.c.l.s8.bf16 %v10329_v62  ;;  %v5439_v61 = vunpack.c.h.s8.bf16 %v10328_v56 }
 0x2c2   : > { %5314 = vmatpush1.bf16.msra.mxu0 %v10283_v8  ;;  %5355 = vmatpush1.bf16.msra.mxu1 %v10285_v9  ;;  %v10314_v8 = vcombine.high %v5075_v1, %v5077_v63  ;;  %v5418_v9 = vunpack.c.l.s8.bf16 %v10318_v2  ;;  %v5441_v1 = vunpack.c.h.s8.bf16 %v10329_v62 }
 0x2c3   : > { %5315 = vmatprep.subr.bf16.mxu0 %v10288_v10  ;;  %5356 = vmatprep.subr.bf16.mxu1 %v10290_v11  ;;  %v5420_v10 = vunpack.c.l.s8.bf16 %v10319_v4  ;;  %v5419_v11 = vunpack.c.h.s8.bf16 %v10318_v2  ;;  %v10331_v2 = vld [vmem:[%s11786_s16 + $0x958] sm:$0xff] }
 0x2c5   : > { %v10343_v24 = vcombine.high %v5418_v9, %v5420_v10  ;;  %v10345_v21 = vcombine.high %v5419_v11, %v5421_v13  ;;  %v10342_v26 = vcombine.low %v5418_v9, %v5420_v10  ;;  %v5444_v9 = vunpack.c.l.s8.bf16 %v10331_v2 }
 0x2c6   : > { %5316 = vmatpush1.bf16.msra.mxu0 %v10287_v17  ;;  %5357 = vmatpush1.bf16.msra.mxu1 %v10289_v18  ;;  %v5424_v17 = vunpack.c.l.s8.bf16 %v10321_v3  ;;  %v5423_v18 = vunpack.c.h.s8.bf16 %v10320_v14  ;;  %v10333_v14 = vld [vmem:[%s11786_s16 + $0x968] sm:$0xff] }
 0x2c7   : > { %5317 = vmatprep.subr.bf16.mxu0 %v10292_v23  ;;  %5358 = vmatprep.subr.bf16.mxu1 %v10294_v25  ;;  %v10323_v23 = vld [vmem:[%s11786_s16 + $0x918] sm:$0xff]  ;;  %v10269_v25 = vcombine.low %v12214_v42, %v12214_v42  ;;  %v10341_v42 = vcombine.high %v12247_v27, %v12247_v27 }
 0x2c8   : > { %v5428_v31 = vunpack.c.l.s8.bf16 %v10323_v23  ;;  %v5429_v33 = vunpack.c.h.s8.bf16 %v10323_v23  ;;  %v10346_v36 = vcombine.low %v5422_v16, %v5424_v17 }
 0x2ca   : > { %5318 = vmatpush1.bf16.msra.mxu0 %v10291_v28  ;;  %5359 = vmatpush1.bf16.msra.mxu1 %v10293_v34  ;;  %v10344_v28 = vcombine.low %v5419_v11, %v5421_v13  ;;  %v10347_v34 = vcombine.high %v5422_v16, %v5424_v17  ;;  %v5445_v11 = vunpack.c.h.s8.bf16 %v10331_v2  ;;  %v10332_v13 = vld [vmem:[%s11786_s16 + $0x960] sm:$0xff]  ;;  %v5448_v16 = vunpack.c.l.s8.bf16 %v10333_v14 }
 0x2cb   : > { %5319 = vmatprep.subr.bf16.mxu0 %v10296_v29  ;;  %5360 = vmatprep.subr.bf16.mxu1 %v10298_v30  ;;  %v10349_v29 = vcombine.high %v5423_v18, %v5425_v20  ;;  %v5426_v30 = vunpack.c.l.s8.bf16 %v10322_v22  ;;  %v5447_v17 = vunpack.c.h.s8.bf16 %v10332_v13  ;;  %v10335_v22 = vld [vmem:[%s11786_s16 + $0x978] sm:$0xff] }
 0x2cd   : > { %v10351_v43 = vcombine.high %v5426_v30, %v5428_v31  ;;  %v10350_v48 = vcombine.low %v5426_v30, %v5428_v31  ;;  %v5453_v31 = vunpack.c.h.s8.bf16 %v10335_v22 }
 0x2ce   : > { %5320 = vmatpush1.bf16.msra.mxu0 %v10295_v37  ;;  %5361 = vmatpush1.bf16.msra.mxu1 %v10297_v39  ;;  %v10348_v37 = vcombine.low %v5423_v18, %v5425_v20  ;;  %v5430_v39 = vunpack.c.l.s8.bf16 %v10324_v38  ;;  %v5449_v18 = vunpack.c.h.s8.bf16 %v10333_v14 }
 0x2cf   : > { %5321 = vmatprep.subr.bf16.mxu0 %v10300_v44  ;;  %5362 = vmatprep.subr.bf16.mxu1 %v10302_v45  ;;  %v10353_v44 = vcombine.high %v5427_v32, %v5429_v33  ;;  %v10326_v45 = vld [vmem:[%s11786_s16 + $0x930] sm:$0xff] }
 0x2d0   : > { %v5435_v53 = vunpack.c.h.s8.bf16 %v10326_v45  ;;  %v10354_v57 = vcombine.low %v5430_v39, %v5432_v40  ;;  %v10372_v35 = vcombine.low %v5447_v17, %v5449_v18 }
 0x2d2   : > { %5322 = vmatpush1.bf16.msra.mxu0 %v10299_v52  ;;  %5363 = vmatpush1.bf16.msra.mxu1 %v10301_v49  ;;  %v10352_v52 = vcombine.low %v5427_v32, %v5429_v33  ;;  %v10355_v49 = vcombine.high %v5430_v39, %v5432_v40  ;;  %v10336_v32 = vld [vmem:[%s11786_s16 + $0x980] sm:$0xff]  ;;  %v10337_v33 = vld [vmem:[%s11786_s16 + $0x988] sm:$0xff] }
 0x2d3   : > { %5323 = vmatprep.subr.bf16.mxu0 %v10304_v55  ;;  %5364 = vmatprep.subr.bf16.mxu1 %v10306_v50  ;;  %v10357_v55 = vcombine.high %v5431_v41, %v5433_v47  ;;  %v5434_v50 = vunpack.c.l.s8.bf16 %v10326_v45  ;;  %v5457_v39 = vunpack.c.h.s8.bf16 %v10337_v33 }
 0x2d5   : > { %v10359_v63 = vcombine.high %v5434_v50, %v5436_v51  ;;  %v10358_v4 = vcombine.low %v5434_v50, %v5436_v51  ;;  %v10389_v51 = vld [vmem:[%s11786_s16 + $0x9a0] sm:$0xff] }
 0x2d6   : > { %5324 = vmatpush1.bf16.msra.mxu0 %v10303_v58  ;;  %5365 = vmatpush1.bf16.msra.mxu1 %v10305_v59  ;;  %v10356_v58 = vcombine.low %v5431_v41, %v5433_v47  ;;  %v5438_v59 = vunpack.c.l.s8.bf16 %v10328_v56  ;;  %v10338_v47 = vld [vmem:[%s11786_s16 + $0x990] sm:$0xff]  ;;  %v5802_v62 = vunpack.c.l.s8.bf16 %v10389_v51 }
 0x2d7   : > { %5325 = vmatprep.subr.bf16.mxu0 %v10308_v7  ;;  %5366 = vmatprep.subr.bf16.mxu1 %v10310_v0  ;;  %v10361_v7 = vcombine.high %v5435_v53, %v5437_v54  ;;  %v10330_v0 = vld [vmem:[%s11786_s16 + $0x950] sm:$0xff] }
 0x2d8   : > { %v5443_v10 = vunpack.c.h.s8.bf16 %v10330_v0  ;;  %v10362_v3 = vcombine.low %v5438_v59, %v5440_v60 }
 0x2da   : > { %5326 = vmatpush1.bf16.msra.mxu0 %v10307_v5  ;;  %5367 = vmatpush1.bf16.msra.mxu1 %v10309_v6  ;;  %v10360_v5 = vcombine.low %v5435_v53, %v5437_v54  ;;  %v10363_v6 = vcombine.high %v5438_v59, %v5440_v60  ;;  %v10390_v53 = vld [vmem:[%s11786_s16 + $0x9a8] sm:$0xff] }
 0x2db   : > { %5327 = vmatprep.subr.bf16.mxu0 %v10312_v12  ;;  %5368 = vmatprep.subr.bf16.mxu1 %v10314_v8  ;;  %v10365_v12 = vcombine.high %v5439_v61, %v5441_v1  ;;  %v5442_v8 = vunpack.c.l.s8.bf16 %v10330_v0  ;;  %v5805_v59 = vunpack.c.h.s8.bf16 %v10390_v53 }
 0x2dd   : > { %v10367_v20 = vcombine.high %v5442_v8, %v5444_v9  ;;  %v10366_v23 = vcombine.low %v5442_v8, %v5444_v9  ;;  %v10393_v9 = vld [vmem:[%s11786_s16 + $0x9c0] sm:$0xff] }
 0x2de   : > { %5328 = vmatpush1.bf16.msra.mxu0 %v10311_v19  ;;  %5369 = vmatpush1.bf16.msra.mxu1 %v10313_v15  ;;  %v10364_v19 = vcombine.low %v5439_v61, %v5441_v1  ;;  %v5446_v15 = vunpack.c.l.s8.bf16 %v10332_v13  ;;  %v10391_v1 = vld [vmem:[%s11786_s16 + $0x9b0] sm:$0xff] }
 0x2df   : > { %5691 = vmatprep.subr.bf16.mxu0 %v10343_v24  ;;  %5732 = vmatprep.subr.bf16.mxu1 %v10345_v21  ;;  %v10369_v24 = vcombine.high %v5443_v10, %v5445_v11  ;;  %v10334_v21 = vld [vmem:[%s11786_s16 + $0x970] sm:$0xff] }
 0x2e0   : > { %v5451_v30 = vunpack.c.h.s8.bf16 %v10334_v21  ;;  %v10370_v38 = vcombine.low %v5446_v15, %v5448_v16 }
 0x2e1   : > { %5340 = vmatmul.mubr.bf16.vlgmr.msra.gmra.mrb[0].mxu0 %v10269_v25  ;;  %5381 = vmatmul.mubr.bf16.vlgmr.msra.gmra.mrb[0].mxu1 %v10269_v25  ;;  %v10368_v25 = vcombine.low %v5443_v10, %v5445_v11  ;;  %v10394_v10 = vld [vmem:[%s11786_s16 + $0x9c8] sm:$0xff]  ;;  %v10340_v11 = vcombine.low %v12247_v27, %v12247_v27 }
 0x2e2   : > { %5692 = vmatpush1.bf16.msra.mxu0 %v10342_v26  ;;  %5733 = vmatpush1.bf16.msra.mxu1 %v10344_v28  ;;  %v10371_v26 = vcombine.high %v5446_v15, %v5448_v16  ;;  %v10373_v28 = vcombine.high %v5447_v17, %v5449_v18  ;;  %v10377_v41 = vcombine.high %v5451_v30, %v5453_v31  ;;  %v5812_v15 = vunpack.c.l.s8.bf16 %v10394_v10 }
 0x2e3   : > { %5693 = vmatprep.subr.bf16.mxu0 %v10347_v34  ;;  %5734 = vmatprep.subr.bf16.mxu1 %v10349_v29  ;;  %v5450_v34 = vunpack.c.l.s8.bf16 %v10334_v21  ;;  %v5452_v29 = vunpack.c.l.s8.bf16 %v10335_v22  ;;  %v10376_v45 = vcombine.low %v5451_v30, %v5453_v31  ;;  %v5811_v16 = vunpack.c.h.s8.bf16 %v10393_v9  ;;  %v10396_v21 = vld [vmem:[%s11786_s16 + $0x9d8] sm:$0xff]  ;;  %v10397_v31 = vld [vmem:[%s11786_s16 + $0x9e0] sm:$0xff] }
 0x2e4   : > { %10386 = vmatprep.mubr.msk.bf16.mxu0 %vm772_vm0, %v10341_v42  ;;  %10387 = vmatprep.mubr.msk.bf16.mxu1 %vm772_vm0, %v10341_v42  ;;  %v5454_v42 = vunpack.c.l.s8.bf16 %v10336_v32  ;;  %v5813_v17 = vunpack.c.h.s8.bf16 %v10394_v10  ;;  %v5817_v30 = vunpack.c.h.s8.bf16 %v10396_v21 }
 0x2e5   : > { %v10375_v40 = vcombine.high %v5450_v34, %v5452_v29 }
 0x2e6   : > { %5694 = vmatpush1.bf16.msra.mxu0 %v10346_v36  ;;  %5735 = vmatpush1.bf16.msra.mxu1 %v10348_v37  ;;  %v5456_v36 = vunpack.c.l.s8.bf16 %v10337_v33  ;;  %v5455_v37 = vunpack.c.h.s8.bf16 %v10336_v32  ;;  %v10398_v32 = vld [vmem:[%s11786_s16 + $0x9e8] sm:$0xff] }
 0x2e7   : > { %5695 = vmatprep.subr.bf16.mxu0 %v10351_v43  ;;  %5736 = vmatprep.subr.bf16.mxu1 %v10353_v44  ;;  %v10339_v43 = vld [vmem:[%s11786_s16 + $0x998] sm:$0xff]  ;;  %v10374_v44 = vcombine.low %v5450_v34, %v5452_v29  ;;  %v5816_v34 = vunpack.c.l.s8.bf16 %v10396_v21 }
 0x2e8   : > { %v10379_v46 = vcombine.high %v5454_v42, %v5456_v36  ;;  %v5461_v50 = vunpack.c.h.s8.bf16 %v10339_v43  ;;  %v10378_v54 = vcombine.low %v5454_v42, %v5456_v36  ;;  %v10380_v56 = vcombine.low %v5455_v37, %v5457_v39 }
 0x2e9   : > { %v5820_v42 = vunpack.c.l.s8.bf16 %v10398_v32  ;;  %v5819_v36 = vunpack.c.h.s8.bf16 %v10397_v31 }
 0x2ea   : > { %5696 = vmatpush1.bf16.msra.mxu0 %v10350_v48  ;;  %5737 = vmatpush1.bf16.msra.mxu1 %v10352_v52  ;;  %v10381_v48 = vcombine.high %v5455_v37, %v5457_v39  ;;  %v5458_v52 = vunpack.c.l.s8.bf16 %v10338_v47  ;;  %v5821_v37 = vunpack.c.h.s8.bf16 %v10398_v32 }
 0x2eb   : > { %5697 = vmatprep.subr.bf16.mxu0 %v10355_v49  ;;  %5738 = vmatprep.subr.bf16.mxu1 %v10357_v55  ;;  %v5460_v49 = vunpack.c.l.s8.bf16 %v10339_v43  ;;  %v5459_v55 = vunpack.c.h.s8.bf16 %v10338_v47  ;;  %v10400_v47 = vld [vmem:[%s11786_s16 + $0x9f8] sm:$0xff] }
 0x2ed   : > { %v10383_v60 = vcombine.high %v5458_v52, %v5460_v49  ;;  %v10385_v61 = vcombine.high %v5459_v55, %v5461_v50  ;;  %v10384_v0 = vcombine.low %v5459_v55, %v5461_v50  ;;  %v5825_v55 = vunpack.c.h.s8.bf16 %v10400_v47  ;;  %v10401_v50 = vld [vmem:[%s11786_s16 + $0xa00] sm:$0xff] }
 0x2ee   : > { %5698 = vmatpush1.bf16.msra.mxu0 %v10354_v57  ;;  %5739 = vmatpush1.bf16.msra.mxu1 %v10356_v58  ;;  %v5804_v57 = vunpack.c.l.s8.bf16 %v10390_v53  ;;  %v5803_v58 = vunpack.c.h.s8.bf16 %v10389_v51  ;;  %v10402_v51 = vld [vmem:[%s11786_s16 + $0xa08] sm:$0xff] }
 0x2ef   : > { %5699 = vmatprep.subr.bf16.mxu0 %v10359_v63  ;;  %5740 = vmatprep.subr.bf16.mxu1 %v10361_v7  ;;  %v10392_v63 = vld [vmem:[%s11786_s16 + $0x9b8] sm:$0xff]  ;;  %v10382_v7 = vcombine.low %v5458_v52, %v5460_v49  ;;  %v5824_v52 = vunpack.c.l.s8.bf16 %v10400_v47 }
 0x2f0   : > { %v10414_v2 = vcombine.high %v5802_v62, %v5804_v57  ;;  %v5809_v8 = vunpack.c.h.s8.bf16 %v10392_v63  ;;  %v10413_v13 = vcombine.low %v5802_v62, %v5804_v57  ;;  %v10415_v14 = vcombine.low %v5803_v58, %v5805_v59 }
 0x2f1   : > { %v5828_v62 = vunpack.c.l.s8.bf16 %v10402_v51  ;;  %v5827_v57 = vunpack.c.h.s8.bf16 %v10401_v50 }
 0x2f2   : > { %5700 = vmatpush1.bf16.msra.mxu0 %v10358_v4  ;;  %5741 = vmatpush1.bf16.msra.mxu1 %v10360_v5  ;;  %v10416_v4 = vcombine.high %v5803_v58, %v5805_v59  ;;  %v5806_v5 = vunpack.c.l.s8.bf16 %v10391_v1  ;;  %v5829_v58 = vunpack.c.h.s8.bf16 %v10402_v51 }
 0x2f3   : > { %5701 = vmatprep.subr.bf16.mxu0 %v10363_v6  ;;  %5742 = vmatprep.subr.bf16.mxu1 %v10365_v12  ;;  %v5808_v6 = vunpack.c.l.s8.bf16 %v10392_v63  ;;  %v5807_v12 = vunpack.c.h.s8.bf16 %v10391_v1  ;;  %v10404_v1 = vld [vmem:[%s11786_s16 + $0xa18] sm:$0xff] }
 0x2f5   : > { %v10418_v18 = vcombine.high %v5806_v5, %v5808_v6  ;;  %v10417_v22 = vcombine.low %v5806_v5, %v5808_v6  ;;  %v5832_v5 = vunpack.c.l.s8.bf16 %v10404_v1 }
 0x2f6   : > { %5702 = vmatpush1.bf16.msra.mxu0 %v10362_v3  ;;  %5743 = vmatpush1.bf16.msra.mxu1 %v10364_v19  ;;  %v12280_v3 = vld [vmem:[%s12591_s0 + $0x70] sm:$0xff]  ;;  %v5810_v19 = vunpack.c.l.s8.bf16 %v10393_v9 }
 0x2f7   : > { %5703 = vmatprep.subr.bf16.mxu0 %v10367_v20  ;;  %5744 = vmatprep.subr.bf16.mxu1 %v10369_v24  ;;  %v10420_v20 = vcombine.high %v5807_v12, %v5809_v8  ;;  %v10395_v24 = vld [vmem:[%s11786_s16 + $0x9d0] sm:$0xff]  ;;  %v10412_v27 = vcombine.high %v12280_v3, %v12280_v3  ;;  %v10406_v9 = vld [vmem:[%s11786_s16 + $0xa28] sm:$0xff] }
 0x2f8   : > { %v5815_v29 = vunpack.c.h.s8.bf16 %v10395_v24  ;;  %v10421_v33 = vcombine.low %v5810_v19, %v5812_v15 }
 0x2fa   : > { %5704 = vmatpush1.bf16.msra.mxu0 %v10366_v23  ;;  %5745 = vmatpush1.bf16.msra.mxu1 %v10368_v25  ;;  %v10419_v23 = vcombine.low %v5807_v12, %v5809_v8  ;;  %v10422_v25 = vcombine.high %v5810_v19, %v5812_v15  ;;  %v5833_v12 = vunpack.c.h.s8.bf16 %v10404_v1  ;;  %v10405_v8 = vld [vmem:[%s11786_s16 + $0xa20] sm:$0xff]  ;;  %v5837_v15 = vunpack.c.h.s8.bf16 %v10406_v9  ;;  %v12313_v1 = vld [vmem:[%s12591_s0 + $0x78] sm:$0xff] }
 0x2fb   : > { %5705 = vmatprep.subr.bf16.mxu0 %v10371_v26  ;;  %5746 = vmatprep.subr.bf16.mxu1 %v10373_v28  ;;  %v10424_v26 = vcombine.high %v5811_v16, %v5813_v17  ;;  %v5814_v28 = vunpack.c.l.s8.bf16 %v10395_v24  ;;  %v5835_v19 = vunpack.c.h.s8.bf16 %v10405_v8 }
 0x2fd   : > { %v10426_v39 = vcombine.high %v5814_v28, %v5816_v34  ;;  %v10425_v43 = vcombine.low %v5814_v28, %v5816_v34  ;;  %v10409_v34 = vld [vmem:[%s11786_s16 + $0xa40] sm:$0xff] }
 0x2fe   : > { %5706 = vmatpush1.bf16.msra.mxu0 %v10370_v38  ;;  %5747 = vmatpush1.bf16.msra.mxu1 %v10372_v35  ;;  %v10423_v38 = vcombine.low %v5811_v16, %v5813_v17  ;;  %v5818_v35 = vunpack.c.l.s8.bf16 %v10397_v31  ;;  %v10447_v31 = vcombine.low %v5835_v19, %v5837_v15  ;;  %v5842_v32 = vunpack.c.l.s8.bf16 %v10409_v34 }
 0x2ff   : > { %5707 = vmatprep.subr.bf16.mxu0 %v10375_v40  ;;  %5748 = vmatprep.subr.bf16.mxu1 %v10377_v41  ;;  %v10428_v40 = vcombine.high %v5815_v29, %v5817_v30  ;;  %v10399_v41 = vld [vmem:[%s11786_s16 + $0x9f0] sm:$0xff] }
 0x300   : > { %v5823_v49 = vunpack.c.h.s8.bf16 %v10399_v41  ;;  %v10429_v53 = vcombine.low %v5818_v35, %v5820_v42 }
 0x302   : > { %5708 = vmatpush1.bf16.msra.mxu0 %v10374_v44  ;;  %5749 = vmatpush1.bf16.msra.mxu1 %v10376_v45  ;;  %v10427_v44 = vcombine.low %v5815_v29, %v5817_v30  ;;  %v10430_v45 = vcombine.high %v5818_v35, %v5820_v42  ;;  %v10410_v29 = vld [vmem:[%s11786_s16 + $0xa48] sm:$0xff] }
 0x303   : > { %5709 = vmatprep.subr.bf16.mxu0 %v10379_v46  ;;  %5750 = vmatprep.subr.bf16.mxu1 %v10381_v48  ;;  %v10432_v46 = vcombine.high %v5819_v36, %v5821_v37  ;;  %v5822_v48 = vunpack.c.l.s8.bf16 %v10399_v41  ;;  %v5845_v35 = vunpack.c.h.s8.bf16 %v10410_v29 }
 0x305   : > { %v10434_v59 = vcombine.high %v5822_v48, %v5824_v52  ;;  %v10433_v63 = vcombine.low %v5822_v48, %v5824_v52  ;;  %v10462_v52 = vld [vmem:[%s11786_s16 + $0xa60] sm:$0xff] }
 0x306   : > { %5710 = vmatpush1.bf16.msra.mxu0 %v10378_v54  ;;  %5751 = vmatpush1.bf16.msra.mxu1 %v10380_v56  ;;  %v10431_v54 = vcombine.low %v5819_v36, %v5821_v37  ;;  %v5826_v56 = vunpack.c.l.s8.bf16 %v10401_v50  ;;  %v10460_v37 = vld [vmem:[%s11786_s16 + $0xa50] sm:$0xff]  ;;  %v6190_v51 = vunpack.c.l.s8.bf16 %v10462_v52 }
 0x307   : > { %5711 = vmatprep.subr.bf16.mxu0 %v10383_v60  ;;  %5752 = vmatprep.subr.bf16.mxu1 %v10385_v61  ;;  %v10436_v60 = vcombine.high %v5823_v49, %v5825_v55  ;;  %v10403_v61 = vld [vmem:[%s11786_s16 + $0xa10] sm:$0xff] }
 0x308   : > { %v5831_v6 = vunpack.c.h.s8.bf16 %v10403_v61  ;;  %v10437_v10 = vcombine.low %v5826_v56, %v5828_v62 }
 0x30a   : > { %5712 = vmatpush1.bf16.msra.mxu0 %v10382_v7  ;;  %5753 = vmatpush1.bf16.msra.mxu1 %v10384_v0  ;;  %v10435_v7 = vcombine.low %v5823_v49, %v5825_v55  ;;  %v10438_v0 = vcombine.high %v5826_v56, %v5828_v62  ;;  %v10444_v17 = vcombine.high %v5831_v6, %v5833_v12  ;;  %v10463_v49 = vld [vmem:[%s11786_s16 + $0xa68] sm:$0xff] }
 0x30b   : > { %6075 = vmatprep.subr.bf16.mxu0 %v10414_v2  ;;  %6116 = vmatprep.subr.bf16.mxu1 %v10416_v4  ;;  %v10440_v2 = vcombine.high %v5827_v57, %v5829_v58  ;;  %v5830_v4 = vunpack.c.l.s8.bf16 %v10403_v61  ;;  %v10443_v21 = vcombine.low %v5831_v6, %v5833_v12  ;;  %v6193_v56 = vunpack.c.h.s8.bf16 %v10463_v49  ;;  %v10466_v12 = vld [vmem:[%s11786_s16 + $0xa80] sm:$0xff] }
 0x30d   : > { %5724 = vmatmul.mubr.bf16.vlgmr.msra.gmra.mrb[0].mxu0 %v10340_v11  ;;  %5765 = vmatmul.mubr.bf16.vlgmr.msra.gmra.mrb[0].mxu1 %v10340_v11  ;;  %v10439_v11 = vcombine.low %v5827_v57, %v5829_v58  ;;  %v10442_v16 = vcombine.high %v5830_v4, %v5832_v5  ;;  %v10441_v24 = vcombine.low %v5830_v4, %v5832_v5  ;;  %v10464_v58 = vld [vmem:[%s11786_s16 + $0xa70] sm:$0xff] }
 0x30e   : > { %6076 = vmatpush1.bf16.msra.mxu0 %v10413_v13  ;;  %6117 = vmatpush1.bf16.msra.mxu1 %v10415_v14  ;;  %v5834_v13 = vunpack.c.l.s8.bf16 %v10405_v8  ;;  %v5836_v14 = vunpack.c.l.s8.bf16 %v10406_v9  ;;  %v6195_v5 = vunpack.c.h.s8.bf16 %v10464_v58  ;;  %v10467_v8 = vld [vmem:[%s11786_s16 + $0xa88] sm:$0xff] }
 0x30f   : > { %6077 = vmatprep.subr.bf16.mxu0 %v10418_v18  ;;  %6118 = vmatprep.subr.bf16.mxu1 %v10420_v20  ;;  %v10407_v18 = vld [vmem:[%s11786_s16 + $0xa30] sm:$0xff]  ;;  %v10408_v20 = vld [vmem:[%s11786_s16 + $0xa38] sm:$0xff] }
 0x310   : > { %10457 = vmatprep.mubr.msk.bf16.mxu0 %vm772_vm0, %v10412_v27  ;;  %10458 = vmatprep.mubr.msk.bf16.mxu1 %vm772_vm0, %v10412_v27  ;;  %v10446_v27 = vcombine.high %v5834_v13, %v5836_v14  ;;  %v5841_v28 = vunpack.c.h.s8.bf16 %v10408_v20  ;;  %v10445_v30 = vcombine.low %v5834_v13, %v5836_v14  ;;  %v6200_v13 = vunpack.c.l.s8.bf16 %v10467_v8 }
 0x311   : > { %v6199_v14 = vunpack.c.h.s8.bf16 %v10466_v12 }
 0x312   : > { %6078 = vmatpush1.bf16.msra.mxu0 %v10417_v22  ;;  %6119 = vmatpush1.bf16.msra.mxu1 %v10419_v23  ;;  %v10448_v22 = vcombine.high %v5835_v19, %v5837_v15  ;;  %v5838_v23 = vunpack.c.l.s8.bf16 %v10407_v18  ;;  %v6201_v19 = vunpack.c.h.s8.bf16 %v10467_v8 }
 0x313   : > { %6079 = vmatprep.subr.bf16.mxu0 %v10422_v25  ;;  %6120 = vmatprep.subr.bf16.mxu1 %v10424_v26  ;;  %v5840_v25 = vunpack.c.l.s8.bf16 %v10408_v20  ;;  %v5839_v26 = vunpack.c.h.s8.bf16 %v10407_v18  ;;  %v10469_v18 = vld [vmem:[%s11786_s16 + $0xa98] sm:$0xff] }
 0x315   : > { %v10450_v42 = vcombine.high %v5838_v23, %v5840_v25  ;;  %v10452_v36 = vcombine.high %v5839_v26, %v5841_v28  ;;  %v10451_v41 = vcombine.low %v5839_v26, %v5841_v28  ;;  %v6205_v26 = vunpack.c.h.s8.bf16 %v10469_v18  ;;  %v10470_v28 = vld [vmem:[%s11786_s16 + $0xaa0] sm:$0xff] }
 0x316   : > { %6080 = vmatpush1.bf16.msra.mxu0 %v10421_v33  ;;  %6121 = vmatpush1.bf16.msra.mxu1 %v10423_v38  ;;  %v5844_v33 = vunpack.c.l.s8.bf16 %v10410_v29  ;;  %v5843_v38 = vunpack.c.h.s8.bf16 %v10409_v34  ;;  %v10471_v34 = vld [vmem:[%s11786_s16 + $0xaa8] sm:$0xff] }
 0x317   : > { %6081 = vmatprep.subr.bf16.mxu0 %v10426_v39  ;;  %6122 = vmatprep.subr.bf16.mxu1 %v10428_v40  ;;  %v10461_v39 = vld [vmem:[%s11786_s16 + $0xa58] sm:$0xff]  ;;  %v10449_v40 = vcombine.low %v5838_v23, %v5840_v25  ;;  %v6204_v23 = vunpack.c.l.s8.bf16 %v10469_v18 }
 0x318   : > { %v10454_v47 = vcombine.high %v5842_v32, %v5844_v33  ;;  %v6189_v48 = vunpack.c.h.s8.bf16 %v10461_v39  ;;  %v10453_v55 = vcombine.low %v5842_v32, %v5844_v33  ;;  %v10455_v50 = vcombine.low %v5843_v38, %v5845_v35 }
 0x319   : > { %v6208_v32 = vunpack.c.l.s8.bf16 %v10471_v34  ;;  %v6207_v33 = vunpack.c.h.s8.bf16 %v10470_v28 }
 0x31a   : > { %6082 = vmatpush1.bf16.msra.mxu0 %v10425_v43  ;;  %6123 = vmatpush1.bf16.msra.mxu1 %v10427_v44  ;;  %v10456_v43 = vcombine.high %v5843_v38, %v5845_v35  ;;  %v6186_v44 = vunpack.c.l.s8.bf16 %v10460_v37  ;;  %v6209_v38 = vunpack.c.h.s8.bf16 %v10471_v34 }
 0x31b   : > { %6083 = vmatprep.subr.bf16.mxu0 %v10430_v45  ;;  %6124 = vmatprep.subr.bf16.mxu1 %v10432_v46  ;;  %v6188_v45 = vunpack.c.l.s8.bf16 %v10461_v39  ;;  %v6187_v46 = vunpack.c.h.s8.bf16 %v10460_v37  ;;  %v10473_v37 = vld [vmem:[%s11786_s16 + $0xab8] sm:$0xff] }
 0x31d   : > { %v10485_v62 = vcombine.high %v6186_v44, %v6188_v45  ;;  %v10487_v57 = vcombine.high %v6187_v46, %v6189_v48  ;;  %v10484_v61 = vcombine.low %v6186_v44, %v6188_v45  ;;  %v6212_v44 = vunpack.c.l.s8.bf16 %v10473_v37 }
 0x31e   : > { %6084 = vmatpush1.bf16.msra.mxu0 %v10429_v53  ;;  %6125 = vmatpush1.bf16.msra.mxu1 %v10431_v54  ;;  %v6192_v53 = vunpack.c.l.s8.bf16 %v10463_v49  ;;  %v6191_v54 = vunpack.c.h.s8.bf16 %v10462_v52  ;;  %v10475_v52 = vld [vmem:[%s11786_s16 + $0xac8] sm:$0xff] }
 0x31f   : > { %6085 = vmatprep.subr.bf16.mxu0 %v10434_v59  ;;  %6126 = vmatprep.subr.bf16.mxu1 %v10436_v60  ;;  %v10465_v59 = vld [vmem:[%s11786_s16 + $0xa78] sm:$0xff]  ;;  %v10411_v60 = vcombine.low %v12280_v3, %v12280_v3  ;;  %v10483_v3 = vcombine.high %v12313_v1, %v12313_v1 }
 0x320   : > { %v6196_v4 = vunpack.c.l.s8.bf16 %v10465_v59  ;;  %v6197_v6 = vunpack.c.h.s8.bf16 %v10465_v59  ;;  %v10488_v9 = vcombine.low %v6190_v51, %v6192_v53 }
 0x322   : > { %6086 = vmatpush1.bf16.msra.mxu0 %v10433_v63  ;;  %6127 = vmatpush1.bf16.msra.mxu1 %v10435_v7  ;;  %v10486_v63 = vcombine.low %v6187_v46, %v6189_v48  ;;  %v10489_v7 = vcombine.high %v6190_v51, %v6192_v53  ;;  %v6213_v46 = vunpack.c.h.s8.bf16 %v10473_v37  ;;  %v10474_v48 = vld [vmem:[%s11786_s16 + $0xac0] sm:$0xff]  ;;  %v6216_v51 = vunpack.c.l.s8.bf16 %v10475_v52 }
 0x323   : > { %6087 = vmatprep.subr.bf16.mxu0 %v10438_v0  ;;  %6128 = vmatprep.subr.bf16.mxu1 %v10440_v2  ;;  %v10491_v0 = vcombine.high %v6191_v54, %v6193_v56  ;;  %v6194_v2 = vunpack.c.l.s8.bf16 %v10464_v58  ;;  %v6215_v53 = vunpack.c.h.s8.bf16 %v10474_v48  ;;  %v10477_v58 = vld [vmem:[%s11786_s16 + $0xad8] sm:$0xff] }
 0x325   : > { %v10493_v15 = vcombine.high %v6194_v2, %v6196_v4  ;;  %v10492_v20 = vcombine.low %v6194_v2, %v6196_v4  ;;  %v6221_v4 = vunpack.c.h.s8.bf16 %v10477_v58 }
 0x326   : > { %6088 = vmatpush1.bf16.msra.mxu0 %v10437_v10  ;;  %6129 = vmatpush1.bf16.msra.mxu1 %v10439_v11  ;;  %v10490_v10 = vcombine.low %v6191_v54, %v6193_v56  ;;  %v6198_v11 = vunpack.c.l.s8.bf16 %v10466_v12  ;;  %v6217_v54 = vunpack.c.h.s8.bf16 %v10475_v52 }
 0x327   : > { %6089 = vmatprep.subr.bf16.mxu0 %v10442_v16  ;;  %6130 = vmatprep.subr.bf16.mxu1 %v10444_v17  ;;  %v10495_v16 = vcombine.high %v6195_v5, %v6197_v6  ;;  %v10468_v17 = vld [vmem:[%s11786_s16 + $0xa90] sm:$0xff] }
 0x328   : > { %v6203_v25 = vunpack.c.h.s8.bf16 %v10468_v17  ;;  %v10496_v29 = vcombine.low %v6198_v11, %v6200_v13  ;;  %v10514_v8 = vcombine.low %v6215_v53, %v6217_v54 }
 0x32a   : > { %6090 = vmatpush1.bf16.msra.mxu0 %v10441_v24  ;;  %6131 = vmatpush1.bf16.msra.mxu1 %v10443_v21  ;;  %v10494_v24 = vcombine.low %v6195_v5, %v6197_v6  ;;  %v10497_v21 = vcombine.high %v6198_v11, %v6200_v13  ;;  %v10478_v5 = vld [vmem:[%s11786_s16 + $0xae0] sm:$0xff]  ;;  %v10479_v6 = vld [vmem:[%s11786_s16 + $0xae8] sm:$0xff] }
 0x32b   : > { %6091 = vmatprep.subr.bf16.mxu0 %v10446_v27  ;;  %6132 = vmatprep.subr.bf16.mxu1 %v10448_v22  ;;  %v10499_v27 = vcombine.high %v6199_v14, %v6201_v19  ;;  %v6202_v22 = vunpack.c.l.s8.bf16 %v10468_v17  ;;  %v6225_v11 = vunpack.c.h.s8.bf16 %v10479_v6 }
 0x32d   : > { %v10501_v35 = vcombine.high %v6202_v22, %v6204_v23  ;;  %v10500_v39 = vcombine.low %v6202_v22, %v6204_v23  ;;  %v10531_v23 = vld [vmem:[%s11786_s16 + $0xb00] sm:$0xff] }
 0x32e   : > { %6092 = vmatpush1.bf16.msra.mxu0 %v10445_v30  ;;  %6133 = vmatpush1.bf16.msra.mxu1 %v10447_v31  ;;  %v10498_v30 = vcombine.low %v6199_v14, %v6201_v19  ;;  %v6206_v31 = vunpack.c.l.s8.bf16 %v10470_v28  ;;  %v10480_v19 = vld [vmem:[%s11786_s16 + $0xaf0] sm:$0xff]  ;;  %v6570_v34 = vunpack.c.l.s8.bf16 %v10531_v23 }
 0x32f   : > { %6093 = vmatprep.subr.bf16.mxu0 %v10450_v42  ;;  %6134 = vmatprep.subr.bf16.mxu1 %v10452_v36  ;;  %v10503_v42 = vcombine.high %v6203_v25, %v6205_v26  ;;  %v10472_v36 = vld [vmem:[%s11786_s16 + $0xab0] sm:$0xff] }
 0x330   : > { %v6211_v45 = vunpack.c.h.s8.bf16 %v10472_v36  ;;  %v10504_v49 = vcombine.low %v6206_v31, %v6208_v32 }
 0x332   : > { %6094 = vmatpush1.bf16.msra.mxu0 %v10449_v40  ;;  %6135 = vmatpush1.bf16.msra.mxu1 %v10451_v41  ;;  %v10502_v40 = vcombine.low %v6203_v25, %v6205_v26  ;;  %v10505_v41 = vcombine.high %v6206_v31, %v6208_v32  ;;  %v10532_v25 = vld [vmem:[%s11786_s16 + $0xb08] sm:$0xff] }
 0x333   : > { %6095 = vmatprep.subr.bf16.mxu0 %v10454_v47  ;;  %6136 = vmatprep.subr.bf16.mxu1 %v10456_v43  ;;  %v10507_v47 = vcombine.high %v6207_v33, %v6209_v38  ;;  %v6210_v43 = vunpack.c.l.s8.bf16 %v10472_v36  ;;  %v6573_v31 = vunpack.c.h.s8.bf16 %v10532_v25 }
 0x335   : > { %v10509_v56 = vcombine.high %v6210_v43, %v6212_v44  ;;  %v10508_v59 = vcombine.low %v6210_v43, %v6212_v44  ;;  %v10535_v44 = vld [vmem:[%s11786_s16 + $0xb20] sm:$0xff] }
 0x336   : > { %6096 = vmatpush1.bf16.msra.mxu0 %v10453_v55  ;;  %6137 = vmatpush1.bf16.msra.mxu1 %v10455_v50  ;;  %v10506_v55 = vcombine.low %v6207_v33, %v6209_v38  ;;  %v6214_v50 = vunpack.c.l.s8.bf16 %v10474_v48  ;;  %v10533_v38 = vld [vmem:[%s11786_s16 + $0xb10] sm:$0xff] }
 0x337   : > { %6459 = vmatprep.subr.bf16.mxu0 %v10485_v62  ;;  %6500 = vmatprep.subr.bf16.mxu1 %v10487_v57  ;;  %v10511_v62 = vcombine.high %v6211_v45, %v6213_v46  ;;  %v10476_v57 = vld [vmem:[%s11786_s16 + $0xad0] sm:$0xff] }
 0x338   : > { %v6219_v2 = vunpack.c.h.s8.bf16 %v10476_v57  ;;  %v10512_v12 = vcombine.low %v6214_v50, %v6216_v51 }
 0x339   : > { %6108 = vmatmul.mubr.bf16.vlgmr.msra.gmra.mrb[0].mxu0 %v10411_v60  ;;  %6149 = vmatmul.mubr.bf16.vlgmr.msra.gmra.mrb[0].mxu1 %v10411_v60  ;;  %v10510_v60 = vcombine.low %v6211_v45, %v6213_v46  ;;  %v10536_v45 = vld [vmem:[%s11786_s16 + $0xb28] sm:$0xff]  ;;  %v10482_v46 = vcombine.low %v12313_v1, %v12313_v1 }
 0x33a   : > { %6460 = vmatpush1.bf16.msra.mxu0 %v10484_v61  ;;  %6501 = vmatpush1.bf16.msra.mxu1 %v10486_v63  ;;  %v10513_v61 = vcombine.high %v6214_v50, %v6216_v51  ;;  %v10515_v63 = vcombine.high %v6215_v53, %v6217_v54  ;;  %v10519_v14 = vcombine.high %v6219_v2, %v6221_v4  ;;  %v6580_v50 = vunpack.c.l.s8.bf16 %v10536_v45 }
 0x33b   : > { %6461 = vmatprep.subr.bf16.mxu0 %v10489_v7  ;;  %6502 = vmatprep.subr.bf16.mxu1 %v10491_v0  ;;  %v6218_v7 = vunpack.c.l.s8.bf16 %v10476_v57  ;;  %v6220_v0 = vunpack.c.l.s8.bf16 %v10477_v58  ;;  %v10518_v17 = vcombine.low %v6219_v2, %v6221_v4  ;;  %v6579_v51 = vunpack.c.h.s8.bf16 %v10535_v44  ;;  %v10538_v57 = vld [vmem:[%s11786_s16 + $0xb38] sm:$0xff]  ;;  %v10539_v4 = vld [vmem:[%s11786_s16 + $0xb40] sm:$0xff] }
 0x33c   : > { %10528 = vmatprep.mubr.msk.bf16.mxu0 %vm772_vm0, %v10483_v3  ;;  %10529 = vmatprep.mubr.msk.bf16.mxu1 %vm772_vm0, %v10483_v3  ;;  %v6222_v3 = vunpack.c.l.s8.bf16 %v10478_v5  ;;  %v6581_v53 = vunpack.c.h.s8.bf16 %v10536_v45  ;;  %v6585_v2 = vunpack.c.h.s8.bf16 %v10538_v57 }
 0x33d   : > { %v10517_v13 = vcombine.high %v6218_v7, %v6220_v0 }
 0x33e   : > { %6462 = vmatpush1.bf16.msra.mxu0 %v10488_v9  ;;  %6503 = vmatpush1.bf16.msra.mxu1 %v10490_v10  ;;  %v6224_v9 = vunpack.c.l.s8.bf16 %v10479_v6  ;;  %v6223_v10 = vunpack.c.h.s8.bf16 %v10478_v5  ;;  %v10540_v5 = vld [vmem:[%s11786_s16 + $0xb48] sm:$0xff] }
 0x33f   : > { %6463 = vmatprep.subr.bf16.mxu0 %v10493_v15  ;;  %6504 = vmatprep.subr.bf16.mxu1 %v10495_v16  ;;  %v10481_v15 = vld [vmem:[%s11786_s16 + $0xaf8] sm:$0xff]  ;;  %v10516_v16 = vcombine.low %v6218_v7, %v6220_v0  ;;  %v6584_v7 = vunpack.c.l.s8.bf16 %v10538_v57 }
 0x340   : > { %v10521_v18 = vcombine.high %v6222_v3, %v6224_v9  ;;  %v6229_v22 = vunpack.c.h.s8.bf16 %v10481_v15  ;;  %v10520_v26 = vcombine.low %v6222_v3, %v6224_v9  ;;  %v10522_v28 = vcombine.low %v6223_v10, %v6225_v11 }
 0x341   : > { %v6588_v3 = vunpack.c.l.s8.bf16 %v10540_v5  ;;  %v6587_v9 = vunpack.c.h.s8.bf16 %v10539_v4 }
 0x342   : > { %6464 = vmatpush1.bf16.msra.mxu0 %v10492_v20  ;;  %6505 = vmatpush1.bf16.msra.mxu1 %v10494_v24  ;;  %v10523_v20 = vcombine.high %v6223_v10, %v6225_v11  ;;  %v6226_v24 = vunpack.c.l.s8.bf16 %v10480_v19  ;;  %v6589_v10 = vunpack.c.h.s8.bf16 %v10540_v5 }
 0x343   : > { %6465 = vmatprep.subr.bf16.mxu0 %v10497_v21  ;;  %6506 = vmatprep.subr.bf16.mxu1 %v10499_v27  ;;  %v6228_v21 = vunpack.c.l.s8.bf16 %v10481_v15  ;;  %v6227_v27 = vunpack.c.h.s8.bf16 %v10480_v19  ;;  %v10542_v19 = vld [vmem:[%s11786_s16 + $0xb58] sm:$0xff] }
 0x345   : > { %v10525_v32 = vcombine.high %v6226_v24, %v6228_v21  ;;  %v10527_v33 = vcombine.high %v6227_v27, %v6229_v22  ;;  %v10526_v36 = vcombine.low %v6227_v27, %v6229_v22  ;;  %v6593_v27 = vunpack.c.h.s8.bf16 %v10542_v19  ;;  %v10543_v22 = vld [vmem:[%s11786_s16 + $0xb60] sm:$0xff] }
 0x346   : > { %6466 = vmatpush1.bf16.msra.mxu0 %v10496_v29  ;;  %6507 = vmatpush1.bf16.msra.mxu1 %v10498_v30  ;;  %v6572_v29 = vunpack.c.l.s8.bf16 %v10532_v25  ;;  %v6571_v30 = vunpack.c.h.s8.bf16 %v10531_v23  ;;  %v10544_v23 = vld [vmem:[%s11786_s16 + $0xb68] sm:$0xff] }
 0x347   : > { %6467 = vmatprep.subr.bf16.mxu0 %v10501_v35  ;;  %6508 = vmatprep.subr.bf16.mxu1 %v10503_v42  ;;  %v10534_v35 = vld [vmem:[%s11786_s16 + $0xb18] sm:$0xff]  ;;  %v10524_v42 = vcombine.low %v6226_v24, %v6228_v21  ;;  %v6592_v24 = vunpack.c.l.s8.bf16 %v10542_v19 }
 0x348   : > { %v10556_v37 = vcombine.high %v6570_v34, %v6572_v29  ;;  %v6577_v43 = vunpack.c.h.s8.bf16 %v10534_v35  ;;  %v10555_v48 = vcombine.low %v6570_v34, %v6572_v29  ;;  %v10557_v52 = vcombine.low %v6571_v30, %v6573_v31 }
 0x349   : > { %v6596_v34 = vunpack.c.l.s8.bf16 %v10544_v23  ;;  %v6595_v29 = vunpack.c.h.s8.bf16 %v10543_v22 }
 0x34a   : > { %6468 = vmatpush1.bf16.msra.mxu0 %v10500_v39  ;;  %6509 = vmatpush1.bf16.msra.mxu1 %v10502_v40  ;;  %v10558_v39 = vcombine.high %v6571_v30, %v6573_v31  ;;  %v6574_v40 = vunpack.c.l.s8.bf16 %v10533_v38  ;;  %v6597_v30 = vunpack.c.h.s8.bf16 %v10544_v23 }
 0x34b   : > { %6469 = vmatprep.subr.bf16.mxu0 %v10505_v41  ;;  %6510 = vmatprep.subr.bf16.mxu1 %v10507_v47  ;;  %v6576_v41 = vunpack.c.l.s8.bf16 %v10534_v35  ;;  %v6575_v47 = vunpack.c.h.s8.bf16 %v10533_v38  ;;  %v10546_v38 = vld [vmem:[%s11786_s16 + $0xb78] sm:$0xff] }
 0x34d   : > { %v10560_v54 = vcombine.high %v6574_v40, %v6576_v41  ;;  %v10559_v58 = vcombine.low %v6574_v40, %v6576_v41  ;;  %v6600_v40 = vunpack.c.l.s8.bf16 %v10546_v38 }
 0x34e   : > { %6470 = vmatpush1.bf16.msra.mxu0 %v10504_v49  ;;  %6511 = vmatpush1.bf16.msra.mxu1 %v10506_v55  ;;  %v12346_v49 = vld [vmem:[%s12591_s0 + $0x80] sm:$0xff]  ;;  %v6578_v55 = vunpack.c.l.s8.bf16 %v10535_v44  ;;  %v10548_v44 = vld [vmem:[%s11786_s16 + $0xb88] sm:$0xff] }
 0x34f   : > { %6471 = vmatprep.subr.bf16.mxu0 %v10509_v56  ;;  %6512 = vmatprep.subr.bf16.mxu1 %v10511_v62  ;;  %v10562_v56 = vcombine.high %v6575_v47, %v6577_v43  ;;  %v10537_v62 = vld [vmem:[%s11786_s16 + $0xb30] sm:$0xff]  ;;  %v10554_v1 = vcombine.high %v12346_v49, %v12346_v49 }
 0x350   : > { %v6583_v0 = vunpack.c.h.s8.bf16 %v10537_v62  ;;  %v10563_v6 = vcombine.low %v6578_v55, %v6580_v50 }
 0x352   : > { %6472 = vmatpush1.bf16.msra.mxu0 %v10508_v59  ;;  %6513 = vmatpush1.bf16.msra.mxu1 %v10510_v60  ;;  %v10561_v59 = vcombine.low %v6575_v47, %v6577_v43  ;;  %v10564_v60 = vcombine.high %v6578_v55, %v6580_v50  ;;  %v6601_v47 = vunpack.c.h.s8.bf16 %v10546_v38  ;;  %v10547_v43 = vld [vmem:[%s11786_s16 + $0xb80] sm:$0xff]  ;;  %v6605_v50 = vunpack.c.h.s8.bf16 %v10548_v44 }
 0x353   : > { %6473 = vmatprep.subr.bf16.mxu0 %v10513_v61  ;;  %6514 = vmatprep.subr.bf16.mxu1 %v10515_v63  ;;  %v10566_v61 = vcombine.high %v6579_v51, %v6581_v53  ;;  %v6582_v63 = vunpack.c.l.s8.bf16 %v10537_v62  ;;  %v6603_v55 = vunpack.c.h.s8.bf16 %v10547_v43  ;;  %v12379_v38 = vld [vmem:[%s12591_s0 + $0x88] sm:$0xff] }
 0x355   : > { %v10568_v11 = vcombine.high %v6582_v63, %v6584_v7  ;;  %v10567_v15 = vcombine.low %v6582_v63, %v6584_v7  ;;  %v10551_v7 = vld [vmem:[%s11786_s16 + $0xba0] sm:$0xff] }
 0x356   : > { %6474 = vmatpush1.bf16.msra.mxu0 %v10512_v12  ;;  %6515 = vmatpush1.bf16.msra.mxu1 %v10514_v8  ;;  %v10565_v12 = vcombine.low %v6579_v51, %v6581_v53  ;;  %v6586_v8 = vunpack.c.l.s8.bf16 %v10539_v4  ;;  %v10589_v4 = vcombine.low %v6603_v55, %v6605_v50  ;;  %v6610_v5 = vunpack.c.l.s8.bf16 %v10551_v7 }
 0x357   : > { %6475 = vmatprep.subr.bf16.mxu0 %v10517_v13  ;;  %6516 = vmatprep.subr.bf16.mxu1 %v10519_v14  ;;  %v10570_v13 = vcombine.high %v6583_v0, %v6585_v2  ;;  %v10541_v14 = vld [vmem:[%s11786_s16 + $0xb50] sm:$0xff] }
 0x358   : > { %v6591_v21 = vunpack.c.h.s8.bf16 %v10541_v14  ;;  %v10571_v25 = vcombine.low %v6586_v8, %v6588_v3 }
 0x35a   : > { %6476 = vmatpush1.bf16.msra.mxu0 %v10516_v16  ;;  %6517 = vmatpush1.bf16.msra.mxu1 %v10518_v17  ;;  %v10569_v16 = vcombine.low %v6583_v0, %v6585_v2  ;;  %v10572_v17 = vcombine.high %v6586_v8, %v6588_v3  ;;  %v10552_v0 = vld [vmem:[%s11786_s16 + $0xba8] sm:$0xff] }
 0x35b   : > { %6477 = vmatprep.subr.bf16.mxu0 %v10521_v18  ;;  %6518 = vmatprep.subr.bf16.mxu1 %v10523_v20  ;;  %v10574_v18 = vcombine.high %v6587_v9, %v6589_v10  ;;  %v6590_v20 = vunpack.c.l.s8.bf16 %v10541_v14  ;;  %v6613_v8 = vunpack.c.h.s8.bf16 %v10552_v0 }
 0x35d   : > { %v10576_v31 = vcombine.high %v6590_v20, %v6592_v24  ;;  %v10575_v35 = vcombine.low %v6590_v20, %v6592_v24  ;;  %v10604_v24 = vld [vmem:[%s11786_s16 + $0xbc0] sm:$0xff] }
 0x35e   : > { %6478 = vmatpush1.bf16.msra.mxu0 %v10520_v26  ;;  %6519 = vmatpush1.bf16.msra.mxu1 %v10522_v28  ;;  %v10573_v26 = vcombine.low %v6587_v9, %v6589_v10  ;;  %v6594_v28 = vunpack.c.l.s8.bf16 %v10543_v22  ;;  %v10602_v10 = vld [vmem:[%s11786_s16 + $0xbb0] sm:$0xff]  ;;  %v6958_v23 = vunpack.c.l.s8.bf16 %v10604_v24 }
 0x35f   : > { %6479 = vmatprep.subr.bf16.mxu0 %v10525_v32  ;;  %6520 = vmatprep.subr.bf16.mxu1 %v10527_v33  ;;  %v10578_v32 = vcombine.high %v6591_v21, %v6593_v27  ;;  %v10545_v33 = vld [vmem:[%s11786_s16 + $0xb70] sm:$0xff] }
 0x360   : > { %v6599_v41 = vunpack.c.h.s8.bf16 %v10545_v33  ;;  %v10579_v45 = vcombine.low %v6594_v28, %v6596_v34 }
 0x362   : > { %6480 = vmatpush1.bf16.msra.mxu0 %v10524_v42  ;;  %6521 = vmatpush1.bf16.msra.mxu1 %v10526_v36  ;;  %v10577_v42 = vcombine.low %v6591_v21, %v6593_v27  ;;  %v10580_v36 = vcombine.high %v6594_v28, %v6596_v34  ;;  %v10586_v53 = vcombine.high %v6599_v41, %v6601_v47  ;;  %v10605_v21 = vld [vmem:[%s11786_s16 + $0xbc8] sm:$0xff] }
 0x363   : > { %6843 = vmatprep.subr.bf16.mxu0 %v10556_v37  ;;  %6884 = vmatprep.subr.bf16.mxu1 %v10558_v39  ;;  %v10582_v37 = vcombine.high %v6595_v29, %v6597_v30  ;;  %v6598_v39 = vunpack.c.l.s8.bf16 %v10545_v33  ;;  %v10585_v57 = vcombine.low %v6599_v41, %v6601_v47  ;;  %v6961_v28 = vunpack.c.h.s8.bf16 %v10605_v21  ;;  %v10608_v47 = vld [vmem:[%s11786_s16 + $0xbe0] sm:$0xff] }
 0x365   : > { %6492 = vmatmul.mubr.bf16.vlgmr.msra.gmra.mrb[0].mxu0 %v10482_v46  ;;  %6533 = vmatmul.mubr.bf16.vlgmr.msra.gmra.mrb[0].mxu1 %v10482_v46  ;;  %v10581_v46 = vcombine.low %v6595_v29, %v6597_v30  ;;  %v10584_v51 = vcombine.high %v6598_v39, %v6600_v40  ;;  %v10583_v62 = vcombine.low %v6598_v39, %v6600_v40  ;;  %v10606_v30 = vld [vmem:[%s11786_s16 + $0xbd0] sm:$0xff] }
 0x366   : > { %6844 = vmatpush1.bf16.msra.mxu0 %v10555_v48  ;;  %6885 = vmatpush1.bf16.msra.mxu1 %v10557_v52  ;;  %v6602_v48 = vunpack.c.l.s8.bf16 %v10547_v43  ;;  %v6604_v52 = vunpack.c.l.s8.bf16 %v10548_v44  ;;  %v6963_v40 = vunpack.c.h.s8.bf16 %v10606_v30  ;;  %v10609_v43 = vld [vmem:[%s11786_s16 + $0xbe8] sm:$0xff] }
 0x367   : > { %6845 = vmatprep.subr.bf16.mxu0 %v10560_v54  ;;  %6886 = vmatprep.subr.bf16.mxu1 %v10562_v56  ;;  %v10549_v54 = vld [vmem:[%s11786_s16 + $0xb90] sm:$0xff]  ;;  %v10550_v56 = vld [vmem:[%s11786_s16 + $0xb98] sm:$0xff] }
 0x368   : > { %10599 = vmatprep.mubr.msk.bf16.mxu0 %vm772_vm0, %v10554_v1  ;;  %10600 = vmatprep.mubr.msk.bf16.mxu1 %vm772_vm0, %v10554_v1  ;;  %v10588_v1 = vcombine.high %v6602_v48, %v6604_v52  ;;  %v6609_v63 = vunpack.c.h.s8.bf16 %v10550_v56  ;;  %v10587_v2 = vcombine.low %v6602_v48, %v6604_v52  ;;  %v6968_v48 = vunpack.c.l.s8.bf16 %v10609_v43 }
 0x369   : > { %v6967_v52 = vunpack.c.h.s8.bf16 %v10608_v47 }
 0x36a   : > { %6846 = vmatpush1.bf16.msra.mxu0 %v10559_v58  ;;  %6887 = vmatpush1.bf16.msra.mxu1 %v10561_v59  ;;  %v10590_v58 = vcombine.high %v6603_v55, %v6605_v50  ;;  %v6606_v59 = vunpack.c.l.s8.bf16 %v10549_v54  ;;  %v6969_v55 = vunpack.c.h.s8.bf16 %v10609_v43 }
 0x36b   : > { %6847 = vmatprep.subr.bf16.mxu0 %v10564_v60  ;;  %6888 = vmatprep.subr.bf16.mxu1 %v10566_v61  ;;  %v6608_v60 = vunpack.c.l.s8.bf16 %v10550_v56  ;;  %v6607_v61 = vunpack.c.h.s8.bf16 %v10549_v54  ;;  %v10611_v54 = vld [vmem:[%s11786_s16 + $0xbf8] sm:$0xff] }
 0x36d   : > { %v10592_v3 = vcombine.high %v6606_v59, %v6608_v60  ;;  %v10594_v9 = vcombine.high %v6607_v61, %v6609_v63  ;;  %v10593_v14 = vcombine.low %v6607_v61, %v6609_v63  ;;  %v6973_v61 = vunpack.c.h.s8.bf16 %v10611_v54  ;;  %v10612_v63 = vld [vmem:[%s11786_s16 + $0xc00] sm:$0xff] }
 0x36e   : > { %6848 = vmatpush1.bf16.msra.mxu0 %v10563_v6  ;;  %6889 = vmatpush1.bf16.msra.mxu1 %v10565_v12  ;;  %v6612_v6 = vunpack.c.l.s8.bf16 %v10552_v0  ;;  %v6611_v12 = vunpack.c.h.s8.bf16 %v10551_v7  ;;  %v10613_v7 = vld [vmem:[%s11786_s16 + $0xc08] sm:$0xff] }
 0x36f   : > { %6849 = vmatprep.subr.bf16.mxu0 %v10568_v11  ;;  %6890 = vmatprep.subr.bf16.mxu1 %v10570_v13  ;;  %v10603_v11 = vld [vmem:[%s11786_s16 + $0xbb8] sm:$0xff]  ;;  %v10591_v13 = vcombine.low %v6606_v59, %v6608_v60  ;;  %v6972_v59 = vunpack.c.l.s8.bf16 %v10611_v54 }
 0x370   : > { %v10596_v19 = vcombine.high %v6610_v5, %v6612_v6  ;;  %v6957_v20 = vunpack.c.h.s8.bf16 %v10603_v11  ;;  %v10595_v27 = vcombine.low %v6610_v5, %v6612_v6  ;;  %v10597_v22 = vcombine.low %v6611_v12, %v6613_v8 }
 0x371   : > { %v6976_v5 = vunpack.c.l.s8.bf16 %v10613_v7  ;;  %v6975_v6 = vunpack.c.h.s8.bf16 %v10612_v63 }
 0x372   : > { %6850 = vmatpush1.bf16.msra.mxu0 %v10567_v15  ;;  %6891 = vmatpush1.bf16.msra.mxu1 %v10569_v16  ;;  %v10598_v15 = vcombine.high %v6611_v12, %v6613_v8  ;;  %v6954_v16 = vunpack.c.l.s8.bf16 %v10602_v10  ;;  %v6977_v12 = vunpack.c.h.s8.bf16 %v10613_v7 }
 0x373   : > { %6851 = vmatprep.subr.bf16.mxu0 %v10572_v17  ;;  %6892 = vmatprep.subr.bf16.mxu1 %v10574_v18  ;;  %v6956_v17 = vunpack.c.l.s8.bf16 %v10603_v11  ;;  %v6955_v18 = vunpack.c.h.s8.bf16 %v10602_v10  ;;  %v10615_v10 = vld [vmem:[%s11786_s16 + $0xc18] sm:$0xff] }
 0x375   : > { %v10627_v34 = vcombine.high %v6954_v16, %v6956_v17  ;;  %v10629_v29 = vcombine.high %v6955_v18, %v6957_v20  ;;  %v10626_v33 = vcombine.low %v6954_v16, %v6956_v17  ;;  %v6980_v16 = vunpack.c.l.s8.bf16 %v10615_v10 }
 0x376   : > { %6852 = vmatpush1.bf16.msra.mxu0 %v10571_v25  ;;  %6893 = vmatpush1.bf16.msra.mxu1 %v10573_v26  ;;  %v6960_v25 = vunpack.c.l.s8.bf16 %v10605_v21  ;;  %v6959_v26 = vunpack.c.h.s8.bf16 %v10604_v24  ;;  %v10617_v24 = vld [vmem:[%s11786_s16 + $0xc28] sm:$0xff] }
 0x377   : > { %6853 = vmatprep.subr.bf16.mxu0 %v10576_v31  ;;  %6894 = vmatprep.subr.bf16.mxu1 %v10578_v32  ;;  %v10607_v31 = vld [vmem:[%s11786_s16 + $0xbd8] sm:$0xff]  ;;  %v10553_v32 = vcombine.low %v12346_v49, %v12346_v49  ;;  %v10625_v49 = vcombine.high %v12379_v38, %v12379_v38 }
 0x378   : > { %v6964_v39 = vunpack.c.l.s8.bf16 %v10607_v31  ;;  %v6965_v41 = vunpack.c.h.s8.bf16 %v10607_v31  ;;  %v10630_v44 = vcombine.low %v6958_v23, %v6960_v25 }
 0x37a   : > { %6854 = vmatpush1.bf16.msra.mxu0 %v10575_v35  ;;  %6895 = vmatpush1.bf16.msra.mxu1 %v10577_v42  ;;  %v10628_v35 = vcombine.low %v6955_v18, %v6957_v20  ;;  %v10631_v42 = vcombine.high %v6958_v23, %v6960_v25  ;;  %v6981_v18 = vunpack.c.h.s8.bf16 %v10615_v10  ;;  %v10616_v20 = vld [vmem:[%s11786_s16 + $0xc20] sm:$0xff]  ;;  %v6984_v23 = vunpack.c.l.s8.bf16 %v10617_v24 }
 0x37b   : > { %6855 = vmatprep.subr.bf16.mxu0 %v10580_v36  ;;  %6896 = vmatprep.subr.bf16.mxu1 %v10582_v37  ;;  %v10633_v36 = vcombine.high %v6959_v26, %v6961_v28  ;;  %v6962_v37 = vunpack.c.l.s8.bf16 %v10606_v30  ;;  %v6983_v25 = vunpack.c.h.s8.bf16 %v10616_v20  ;;  %v10619_v30 = vld [vmem:[%s11786_s16 + $0xc38] sm:$0xff] }
 0x37d   : > { %v10635_v50 = vcombine.high %v6962_v37, %v6964_v39  ;;  %v10634_v56 = vcombine.low %v6962_v37, %v6964_v39  ;;  %v6989_v39 = vunpack.c.h.s8.bf16 %v10619_v30 }
 0x37e   : > { %6856 = vmatpush1.bf16.msra.mxu0 %v10579_v45  ;;  %6897 = vmatpush1.bf16.msra.mxu1 %v10581_v46  ;;  %v10632_v45 = vcombine.low %v6959_v26, %v6961_v28  ;;  %v6966_v46 = vunpack.c.l.s8.bf16 %v10608_v47  ;;  %v6985_v26 = vunpack.c.h.s8.bf16 %v10617_v24 }
 0x37f   : > { %6857 = vmatprep.subr.bf16.mxu0 %v10584_v51  ;;  %6898 = vmatprep.subr.bf16.mxu1 %v10586_v53  ;;  %v10637_v51 = vcombine.high %v6963_v40, %v6965_v41  ;;  %v10610_v53 = vld [vmem:[%s11786_s16 + $0xbf0] sm:$0xff] }
 0x380   : > { %v6971_v60 = vunpack.c.h.s8.bf16 %v10610_v53  ;;  %v10638_v0 = vcombine.low %v6966_v46, %v6968_v48  ;;  %v10656_v43 = vcombine.low %v6983_v25, %v6985_v26 }
 0x382   : > { %6858 = vmatpush1.bf16.msra.mxu0 %v10583_v62  ;;  %6899 = vmatpush1.bf16.msra.mxu1 %v10585_v57  ;;  %v10636_v62 = vcombine.low %v6963_v40, %v6965_v41  ;;  %v10639_v57 = vcombine.high %v6966_v46, %v6968_v48  ;;  %v10620_v40 = vld [vmem:[%s11786_s16 + $0xc40] sm:$0xff]  ;;  %v10621_v41 = vld [vmem:[%s11786_s16 + $0xc48] sm:$0xff] }
 0x383   : > { %6859 = vmatprep.subr.bf16.mxu0 %v10588_v1  ;;  %6900 = vmatprep.subr.bf16.mxu1 %v10590_v58  ;;  %v10641_v1 = vcombine.high %v6967_v52, %v6969_v55  ;;  %v6970_v58 = vunpack.c.l.s8.bf16 %v10610_v53  ;;  %v6993_v46 = vunpack.c.h.s8.bf16 %v10621_v41 }
 0x385   : > { %v10643_v8 = vcombine.high %v6970_v58, %v6972_v59  ;;  %v10642_v11 = vcombine.low %v6970_v58, %v6972_v59  ;;  %v10673_v59 = vld [vmem:[%s11786_s16 + $0xc60] sm:$0xff] }
 0x386   : > { %6860 = vmatpush1.bf16.msra.mxu0 %v10587_v2  ;;  %6901 = vmatpush1.bf16.msra.mxu1 %v10589_v4  ;;  %v10640_v2 = vcombine.low %v6967_v52, %v6969_v55  ;;  %v6974_v4 = vunpack.c.l.s8.bf16 %v10612_v63  ;;  %v10622_v55 = vld [vmem:[%s11786_s16 + $0xc50] sm:$0xff]  ;;  %v7338_v7 = vunpack.c.l.s8.bf16 %v10673_v59 }
 0x387   : > { %6861 = vmatprep.subr.bf16.mxu0 %v10592_v3  ;;  %6902 = vmatprep.subr.bf16.mxu1 %v10594_v9  ;;  %v10645_v3 = vcombine.high %v6971_v60, %v6973_v61  ;;  %v10614_v9 = vld [vmem:[%s11786_s16 + $0xc10] sm:$0xff] }
 0x388   : > { %v6979_v17 = vunpack.c.h.s8.bf16 %v10614_v9  ;;  %v10646_v21 = vcombine.low %v6974_v4, %v6976_v5 }
 0x38a   : > { %6862 = vmatpush1.bf16.msra.mxu0 %v10591_v13  ;;  %6903 = vmatpush1.bf16.msra.mxu1 %v10593_v14  ;;  %v10644_v13 = vcombine.low %v6971_v60, %v6973_v61  ;;  %v10647_v14 = vcombine.high %v6974_v4, %v6976_v5  ;;  %v10674_v60 = vld [vmem:[%s11786_s16 + $0xc68] sm:$0xff] }
 0x38b   : > { %6863 = vmatprep.subr.bf16.mxu0 %v10596_v19  ;;  %6904 = vmatprep.subr.bf16.mxu1 %v10598_v15  ;;  %v10649_v19 = vcombine.high %v6975_v6, %v6977_v12  ;;  %v6978_v15 = vunpack.c.l.s8.bf16 %v10614_v9  ;;  %v7341_v4 = vunpack.c.h.s8.bf16 %v10674_v60 }
 0x38d   : > { %v10651_v28 = vcombine.high %v6978_v15, %v6980_v16  ;;  %v10650_v31 = vcombine.low %v6978_v15, %v6980_v16  ;;  %v10677_v16 = vld [vmem:[%s11786_s16 + $0xc80] sm:$0xff] }
 0x38e   : > { %6864 = vmatpush1.bf16.msra.mxu0 %v10595_v27  ;;  %6905 = vmatpush1.bf16.msra.mxu1 %v10597_v22  ;;  %v10648_v27 = vcombine.low %v6975_v6, %v6977_v12  ;;  %v6982_v22 = vunpack.c.l.s8.bf16 %v10616_v20  ;;  %v10675_v12 = vld [vmem:[%s11786_s16 + $0xc70] sm:$0xff] }
 0x38f   : > { %7227 = vmatprep.subr.bf16.mxu0 %v10627_v34  ;;  %7268 = vmatprep.subr.bf16.mxu1 %v10629_v29  ;;  %v10653_v34 = vcombine.high %v6979_v17, %v6981_v18  ;;  %v10618_v29 = vld [vmem:[%s11786_s16 + $0xc30] sm:$0xff] }
 0x390   : > { %v6987_v37 = vunpack.c.h.s8.bf16 %v10618_v29  ;;  %v10654_v47 = vcombine.low %v6982_v22, %v6984_v23 }
 0x391   : > { %6876 = vmatmul.mubr.bf16.vlgmr.msra.gmra.mrb[0].mxu0 %v10553_v32  ;;  %6917 = vmatmul.mubr.bf16.vlgmr.msra.gmra.mrb[0].mxu1 %v10553_v32  ;;  %v10652_v32 = vcombine.low %v6979_v17, %v6981_v18  ;;  %v10678_v17 = vld [vmem:[%s11786_s16 + $0xc88] sm:$0xff]  ;;  %v10624_v18 = vcombine.low %v12379_v38, %v12379_v38 }
 0x392   : > { %7228 = vmatpush1.bf16.msra.mxu0 %v10626_v33  ;;  %7269 = vmatpush1.bf16.msra.mxu1 %v10628_v35  ;;  %v10655_v33 = vcombine.high %v6982_v22, %v6984_v23  ;;  %v10657_v35 = vcombine.high %v6983_v25, %v6985_v26  ;;  %v10661_v52 = vcombine.high %v6987_v37, %v6989_v39  ;;  %v7348_v22 = vunpack.c.l.s8.bf16 %v10678_v17 }
 0x393   : > { %7229 = vmatprep.subr.bf16.mxu0 %v10631_v42  ;;  %7270 = vmatprep.subr.bf16.mxu1 %v10633_v36  ;;  %v6986_v42 = vunpack.c.l.s8.bf16 %v10618_v29  ;;  %v6988_v36 = vunpack.c.l.s8.bf16 %v10619_v30  ;;  %v10660_v53 = vcombine.low %v6987_v37, %v6989_v39  ;;  %v7347_v23 = vunpack.c.h.s8.bf16 %v10677_v16  ;;  %v10680_v29 = vld [vmem:[%s11786_s16 + $0xc98] sm:$0xff]  ;;  %v10681_v39 = vld [vmem:[%s11786_s16 + $0xca0] sm:$0xff] }
 0x394   : > { %10670 = vmatprep.mubr.msk.bf16.mxu0 %vm772_vm0, %v10625_v49  ;;  %10671 = vmatprep.mubr.msk.bf16.mxu1 %vm772_vm0, %v10625_v49  ;;  %v6990_v49 = vunpack.c.l.s8.bf16 %v10620_v40  ;;  %v7349_v25 = vunpack.c.h.s8.bf16 %v10678_v17  ;;  %v7353_v37 = vunpack.c.h.s8.bf16 %v10680_v29 }
 0x395   : > { %v10659_v48 = vcombine.high %v6986_v42, %v6988_v36 }
 0x396   : > { %7230 = vmatpush1.bf16.msra.mxu0 %v10630_v44  ;;  %7271 = vmatpush1.bf16.msra.mxu1 %v10632_v45  ;;  %v6992_v44 = vunpack.c.l.s8.bf16 %v10621_v41  ;;  %v6991_v45 = vunpack.c.h.s8.bf16 %v10620_v40  ;;  %v10682_v40 = vld [vmem:[%s11786_s16 + $0xca8] sm:$0xff] }
 0x397   : > { %7231 = vmatprep.subr.bf16.mxu0 %v10635_v50  ;;  %7272 = vmatprep.subr.bf16.mxu1 %v10637_v51  ;;  %v10623_v50 = vld [vmem:[%s11786_s16 + $0xc58] sm:$0xff]  ;;  %v10658_v51 = vcombine.low %v6986_v42, %v6988_v36  ;;  %v7352_v42 = vunpack.c.l.s8.bf16 %v10680_v29 }
 0x398   : > { %v10663_v54 = vcombine.high %v6990_v49, %v6992_v44  ;;  %v6997_v58 = vunpack.c.h.s8.bf16 %v10623_v50  ;;  %v10662_v61 = vcombine.low %v6990_v49, %v6992_v44  ;;  %v10664_v63 = vcombine.low %v6991_v45, %v6993_v46 }
 0x399   : > { %v7356_v49 = vunpack.c.l.s8.bf16 %v10682_v40  ;;  %v7355_v44 = vunpack.c.h.s8.bf16 %v10681_v39 }
 0x39a   : > { %7232 = vmatpush1.bf16.msra.mxu0 %v10634_v56  ;;  %7273 = vmatpush1.bf16.msra.mxu1 %v10636_v62  ;;  %v10665_v56 = vcombine.high %v6991_v45, %v6993_v46  ;;  %v6994_v62 = vunpack.c.l.s8.bf16 %v10622_v55  ;;  %v7357_v45 = vunpack.c.h.s8.bf16 %v10682_v40 }
 0x39b   : > { %7233 = vmatprep.subr.bf16.mxu0 %v10639_v57  ;;  %7274 = vmatprep.subr.bf16.mxu1 %v10641_v1  ;;  %v6996_v57 = vunpack.c.l.s8.bf16 %v10623_v50  ;;  %v6995_v1 = vunpack.c.h.s8.bf16 %v10622_v55  ;;  %v10684_v55 = vld [vmem:[%s11786_s16 + $0xcb8] sm:$0xff] }
 0x39d   : > { %v10667_v5 = vcombine.high %v6994_v62, %v6996_v57  ;;  %v10669_v6 = vcombine.high %v6995_v1, %v6997_v58  ;;  %v10668_v9 = vcombine.low %v6995_v1, %v6997_v58  ;;  %v7361_v1 = vunpack.c.h.s8.bf16 %v10684_v55  ;;  %v10685_v58 = vld [vmem:[%s11786_s16 + $0xcc0] sm:$0xff] }
 0x39e   : > { %7234 = vmatpush1.bf16.msra.mxu0 %v10638_v0  ;;  %7275 = vmatpush1.bf16.msra.mxu1 %v10640_v2  ;;  %v7340_v0 = vunpack.c.l.s8.bf16 %v10674_v60  ;;  %v7339_v2 = vunpack.c.h.s8.bf16 %v10673_v59  ;;  %v10686_v59 = vld [vmem:[%s11786_s16 + $0xcc8] sm:$0xff] }
 0x39f   : > { %7235 = vmatprep.subr.bf16.mxu0 %v10643_v8  ;;  %7276 = vmatprep.subr.bf16.mxu1 %v10645_v3  ;;  %v10676_v8 = vld [vmem:[%s11786_s16 + $0xc78] sm:$0xff]  ;;  %v10666_v3 = vcombine.low %v6994_v62, %v6996_v57  ;;  %v7360_v62 = vunpack.c.l.s8.bf16 %v10684_v55 }
 0x3a0   : > { %v10698_v10 = vcombine.high %v7338_v7, %v7340_v0  ;;  %v7345_v15 = vunpack.c.h.s8.bf16 %v10676_v8  ;;  %v10697_v20 = vcombine.low %v7338_v7, %v7340_v0  ;;  %v10699_v24 = vcombine.low %v7339_v2, %v7341_v4 }
 0x3a1   : > { %v7364_v7 = vunpack.c.l.s8.bf16 %v10686_v59  ;;  %v7363_v0 = vunpack.c.h.s8.bf16 %v10685_v58 }
 0x3a2   : > { %7236 = vmatpush1.bf16.msra.mxu0 %v10642_v11  ;;  %7277 = vmatpush1.bf16.msra.mxu1 %v10644_v13  ;;  %v10700_v11 = vcombine.high %v7339_v2, %v7341_v4  ;;  %v7342_v13 = vunpack.c.l.s8.bf16 %v10675_v12  ;;  %v7365_v2 = vunpack.c.h.s8.bf16 %v10686_v59 }
 0x3a3   : > { %7237 = vmatprep.subr.bf16.mxu0 %v10647_v14  ;;  %7278 = vmatprep.subr.bf16.mxu1 %v10649_v19  ;;  %v7344_v14 = vunpack.c.l.s8.bf16 %v10676_v8  ;;  %v7343_v19 = vunpack.c.h.s8.bf16 %v10675_v12  ;;  %v10688_v12 = vld [vmem:[%s11786_s16 + $0xcd8] sm:$0xff] }
 0x3a5   : > { %v10702_v26 = vcombine.high %v7342_v13, %v7344_v14  ;;  %v10701_v30 = vcombine.low %v7342_v13, %v7344_v14  ;;  %v7368_v13 = vunpack.c.l.s8.bf16 %v10688_v12 }
 0x3a6   : > { %7238 = vmatpush1.bf16.msra.mxu0 %v10646_v21  ;;  %7279 = vmatpush1.bf16.msra.mxu1 %v10648_v27  ;;  %v12412_v21 = vld [vmem:[%s12591_s0 + $0x90] sm:$0xff]  ;;  %v7346_v27 = vunpack.c.l.s8.bf16 %v10677_v16 }
 0x3a7   : > { %7239 = vmatprep.subr.bf16.mxu0 %v10651_v28  ;;  %7280 = vmatprep.subr.bf16.mxu1 %v10653_v34  ;;  %v10704_v28 = vcombine.high %v7343_v19, %v7345_v15  ;;  %v10679_v34 = vld [vmem:[%s11786_s16 + $0xc90] sm:$0xff]  ;;  %v10696_v38 = vcombine.high %v12412_v21, %v12412_v21  ;;  %v10690_v16 = vld [vmem:[%s11786_s16 + $0xce8] sm:$0xff] }
 0x3a8   : > { %v7351_v36 = vunpack.c.h.s8.bf16 %v10679_v34  ;;  %v10705_v41 = vcombine.low %v7346_v27, %v7348_v22 }
 0x3aa   : > { %7240 = vmatpush1.bf16.msra.mxu0 %v10650_v31  ;;  %7281 = vmatpush1.bf16.msra.mxu1 %v10652_v32  ;;  %v10703_v31 = vcombine.low %v7343_v19, %v7345_v15  ;;  %v10706_v32 = vcombine.high %v7346_v27, %v7348_v22  ;;  %v7369_v19 = vunpack.c.h.s8.bf16 %v10688_v12  ;;  %v10689_v15 = vld [vmem:[%s11786_s16 + $0xce0] sm:$0xff]  ;;  %v7373_v22 = vunpack.c.h.s8.bf16 %v10690_v16  ;;  %v12445_v12 = vld [vmem:[%s12591_s0 + $0x98] sm:$0xff] }
 0x3ab   : > { %7241 = vmatprep.subr.bf16.mxu0 %v10655_v33  ;;  %7282 = vmatprep.subr.bf16.mxu1 %v10657_v35  ;;  %v10708_v33 = vcombine.high %v7347_v23, %v7349_v25  ;;  %v7350_v35 = vunpack.c.l.s8.bf16 %v10679_v34  ;;  %v7371_v27 = vunpack.c.h.s8.bf16 %v10689_v15 }
 0x3ad   : > { %v10710_v46 = vcombine.high %v7350_v35, %v7352_v42  ;;  %v10709_v50 = vcombine.low %v7350_v35, %v7352_v42  ;;  %v10693_v42 = vld [vmem:[%s11786_s16 + $0xd00] sm:$0xff] }
 0x3ae   : > { %7242 = vmatpush1.bf16.msra.mxu0 %v10654_v47  ;;  %7283 = vmatpush1.bf16.msra.mxu1 %v10656_v43  ;;  %v10707_v47 = vcombine.low %v7347_v23, %v7349_v25  ;;  %v7354_v43 = vunpack.c.l.s8.bf16 %v10681_v39  ;;  %v10731_v39 = vcombine.low %v7371_v27, %v7373_v22  ;;  %v7378_v40 = vunpack.c.l.s8.bf16 %v10693_v42 }
 0x3af   : > { %7243 = vmatprep.subr.bf16.mxu0 %v10659_v48  ;;  %7284 = vmatprep.subr.bf16.mxu1 %v10661_v52  ;;  %v10712_v48 = vcombine.high %v7351_v36, %v7353_v37  ;;  %v10683_v52 = vld [vmem:[%s11786_s16 + $0xcb0] sm:$0xff] }
 0x3b0   : > { %v7359_v57 = vunpack.c.h.s8.bf16 %v10683_v52  ;;  %v10713_v60 = vcombine.low %v7354_v43, %v7356_v49 }
 0x3b2   : > { %7244 = vmatpush1.bf16.msra.mxu0 %v10658_v51  ;;  %7285 = vmatpush1.bf16.msra.mxu1 %v10660_v53  ;;  %v10711_v51 = vcombine.low %v7351_v36, %v7353_v37  ;;  %v10714_v53 = vcombine.high %v7354_v43, %v7356_v49  ;;  %v10694_v36 = vld [vmem:[%s11786_s16 + $0xd08] sm:$0xff] }
 0x3b3   : > { %7245 = vmatprep.subr.bf16.mxu0 %v10663_v54  ;;  %7286 = vmatprep.subr.bf16.mxu1 %v10665_v56  ;;  %v10716_v54 = vcombine.high %v7355_v44, %v7357_v45  ;;  %v7358_v56 = vunpack.c.l.s8.bf16 %v10683_v52  ;;  %v7381_v43 = vunpack.c.h.s8.bf16 %v10694_v36 }
 0x3b5   : > { %v10718_v4 = vcombine.high %v7358_v56, %v7360_v62  ;;  %v10717_v8 = vcombine.low %v7358_v56, %v7360_v62  ;;  %v10746_v62 = vld [vmem:[%s11786_s16 + $0xd20] sm:$0xff] }
 0x3b6   : > { %7246 = vmatpush1.bf16.msra.mxu0 %v10662_v61  ;;  %7287 = vmatpush1.bf16.msra.mxu1 %v10664_v63  ;;  %v10715_v61 = vcombine.low %v7355_v44, %v7357_v45  ;;  %v7362_v63 = vunpack.c.l.s8.bf16 %v10685_v58  ;;  %v10744_v45 = vld [vmem:[%s11786_s16 + $0xd10] sm:$0xff]  ;;  %v7726_v59 = vunpack.c.l.s8.bf16 %v10746_v62 }
 0x3b7   : > { %7247 = vmatprep.subr.bf16.mxu0 %v10667_v5  ;;  %7288 = vmatprep.subr.bf16.mxu1 %v10669_v6  ;;  %v10720_v5 = vcombine.high %v7359_v57, %v7361_v1  ;;  %v10687_v6 = vld [vmem:[%s11786_s16 + $0xcd0] sm:$0xff] }
 0x3b8   : > { %v7367_v14 = vunpack.c.h.s8.bf16 %v10687_v6  ;;  %v10721_v17 = vcombine.low %v7362_v63, %v7364_v7 }
 0x3ba   : > { %7248 = vmatpush1.bf16.msra.mxu0 %v10666_v3  ;;  %7289 = vmatpush1.bf16.msra.mxu1 %v10668_v9  ;;  %v10719_v3 = vcombine.low %v7359_v57, %v7361_v1  ;;  %v10722_v9 = vcombine.high %v7362_v63, %v7364_v7  ;;  %v10728_v25 = vcombine.high %v7367_v14, %v7369_v19  ;;  %v10747_v57 = vld [vmem:[%s11786_s16 + $0xd28] sm:$0xff] }
 0x3bb   : > { %7611 = vmatprep.subr.bf16.mxu0 %v10698_v10  ;;  %7652 = vmatprep.subr.bf16.mxu1 %v10700_v11  ;;  %v10724_v10 = vcombine.high %v7363_v0, %v7365_v2  ;;  %v7366_v11 = vunpack.c.l.s8.bf16 %v10687_v6  ;;  %v10727_v29 = vcombine.low %v7367_v14, %v7369_v19  ;;  %v7729_v63 = vunpack.c.h.s8.bf16 %v10747_v57  ;;  %v10750_v19 = vld [vmem:[%s11786_s16 + $0xd40] sm:$0xff] }
 0x3bd   : > { %7260 = vmatmul.mubr.bf16.vlgmr.msra.gmra.mrb[0].mxu0 %v10624_v18  ;;  %7301 = vmatmul.mubr.bf16.vlgmr.msra.gmra.mrb[0].mxu1 %v10624_v18  ;;  %v10723_v18 = vcombine.low %v7363_v0, %v7365_v2  ;;  %v10726_v23 = vcombine.high %v7366_v11, %v7368_v13  ;;  %v10725_v34 = vcombine.low %v7366_v11, %v7368_v13  ;;  %v10748_v2 = vld [vmem:[%s11786_s16 + $0xd30] sm:$0xff] }
 0x3be   : > { %7612 = vmatpush1.bf16.msra.mxu0 %v10697_v20  ;;  %7653 = vmatpush1.bf16.msra.mxu1 %v10699_v24  ;;  %v7370_v20 = vunpack.c.l.s8.bf16 %v10689_v15  ;;  %v7372_v24 = vunpack.c.l.s8.bf16 %v10690_v16  ;;  %v7731_v13 = vunpack.c.h.s8.bf16 %v10748_v2  ;;  %v10751_v15 = vld [vmem:[%s11786_s16 + $0xd48] sm:$0xff] }
 0x3bf   : > { %7613 = vmatprep.subr.bf16.mxu0 %v10702_v26  ;;  %7654 = vmatprep.subr.bf16.mxu1 %v10704_v28  ;;  %v10691_v26 = vld [vmem:[%s11786_s16 + $0xcf0] sm:$0xff]  ;;  %v10692_v28 = vld [vmem:[%s11786_s16 + $0xcf8] sm:$0xff] }
 0x3c0   : > { %10741 = vmatprep.mubr.msk.bf16.mxu0 %vm772_vm0, %v10696_v38  ;;  %10742 = vmatprep.mubr.msk.bf16.mxu1 %vm772_vm0, %v10696_v38  ;;  %v10730_v38 = vcombine.high %v7370_v20, %v7372_v24  ;;  %v7377_v35 = vunpack.c.h.s8.bf16 %v10692_v28  ;;  %v10729_v37 = vcombine.low %v7370_v20, %v7372_v24  ;;  %v7736_v20 = vunpack.c.l.s8.bf16 %v10751_v15 }
 0x3c1   : > { %v7735_v24 = vunpack.c.h.s8.bf16 %v10750_v19 }
 0x3c2   : > { %7614 = vmatpush1.bf16.msra.mxu0 %v10701_v30  ;;  %7655 = vmatpush1.bf16.msra.mxu1 %v10703_v31  ;;  %v10732_v30 = vcombine.high %v7371_v27, %v7373_v22  ;;  %v7374_v31 = vunpack.c.l.s8.bf16 %v10691_v26  ;;  %v7737_v27 = vunpack.c.h.s8.bf16 %v10751_v15 }
 0x3c3   : > { %7615 = vmatprep.subr.bf16.mxu0 %v10706_v32  ;;  %7656 = vmatprep.subr.bf16.mxu1 %v10708_v33  ;;  %v7376_v32 = vunpack.c.l.s8.bf16 %v10692_v28  ;;  %v7375_v33 = vunpack.c.h.s8.bf16 %v10691_v26  ;;  %v10753_v26 = vld [vmem:[%s11786_s16 + $0xd58] sm:$0xff] }
 0x3c5   : > { %v10734_v49 = vcombine.high %v7374_v31, %v7376_v32  ;;  %v10736_v44 = vcombine.high %v7375_v33, %v7377_v35  ;;  %v10735_v52 = vcombine.low %v7375_v33, %v7377_v35  ;;  %v7741_v33 = vunpack.c.h.s8.bf16 %v10753_v26  ;;  %v10754_v35 = vld [vmem:[%s11786_s16 + $0xd60] sm:$0xff] }
 0x3c6   : > { %7616 = vmatpush1.bf16.msra.mxu0 %v10705_v41  ;;  %7657 = vmatpush1.bf16.msra.mxu1 %v10707_v47  ;;  %v7380_v41 = vunpack.c.l.s8.bf16 %v10694_v36  ;;  %v7379_v47 = vunpack.c.h.s8.bf16 %v10693_v42  ;;  %v10755_v42 = vld [vmem:[%s11786_s16 + $0xd68] sm:$0xff] }
 0x3c7   : > { %7617 = vmatprep.subr.bf16.mxu0 %v10710_v46  ;;  %7658 = vmatprep.subr.bf16.mxu1 %v10712_v48  ;;  %v10745_v46 = vld [vmem:[%s11786_s16 + $0xd18] sm:$0xff]  ;;  %v10733_v48 = vcombine.low %v7374_v31, %v7376_v32  ;;  %v7740_v31 = vunpack.c.l.s8.bf16 %v10753_v26 }
 0x3c8   : > { %v10738_v55 = vcombine.high %v7378_v40, %v7380_v41  ;;  %v7725_v56 = vunpack.c.h.s8.bf16 %v10745_v46  ;;  %v10737_v1 = vcombine.low %v7378_v40, %v7380_v41  ;;  %v10739_v58 = vcombine.low %v7379_v47, %v7381_v43 }
 0x3c9   : > { %v7744_v40 = vunpack.c.l.s8.bf16 %v10755_v42  ;;  %v7743_v41 = vunpack.c.h.s8.bf16 %v10754_v35 }
 0x3ca   : > { %7618 = vmatpush1.bf16.msra.mxu0 %v10709_v50  ;;  %7659 = vmatpush1.bf16.msra.mxu1 %v10711_v51  ;;  %v10740_v50 = vcombine.high %v7379_v47, %v7381_v43  ;;  %v7722_v51 = vunpack.c.l.s8.bf16 %v10744_v45  ;;  %v7745_v47 = vunpack.c.h.s8.bf16 %v10755_v42 }
 0x3cb   : > { %7619 = vmatprep.subr.bf16.mxu0 %v10714_v53  ;;  %7660 = vmatprep.subr.bf16.mxu1 %v10716_v54  ;;  %v7724_v53 = vunpack.c.l.s8.bf16 %v10745_v46  ;;  %v7723_v54 = vunpack.c.h.s8.bf16 %v10744_v45  ;;  %v10757_v45 = vld [vmem:[%s11786_s16 + $0xd78] sm:$0xff] }
 0x3cd   : > { %v10769_v7 = vcombine.high %v7722_v51, %v7724_v53  ;;  %v10771_v0 = vcombine.high %v7723_v54, %v7725_v56  ;;  %v10768_v6 = vcombine.low %v7722_v51, %v7724_v53  ;;  %v7748_v51 = vunpack.c.l.s8.bf16 %v10757_v45 }
 0x3ce   : > { %7620 = vmatpush1.bf16.msra.mxu0 %v10713_v60  ;;  %7661 = vmatpush1.bf16.msra.mxu1 %v10715_v61  ;;  %v7728_v60 = vunpack.c.l.s8.bf16 %v10747_v57  ;;  %v7727_v61 = vunpack.c.h.s8.bf16 %v10746_v62  ;;  %v10759_v62 = vld [vmem:[%s11786_s16 + $0xd88] sm:$0xff] }
 0x3cf   : > { %7621 = vmatprep.subr.bf16.mxu0 %v10718_v4  ;;  %7662 = vmatprep.subr.bf16.mxu1 %v10720_v5  ;;  %v10749_v4 = vld [vmem:[%s11786_s16 + $0xd38] sm:$0xff]  ;;  %v10695_v5 = vcombine.low %v12412_v21, %v12412_v21  ;;  %v10767_v21 = vcombine.high %v12445_v12, %v12445_v12 }
 0x3d0   : > { %v7732_v11 = vunpack.c.l.s8.bf16 %v10749_v4  ;;  %v7733_v14 = vunpack.c.h.s8.bf16 %v10749_v4  ;;  %v10772_v16 = vcombine.low %v7726_v59, %v7728_v60 }
 0x3d2   : > { %7622 = vmatpush1.bf16.msra.mxu0 %v10717_v8  ;;  %7663 = vmatpush1.bf16.msra.mxu1 %v10719_v3  ;;  %v10770_v8 = vcombine.low %v7723_v54, %v7725_v56  ;;  %v10773_v3 = vcombine.high %v7726_v59, %v7728_v60  ;;  %v7749_v54 = vunpack.c.h.s8.bf16 %v10757_v45  ;;  %v10758_v56 = vld [vmem:[%s11786_s16 + $0xd80] sm:$0xff]  ;;  %v7752_v59 = vunpack.c.l.s8.bf16 %v10759_v62 }
 0x3d3   : > { %7623 = vmatprep.subr.bf16.mxu0 %v10722_v9  ;;  %7664 = vmatprep.subr.bf16.mxu1 %v10724_v10  ;;  %v10775_v9 = vcombine.high %v7727_v61, %v7729_v63  ;;  %v7730_v10 = vunpack.c.l.s8.bf16 %v10748_v2  ;;  %v7751_v60 = vunpack.c.h.s8.bf16 %v10758_v56  ;;  %v10761_v2 = vld [vmem:[%s11786_s16 + $0xd98] sm:$0xff] }
 0x3d5   : > { %v10777_v22 = vcombine.high %v7730_v10, %v7732_v11  ;;  %v10776_v28 = vcombine.low %v7730_v10, %v7732_v11  ;;  %v7757_v11 = vunpack.c.h.s8.bf16 %v10761_v2 }
 0x3d6   : > { %7624 = vmatpush1.bf16.msra.mxu0 %v10721_v17  ;;  %7665 = vmatpush1.bf16.msra.mxu1 %v10723_v18  ;;  %v10774_v17 = vcombine.low %v7727_v61, %v7729_v63  ;;  %v7734_v18 = vunpack.c.l.s8.bf16 %v10750_v19  ;;  %v7753_v61 = vunpack.c.h.s8.bf16 %v10759_v62 }
 0x3d7   : > { %7625 = vmatprep.subr.bf16.mxu0 %v10726_v23  ;;  %7666 = vmatprep.subr.bf16.mxu1 %v10728_v25  ;;  %v10779_v23 = vcombine.high %v7731_v13, %v7733_v14  ;;  %v10752_v25 = vld [vmem:[%s11786_s16 + $0xd50] sm:$0xff] }
 0x3d8   : > { %v7739_v32 = vunpack.c.h.s8.bf16 %v10752_v25  ;;  %v10780_v36 = vcombine.low %v7734_v18, %v7736_v20  ;;  %v10798_v15 = vcombine.low %v7751_v60, %v7753_v61 }
 0x3da   : > { %7626 = vmatpush1.bf16.msra.mxu0 %v10725_v34  ;;  %7667 = vmatpush1.bf16.msra.mxu1 %v10727_v29  ;;  %v10778_v34 = vcombine.low %v7731_v13, %v7733_v14  ;;  %v10781_v29 = vcombine.high %v7734_v18, %v7736_v20  ;;  %v10762_v13 = vld [vmem:[%s11786_s16 + $0xda0] sm:$0xff]  ;;  %v10763_v14 = vld [vmem:[%s11786_s16 + $0xda8] sm:$0xff] }
 0x3db   : > { %7627 = vmatprep.subr.bf16.mxu0 %v10730_v38  ;;  %7668 = vmatprep.subr.bf16.mxu1 %v10732_v30  ;;  %v10783_v38 = vcombine.high %v7735_v24, %v7737_v27  ;;  %v7738_v30 = vunpack.c.l.s8.bf16 %v10752_v25  ;;  %v7761_v18 = vunpack.c.h.s8.bf16 %v10763_v14 }
 0x3dd   : > { %v10785_v43 = vcombine.high %v7738_v30, %v7740_v31  ;;  %v10784_v46 = vcombine.low %v7738_v30, %v7740_v31  ;;  %v10815_v31 = vld [vmem:[%s11786_s16 + $0xdc0] sm:$0xff] }
 0x3de   : > { %7628 = vmatpush1.bf16.msra.mxu0 %v10729_v37  ;;  %7669 = vmatpush1.bf16.msra.mxu1 %v10731_v39  ;;  %v10782_v37 = vcombine.low %v7735_v24, %v7737_v27  ;;  %v7742_v39 = vunpack.c.l.s8.bf16 %v10754_v35  ;;  %v10764_v27 = vld [vmem:[%s11786_s16 + $0xdb0] sm:$0xff]  ;;  %v8106_v42 = vunpack.c.l.s8.bf16 %v10815_v31 }
 0x3df   : > { %7629 = vmatprep.subr.bf16.mxu0 %v10734_v49  ;;  %7670 = vmatprep.subr.bf16.mxu1 %v10736_v44  ;;  %v10787_v49 = vcombine.high %v7739_v32, %v7741_v33  ;;  %v10756_v44 = vld [vmem:[%s11786_s16 + $0xd70] sm:$0xff] }
 0x3e0   : > { %v7747_v53 = vunpack.c.h.s8.bf16 %v10756_v44  ;;  %v10788_v57 = vcombine.low %v7742_v39, %v7744_v40 }
 0x3e2   : > { %7630 = vmatpush1.bf16.msra.mxu0 %v10733_v48  ;;  %7671 = vmatpush1.bf16.msra.mxu1 %v10735_v52  ;;  %v10786_v48 = vcombine.low %v7739_v32, %v7741_v33  ;;  %v10789_v52 = vcombine.high %v7742_v39, %v7744_v40  ;;  %v10816_v32 = vld [vmem:[%s11786_s16 + $0xdc8] sm:$0xff] }
 0x3e3   : > { %7631 = vmatprep.subr.bf16.mxu0 %v10738_v55  ;;  %7672 = vmatprep.subr.bf16.mxu1 %v10740_v50  ;;  %v10791_v55 = vcombine.high %v7743_v41, %v7745_v47  ;;  %v7746_v50 = vunpack.c.l.s8.bf16 %v10756_v44  ;;  %v8109_v39 = vunpack.c.h.s8.bf16 %v10816_v32 }
 0x3e5   : > { %v10793_v63 = vcombine.high %v7746_v50, %v7748_v51  ;;  %v10792_v4 = vcombine.low %v7746_v50, %v7748_v51  ;;  %v10819_v51 = vld [vmem:[%s11786_s16 + $0xde0] sm:$0xff] }
 0x3e6   : > { %7632 = vmatpush1.bf16.msra.mxu0 %v10737_v1  ;;  %7673 = vmatpush1.bf16.msra.mxu1 %v10739_v58  ;;  %v10790_v1 = vcombine.low %v7743_v41, %v7745_v47  ;;  %v7750_v58 = vunpack.c.l.s8.bf16 %v10758_v56  ;;  %v10817_v47 = vld [vmem:[%s11786_s16 + $0xdd0] sm:$0xff] }
 0x3e7   : > { %7995 = vmatprep.subr.bf16.mxu0 %v10769_v7  ;;  %8036 = vmatprep.subr.bf16.mxu1 %v10771_v0  ;;  %v10795_v7 = vcombine.high %v7747_v53, %v7749_v54  ;;  %v10760_v0 = vld [vmem:[%s11786_s16 + $0xd90] sm:$0xff] }
 0x3e8   : > { %v7755_v10 = vunpack.c.h.s8.bf16 %v10760_v0  ;;  %v10796_v19 = vcombine.low %v7750_v58, %v7752_v59 }
 0x3e9   : > { %7644 = vmatmul.mubr.bf16.vlgmr.msra.gmra.mrb[0].mxu0 %v10695_v5  ;;  %7685 = vmatmul.mubr.bf16.vlgmr.msra.gmra.mrb[0].mxu1 %v10695_v5  ;;  %v10794_v5 = vcombine.low %v7747_v53, %v7749_v54  ;;  %v10820_v53 = vld [vmem:[%s11786_s16 + $0xde8] sm:$0xff]  ;;  %v10766_v54 = vcombine.low %v12445_v12, %v12445_v12 }
 0x3ea   : > { %7996 = vmatpush1.bf16.msra.mxu0 %v10768_v6  ;;  %8037 = vmatpush1.bf16.msra.mxu1 %v10770_v8  ;;  %v10797_v6 = vcombine.high %v7750_v58, %v7752_v59  ;;  %v10799_v8 = vcombine.high %v7751_v60, %v7753_v61  ;;  %v10803_v24 = vcombine.high %v7755_v10, %v7757_v11  ;;  %v8116_v58 = vunpack.c.l.s8.bf16 %v10820_v53 }
 0x3eb   : > { %7997 = vmatprep.subr.bf16.mxu0 %v10773_v3  ;;  %8038 = vmatprep.subr.bf16.mxu1 %v10775_v9  ;;  %v7754_v3 = vunpack.c.l.s8.bf16 %v10760_v0  ;;  %v7756_v9 = vunpack.c.l.s8.bf16 %v10761_v2  ;;  %v10802_v25 = vcombine.low %v7755_v10, %v7757_v11  ;;  %v8115_v59 = vunpack.c.h.s8.bf16 %v10819_v51  ;;  %v10822_v0 = vld [vmem:[%s11786_s16 + $0xdf8] sm:$0xff]  ;;  %v10823_v11 = vld [vmem:[%s11786_s16 + $0xe00] sm:$0xff] }
 0x3ec   : > { %10812 = vmatprep.mubr.msk.bf16.mxu0 %vm772_vm0, %v10767_v21  ;;  %10813 = vmatprep.mubr.msk.bf16.mxu1 %vm772_vm0, %v10767_v21  ;;  %v7758_v21 = vunpack.c.l.s8.bf16 %v10762_v13  ;;  %v8117_v60 = vunpack.c.h.s8.bf16 %v10820_v53  ;;  %v8121_v10 = vunpack.c.h.s8.bf16 %v10822_v0 }
 0x3ed   : > { %v10801_v20 = vcombine.high %v7754_v3, %v7756_v9 }
 0x3ee   : > { %7998 = vmatpush1.bf16.msra.mxu0 %v10772_v16  ;;  %8039 = vmatpush1.bf16.msra.mxu1 %v10774_v17  ;;  %v7760_v16 = vunpack.c.l.s8.bf16 %v10763_v14  ;;  %v7759_v17 = vunpack.c.h.s8.bf16 %v10762_v13  ;;  %v10824_v13 = vld [vmem:[%s11786_s16 + $0xe08] sm:$0xff] }
 0x3ef   : > { %7999 = vmatprep.subr.bf16.mxu0 %v10777_v22  ;;  %8040 = vmatprep.subr.bf16.mxu1 %v10779_v23  ;;  %v10765_v22 = vld [vmem:[%s11786_s16 + $0xdb8] sm:$0xff]  ;;  %v10800_v23 = vcombine.low %v7754_v3, %v7756_v9  ;;  %v8120_v3 = vunpack.c.l.s8.bf16 %v10822_v0 }
 0x3f0   : > { %v10805_v26 = vcombine.high %v7758_v21, %v7760_v16  ;;  %v7765_v30 = vunpack.c.h.s8.bf16 %v10765_v22  ;;  %v10804_v33 = vcombine.low %v7758_v21, %v7760_v16  ;;  %v10806_v35 = vcombine.low %v7759_v17, %v7761_v18 }
 0x3f1   : > { %v8124_v21 = vunpack.c.l.s8.bf16 %v10824_v13  ;;  %v8123_v16 = vunpack.c.h.s8.bf16 %v10823_v11 }
 0x3f2   : > { %8000 = vmatpush1.bf16.msra.mxu0 %v10776_v28  ;;  %8041 = vmatpush1.bf16.msra.mxu1 %v10778_v34  ;;  %v10807_v28 = vcombine.high %v7759_v17, %v7761_v18  ;;  %v7762_v34 = vunpack.c.l.s8.bf16 %v10764_v27  ;;  %v8125_v17 = vunpack.c.h.s8.bf16 %v10824_v13 }
 0x3f3   : > { %8001 = vmatprep.subr.bf16.mxu0 %v10781_v29  ;;  %8042 = vmatprep.subr.bf16.mxu1 %v10783_v38  ;;  %v7764_v29 = vunpack.c.l.s8.bf16 %v10765_v22  ;;  %v7763_v38 = vunpack.c.h.s8.bf16 %v10764_v27  ;;  %v10826_v27 = vld [vmem:[%s11786_s16 + $0xe18] sm:$0xff] }
 0x3f5   : > { %v10809_v40 = vcombine.high %v7762_v34, %v7764_v29  ;;  %v10811_v41 = vcombine.high %v7763_v38, %v7765_v30  ;;  %v10810_v44 = vcombine.low %v7763_v38, %v7765_v30  ;;  %v8129_v38 = vunpack.c.h.s8.bf16 %v10826_v27  ;;  %v10827_v30 = vld [vmem:[%s11786_s16 + $0xe20] sm:$0xff] }
 0x3f6   : > { %8002 = vmatpush1.bf16.msra.mxu0 %v10780_v36  ;;  %8043 = vmatpush1.bf16.msra.mxu1 %v10782_v37  ;;  %v8108_v36 = vunpack.c.l.s8.bf16 %v10816_v32  ;;  %v8107_v37 = vunpack.c.h.s8.bf16 %v10815_v31  ;;  %v10828_v31 = vld [vmem:[%s11786_s16 + $0xe28] sm:$0xff] }
 0x3f7   : > { %8003 = vmatprep.subr.bf16.mxu0 %v10785_v43  ;;  %8044 = vmatprep.subr.bf16.mxu1 %v10787_v49  ;;  %v10818_v43 = vld [vmem:[%s11786_s16 + $0xdd8] sm:$0xff]  ;;  %v10808_v49 = vcombine.low %v7762_v34, %v7764_v29  ;;  %v8128_v34 = vunpack.c.l.s8.bf16 %v10826_v27 }
 0x3f8   : > { %v10840_v45 = vcombine.high %v8106_v42, %v8108_v36  ;;  %v8113_v50 = vunpack.c.h.s8.bf16 %v10818_v43  ;;  %v10839_v56 = vcombine.low %v8106_v42, %v8108_v36  ;;  %v10841_v62 = vcombine.low %v8107_v37, %v8109_v39 }
 0x3f9   : > { %v8132_v42 = vunpack.c.l.s8.bf16 %v10828_v31  ;;  %v8131_v36 = vunpack.c.h.s8.bf16 %v10827_v30 }
 0x3fa   : > { %8004 = vmatpush1.bf16.msra.mxu0 %v10784_v46  ;;  %8045 = vmatpush1.bf16.msra.mxu1 %v10786_v48  ;;  %v10842_v46 = vcombine.high %v8107_v37, %v8109_v39  ;;  %v8110_v48 = vunpack.c.l.s8.bf16 %v10817_v47  ;;  %v8133_v37 = vunpack.c.h.s8.bf16 %v10828_v31 }
 0x3fb   : > { %8005 = vmatprep.subr.bf16.mxu0 %v10789_v52  ;;  %8046 = vmatprep.subr.bf16.mxu1 %v10791_v55  ;;  %v8112_v52 = vunpack.c.l.s8.bf16 %v10818_v43  ;;  %v8111_v55 = vunpack.c.h.s8.bf16 %v10817_v47  ;;  %v10830_v47 = vld [vmem:[%s11786_s16 + $0xe38] sm:$0xff] }
 0x3fd   : > { %v10844_v61 = vcombine.high %v8110_v48, %v8112_v52  ;;  %v10843_v2 = vcombine.low %v8110_v48, %v8112_v52  ;;  %v8136_v48 = vunpack.c.l.s8.bf16 %v10830_v47 }
 0x3fe   : > { %8006 = vmatpush1.bf16.msra.mxu0 %v10788_v57  ;;  %8047 = vmatpush1.bf16.msra.mxu1 %v10790_v1  ;;  %v12478_v57 = vld [vmem:[%s12591_s0 + $0xa0] sm:$0xff]  ;;  %v8114_v1 = vunpack.c.l.s8.bf16 %v10819_v51  ;;  %v10832_v51 = vld [vmem:[%s11786_s16 + $0xe48] sm:$0xff] }
 0x3ff   : > { %8007 = vmatprep.subr.bf16.mxu0 %v10793_v63  ;;  %8048 = vmatprep.subr.bf16.mxu1 %v10795_v7  ;;  %v10846_v63 = vcombine.high %v8111_v55, %v8113_v50  ;;  %v10821_v7 = vld [vmem:[%s11786_s16 + $0xdf0] sm:$0xff]  ;;  %v10838_v12 = vcombine.high %v12478_v57, %v12478_v57 }
 0x400   : > { %v8119_v9 = vunpack.c.h.s8.bf16 %v10821_v7  ;;  %v10847_v14 = vcombine.low %v8114_v1, %v8116_v58 }
 0x402   : > { %8008 = vmatpush1.bf16.msra.mxu0 %v10792_v4  ;;  %8049 = vmatpush1.bf16.msra.mxu1 %v10794_v5  ;;  %v10845_v4 = vcombine.low %v8111_v55, %v8113_v50  ;;  %v10848_v5 = vcombine.high %v8114_v1, %v8116_v58  ;;  %v8137_v55 = vunpack.c.h.s8.bf16 %v10830_v47  ;;  %v10831_v50 = vld [vmem:[%s11786_s16 + $0xe40] sm:$0xff]  ;;  %v8141_v58 = vunpack.c.h.s8.bf16 %v10832_v51 }
 0x403   : > { %8009 = vmatprep.subr.bf16.mxu0 %v10797_v6  ;;  %8050 = vmatprep.subr.bf16.mxu1 %v10799_v8  ;;  %v10850_v6 = vcombine.high %v8115_v59, %v8117_v60  ;;  %v8118_v8 = vunpack.c.l.s8.bf16 %v10821_v7  ;;  %v8139_v1 = vunpack.c.h.s8.bf16 %v10831_v50  ;;  %v12511_v47 = vld [vmem:[%s12591_s0 + $0xa8] sm:$0xff] }
 0x405   : > { %v10852_v18 = vcombine.high %v8118_v8, %v8120_v3  ;;  %v10851_v22 = vcombine.low %v8118_v8, %v8120_v3  ;;  %v10835_v3 = vld [vmem:[%s11786_s16 + $0xe60] sm:$0xff] }
 0x406   : > { %8010 = vmatpush1.bf16.msra.mxu0 %v10796_v19  ;;  %8051 = vmatpush1.bf16.msra.mxu1 %v10798_v15  ;;  %v10849_v19 = vcombine.low %v8115_v59, %v8117_v60  ;;  %v8122_v15 = vunpack.c.l.s8.bf16 %v10823_v11  ;;  %v10873_v11 = vcombine.low %v8139_v1, %v8141_v58  ;;  %v8146_v13 = vunpack.c.l.s8.bf16 %v10835_v3 }
 0x407   : > { %8011 = vmatprep.subr.bf16.mxu0 %v10801_v20  ;;  %8052 = vmatprep.subr.bf16.mxu1 %v10803_v24  ;;  %v10854_v20 = vcombine.high %v8119_v9, %v8121_v10  ;;  %v10825_v24 = vld [vmem:[%s11786_s16 + $0xe10] sm:$0xff] }
 0x408   : > { %v8127_v29 = vunpack.c.h.s8.bf16 %v10825_v24  ;;  %v10855_v32 = vcombine.low %v8122_v15, %v8124_v21 }
 0x40a   : > { %8012 = vmatpush1.bf16.msra.mxu0 %v10800_v23  ;;  %8053 = vmatpush1.bf16.msra.mxu1 %v10802_v25  ;;  %v10853_v23 = vcombine.low %v8119_v9, %v8121_v10  ;;  %v10856_v25 = vcombine.high %v8122_v15, %v8124_v21  ;;  %v10836_v9 = vld [vmem:[%s11786_s16 + $0xe68] sm:$0xff] }
 0x40b   : > { %8013 = vmatprep.subr.bf16.mxu0 %v10805_v26  ;;  %8054 = vmatprep.subr.bf16.mxu1 %v10807_v28  ;;  %v10858_v26 = vcombine.high %v8123_v16, %v8125_v17  ;;  %v8126_v28 = vunpack.c.l.s8.bf16 %v10825_v24  ;;  %v8149_v15 = vunpack.c.h.s8.bf16 %v10836_v9 }
 0x40d   : > { %v10860_v39 = vcombine.high %v8126_v28, %v8128_v34  ;;  %v10859_v43 = vcombine.low %v8126_v28, %v8128_v34  ;;  %v10888_v34 = vld [vmem:[%s11786_s16 + $0xe80] sm:$0xff] }
 0x40e   : > { %8014 = vmatpush1.bf16.msra.mxu0 %v10804_v33  ;;  %8055 = vmatpush1.bf16.msra.mxu1 %v10806_v35  ;;  %v10857_v33 = vcombine.low %v8123_v16, %v8125_v17  ;;  %v8130_v35 = vunpack.c.l.s8.bf16 %v10827_v30  ;;  %v10886_v17 = vld [vmem:[%s11786_s16 + $0xe70] sm:$0xff]  ;;  %v8494_v31 = vunpack.c.l.s8.bf16 %v10888_v34 }
 0x40f   : > { %8015 = vmatprep.subr.bf16.mxu0 %v10809_v40  ;;  %8056 = vmatprep.subr.bf16.mxu1 %v10811_v41  ;;  %v10862_v40 = vcombine.high %v8127_v29, %v8129_v38  ;;  %v10829_v41 = vld [vmem:[%s11786_s16 + $0xe30] sm:$0xff] }
 0x410   : > { %v8135_v52 = vunpack.c.h.s8.bf16 %v10829_v41  ;;  %v10863_v53 = vcombine.low %v8130_v35, %v8132_v42 }
 0x412   : > { %8016 = vmatpush1.bf16.msra.mxu0 %v10808_v49  ;;  %8057 = vmatpush1.bf16.msra.mxu1 %v10810_v44  ;;  %v10861_v49 = vcombine.low %v8127_v29, %v8129_v38  ;;  %v10864_v44 = vcombine.high %v8130_v35, %v8132_v42  ;;  %v10870_v60 = vcombine.high %v8135_v52, %v8137_v55  ;;  %v10889_v29 = vld [vmem:[%s11786_s16 + $0xe88] sm:$0xff] }
 0x413   : > { %8379 = vmatprep.subr.bf16.mxu0 %v10840_v45  ;;  %8420 = vmatprep.subr.bf16.mxu1 %v10842_v46  ;;  %v10866_v45 = vcombine.high %v8131_v36, %v8133_v37  ;;  %v8134_v46 = vunpack.c.l.s8.bf16 %v10829_v41  ;;  %v10869_v0 = vcombine.low %v8135_v52, %v8137_v55  ;;  %v8497_v35 = vunpack.c.h.s8.bf16 %v10889_v29  ;;  %v10892_v55 = vld [vmem:[%s11786_s16 + $0xea0] sm:$0xff] }
 0x415   : > { %8028 = vmatmul.mubr.bf16.vlgmr.msra.gmra.mrb[0].mxu0 %v10766_v54  ;;  %8069 = vmatmul.mubr.bf16.vlgmr.msra.gmra.mrb[0].mxu1 %v10766_v54  ;;  %v10865_v54 = vcombine.low %v8131_v36, %v8133_v37  ;;  %v10868_v59 = vcombine.high %v8134_v46, %v8136_v48  ;;  %v10867_v7 = vcombine.low %v8134_v46, %v8136_v48  ;;  %v10890_v37 = vld [vmem:[%s11786_s16 + $0xe90] sm:$0xff] }
 0x416   : > { %8380 = vmatpush1.bf16.msra.mxu0 %v10839_v56  ;;  %8421 = vmatpush1.bf16.msra.mxu1 %v10841_v62  ;;  %v8138_v56 = vunpack.c.l.s8.bf16 %v10831_v50  ;;  %v8140_v62 = vunpack.c.l.s8.bf16 %v10832_v51  ;;  %v8499_v48 = vunpack.c.h.s8.bf16 %v10890_v37  ;;  %v10893_v50 = vld [vmem:[%s11786_s16 + $0xea8] sm:$0xff] }
 0x417   : > { %8381 = vmatprep.subr.bf16.mxu0 %v10844_v61  ;;  %8422 = vmatprep.subr.bf16.mxu1 %v10846_v63  ;;  %v10833_v61 = vld [vmem:[%s11786_s16 + $0xe50] sm:$0xff]  ;;  %v10834_v63 = vld [vmem:[%s11786_s16 + $0xe58] sm:$0xff] }
 0x418   : > { %10883 = vmatprep.mubr.msk.bf16.mxu0 %vm772_vm0, %v10838_v12  ;;  %10884 = vmatprep.mubr.msk.bf16.mxu1 %vm772_vm0, %v10838_v12  ;;  %v10872_v12 = vcombine.high %v8138_v56, %v8140_v62  ;;  %v8145_v8 = vunpack.c.h.s8.bf16 %v10834_v63  ;;  %v10871_v10 = vcombine.low %v8138_v56, %v8140_v62  ;;  %v8504_v56 = vunpack.c.l.s8.bf16 %v10893_v50 }
 0x419   : > { %v8503_v62 = vunpack.c.h.s8.bf16 %v10892_v55 }
 0x41a   : > { %8382 = vmatpush1.bf16.msra.mxu0 %v10843_v2  ;;  %8423 = vmatpush1.bf16.msra.mxu1 %v10845_v4  ;;  %v10874_v2 = vcombine.high %v8139_v1, %v8141_v58  ;;  %v8142_v4 = vunpack.c.l.s8.bf16 %v10833_v61  ;;  %v8505_v1 = vunpack.c.h.s8.bf16 %v10893_v50 }
 0x41b   : > { %8383 = vmatprep.subr.bf16.mxu0 %v10848_v5  ;;  %8424 = vmatprep.subr.bf16.mxu1 %v10850_v6  ;;  %v8144_v5 = vunpack.c.l.s8.bf16 %v10834_v63  ;;  %v8143_v6 = vunpack.c.h.s8.bf16 %v10833_v61  ;;  %v10895_v61 = vld [vmem:[%s11786_s16 + $0xeb8] sm:$0xff] }
 0x41d   : > { %v10876_v21 = vcombine.high %v8142_v4, %v8144_v5  ;;  %v10878_v16 = vcombine.high %v8143_v6, %v8145_v8  ;;  %v10877_v24 = vcombine.low %v8143_v6, %v8145_v8  ;;  %v8509_v6 = vunpack.c.h.s8.bf16 %v10895_v61  ;;  %v10896_v8 = vld [vmem:[%s11786_s16 + $0xec0] sm:$0xff] }
 0x41e   : > { %8384 = vmatpush1.bf16.msra.mxu0 %v10847_v14  ;;  %8425 = vmatpush1.bf16.msra.mxu1 %v10849_v19  ;;  %v8148_v14 = vunpack.c.l.s8.bf16 %v10836_v9  ;;  %v8147_v19 = vunpack.c.h.s8.bf16 %v10835_v3  ;;  %v10897_v3 = vld [vmem:[%s11786_s16 + $0xec8] sm:$0xff] }
 0x41f   : > { %8385 = vmatprep.subr.bf16.mxu0 %v10852_v18  ;;  %8426 = vmatprep.subr.bf16.mxu1 %v10854_v20  ;;  %v10887_v18 = vld [vmem:[%s11786_s16 + $0xe78] sm:$0xff]  ;;  %v10875_v20 = vcombine.low %v8142_v4, %v8144_v5  ;;  %v8508_v4 = vunpack.c.l.s8.bf16 %v10895_v61 }
 0x420   : > { %v10880_v27 = vcombine.high %v8146_v13, %v8148_v14  ;;  %v8493_v28 = vunpack.c.h.s8.bf16 %v10887_v18  ;;  %v10879_v38 = vcombine.low %v8146_v13, %v8148_v14  ;;  %v10881_v30 = vcombine.low %v8147_v19, %v8149_v15 }
 0x421   : > { %v8512_v13 = vunpack.c.l.s8.bf16 %v10897_v3  ;;  %v8511_v14 = vunpack.c.h.s8.bf16 %v10896_v8 }
 0x422   : > { %8386 = vmatpush1.bf16.msra.mxu0 %v10851_v22  ;;  %8427 = vmatpush1.bf16.msra.mxu1 %v10853_v23  ;;  %v10882_v22 = vcombine.high %v8147_v19, %v8149_v15  ;;  %v8490_v23 = vunpack.c.l.s8.bf16 %v10886_v17  ;;  %v8513_v19 = vunpack.c.h.s8.bf16 %v10897_v3 }
 0x423   : > { %8387 = vmatprep.subr.bf16.mxu0 %v10856_v25  ;;  %8428 = vmatprep.subr.bf16.mxu1 %v10858_v26  ;;  %v8492_v25 = vunpack.c.l.s8.bf16 %v10887_v18  ;;  %v8491_v26 = vunpack.c.h.s8.bf16 %v10886_v17  ;;  %v10899_v17 = vld [vmem:[%s11786_s16 + $0xed8] sm:$0xff] }
 0x425   : > { %v10911_v42 = vcombine.high %v8490_v23, %v8492_v25  ;;  %v10913_v36 = vcombine.high %v8491_v26, %v8493_v28  ;;  %v10910_v41 = vcombine.low %v8490_v23, %v8492_v25  ;;  %v8516_v23 = vunpack.c.l.s8.bf16 %v10899_v17 }
 0x426   : > { %8388 = vmatpush1.bf16.msra.mxu0 %v10855_v32  ;;  %8429 = vmatpush1.bf16.msra.mxu1 %v10857_v33  ;;  %v8496_v32 = vunpack.c.l.s8.bf16 %v10889_v29  ;;  %v8495_v33 = vunpack.c.h.s8.bf16 %v10888_v34  ;;  %v10901_v34 = vld [vmem:[%s11786_s16 + $0xee8] sm:$0xff] }
 0x427   : > { %8389 = vmatprep.subr.bf16.mxu0 %v10860_v39  ;;  %8430 = vmatprep.subr.bf16.mxu1 %v10862_v40  ;;  %v10891_v39 = vld [vmem:[%s11786_s16 + $0xe98] sm:$0xff]  ;;  %v10837_v40 = vcombine.low %v12478_v57, %v12478_v57  ;;  %v10909_v57 = vcombine.high %v12511_v47, %v12511_v47 }
 0x428   : > { %v8500_v46 = vunpack.c.l.s8.bf16 %v10891_v39  ;;  %v8501_v52 = vunpack.c.h.s8.bf16 %v10891_v39  ;;  %v10914_v51 = vcombine.low %v8494_v31, %v8496_v32 }
 0x42a   : > { %8390 = vmatpush1.bf16.msra.mxu0 %v10859_v43  ;;  %8431 = vmatpush1.bf16.msra.mxu1 %v10861_v49  ;;  %v10912_v43 = vcombine.low %v8491_v26, %v8493_v28  ;;  %v10915_v49 = vcombine.high %v8494_v31, %v8496_v32  ;;  %v8517_v26 = vunpack.c.h.s8.bf16 %v10899_v17  ;;  %v10900_v28 = vld [vmem:[%s11786_s16 + $0xee0] sm:$0xff]  ;;  %v8520_v31 = vunpack.c.l.s8.bf16 %v10901_v34 }
 0x42b   : > { %8391 = vmatprep.subr.bf16.mxu0 %v10864_v44  ;;  %8432 = vmatprep.subr.bf16.mxu1 %v10866_v45  ;;  %v10917_v44 = vcombine.high %v8495_v33, %v8497_v35  ;;  %v8498_v45 = vunpack.c.l.s8.bf16 %v10890_v37  ;;  %v8519_v32 = vunpack.c.h.s8.bf16 %v10900_v28  ;;  %v10903_v37 = vld [vmem:[%s11786_s16 + $0xef8] sm:$0xff]  ;;  %v11338_v17 = vld [vmem:[%s11802_s10 + $0x50] sm:$0xff]  }
 0x42d   : > { %v10919_v58 = vcombine.high %v8498_v45, %v8500_v46  ;;  %v10918_v63 = vcombine.low %v8498_v45, %v8500_v46  ;;  %v8525_v46 = vunpack.c.h.s8.bf16 %v10903_v37 }
 0x42e   : > { %8392 = vmatpush1.bf16.msra.mxu0 %v10863_v53  ;;  %8433 = vmatpush1.bf16.msra.mxu1 %v10865_v54  ;;  %v10916_v53 = vcombine.low %v8495_v33, %v8497_v35  ;;  %v8502_v54 = vunpack.c.l.s8.bf16 %v10892_v55  ;;  %v8521_v33 = vunpack.c.h.s8.bf16 %v10901_v34  ;;  %v11348_v34 = vld [vmem:[%s11802_s10 + $0x20] sm:$0xff]  }
 0x42f   : > { %8393 = vmatprep.subr.bf16.mxu0 %v10868_v59  ;;  %8434 = vmatprep.subr.bf16.mxu1 %v10870_v60  ;;  %v10921_v59 = vcombine.high %v8499_v48, %v8501_v52  ;;  %v10894_v60 = vld [vmem:[%s11786_s16 + $0xeb0] sm:$0xff] }
 0x430   : > { %v8507_v5 = vunpack.c.h.s8.bf16 %v10894_v60  ;;  %v10922_v9 = vcombine.low %v8502_v54, %v8504_v56  ;;  %v10940_v50 = vcombine.low %v8519_v32, %v8521_v33 }
 0x432   : > { %8394 = vmatpush1.bf16.msra.mxu0 %v10867_v7  ;;  %8435 = vmatpush1.bf16.msra.mxu1 %v10869_v0  ;;  %v10920_v7 = vcombine.low %v8499_v48, %v8501_v52  ;;  %v10923_v0 = vcombine.high %v8502_v54, %v8504_v56  ;;  %v10904_v48 = vld [vmem:[%s11786_s16 + $0xf00] sm:$0xff]  ;;  %v10905_v52 = vld [vmem:[%s11786_s16 + $0xf08] sm:$0xff] }
 0x433   : > { %8395 = vmatprep.subr.bf16.mxu0 %v10872_v12  ;;  %8436 = vmatprep.subr.bf16.mxu1 %v10874_v2  ;;  %v10925_v12 = vcombine.high %v8503_v62, %v8505_v1  ;;  %v8506_v2 = vunpack.c.l.s8.bf16 %v10894_v60  ;;  %v8529_v54 = vunpack.c.h.s8.bf16 %v10905_v52 }
 0x435   : > { %v10927_v15 = vcombine.high %v8506_v2, %v8508_v4  ;;  %v10926_v18 = vcombine.low %v8506_v2, %v8508_v4 }
 0x436   : > { %8396 = vmatpush1.bf16.msra.mxu0 %v10871_v10  ;;  %8437 = vmatpush1.bf16.msra.mxu1 %v10873_v11  ;;  %v10924_v10 = vcombine.low %v8503_v62, %v8505_v1  ;;  %v8510_v11 = vunpack.c.l.s8.bf16 %v10896_v8  ;;  %v10906_v1 = vld [vmem:[%s11786_s16 + $0xf10] sm:$0xff] }
 0x437   : > { %8397 = vmatprep.subr.bf16.mxu0 %v10876_v21  ;;  %8438 = vmatprep.subr.bf16.mxu1 %v10878_v16  ;;  %v10929_v21 = vcombine.high %v8507_v5, %v8509_v6  ;;  %v10898_v16 = vld [vmem:[%s11786_s16 + $0xed0] sm:$0xff] }
 0x438   : > { %v8515_v25 = vunpack.c.h.s8.bf16 %v10898_v16  ;;  %v10930_v29 = vcombine.low %v8510_v11, %v8512_v13 }
 0x43a   : > { %8398 = vmatpush1.bf16.msra.mxu0 %v10875_v20  ;;  %8439 = vmatpush1.bf16.msra.mxu1 %v10877_v24  ;;  %v10928_v20 = vcombine.low %v8507_v5, %v8509_v6  ;;  %v10931_v24 = vcombine.high %v8510_v11, %v8512_v13  ;;  %v11331_v11 = vld [vmem:[%s11802_s10 + $0xc0] sm:$0xff]   ;;  %v10908_v13 = vcombine.low %v12511_v47, %v12511_v47  ;;  %v11337_v47 = vld [vmem:[%s11802_s10 + $0x88] sm:$0xff]  }
 0x43b   : > { %8399 = vmatprep.subr.bf16.mxu0 %v10880_v27  ;;  %8440 = vmatprep.subr.bf16.mxu1 %v10882_v22  ;;  %v10933_v27 = vcombine.high %v8511_v14, %v8513_v19  ;;  %v8514_v22 = vunpack.c.l.s8.bf16 %v10898_v16  ;;  %v11336_v16 = vld [vmem:[%s11802_s10 + $0x8] sm:$0xff]  }
 0x43d   : > { %v10935_v35 = vcombine.high %v8514_v22, %v8516_v23  ;;  %v10934_v39 = vcombine.low %v8514_v22, %v8516_v23  ;;  %v11343_v22 = vld [vmem:[%s11802_s10 + $0xd8] sm:$0xff]  }
 0x43e   : > { %8400 = vmatpush1.bf16.msra.mxu0 %v10879_v38  ;;  %8441 = vmatpush1.bf16.msra.mxu1 %v10881_v30  ;;  %v10932_v38 = vcombine.low %v8511_v14, %v8513_v19  ;;  %v8518_v30 = vunpack.c.l.s8.bf16 %v10900_v28  ;;  %v11332_v14 = vld [vmem:[%s11802_s10] sm:$0xff]   ;;  %v11344_v23 = vld [vmem:[%s11802_s10 + $0x18] sm:$0xff]  }
 0x43f   : > { %8763 = vmatprep.subr.bf16.mxu0 %v10911_v42  ;;  %8804 = vmatprep.subr.bf16.mxu1 %v10913_v36  ;;  %v10937_v42 = vcombine.high %v8515_v25, %v8517_v26  ;;  %v10902_v36 = vld [vmem:[%s11786_s16 + $0xef0] sm:$0xff] }
 0x440   : > { %v8523_v45 = vunpack.c.h.s8.bf16 %v10902_v36  ;;  %v10938_v55 = vcombine.low %v8518_v30, %v8520_v31  ;;  %v11333_v19 = vld [vmem:[%s11802_s10 + $0x80] sm:$0xff]  }
 0x441   : > { %8412 = vmatmul.mubr.bf16.vlgmr.msra.gmra.mrb[0].mxu0 %v10837_v40  ;;  %8453 = vmatmul.mubr.bf16.vlgmr.msra.gmra.mrb[0].mxu1 %v10837_v40  ;;  %v10936_v40 = vcombine.low %v8515_v25, %v8517_v26  ;;  %v11345_v25 = vld [vmem:[%s11802_s10 + $0x98] sm:$0xff]   ;;  %v11346_v26 = vld [vmem:[%s11802_s10 + $0x60] sm:$0xff]  }
 0x442   : > { %8764 = vmatpush1.bf16.msra.mxu0 %v10910_v41  ;;  %8805 = vmatpush1.bf16.msra.mxu1 %v10912_v43  ;;  %v10939_v41 = vcombine.high %v8518_v30, %v8520_v31  ;;  %v10941_v43 = vcombine.high %v8519_v32, %v8521_v33  ;;  %v10945_v62 = vcombine.high %v8523_v45, %v8525_v46  ;;  %v11347_v28 = vld [vmem:[%s11802_s10 + $0xe0] sm:$0xff]   ;;  %v11351_v30 = vld [vmem:[%s11802_s10 + $0xe8] sm:$0xff]   ;;  %v11354_v33 = vld [vmem:[%s11802_s10 + $0x70] sm:$0xff]  }
 0x443   : > { %8765 = vmatprep.subr.bf16.mxu0 %v10915_v49  ;;  %8806 = vmatprep.subr.bf16.mxu1 %v10917_v44  ;;  %v8522_v49 = vunpack.c.l.s8.bf16 %v10902_v36  ;;  %v8524_v44 = vunpack.c.l.s8.bf16 %v10903_v37  ;;  %v10944_v60 = vcombine.low %v8523_v45, %v8525_v46  ;;  %v11352_v31 = vld [vmem:[%s11802_s10 + $0x28] sm:$0xff]   ;;  %v11357_v36 = vld [vmem:[%s11802_s10 + $0xb0] sm:$0xff]   ;;  %v11358_v37 = vld [vmem:[%s11802_s10 + $0x78] sm:$0xff]  }
 0x444   : > { %10954 = vmatprep.mubr.msk.bf16.mxu0 %vm772_vm0, %v10909_v57  ;;  %10955 = vmatprep.mubr.msk.bf16.mxu1 %vm772_vm0, %v10909_v57  ;;  %v8526_v57 = vunpack.c.l.s8.bf16 %v10904_v48  ;;  %v11353_v32 = vld [vmem:[%s11802_s10 + $0xa8] sm:$0xff]   ;;  %v8849_v46 = vld [vmem:[%s11794_s11] sm:$0xf] }
 0x445   : > { %v10943_v56 = vcombine.high %v8522_v49, %v8524_v44 }
 0x446   : > { %8766 = vmatpush1.bf16.msra.mxu0 %v10914_v51  ;;  %8807 = vmatpush1.bf16.msra.mxu1 %v10916_v53  ;;  %v8528_v51 = vunpack.c.l.s8.bf16 %v10905_v52  ;;  %v8527_v53 = vunpack.c.h.s8.bf16 %v10904_v48 }
 0x447   : > { %8767 = vmatprep.subr.bf16.mxu0 %v10919_v58  ;;  %8808 = vmatprep.subr.bf16.mxu1 %v10921_v59  ;;  %v10907_v58 = vld [vmem:[%s11786_s16 + $0xf18] sm:$0xff]  ;;  %v10942_v59 = vcombine.low %v8522_v49, %v8524_v44 }
 0x448   : > { %v10947_v61 = vcombine.high %v8526_v57, %v8528_v51  ;;  %v8533_v2 = vunpack.c.h.s8.bf16 %v10907_v58  ;;  %v10946_v4 = vcombine.low %v8526_v57, %v8528_v51  ;;  %v10948_v5 = vcombine.low %v8527_v53, %v8529_v54 }
 0x44a   : > { %8768 = vmatpush1.bf16.msra.mxu0 %v10918_v63  ;;  %8809 = vmatpush1.bf16.msra.mxu1 %v10920_v7  ;;  %v10949_v63 = vcombine.high %v8527_v53, %v8529_v54  ;;  %v8530_v7 = vunpack.c.l.s8.bf16 %v10906_v1 }
 0x44b   : > { %8769 = vmatprep.subr.bf16.mxu0 %v10923_v0  ;;  %8810 = vmatprep.subr.bf16.mxu1 %v10925_v12  ;;  %v8532_v0 = vunpack.c.l.s8.bf16 %v10907_v58  ;;  %v8531_v12 = vunpack.c.h.s8.bf16 %v10906_v1 }
 0x44d   : > { %v10951_v6 = vcombine.high %v8530_v7, %v8532_v0  ;;  %v10953_v8 = vcombine.high %v8531_v12, %v8533_v2  ;;  %v10950_v3 = vcombine.low %v8530_v7, %v8532_v0 }
 0x44e   : > { %8770 = vmatpush1.bf16.msra.mxu0 %v10922_v9  ;;  %8811 = vmatpush1.bf16.msra.mxu1 %v10924_v10  ;;  %v10952_v9 = vcombine.low %v8531_v12, %v8533_v2  ;;  %v11330_v10 = vld [vmem:[%s11802_s10 + $0x40] sm:$0xff]  }
 0x44f   : > { %8771 = vmatprep.subr.bf16.mxu0 %v10927_v15  ;;  %8812 = vmatprep.subr.bf16.mxu1 %v10929_v21  ;;  %v11334_v15 = vld [vmem:[%s11802_s10 + $0x48] sm:$0xff]  }
 0x450   : > { %v11335_v21 = vld [vmem:[%s11802_s10 + $0xc8] sm:$0xff]  }
 0x452   : > { %8772 = vmatpush1.bf16.msra.mxu0 %v10926_v18  ;;  %8813 = vmatpush1.bf16.msra.mxu1 %v10928_v20  ;;  %v11339_v18 = vld [vmem:[%s11802_s10 + $0xd0] sm:$0xff]  }
 0x453   : > { %8773 = vmatprep.subr.bf16.mxu0 %v10931_v24  ;;  %8814 = vmatprep.subr.bf16.mxu1 %v10933_v27  ;;  %v11340_v20 = vld [vmem:[%s11802_s10 + $0x10] sm:$0xff]   ;;  %v11342_v27 = vld [vmem:[%s11802_s10 + $0x58] sm:$0xff]  }
 0x454   : > { %v11341_v24 = vld [vmem:[%s11802_s10 + $0x90] sm:$0xff]  }
 0x456   : > { %8774 = vmatpush1.bf16.msra.mxu0 %v10930_v29  ;;  %8815 = vmatpush1.bf16.msra.mxu1 %v10932_v38  ;;  %v11349_v29 = vld [vmem:[%s11802_s10 + $0xa0] sm:$0xff]   ;;  %v11350_v38 = vld [vmem:[%s11802_s10 + $0x68] sm:$0xff]  }
 0x457   : > { %8775 = vmatprep.subr.bf16.mxu0 %v10935_v35  ;;  %8816 = vmatprep.subr.bf16.mxu1 %v10937_v42  ;;  %v11355_v35 = vld [vmem:[%s11802_s10 + $0xf0] sm:$0xff]  }
 0x458   : > { %v11356_v42 = vld [vmem:[%s11802_s10 + $0x30] sm:$0xff]  }
 0x45a   : > { %8776 = vmatpush1.bf16.msra.mxu0 %v10934_v39  ;;  %8817 = vmatpush1.bf16.msra.mxu1 %v10936_v40  ;;  %v11359_v39 = vld [vmem:[%s11802_s10 + $0xf8] sm:$0xff]  }
 0x45b   : > { %8777 = vmatprep.subr.bf16.mxu0 %v10939_v41  ;;  %8818 = vmatprep.subr.bf16.mxu1 %v10941_v43  ;;  %v11360_v40 = vld [vmem:[%s11802_s10 + $0x38] sm:$0xff]   ;;  %v8851_v43 = vlaneseq }
 0x45c   : > { %v11361_v41 = vld [vmem:[%s11802_s10 + $0xb8] sm:$0xff]  }
 0x45d   : > { %v8852_v49 = vshrl.u32 %v8851_v43, 7 }
 0x45e   : > { %8778 = vmatpush1.bf16.msra.mxu0 %v10938_v55  ;;  %8819 = vmatpush1.bf16.msra.mxu1 %v10940_v50  ;;  %v8875_v55 = vld [vmem:[%s11800_s13] sm:$0xf] }
 0x45f   : > { %8779 = vmatprep.subr.bf16.mxu0 %v10943_v56  ;;  %8820 = vmatprep.subr.bf16.mxu1 %v10945_v62  ;;  %v8853_v44 = vsub.s32 0, %v8852_v49  ;;  %v8861_v45 = vsub.s32 2, %v8852_v49  ;;  %v8857_v48 = vsub.s32 1, %v8852_v49  ;;  %v8865_v52 = vsub.s32 3, %v8852_v49 }
 0x461   : > { %v8854_v50 = vrot.slane %v8849_v46, %v8853_v44  ;;  %v8862_v57 = vrot.slane %v8849_v46, %v8861_v45  ;;  %v8858_v51 = vrot.slane %v8849_v46, %v8857_v48  ;;  %v8866_v53 = vrot.slane %v8849_v46, %v8865_v52 }
 0x462   : > { %8780 = vmatpush1.bf16.msra.mxu0 %v10942_v59  ;;  %8821 = vmatpush1.bf16.msra.mxu1 %v10944_v60  ;;  %v8880_v54 = vrot.slane %v8875_v55, %v8853_v44  ;;  %v8888_v56 = vrot.slane %v8875_v55, %v8861_v45  ;;  %v8884_v58 = vrot.slane %v8875_v55, %v8857_v48 }
 0x463   : > { %8781 = vmatprep.subr.bf16.mxu0 %v10947_v61  ;;  %8822 = vmatprep.subr.bf16.mxu1 %v10949_v63  ;;  %v8892_v59 = vrot.slane %v8875_v55, %v8865_v52 }
 0x466   : > { %8782 = vmatpush1.bf16.msra.mxu0 %v10946_v4  ;;  %8823 = vmatpush1.bf16.msra.mxu1 %v10948_v5 }
 0x467   : > { %8783 = vmatprep.subr.bf16.mxu0 %v10951_v6  ;;  %8824 = vmatprep.subr.bf16.mxu1 %v10953_v8 }
 0x46a   : > { %8784 = vmatpush1.bf16.msra.mxu0 %v10950_v3  ;;  %8825 = vmatpush1.bf16.msra.mxu1 %v10952_v9 }
 0x46b   : > { %10996 = vmatprep.subr.bf16.mxu0 %v11330_v10  ;;  %11018 = vmatprep.subr.bf16.mxu1 %v11331_v11 }
 0x46d   : > { %8796 = vmatmul.mubr.bf16.vlgmr.msra.gmra.mrb[0].mxu0 %v10908_v13  ;;  %8837 = vmatmul.mubr.bf16.vlgmr.msra.gmra.mrb[0].mxu1 %v10908_v13 }
 0x46e   : > { %10997 = vmatpush3.bf16.msra.mxu0 %v11332_v14  ;;  %11019 = vmatpush3.bf16.msra.mxu1 %v11333_v19 }
 0x46f   : > { %10998 = vmatprep.subr.bf16.mxu0 %v11334_v15  ;;  %11020 = vmatprep.subr.bf16.mxu1 %v11335_v21 }
 0x472   : > { %10999 = vmatpush3.bf16.msra.mxu0 %v11336_v16  ;;  %11021 = vmatpush3.bf16.msra.mxu1 %v11337_v47 }
 0x473   : > { %11000 = vmatprep.subr.bf16.mxu0 %v11338_v17  ;;  %11022 = vmatprep.subr.bf16.mxu1 %v11339_v18 }
 0x476   : > { %11001 = vmatpush3.bf16.msra.mxu0 %v11340_v20  ;;  %11023 = vmatpush3.bf16.msra.mxu1 %v11341_v24 }
 0x477   : > { %11002 = vmatprep.subr.bf16.mxu0 %v11342_v27  ;;  %11024 = vmatprep.subr.bf16.mxu1 %v11343_v22 }
 0x47a   : > { %11003 = vmatpush3.bf16.msra.mxu0 %v11344_v23  ;;  %11025 = vmatpush3.bf16.msra.mxu1 %v11345_v25 }
 0x47b   : > { %11004 = vmatprep.subr.bf16.mxu0 %v11346_v26  ;;  %11026 = vmatprep.subr.bf16.mxu1 %v11347_v28  ;;  %v8905_v26 = vld [vmem:[#allocation2] sm:$0xff] }
 0x47e   : > { %11005 = vmatpush3.bf16.msra.mxu0 %v11348_v34  ;;  %11027 = vmatpush3.bf16.msra.mxu1 %v11349_v29 }
 0x47f   : > { %11006 = vmatprep.subr.bf16.mxu0 %v11350_v38  ;;  %11028 = vmatprep.subr.bf16.mxu1 %v11351_v30 }
 0x482   : > { %11007 = vmatpush3.bf16.msra.mxu0 %v11352_v31  ;;  %11029 = vmatpush3.bf16.msra.mxu1 %v11353_v32 }
 0x483   : > { %11008 = vmatprep.subr.bf16.mxu0 %v11354_v33  ;;  %11030 = vmatprep.subr.bf16.mxu1 %v11355_v35 }
 0x486   : > { %11009 = vmatpush3.bf16.msra.mxu0 %v11356_v42  ;;  %11031 = vmatpush3.bf16.msra.mxu1 %v11357_v36 }
 0x487   : > { %11010 = vmatprep.subr.bf16.mxu0 %v11358_v37  ;;  %11032 = vmatprep.subr.bf16.mxu1 %v11359_v39 }
 0x48a   : > { %11011 = vmatpush3.bf16.msra.mxu0 %v11360_v40  ;;  %11033 = vmatpush3.bf16.msra.mxu1 %v11361_v41 }
 0x540   : > { %v8797_v62 = vpop.f32.mrb[0].mxu0  ;;  %v8838_v1 = vpop.f32.mrb[0].mxu1 }
 0x541   : > { %v8871_v60 = vmul.f32 %v8854_v50, %v8797_v62  ;;  %v8873_v61 = vmul.f32 %v8862_v57, %v8838_v1  ;;  %v8799_v63 = vpop.f32.mrb[1].mxu0  ;;  %v8840_v7 = vpop.f32.mrb[1].mxu1 }
 0x542   : > { %v8872_v0 = vmul.f32 %v8858_v51, %v8799_v63  ;;  %v8874_v12 = vmul.f32 %v8866_v53, %v8840_v7  ;;  %v8801_v2 = vpop.f32.mrb[2].mxu0  ;;  %v8842_v4 = vpop.f32.mrb[2].mxu1 }
 0x543   : > { %v8897_v5 = vadd.f32 %v8880_v54, %v8871_v60  ;;  %v8899_v6 = vadd.f32 %v8888_v56, %v8873_v61  ;;  %v8802_v8 = vpop.f32.mrb[3].mxu0  ;;  %v8843_v3 = vpop.f32.mrb[3].mxu1 }
 0x544   : > { %v8898_v9 = vadd.f32 %v8884_v58, %v8872_v0  ;;  %v8900_v10 = vadd.f32 %v8892_v59, %v8874_v12 }
 0x545   : > { %v8901_v11 = vmax.f32 %v8897_v5, 0.0  ;;  %v8903_v13 = vmax.f32 %v8899_v6, 0.0 }
 0x546   : > { %v8902_v14 = vmax.f32 %v8898_v9, 0.0  ;;  %v8904_v19 = vmax.f32 %v8900_v10, 0.0 }
 0x547   : > { %v8906_v16 = vpack.c.bf16 %v8901_v11, %v8901_v11  ;;  %v8908_v47 = vpack.c.bf16 %v8903_v13, %v8903_v13 }
 0x548   : > { %v8907_v15 = vpack.c.bf16 %v8902_v14, %v8902_v14  ;;  %v8909_v21 = vpack.c.bf16 %v8904_v19, %v8904_v19 }
 0x54a   : > { %9198 = vmatprep.mubr.bf16.mxu0 %v8907_v15  ;;  %9238 = vmatprep.mubr.bf16.mxu1 %v8909_v21 }
 0x54b   : > { %9199 = vmatmul.mubr.bf16.vlgmr.msra.gmra.mrb[4].mxu0 %v8906_v16  ;;  %9239 = vmatmul.mubr.bf16.vlgmr.msra.gmra.mrb[4].mxu1 %v8908_v47 }
 0x61e   : > { %v11012_v17 = vpop.f32.mrb[4].mxu0  ;;  %v11034_v18 = vpop.f32.mrb[4].mxu1 }
 0x61f   : > { %v11013_v20 = vpop.f32.mrb[5].mxu0  ;;  %v11035_v24 = vpop.f32.mrb[5].mxu1 }
 0x620   : > { %v11014_v27 = vadd.f32 %v11013_v20, %v11012_v17  ;;  %v11036_v22 = vadd.f32 %v11035_v24, %v11034_v18  ;;  %v11015_v23 = vpop.f32.mrb[6].mxu0  ;;  %v11037_v25 = vpop.f32.mrb[6].mxu1  ;;  %9251 = sbr.rel (%p10988_p3) target bundleno = 1583 (0x62f), region = 64 }
 0x621   : > { %v11016_v28 = vpop.f32.mrb[7].mxu0  ;;  %v11038_v34 = vpop.f32.mrb[7].mxu1 }
 0x622   : > { %v9241_v29 = vadd.f32 %v11036_v22, %v11014_v27 }
 0x624   : > { %v9246_v38 = vadd.f32 %v9241_v29, %v8905_v26 }
 0x626   : > { %9247 = vst [vmem:[#allocation2] sm:$0xff] %v9246_v38 }
 0x62d   : > { %v9252_v30 = vld [vmem:[#allocation2] sm:$0xff] }
 0x62e   : > { %9253 = vst [vmem:[%s12596_s5] sm:$0xff] %v9252_v30 }
 0x62f PF: > { %s24_s23 = sadd.s32 1, %s11540_s23   ;;  %s12620_s13 = sld [smem:[#allocation13_spill]] }
 0x630   : > { %p21_p4 = scmp.ge.s32.totalorder %s24_s23, 4   ;;  %s12621_s20 = sld [smem:[#allocation15_spill]] }
 0x631   : > { %s12622_s10 = sld [smem:[#allocation14_spill]]  ;;  %s12623_s18 = smov %s11524_s19 }
 0x632   : > { %s12625_s21 = smov %s11536_s22  ;;  %23 = sbr.rel (!%p21_p4) target bundleno = 11 (0xb), region = 167 }
 0x635   : > { %s12624_s19 = smov %s12620_s13 }
 0x637   : > { %s12626_s22 = smov %s12622_s10 }
 0x639   :  { %9273 = vsyncpa [#allocation4], 1 }
 0x63a   :  { %9275 = vsyncpa [#allocation4 + $0x1], 1 }
 0x63b   :  { %9276 = vsyncpa [#allocation6], 1 }
 0x63c   :  { %9278 = vsyncpa [#allocation6 + $0x1], 1 }
 0x63d   :  { %9279 = vsyncpa [#allocation9], 1 }
 0x63e   :  { %9281 = vsyncpa [#allocation9 + $0x1], 1 }

</bundles_post_ra>
